<compile_context>
chip_gen: v5e
topology: v5e:2x2
jax: 0.10.0
libtpu: 0.0.40
codegen_flags: <defaults>
</compile_context>

<pallas_src>
import jax
import jax.numpy as jnp
from jax.experimental import pallas as pl
from jax.experimental.pallas import tpu as pltpu

# Fixed AlexNet-feature channel geometry, padded to lane-dense multiples of 128.
_K1 = 384        # conv1 im2col depth: 3*11*11 = 363 -> 384
_C1 = 128        # conv1 Cout 48  -> 128 (zero-padded)
_C2 = 128        # conv2 Cout 128 -> 128
_C3 = 256        # conv3 Cout 192 -> 256 (zero-padded)
_C4 = 128        # conv4 Cout 128 -> 128


# -----------------------------------------------------------------------------
# Parameter packing (done ONCE, outside the forward)
# -----------------------------------------------------------------------------
def prepare_params(params):
    """Pack torch-layout conv weights once into the fused kernel's GEMM layouts.

    Deep-K layout (conv2..4): row index = (di*kw + dj) * Cin_pad + cin.
    conv1 (im2col) layout   : row index = cin*121 + di*11 + dj (matches the
    identity-conv patch extractor), zero-padded to _K1 rows.
    Biases are f32, zero-padded to the lane-dense Cout.
    """
    def pack_deep(w, cin_pad, cout_pad):
        cout, cin, kh, kw = w.shape
        wt = jnp.transpose(w, (2, 3, 1, 0))                    # (kh, kw, cin, cout)
        wt = jnp.pad(wt, ((0, 0), (0, 0),
                          (0, cin_pad - cin), (0, cout_pad - cout)))
        return wt.reshape(kh * kw * cin_pad, cout_pad).astype(jnp.bfloat16)

    def pack_bias(b, cout_pad):
        return jnp.pad(b.astype(jnp.float32), (0, cout_pad - b.shape[0])).reshape(1, -1)

    w1 = params["w1"]
    cout1, cin1, kh1, kw1 = w1.shape
    w1p = jnp.transpose(w1, (1, 2, 3, 0)).reshape(cin1 * kh1 * kw1, cout1)
    w1p = jnp.pad(w1p, ((0, _K1 - cin1 * kh1 * kw1),
                        (0, _C1 - cout1))).astype(jnp.bfloat16)

    return {
        "w1": w1p,                               "b1": pack_bias(params["b1"], _C1),
        "w2": pack_deep(params["w2"], _C1, _C2), "b2": pack_bias(params["b2"], _C2),
        "w3": pack_deep(params["w3"], _C2, _C3), "b3": pack_bias(params["b3"], _C3),
        "w4": pack_deep(params["w4"], _C3, _C4), "b4": pack_bias(params["b4"], _C4),
    }


# -----------------------------------------------------------------------------
# Fused AlexNet feature extractor
# -----------------------------------------------------------------------------
def _pool_out(s):
    return (s - 3) // 2 + 1


def build_alexnet_forward(in_hw):
    """Builds the feature+flatten forward for square inputs of size in_hw."""
    c1 = (in_hw + 2 * 2 - 11) // 4 + 1   # conv1 out (k=11, s=4, p=2)
    p1 = _pool_out(c1)                   # pool1
    c2 = p1                              # conv2 (5x5, p=2) keeps size
    p2 = _pool_out(c2)                   # pool2
    c3 = p2                              # conv3 (3x3, p=1)
    c4 = c3                              # conv4 (3x3, p=1)
    p4 = _pool_out(c4)                   # pool3
    assert c1 >= 3 and c2 >= 3 and c4 >= 3 and p4 >= 1, "input too small"
    # every pool window set must fit inside its source plane (review note)
    for src, dst in ((c1, p1), (c2, p2), (c4, p4)):
        assert src >= 2 * dst + 1

    wp2, wp3, wp4 = p1 + 4, p2 + 2, c3 + 2            # padded plane pitches
    np2, np3, np4 = wp2 * wp2, wp3 * wp3, wp4 * wp4   # padded plane row counts
    m1 = c1 * c1                                      # flat conv-output rows
    m2 = (c2 - 1) * wp2 + c2
    m3 = (c3 - 1) * wp3 + c3
    m4 = (c4 - 1) * wp4 + c4
    taps2 = tuple(di * wp2 + dj for di in range(5) for dj in range(5))
    taps3 = tuple(di * wp3 + dj for di in range(3) for dj in range(3))
    taps4 = tuple(di * wp4 + dj for di in range(3) for dj in range(3))
    out_rows = p4 * p4

    # ---- in-kernel fused 3x3/stride-2 max-pool -------------------------------
    def _maxpool3s2(y, w_src, w_out, n_pool, emit_row):
        """Pool the flat conv output y ((h_out-1)*w_src + w_out, C).

        Height/width maxima are whole-slab shifted jnp.maximum (VPU); only the
        final stride-2 row pick is per-row.  emit_row(ph, (n_pool, C) block)
        stores pooled row ph.  Rows straddling image-row boundaries are
        computed but never read.
        """
        L = 2 * (n_pool - 1) * w_src + w_out
        hm = jnp.maximum(jnp.maximum(y[0:L], y[w_src:w_src + L]),
                         y[2 * w_src:2 * w_src + L])
        lq = L - 2
        q = jnp.maximum(jnp.maximum(hm[0:lq], hm[1:lq + 1]), hm[2:lq + 2])
        # q[r] = max over the 3x3 window whose top-left conv cell is flat row r.
        for ph in range(n_pool):
            rows = [q[2 * (ph * w_src + pw):2 * (ph * w_src + pw) + 1, :]
                    for pw in range(n_pool)]
            emit_row(ph, rows[0] if n_pool == 1 else jnp.concatenate(rows, axis=0))

    # ---- the single fused kernel ---------------------------------------------
    def kernel(a1_ref, w1_ref, b1_ref, w2_ref, b2_ref, w3_ref, b3_ref,
               w4_ref, b4_ref, o_ref, pl2_ref, pl3_ref, pl4_ref):
        f32 = jnp.float32

        # Zero-padded activation planes: halo must be true zeros for every image.
        pl2_ref[...] = jnp.zeros_like(pl2_ref)
        pl3_ref[...] = jnp.zeros_like(pl3_ref)
        pl4_ref[...] = jnp.zeros_like(pl4_ref)

        def conv_gemm(plane_ref, taps, m_rows, w_ref, b_ref):
            # Deep-K gather: lane-aligned concat of the shifted tap slices,
            # ONE bf16 MXU GEMM with f32 accumulation, bias + ReLU once.
            xs = [plane_ref[off:off + m_rows, :] for off in taps]
            x = xs[0] if len(xs) == 1 else jnp.concatenate(xs, axis=1)
            y = jnp.dot(x, w_ref[...], preferred_element_type=f32)
            return jnp.maximum(y + b_ref[...], 0.0)

        # -- stage 1: conv1 (im2col GEMM) + bias + ReLU + maxpool --------------
        y1 = jnp.dot(a1_ref[0], w1_ref[...], preferred_element_type=f32)
        y1 = jnp.maximum(y1 + b1_ref[...], 0.0)                       # (m1, _C1)

        def emit1(ph, blk):
            r0 = (ph + 2) * wp2 + 2
            pl2_ref[r0:r0 + p1, :] = blk.astype(pl2_ref.dtype)
        _maxpool3s2(y1, c1, c1, p1, emit1)

        # -- stage 2: conv2 + bias + ReLU + maxpool ----------------------------
        y2 = conv_gemm(pl2_ref, taps2, m2, w2_ref, b2_ref)            # (m2, _C2)

        def emit2(ph, blk):
            r0 = (ph + 1) * wp3 + 1
            pl3_ref[r0:r0 + p2, :] = blk.astype(pl3_ref.dtype)
        _maxpool3s2(y2, wp2, c2, p2, emit2)

        # -- stage 3: conv3 + bias + ReLU (no pool) ----------------------------
        y3 = conv_gemm(pl3_ref, taps3, m3, w3_ref, b3_ref)            # (m3, _C3)
        for h in range(c3):
            r0 = (h + 1) * wp4 + 1
            pl4_ref[r0:r0 + c3, :] = y3[h * wp3:h * wp3 + c3, :].astype(pl4_ref.dtype)

        # -- stage 4: conv4 + bias + ReLU + maxpool -> final features ----------
        y4 = conv_gemm(pl4_ref, taps4, m4, w4_ref, b4_ref)            # (m4, _C4)

        def emit4(ph, blk):
            o_ref[0:1, ph * p4:ph * p4 + p4, :] = blk[None].astype(o_ref.dtype)
        _maxpool3s2(y4, wp4, c4, p4, emit4)

    def fused(a1, w1, b1, w2, b2, w3, b3, w4, b4):
        n = a1.shape[0]
        full = lambda i: (0, 0)
        return pl.pallas_call(
            kernel,
            out_shape=jax.ShapeDtypeStruct((n, out_rows, _C4), jnp.float32),
            grid=(n,),
            in_specs=[
                pl.BlockSpec((1, m1, _K1), lambda i: (i, 0, 0)),
                pl.BlockSpec(w1.shape, full), pl.BlockSpec(b1.shape, full),
                pl.BlockSpec(w2.shape, full), pl.BlockSpec(b2.shape, full),
                pl.BlockSpec(w3.shape, full), pl.BlockSpec(b3.shape, full),
                pl.BlockSpec(w4.shape, full), pl.BlockSpec(b4.shape, full),
            ],
            out_specs=pl.BlockSpec((1, out_rows, _C4), lambda i: (i, 0, 0)),
            scratch_shapes=[
                pltpu.VMEM((np2, _C1), jnp.bfloat16),   # conv2 padded input plane
                pltpu.VMEM((np3, _C2), jnp.bfloat16),   # conv3 padded input plane
                pltpu.VMEM((np4, _C3), jnp.bfloat16),   # conv4 padded input plane
            ],
            compiler_params=pltpu.CompilerParams(
                dimension_semantics=("parallel",)),
        )(a1, w1, b1, w2, b2, w3, b3, w4, b4)

    # conv1 im2col as ONE identity-kernel conv; column order (cin, di, dj),
    # zero-padded to _K1 so the kernel-side GEMM operand is lane-dense.
    eye = jnp.pad(jnp.eye(3 * 11 * 11, dtype=jnp.bfloat16), ((0, 0), (0, _K1 - 363)))
    patch_rhs = eye.reshape(3, 11, 11, _K1).transpose(1, 2, 0, 3)     # HWIO

    @jax.jit
    def forward(x_nchw, packed):
        n = x_nchw.shape[0]
        x = jnp.transpose(x_nchw, (0, 2, 3, 1)).astype(jnp.bfloat16)  # NHWC bf16
        a1 = jax.lax.conv_general_dilated(
            x, patch_rhs, window_strides=(4, 4), padding=((2, 2), (2, 2)),
            dimension_numbers=("NHWC", "HWIO", "NHWC"))               # (n, c1, c1, _K1)
        a1 = a1.reshape(n, m1, _K1)

        feats = fused(a1, packed["w1"], packed["b1"], packed["w2"], packed["b2"],
                      packed["w3"], packed["b3"], packed["w4"], packed["b4"])
        # torch.flatten(x, 1) on NCHW => channel-major flatten of (128, p4, p4).
        h = feats.reshape(n, p4, p4, _C4).transpose(0, 3, 1, 2)
        return h.reshape(n, _C4 * p4 * p4)
        # TODO(synk): self.classifier (Dropout/Linear stack) is defined in
        #             __init__ but never called in the provided forward(), so
        #             it is intentionally not implemented here.

    return forward


# -----------------------------------------------------------------------------
# Plain-JAX reference (f32, HIGHEST precision)
# -----------------------------------------------------------------------------
def _reference_forward(x_nchw, p):
    def conv(x, w, b, s, pad):
        y = jax.lax.conv_general_dilated(
            x, w, window_strides=(s, s), padding=((pad, pad), (pad, pad)),
            dimension_numbers=("NCHW", "OIHW", "NCHW"),
            precision=jax.lax.Precision.HIGHEST)
        return jnp.maximum(y + b[None, :, None, None], 0.0)

    def pool(x):
        return jax.lax.reduce_window(
            x, -jnp.inf, jax.lax.max,
            window_dimensions=(1, 1, 3, 3), window_strides=(1, 1, 2, 2),
            padding="VALID")

    x = pool(conv(x_nchw, p["w1"], p["b1"], 4, 2))
    x = pool(conv(x, p["w2"], p["b2"], 1, 2))
    x = conv(x, p["w3"], p["b3"], 1, 1)
    x = pool(conv(x, p["w4"], p["b4"], 1, 1))
    return x.reshape(x.shape[0], -1)


# -----------------------------------------------------------------------------
if __name__ == "__main__":
    key = jax.random.PRNGKey(0)
    ks = jax.random.split(key, 9)
    f32 = jnp.float32

    # 63x63 keeps every stage non-degenerate:
    # 63 -> conv1 15 -> pool 7 -> conv2 7 -> pool 3 -> conv3/4 3 -> pool 1
    x = jax.random.normal(ks[0], (2, 3, 63, 63), dtype=f32)

    params = {
        "w1": 0.05 * jax.random.normal(ks[1], (48, 3, 11, 11), dtype=f32),
        "b1": 0.05 * jax.random.normal(ks[2], (48,), dtype=f32),
        "w2": 0.05 * jax.random.normal(ks[3], (128, 48, 5, 5), dtype=f32),
        "b2": 0.05 * jax.random.normal(ks[4], (128,), dtype=f32),
        "w3": 0.05 * jax.random.normal(ks[5], (192, 128, 3, 3), dtype=f32),
        "b3": 0.05 * jax.random.normal(ks[6], (192,), dtype=f32),
        "w4": 0.05 * jax.random.normal(ks[7], (128, 192, 3, 3), dtype=f32),
        "b4": 0.05 * jax.random.normal(ks[8], (128,), dtype=f32),
    }

    forward = build_alexnet_forward(63)
    packed = prepare_params(params)

    out = jax.block_until_ready(forward(x, packed))
    assert out.shape == (2, 128), out.shape

    ref = jax.block_until_ready(_reference_forward(x, params))
    max_err = float(jnp.max(jnp.abs(out - ref)))
    scale = float(jnp.max(jnp.abs(ref))) + 1e-6
    if max_err / scale > 5e-2:      # relative tolerance (bf16 MXU operands)
        raise RuntimeError(f"mismatch vs reference: max_err={max_err}, scale={scale}")

    print("KERNEL_OK")
</pallas_src>

<mosaic_0001>
module attributes {stable_mosaic.version = 11 : i64} {
  func.func @kernel(%arg0: i32, %arg1: memref<1x225x384xbf16, #tpu.memory_space<vmem>>, %arg2: memref<384x128xbf16, #tpu.memory_space<vmem>>, %arg3: memref<1x128xf32, #tpu.memory_space<vmem>>, %arg4: memref<3200x128xbf16, #tpu.memory_space<vmem>>, %arg5: memref<1x128xf32, #tpu.memory_space<vmem>>, %arg6: memref<1152x256xbf16, #tpu.memory_space<vmem>>, %arg7: memref<1x256xf32, #tpu.memory_space<vmem>>, %arg8: memref<2304x128xbf16, #tpu.memory_space<vmem>>, %arg9: memref<1x128xf32, #tpu.memory_space<vmem>>, %arg10: memref<1x1x128xf32, #tpu.memory_space<vmem>>, %arg11: memref<121x128xbf16, #tpu.memory_space<vmem>>, %arg12: memref<25x128xbf16, #tpu.memory_space<vmem>>, %arg13: memref<25x256xbf16, #tpu.memory_space<vmem>>) attributes {dimension_semantics = [#tpu.dimension_semantics<parallel>], iteration_bounds = array<i64: 2>, scalar_prefetch = 0 : i64, scratch_operands = 3 : i64, tpu.core_type = #tpu.core_type<tc>, window_params = [{transform_indices = @transform_0, window_bounds = array<i64: 1, 225, 384>}, {pipeline_mode = #tpu.pipeline_mode<synchronous>, transform_indices = @transform_1, window_bounds = array<i64: 384, 128>}, {pipeline_mode = #tpu.pipeline_mode<synchronous>, transform_indices = @transform_2, window_bounds = array<i64: 1, 128>}, {pipeline_mode = #tpu.pipeline_mode<synchronous>, transform_indices = @transform_3, window_bounds = array<i64: 3200, 128>}, {pipeline_mode = #tpu.pipeline_mode<synchronous>, transform_indices = @transform_4, window_bounds = array<i64: 1, 128>}, {pipeline_mode = #tpu.pipeline_mode<synchronous>, transform_indices = @transform_5, window_bounds = array<i64: 1152, 256>}, {pipeline_mode = #tpu.pipeline_mode<synchronous>, transform_indices = @transform_6, window_bounds = array<i64: 1, 256>}, {pipeline_mode = #tpu.pipeline_mode<synchronous>, transform_indices = @transform_7, window_bounds = array<i64: 2304, 128>}, {pipeline_mode = #tpu.pipeline_mode<synchronous>, transform_indices = @transform_8, window_bounds = array<i64: 1, 128>}, {transform_indices = @transform_9, window_bounds = array<i64: 1, 1, 128>}]} {
    %cst = arith.constant 0.000000e+00 : bf16
    %0 = vector.broadcast %cst : bf16 to vector<121x128xbf16>
    %c0 = arith.constant 0 : index
    %c0_0 = arith.constant 0 : index
    %1 = vector.load %arg11[%c0, %c0_0] : memref<121x128xbf16, #tpu.memory_space<vmem>>, vector<121x128xbf16>
    tpu.vector_store %arg11[%c0, %c0_0], %0 {strides = array<i32>} : memref<121x128xbf16, #tpu.memory_space<vmem>>, vector<121x128xbf16>,
    %cst_1 = arith.constant 0.000000e+00 : bf16
    %2 = vector.broadcast %cst_1 : bf16 to vector<25x128xbf16>
    %c0_2 = arith.constant 0 : index
    %c0_3 = arith.constant 0 : index
    %3 = vector.load %arg12[%c0_2, %c0_3] : memref<25x128xbf16, #tpu.memory_space<vmem>>, vector<25x128xbf16>
    tpu.vector_store %arg12[%c0_2, %c0_3], %2 {strides = array<i32>} : memref<25x128xbf16, #tpu.memory_space<vmem>>, vector<25x128xbf16>,
    %cst_4 = arith.constant 0.000000e+00 : bf16
    %4 = vector.broadcast %cst_4 : bf16 to vector<25x256xbf16>
    %c0_5 = arith.constant 0 : index
    %c0_6 = arith.constant 0 : index
    %5 = vector.load %arg13[%c0_5, %c0_6] : memref<25x256xbf16, #tpu.memory_space<vmem>>, vector<25x256xbf16>
    tpu.vector_store %arg13[%c0_5, %c0_6], %4 {strides = array<i32>} : memref<25x256xbf16, #tpu.memory_space<vmem>>, vector<25x256xbf16>,
    %c0_7 = arith.constant 0 : index
    %c0_8 = arith.constant 0 : index
    %c0_9 = arith.constant 0 : index
    %6 = vector.load %arg1[%c0_7, %c0_8, %c0_9] : memref<1x225x384xbf16, #tpu.memory_space<vmem>>, vector<1x225x384xbf16>
    %7 = vector.shape_cast %6 : vector<1x225x384xbf16> to vector<225x384xbf16>
    %c0_10 = arith.constant 0 : index
    %c0_11 = arith.constant 0 : index
    %8 = vector.load %arg2[%c0_10, %c0_11] : memref<384x128xbf16, #tpu.memory_space<vmem>>, vector<384x128xbf16>
    %cst_12 = arith.constant dense<0.000000e+00> : vector<225x128xf32>
    %9 = tpu.matmul %7, %8, %cst_12 {dimension_numbers = #tpu.dot_dimension_numbers<[1], [0], [0], [1], [0, 0, 1, 1], [], []>} : vector<225x384xbf16>, vector<384x128xbf16>, vector<225x128xf32> -> vector<225x128xf32>
    %c0_13 = arith.constant 0 : index
    %c0_14 = arith.constant 0 : index
    %10 = vector.load %arg3[%c0_13, %c0_14] : memref<1x128xf32, #tpu.memory_space<vmem>>, vector<1x128xf32>
    %11 = vector.broadcast %10 : vector<1x128xf32> to vector<225x128xf32>
    %12 = arith.addf %9, %11 : vector<225x128xf32>
    %cst_15 = arith.constant 0.000000e+00 : f32
    %13 = vector.broadcast %cst_15 : f32 to vector<225x128xf32>
    %14 = arith.maximumf %12, %13 : vector<225x128xf32>
    %15 = vector.extract_strided_slice %14 {offsets = [0, 0], sizes = [195, 128], strides = [1, 1]} : vector<225x128xf32> to vector<195x128xf32>
    %16 = vector.extract_strided_slice %14 {offsets = [15, 0], sizes = [195, 128], strides = [1, 1]} : vector<225x128xf32> to vector<195x128xf32>
    %17 = arith.maximumf %15, %16 : vector<195x128xf32>
    %18 = vector.extract_strided_slice %14 {offsets = [30, 0], sizes = [195, 128], strides = [1, 1]} : vector<225x128xf32> to vector<195x128xf32>
    %19 = arith.maximumf %17, %18 : vector<195x128xf32>
    %20 = vector.extract_strided_slice %19 {offsets = [0, 0], sizes = [193, 128], strides = [1, 1]} : vector<195x128xf32> to vector<193x128xf32>
    %21 = vector.extract_strided_slice %19 {offsets = [1, 0], sizes = [193, 128], strides = [1, 1]} : vector<195x128xf32> to vector<193x128xf32>
    %22 = arith.maximumf %20, %21 : vector<193x128xf32>
    %23 = vector.extract_strided_slice %19 {offsets = [2, 0], sizes = [193, 128], strides = [1, 1]} : vector<195x128xf32> to vector<193x128xf32>
    %24 = arith.maximumf %22, %23 : vector<193x128xf32>
    %25 = vector.extract_strided_slice %24 {offsets = [0, 0], sizes = [1, 128], strides = [1, 1]} : vector<193x128xf32> to vector<1x128xf32>
    %26 = vector.extract_strided_slice %24 {offsets = [2, 0], sizes = [1, 128], strides = [1, 1]} : vector<193x128xf32> to vector<1x128xf32>
    %27 = vector.extract_strided_slice %24 {offsets = [4, 0], sizes = [1, 128], strides = [1, 1]} : vector<193x128xf32> to vector<1x128xf32>
    %28 = vector.extract_strided_slice %24 {offsets = [6, 0], sizes = [1, 128], strides = [1, 1]} : vector<193x128xf32> to vector<1x128xf32>
    %29 = vector.extract_strided_slice %24 {offsets = [8, 0], sizes = [1, 128], strides = [1, 1]} : vector<193x128xf32> to vector<1x128xf32>
    %30 = vector.extract_strided_slice %24 {offsets = [10, 0], sizes = [1, 128], strides = [1, 1]} : vector<193x128xf32> to vector<1x128xf32>
    %31 = vector.extract_strided_slice %24 {offsets = [12, 0], sizes = [1, 128], strides = [1, 1]} : vector<193x128xf32> to vector<1x128xf32>
    %32 = tpu.concatenate %25, %26, %27, %28, %29, %30, %31 in 0 : vector<1x128xf32>, vector<1x128xf32>, vector<1x128xf32>, vector<1x128xf32>, vector<1x128xf32>, vector<1x128xf32>, vector<1x128xf32> -> vector<7x128xf32>
    %33 = arith.truncf %32 : vector<7x128xf32> to vector<7x128xbf16>
    %c24 = arith.constant 24 : index
    %c0_16 = arith.constant 0 : index
    %34 = vector.load %arg11[%c24, %c0_16] : memref<121x128xbf16, #tpu.memory_space<vmem>>, vector<7x128xbf16>
    tpu.vector_store %arg11[%c24, %c0_16], %33 {strides = array<i32>} : memref<121x128xbf16, #tpu.memory_space<vmem>>, vector<7x128xbf16>,
    %35 = vector.extract_strided_slice %24 {offsets = [30, 0], sizes = [1, 128], strides = [1, 1]} : vector<193x128xf32> to vector<1x128xf32>
    %36 = vector.extract_strided_slice %24 {offsets = [32, 0], sizes = [1, 128], strides = [1, 1]} : vector<193x128xf32> to vector<1x128xf32>
    %37 = vector.extract_strided_slice %24 {offsets = [34, 0], sizes = [1, 128], strides = [1, 1]} : vector<193x128xf32> to vector<1x128xf32>
    %38 = vector.extract_strided_slice %24 {offsets = [36, 0], sizes = [1, 128], strides = [1, 1]} : vector<193x128xf32> to vector<1x128xf32>
    %39 = vector.extract_strided_slice %24 {offsets = [38, 0], sizes = [1, 128], strides = [1, 1]} : vector<193x128xf32> to vector<1x128xf32>
    %40 = vector.extract_strided_slice %24 {offsets = [40, 0], sizes = [1, 128], strides = [1, 1]} : vector<193x128xf32> to vector<1x128xf32>
    %41 = vector.extract_strided_slice %24 {offsets = [42, 0], sizes = [1, 128], strides = [1, 1]} : vector<193x128xf32> to vector<1x128xf32>
    %42 = tpu.concatenate %35, %36, %37, %38, %39, %40, %41 in 0 : vector<1x128xf32>, vector<1x128xf32>, vector<1x128xf32>, vector<1x128xf32>, vector<1x128xf32>, vector<1x128xf32>, vector<1x128xf32> -> vector<7x128xf32>
    %43 = arith.truncf %42 : vector<7x128xf32> to vector<7x128xbf16>
    %c35 = arith.constant 35 : index
    %c0_17 = arith.constant 0 : index
    %44 = vector.load %arg11[%c35, %c0_17] : memref<121x128xbf16, #tpu.memory_space<vmem>>, vector<7x128xbf16>
    tpu.vector_store %arg11[%c35, %c0_17], %43 {strides = array<i32>} : memref<121x128xbf16, #tpu.memory_space<vmem>>, vector<7x128xbf16>,
    %45 = vector.extract_strided_slice %24 {offsets = [60, 0], sizes = [1, 128], strides = [1, 1]} : vector<193x128xf32> to vector<1x128xf32>
    %46 = vector.extract_strided_slice %24 {offsets = [62, 0], sizes = [1, 128], strides = [1, 1]} : vector<193x128xf32> to vector<1x128xf32>
    %47 = vector.extract_strided_slice %24 {offsets = [64, 0], sizes = [1, 128], strides = [1, 1]} : vector<193x128xf32> to vector<1x128xf32>
    %48 = vector.extract_strided_slice %24 {offsets = [66, 0], sizes = [1, 128], strides = [1, 1]} : vector<193x128xf32> to vector<1x128xf32>
    %49 = vector.extract_strided_slice %24 {offsets = [68, 0], sizes = [1, 128], strides = [1, 1]} : vector<193x128xf32> to vector<1x128xf32>
    %50 = vector.extract_strided_slice %24 {offsets = [70, 0], sizes = [1, 128], strides = [1, 1]} : vector<193x128xf32> to vector<1x128xf32>
    %51 = vector.extract_strided_slice %24 {offsets = [72, 0], sizes = [1, 128], strides = [1, 1]} : vector<193x128xf32> to vector<1x128xf32>
    %52 = tpu.concatenate %45, %46, %47, %48, %49, %50, %51 in 0 : vector<1x128xf32>, vector<1x128xf32>, vector<1x128xf32>, vector<1x128xf32>, vector<1x128xf32>, vector<1x128xf32>, vector<1x128xf32> -> vector<7x128xf32>
    %53 = arith.truncf %52 : vector<7x128xf32> to vector<7x128xbf16>
    %c46 = arith.constant 46 : index
    %c0_18 = arith.constant 0 : index
    %54 = vector.load %arg11[%c46, %c0_18] : memref<121x128xbf16, #tpu.memory_space<vmem>>, vector<7x128xbf16>
    tpu.vector_store %arg11[%c46, %c0_18], %53 {strides = array<i32>} : memref<121x128xbf16, #tpu.memory_space<vmem>>, vector<7x128xbf16>,
    %55 = vector.extract_strided_slice %24 {offsets = [90, 0], sizes = [1, 128], strides = [1, 1]} : vector<193x128xf32> to vector<1x128xf32>
    %56 = vector.extract_strided_slice %24 {offsets = [92, 0], sizes = [1, 128], strides = [1, 1]} : vector<193x128xf32> to vector<1x128xf32>
    %57 = vector.extract_strided_slice %24 {offsets = [94, 0], sizes = [1, 128], strides = [1, 1]} : vector<193x128xf32> to vector<1x128xf32>
    %58 = vector.extract_strided_slice %24 {offsets = [96, 0], sizes = [1, 128], strides = [1, 1]} : vector<193x128xf32> to vector<1x128xf32>
    %59 = vector.extract_strided_slice %24 {offsets = [98, 0], sizes = [1, 128], strides = [1, 1]} : vector<193x128xf32> to vector<1x128xf32>
    %60 = vector.extract_strided_slice %24 {offsets = [100, 0], sizes = [1, 128], strides = [1, 1]} : vector<193x128xf32> to vector<1x128xf32>
    %61 = vector.extract_strided_slice %24 {offsets = [102, 0], sizes = [1, 128], strides = [1, 1]} : vector<193x128xf32> to vector<1x128xf32>
    %62 = tpu.concatenate %55, %56, %57, %58, %59, %60, %61 in 0 : vector<1x128xf32>, vector<1x128xf32>, vector<1x128xf32>, vector<1x128xf32>, vector<1x128xf32>, vector<1x128xf32>, vector<1x128xf32> -> vector<7x128xf32>
    %63 = arith.truncf %62 : vector<7x128xf32> to vector<7x128xbf16>
    %c57 = arith.constant 57 : index
    %c0_19 = arith.constant 0 : index
    %64 = vector.load %arg11[%c57, %c0_19] : memref<121x128xbf16, #tpu.memory_space<vmem>>, vector<7x128xbf16>
    tpu.vector_store %arg11[%c57, %c0_19], %63 {strides = array<i32>} : memref<121x128xbf16, #tpu.memory_space<vmem>>, vector<7x128xbf16>,
    %65 = vector.extract_strided_slice %24 {offsets = [120, 0], sizes = [1, 128], strides = [1, 1]} : vector<193x128xf32> to vector<1x128xf32>
    %66 = vector.extract_strided_slice %24 {offsets = [122, 0], sizes = [1, 128], strides = [1, 1]} : vector<193x128xf32> to vector<1x128xf32>
    %67 = vector.extract_strided_slice %24 {offsets = [124, 0], sizes = [1, 128], strides = [1, 1]} : vector<193x128xf32> to vector<1x128xf32>
    %68 = vector.extract_strided_slice %24 {offsets = [126, 0], sizes = [1, 128], strides = [1, 1]} : vector<193x128xf32> to vector<1x128xf32>
    %69 = vector.extract_strided_slice %24 {offsets = [128, 0], sizes = [1, 128], strides = [1, 1]} : vector<193x128xf32> to vector<1x128xf32>
    %70 = vector.extract_strided_slice %24 {offsets = [130, 0], sizes = [1, 128], strides = [1, 1]} : vector<193x128xf32> to vector<1x128xf32>
    %71 = vector.extract_strided_slice %24 {offsets = [132, 0], sizes = [1, 128], strides = [1, 1]} : vector<193x128xf32> to vector<1x128xf32>
    %72 = tpu.concatenate %65, %66, %67, %68, %69, %70, %71 in 0 : vector<1x128xf32>, vector<1x128xf32>, vector<1x128xf32>, vector<1x128xf32>, vector<1x128xf32>, vector<1x128xf32>, vector<1x128xf32> -> vector<7x128xf32>
    %73 = arith.truncf %72 : vector<7x128xf32> to vector<7x128xbf16>
    %c68 = arith.constant 68 : index
    %c0_20 = arith.constant 0 : index
    %74 = vector.load %arg11[%c68, %c0_20] : memref<121x128xbf16, #tpu.memory_space<vmem>>, vector<7x128xbf16>
    tpu.vector_store %arg11[%c68, %c0_20], %73 {strides = array<i32>} : memref<121x128xbf16, #tpu.memory_space<vmem>>, vector<7x128xbf16>,
    %75 = vector.extract_strided_slice %24 {offsets = [150, 0], sizes = [1, 128], strides = [1, 1]} : vector<193x128xf32> to vector<1x128xf32>
    %76 = vector.extract_strided_slice %24 {offsets = [152, 0], sizes = [1, 128], strides = [1, 1]} : vector<193x128xf32> to vector<1x128xf32>
    %77 = vector.extract_strided_slice %24 {offsets = [154, 0], sizes = [1, 128], strides = [1, 1]} : vector<193x128xf32> to vector<1x128xf32>
    %78 = vector.extract_strided_slice %24 {offsets = [156, 0], sizes = [1, 128], strides = [1, 1]} : vector<193x128xf32> to vector<1x128xf32>
    %79 = vector.extract_strided_slice %24 {offsets = [158, 0], sizes = [1, 128], strides = [1, 1]} : vector<193x128xf32> to vector<1x128xf32>
    %80 = vector.extract_strided_slice %24 {offsets = [160, 0], sizes = [1, 128], strides = [1, 1]} : vector<193x128xf32> to vector<1x128xf32>
    %81 = vector.extract_strided_slice %24 {offsets = [162, 0], sizes = [1, 128], strides = [1, 1]} : vector<193x128xf32> to vector<1x128xf32>
    %82 = tpu.concatenate %75, %76, %77, %78, %79, %80, %81 in 0 : vector<1x128xf32>, vector<1x128xf32>, vector<1x128xf32>, vector<1x128xf32>, vector<1x128xf32>, vector<1x128xf32>, vector<1x128xf32> -> vector<7x128xf32>
    %83 = arith.truncf %82 : vector<7x128xf32> to vector<7x128xbf16>
    %c79 = arith.constant 79 : index
    %c0_21 = arith.constant 0 : index
    %84 = vector.load %arg11[%c79, %c0_21] : memref<121x128xbf16, #tpu.memory_space<vmem>>, vector<7x128xbf16>
    tpu.vector_store %arg11[%c79, %c0_21], %83 {strides = array<i32>} : memref<121x128xbf16, #tpu.memory_space<vmem>>, vector<7x128xbf16>,
    %85 = vector.extract_strided_slice %24 {offsets = [180, 0], sizes = [1, 128], strides = [1, 1]} : vector<193x128xf32> to vector<1x128xf32>
    %86 = vector.extract_strided_slice %24 {offsets = [182, 0], sizes = [1, 128], strides = [1, 1]} : vector<193x128xf32> to vector<1x128xf32>
    %87 = vector.extract_strided_slice %24 {offsets = [184, 0], sizes = [1, 128], strides = [1, 1]} : vector<193x128xf32> to vector<1x128xf32>
    %88 = vector.extract_strided_slice %24 {offsets = [186, 0], sizes = [1, 128], strides = [1, 1]} : vector<193x128xf32> to vector<1x128xf32>
    %89 = vector.extract_strided_slice %24 {offsets = [188, 0], sizes = [1, 128], strides = [1, 1]} : vector<193x128xf32> to vector<1x128xf32>
    %90 = vector.extract_strided_slice %24 {offsets = [190, 0], sizes = [1, 128], strides = [1, 1]} : vector<193x128xf32> to vector<1x128xf32>
    %91 = vector.extract_strided_slice %24 {offsets = [192, 0], sizes = [1, 128], strides = [1, 1]} : vector<193x128xf32> to vector<1x128xf32>
    %92 = tpu.concatenate %85, %86, %87, %88, %89, %90, %91 in 0 : vector<1x128xf32>, vector<1x128xf32>, vector<1x128xf32>, vector<1x128xf32>, vector<1x128xf32>, vector<1x128xf32>, vector<1x128xf32> -> vector<7x128xf32>
    %93 = arith.truncf %92 : vector<7x128xf32> to vector<7x128xbf16>
    %c90 = arith.constant 90 : index
    %c0_22 = arith.constant 0 : index
    %94 = vector.load %arg11[%c90, %c0_22] : memref<121x128xbf16, #tpu.memory_space<vmem>>, vector<7x128xbf16>
    tpu.vector_store %arg11[%c90, %c0_22], %93 {strides = array<i32>} : memref<121x128xbf16, #tpu.memory_space<vmem>>, vector<7x128xbf16>,
    %c0_23 = arith.constant 0 : index
    %c0_24 = arith.constant 0 : index
    %95 = vector.load %arg11[%c0_23, %c0_24] : memref<121x128xbf16, #tpu.memory_space<vmem>>, vector<73x128xbf16>
    %c1 = arith.constant 1 : index
    %c0_25 = arith.constant 0 : index
    %96 = vector.load %arg11[%c1, %c0_25] : memref<121x128xbf16, #tpu.memory_space<vmem>>, vector<73x128xbf16>
    %c2 = arith.constant 2 : index
    %c0_26 = arith.constant 0 : index
    %97 = vector.load %arg11[%c2, %c0_26] : memref<121x128xbf16, #tpu.memory_space<vmem>>, vector<73x128xbf16>
    %c3 = arith.constant 3 : index
    %c0_27 = arith.constant 0 : index
    %98 = vector.load %arg11[%c3, %c0_27] : memref<121x128xbf16, #tpu.memory_space<vmem>>, vector<73x128xbf16>
    %c4 = arith.constant 4 : index
    %c0_28 = arith.constant 0 : index
    %99 = vector.load %arg11[%c4, %c0_28] : memref<121x128xbf16, #tpu.memory_space<vmem>>, vector<73x128xbf16>
    %c11 = arith.constant 11 : index
    %c0_29 = arith.constant 0 : index
    %100 = vector.load %arg11[%c11, %c0_29] : memref<121x128xbf16, #tpu.memory_space<vmem>>, vector<73x128xbf16>
    %c12 = arith.constant 12 : index
    %c0_30 = arith.constant 0 : index
    %101 = vector.load %arg11[%c12, %c0_30] : memref<121x128xbf16, #tpu.memory_space<vmem>>, vector<73x128xbf16>
    %c13 = arith.constant 13 : index
    %c0_31 = arith.constant 0 : index
    %102 = vector.load %arg11[%c13, %c0_31] : memref<121x128xbf16, #tpu.memory_space<vmem>>, vector<73x128xbf16>
    %c14 = arith.constant 14 : index
    %c0_32 = arith.constant 0 : index
    %103 = vector.load %arg11[%c14, %c0_32] : memref<121x128xbf16, #tpu.memory_space<vmem>>, vector<73x128xbf16>
    %c15 = arith.constant 15 : index
    %c0_33 = arith.constant 0 : index
    %104 = vector.load %arg11[%c15, %c0_33] : memref<121x128xbf16, #tpu.memory_space<vmem>>, vector<73x128xbf16>
    %c22 = arith.constant 22 : index
    %c0_34 = arith.constant 0 : index
    %105 = vector.load %arg11[%c22, %c0_34] : memref<121x128xbf16, #tpu.memory_space<vmem>>, vector<73x128xbf16>
    %c23 = arith.constant 23 : index
    %c0_35 = arith.constant 0 : index
    %106 = vector.load %arg11[%c23, %c0_35] : memref<121x128xbf16, #tpu.memory_space<vmem>>, vector<73x128xbf16>
    %c24_36 = arith.constant 24 : index
    %c0_37 = arith.constant 0 : index
    %107 = vector.load %arg11[%c24_36, %c0_37] : memref<121x128xbf16, #tpu.memory_space<vmem>>, vector<73x128xbf16>
    %c25 = arith.constant 25 : index
    %c0_38 = arith.constant 0 : index
    %108 = vector.load %arg11[%c25, %c0_38] : memref<121x128xbf16, #tpu.memory_space<vmem>>, vector<73x128xbf16>
    %c26 = arith.constant 26 : index
    %c0_39 = arith.constant 0 : index
    %109 = vector.load %arg11[%c26, %c0_39] : memref<121x128xbf16, #tpu.memory_space<vmem>>, vector<73x128xbf16>
    %c33 = arith.constant 33 : index
    %c0_40 = arith.constant 0 : index
    %110 = vector.load %arg11[%c33, %c0_40] : memref<121x128xbf16, #tpu.memory_space<vmem>>, vector<73x128xbf16>
    %c34 = arith.constant 34 : index
    %c0_41 = arith.constant 0 : index
    %111 = vector.load %arg11[%c34, %c0_41] : memref<121x128xbf16, #tpu.memory_space<vmem>>, vector<73x128xbf16>
    %c35_42 = arith.constant 35 : index
    %c0_43 = arith.constant 0 : index
    %112 = vector.load %arg11[%c35_42, %c0_43] : memref<121x128xbf16, #tpu.memory_space<vmem>>, vector<73x128xbf16>
    %c36 = arith.constant 36 : index
    %c0_44 = arith.constant 0 : index
    %113 = vector.load %arg11[%c36, %c0_44] : memref<121x128xbf16, #tpu.memory_space<vmem>>, vector<73x128xbf16>
    %c37 = arith.constant 37 : index
    %c0_45 = arith.constant 0 : index
    %114 = vector.load %arg11[%c37, %c0_45] : memref<121x128xbf16, #tpu.memory_space<vmem>>, vector<73x128xbf16>
    %c44 = arith.constant 44 : index
    %c0_46 = arith.constant 0 : index
    %115 = vector.load %arg11[%c44, %c0_46] : memref<121x128xbf16, #tpu.memory_space<vmem>>, vector<73x128xbf16>
    %c45 = arith.constant 45 : index
    %c0_47 = arith.constant 0 : index
    %116 = vector.load %arg11[%c45, %c0_47] : memref<121x128xbf16, #tpu.memory_space<vmem>>, vector<73x128xbf16>
    %c46_48 = arith.constant 46 : index
    %c0_49 = arith.constant 0 : index
    %117 = vector.load %arg11[%c46_48, %c0_49] : memref<121x128xbf16, #tpu.memory_space<vmem>>, vector<73x128xbf16>
    %c47 = arith.constant 47 : index
    %c0_50 = arith.constant 0 : index
    %118 = vector.load %arg11[%c47, %c0_50] : memref<121x128xbf16, #tpu.memory_space<vmem>>, vector<73x128xbf16>
    %c48 = arith.constant 48 : index
    %c0_51 = arith.constant 0 : index
    %119 = vector.load %arg11[%c48, %c0_51] : memref<121x128xbf16, #tpu.memory_space<vmem>>, vector<73x128xbf16>
    %120 = tpu.concatenate %95, %96, %97, %98, %99, %100, %101, %102, %103, %104, %105, %106, %107, %108, %109, %110 in 1 : vector<73x128xbf16>, vector<73x128xbf16>, vector<73x128xbf16>, vector<73x128xbf16>, vector<73x128xbf16>, vector<73x128xbf16>, vector<73x128xbf16>, vector<73x128xbf16>, vector<73x128xbf16>, vector<73x128xbf16>, vector<73x128xbf16>, vector<73x128xbf16>, vector<73x128xbf16>, vector<73x128xbf16>, vector<73x128xbf16>, vector<73x128xbf16> -> vector<73x2048xbf16>
    %121 = tpu.concatenate %111, %112, %113, %114, %115, %116, %117, %118, %119 in 1 : vector<73x128xbf16>, vector<73x128xbf16>, vector<73x128xbf16>, vector<73x128xbf16>, vector<73x128xbf16>, vector<73x128xbf16>, vector<73x128xbf16>, vector<73x128xbf16>, vector<73x128xbf16> -> vector<73x1152xbf16>
    %122 = tpu.concatenate %120, %121 in 1 : vector<73x2048xbf16>, vector<73x1152xbf16> -> vector<73x3200xbf16>
    %c0_52 = arith.constant 0 : index
    %c0_53 = arith.constant 0 : index
    %123 = vector.load %arg4[%c0_52, %c0_53] : memref<3200x128xbf16, #tpu.memory_space<vmem>>, vector<3200x128xbf16>
    %cst_54 = arith.constant dense<0.000000e+00> : vector<73x128xf32>
    %124 = tpu.matmul %122, %123, %cst_54 {dimension_numbers = #tpu.dot_dimension_numbers<[1], [0], [0], [1], [0, 0, 1, 1], [], []>} : vector<73x3200xbf16>, vector<3200x128xbf16>, vector<73x128xf32> -> vector<73x128xf32>
    %c0_55 = arith.constant 0 : index
    %c0_56 = arith.constant 0 : index
    %125 = vector.load %arg5[%c0_55, %c0_56] : memref<1x128xf32, #tpu.memory_space<vmem>>, vector<1x128xf32>
    %126 = vector.broadcast %125 : vector<1x128xf32> to vector<73x128xf32>
    %127 = arith.addf %124, %126 : vector<73x128xf32>
    %cst_57 = arith.constant 0.000000e+00 : f32
    %128 = vector.broadcast %cst_57 : f32 to vector<73x128xf32>
    %129 = arith.maximumf %127, %128 : vector<73x128xf32>
    %130 = vector.extract_strided_slice %129 {offsets = [0, 0], sizes = [51, 128], strides = [1, 1]} : vector<73x128xf32> to vector<51x128xf32>
    %131 = vector.extract_strided_slice %129 {offsets = [11, 0], sizes = [51, 128], strides = [1, 1]} : vector<73x128xf32> to vector<51x128xf32>
    %132 = arith.maximumf %130, %131 : vector<51x128xf32>
    %133 = vector.extract_strided_slice %129 {offsets = [22, 0], sizes = [51, 128], strides = [1, 1]} : vector<73x128xf32> to vector<51x128xf32>
    %134 = arith.maximumf %132, %133 : vector<51x128xf32>
    %135 = vector.extract_strided_slice %134 {offsets = [0, 0], sizes = [49, 128], strides = [1, 1]} : vector<51x128xf32> to vector<49x128xf32>
    %136 = vector.extract_strided_slice %134 {offsets = [1, 0], sizes = [49, 128], strides = [1, 1]} : vector<51x128xf32> to vector<49x128xf32>
    %137 = arith.maximumf %135, %136 : vector<49x128xf32>
    %138 = vector.extract_strided_slice %134 {offsets = [2, 0], sizes = [49, 128], strides = [1, 1]} : vector<51x128xf32> to vector<49x128xf32>
    %139 = arith.maximumf %137, %138 : vector<49x128xf32>
    %140 = vector.extract_strided_slice %139 {offsets = [0, 0], sizes = [1, 128], strides = [1, 1]} : vector<49x128xf32> to vector<1x128xf32>
    %141 = vector.extract_strided_slice %139 {offsets = [2, 0], sizes = [1, 128], strides = [1, 1]} : vector<49x128xf32> to vector<1x128xf32>
    %142 = vector.extract_strided_slice %139 {offsets = [4, 0], sizes = [1, 128], strides = [1, 1]} : vector<49x128xf32> to vector<1x128xf32>
    %143 = tpu.concatenate %140, %141, %142 in 0 : vector<1x128xf32>, vector<1x128xf32>, vector<1x128xf32> -> vector<3x128xf32>
    %144 = arith.truncf %143 : vector<3x128xf32> to vector<3x128xbf16>
    %c6 = arith.constant 6 : index
    %c0_58 = arith.constant 0 : index
    %145 = vector.load %arg12[%c6, %c0_58] : memref<25x128xbf16, #tpu.memory_space<vmem>>, vector<3x128xbf16>
    tpu.vector_store %arg12[%c6, %c0_58], %144 {strides = array<i32>} : memref<25x128xbf16, #tpu.memory_space<vmem>>, vector<3x128xbf16>,
    %146 = vector.extract_strided_slice %139 {offsets = [22, 0], sizes = [1, 128], strides = [1, 1]} : vector<49x128xf32> to vector<1x128xf32>
    %147 = vector.extract_strided_slice %139 {offsets = [24, 0], sizes = [1, 128], strides = [1, 1]} : vector<49x128xf32> to vector<1x128xf32>
    %148 = vector.extract_strided_slice %139 {offsets = [26, 0], sizes = [1, 128], strides = [1, 1]} : vector<49x128xf32> to vector<1x128xf32>
    %149 = tpu.concatenate %146, %147, %148 in 0 : vector<1x128xf32>, vector<1x128xf32>, vector<1x128xf32> -> vector<3x128xf32>
    %150 = arith.truncf %149 : vector<3x128xf32> to vector<3x128xbf16>
    %c11_59 = arith.constant 11 : index
    %c0_60 = arith.constant 0 : index
    %151 = vector.load %arg12[%c11_59, %c0_60] : memref<25x128xbf16, #tpu.memory_space<vmem>>, vector<3x128xbf16>
    tpu.vector_store %arg12[%c11_59, %c0_60], %150 {strides = array<i32>} : memref<25x128xbf16, #tpu.memory_space<vmem>>, vector<3x128xbf16>,
    %152 = vector.extract_strided_slice %139 {offsets = [44, 0], sizes = [1, 128], strides = [1, 1]} : vector<49x128xf32> to vector<1x128xf32>
    %153 = vector.extract_strided_slice %139 {offsets = [46, 0], sizes = [1, 128], strides = [1, 1]} : vector<49x128xf32> to vector<1x128xf32>
    %154 = vector.extract_strided_slice %139 {offsets = [48, 0], sizes = [1, 128], strides = [1, 1]} : vector<49x128xf32> to vector<1x128xf32>
    %155 = tpu.concatenate %152, %153, %154 in 0 : vector<1x128xf32>, vector<1x128xf32>, vector<1x128xf32> -> vector<3x128xf32>
    %156 = arith.truncf %155 : vector<3x128xf32> to vector<3x128xbf16>
    %c16 = arith.constant 16 : index
    %c0_61 = arith.constant 0 : index
    %157 = vector.load %arg12[%c16, %c0_61] : memref<25x128xbf16, #tpu.memory_space<vmem>>, vector<3x128xbf16>
    tpu.vector_store %arg12[%c16, %c0_61], %156 {strides = array<i32>} : memref<25x128xbf16, #tpu.memory_space<vmem>>, vector<3x128xbf16>,
    %c0_62 = arith.constant 0 : index
    %c0_63 = arith.constant 0 : index
    %158 = vector.load %arg12[%c0_62, %c0_63] : memref<25x128xbf16, #tpu.memory_space<vmem>>, vector<13x128xbf16>
    %c1_64 = arith.constant 1 : index
    %c0_65 = arith.constant 0 : index
    %159 = vector.load %arg12[%c1_64, %c0_65] : memref<25x128xbf16, #tpu.memory_space<vmem>>, vector<13x128xbf16>
    %c2_66 = arith.constant 2 : index
    %c0_67 = arith.constant 0 : index
    %160 = vector.load %arg12[%c2_66, %c0_67] : memref<25x128xbf16, #tpu.memory_space<vmem>>, vector<13x128xbf16>
    %c5 = arith.constant 5 : index
    %c0_68 = arith.constant 0 : index
    %161 = vector.load %arg12[%c5, %c0_68] : memref<25x128xbf16, #tpu.memory_space<vmem>>, vector<13x128xbf16>
    %c6_69 = arith.constant 6 : index
    %c0_70 = arith.constant 0 : index
    %162 = vector.load %arg12[%c6_69, %c0_70] : memref<25x128xbf16, #tpu.memory_space<vmem>>, vector<13x128xbf16>
    %c7 = arith.constant 7 : index
    %c0_71 = arith.constant 0 : index
    %163 = vector.load %arg12[%c7, %c0_71] : memref<25x128xbf16, #tpu.memory_space<vmem>>, vector<13x128xbf16>
    %c10 = arith.constant 10 : index
    %c0_72 = arith.constant 0 : index
    %164 = vector.load %arg12[%c10, %c0_72] : memref<25x128xbf16, #tpu.memory_space<vmem>>, vector<13x128xbf16>
    %c11_73 = arith.constant 11 : index
    %c0_74 = arith.constant 0 : index
    %165 = vector.load %arg12[%c11_73, %c0_74] : memref<25x128xbf16, #tpu.memory_space<vmem>>, vector<13x128xbf16>
    %c12_75 = arith.constant 12 : index
    %c0_76 = arith.constant 0 : index
    %166 = vector.load %arg12[%c12_75, %c0_76] : memref<25x128xbf16, #tpu.memory_space<vmem>>, vector<13x128xbf16>
    %167 = tpu.concatenate %158, %159, %160, %161, %162, %163, %164, %165, %166 in 1 : vector<13x128xbf16>, vector<13x128xbf16>, vector<13x128xbf16>, vector<13x128xbf16>, vector<13x128xbf16>, vector<13x128xbf16>, vector<13x128xbf16>, vector<13x128xbf16>, vector<13x128xbf16> -> vector<13x1152xbf16>
    %c0_77 = arith.constant 0 : index
    %c0_78 = arith.constant 0 : index
    %168 = vector.load %arg6[%c0_77, %c0_78] : memref<1152x256xbf16, #tpu.memory_space<vmem>>, vector<1152x256xbf16>
    %cst_79 = arith.constant dense<0.000000e+00> : vector<13x256xf32>
    %169 = tpu.matmul %167, %168, %cst_79 {dimension_numbers = #tpu.dot_dimension_numbers<[1], [0], [0], [1], [0, 0, 1, 1], [], []>} : vector<13x1152xbf16>, vector<1152x256xbf16>, vector<13x256xf32> -> vector<13x256xf32>
    %c0_80 = arith.constant 0 : index
    %c0_81 = arith.constant 0 : index
    %170 = vector.load %arg7[%c0_80, %c0_81] : memref<1x256xf32, #tpu.memory_space<vmem>>, vector<1x256xf32>
    %171 = vector.broadcast %170 : vector<1x256xf32> to vector<13x256xf32>
    %172 = arith.addf %169, %171 : vector<13x256xf32>
    %cst_82 = arith.constant 0.000000e+00 : f32
    %173 = vector.broadcast %cst_82 : f32 to vector<13x256xf32>
    %174 = arith.maximumf %172, %173 : vector<13x256xf32>
    %175 = vector.extract_strided_slice %174 {offsets = [0, 0], sizes = [3, 256], strides = [1, 1]} : vector<13x256xf32> to vector<3x256xf32>
    %176 = arith.truncf %175 : vector<3x256xf32> to vector<3x256xbf16>
    %c6_83 = arith.constant 6 : index
    %c0_84 = arith.constant 0 : index
    %177 = vector.load %arg13[%c6_83, %c0_84] : memref<25x256xbf16, #tpu.memory_space<vmem>>, vector<3x256xbf16>
    tpu.vector_store %arg13[%c6_83, %c0_84], %176 {strides = array<i32>} : memref<25x256xbf16, #tpu.memory_space<vmem>>, vector<3x256xbf16>,
    %178 = vector.extract_strided_slice %174 {offsets = [5, 0], sizes = [3, 256], strides = [1, 1]} : vector<13x256xf32> to vector<3x256xf32>
    %179 = arith.truncf %178 : vector<3x256xf32> to vector<3x256xbf16>
    %c11_85 = arith.constant 11 : index
    %c0_86 = arith.constant 0 : index
    %180 = vector.load %arg13[%c11_85, %c0_86] : memref<25x256xbf16, #tpu.memory_space<vmem>>, vector<3x256xbf16>
    tpu.vector_store %arg13[%c11_85, %c0_86], %179 {strides = array<i32>} : memref<25x256xbf16, #tpu.memory_space<vmem>>, vector<3x256xbf16>,
    %181 = vector.extract_strided_slice %174 {offsets = [10, 0], sizes = [3, 256], strides = [1, 1]} : vector<13x256xf32> to vector<3x256xf32>
    %182 = arith.truncf %181 : vector<3x256xf32> to vector<3x256xbf16>
    %c16_87 = arith.constant 16 : index
    %c0_88 = arith.constant 0 : index
    %183 = vector.load %arg13[%c16_87, %c0_88] : memref<25x256xbf16, #tpu.memory_space<vmem>>, vector<3x256xbf16>
    tpu.vector_store %arg13[%c16_87, %c0_88], %182 {strides = array<i32>} : memref<25x256xbf16, #tpu.memory_space<vmem>>, vector<3x256xbf16>,
    %c0_89 = arith.constant 0 : index
    %c0_90 = arith.constant 0 : index
    %184 = vector.load %arg13[%c0_89, %c0_90] : memref<25x256xbf16, #tpu.memory_space<vmem>>, vector<13x256xbf16>
    %c1_91 = arith.constant 1 : index
    %c0_92 = arith.constant 0 : index
    %185 = vector.load %arg13[%c1_91, %c0_92] : memref<25x256xbf16, #tpu.memory_space<vmem>>, vector<13x256xbf16>
    %c2_93 = arith.constant 2 : index
    %c0_94 = arith.constant 0 : index
    %186 = vector.load %arg13[%c2_93, %c0_94] : memref<25x256xbf16, #tpu.memory_space<vmem>>, vector<13x256xbf16>
    %c5_95 = arith.constant 5 : index
    %c0_96 = arith.constant 0 : index
    %187 = vector.load %arg13[%c5_95, %c0_96] : memref<25x256xbf16, #tpu.memory_space<vmem>>, vector<13x256xbf16>
    %c6_97 = arith.constant 6 : index
    %c0_98 = arith.constant 0 : index
    %188 = vector.load %arg13[%c6_97, %c0_98] : memref<25x256xbf16, #tpu.memory_space<vmem>>, vector<13x256xbf16>
    %c7_99 = arith.constant 7 : index
    %c0_100 = arith.constant 0 : index
    %189 = vector.load %arg13[%c7_99, %c0_100] : memref<25x256xbf16, #tpu.memory_space<vmem>>, vector<13x256xbf16>
    %c10_101 = arith.constant 10 : index
    %c0_102 = arith.constant 0 : index
    %190 = vector.load %arg13[%c10_101, %c0_102] : memref<25x256xbf16, #tpu.memory_space<vmem>>, vector<13x256xbf16>
    %c11_103 = arith.constant 11 : index
    %c0_104 = arith.constant 0 : index
    %191 = vector.load %arg13[%c11_103, %c0_104] : memref<25x256xbf16, #tpu.memory_space<vmem>>, vector<13x256xbf16>
    %c12_105 = arith.constant 12 : index
    %c0_106 = arith.constant 0 : index
    %192 = vector.load %arg13[%c12_105, %c0_106] : memref<25x256xbf16, #tpu.memory_space<vmem>>, vector<13x256xbf16>
    %193 = tpu.concatenate %184, %185, %186, %187, %188, %189, %190, %191, %192 in 1 : vector<13x256xbf16>, vector<13x256xbf16>, vector<13x256xbf16>, vector<13x256xbf16>, vector<13x256xbf16>, vector<13x256xbf16>, vector<13x256xbf16>, vector<13x256xbf16>, vector<13x256xbf16> -> vector<13x2304xbf16>
    %c0_107 = arith.constant 0 : index
    %c0_108 = arith.constant 0 : index
    %194 = vector.load %arg8[%c0_107, %c0_108] : memref<2304x128xbf16, #tpu.memory_space<vmem>>, vector<2304x128xbf16>
    %cst_109 = arith.constant dense<0.000000e+00> : vector<13x128xf32>
    %195 = tpu.matmul %193, %194, %cst_109 {dimension_numbers = #tpu.dot_dimension_numbers<[1], [0], [0], [1], [0, 0, 1, 1], [], []>} : vector<13x2304xbf16>, vector<2304x128xbf16>, vector<13x128xf32> -> vector<13x128xf32>
    %c0_110 = arith.constant 0 : index
    %c0_111 = arith.constant 0 : index
    %196 = vector.load %arg9[%c0_110, %c0_111] : memref<1x128xf32, #tpu.memory_space<vmem>>, vector<1x128xf32>
    %197 = vector.broadcast %196 : vector<1x128xf32> to vector<13x128xf32>
    %198 = arith.addf %195, %197 : vector<13x128xf32>
    %cst_112 = arith.constant 0.000000e+00 : f32
    %199 = vector.broadcast %cst_112 : f32 to vector<13x128xf32>
    %200 = arith.maximumf %198, %199 : vector<13x128xf32>
    %201 = vector.extract_strided_slice %200 {offsets = [0, 0], sizes = [3, 128], strides = [1, 1]} : vector<13x128xf32> to vector<3x128xf32>
    %202 = vector.extract_strided_slice %200 {offsets = [5, 0], sizes = [3, 128], strides = [1, 1]} : vector<13x128xf32> to vector<3x128xf32>
    %203 = arith.maximumf %201, %202 : vector<3x128xf32>
    %204 = vector.extract_strided_slice %200 {offsets = [10, 0], sizes = [3, 128], strides = [1, 1]} : vector<13x128xf32> to vector<3x128xf32>
    %205 = arith.maximumf %203, %204 : vector<3x128xf32>
    %206 = vector.extract_strided_slice %205 {offsets = [0, 0], sizes = [1, 128], strides = [1, 1]} : vector<3x128xf32> to vector<1x128xf32>
    %207 = vector.extract_strided_slice %205 {offsets = [1, 0], sizes = [1, 128], strides = [1, 1]} : vector<3x128xf32> to vector<1x128xf32>
    %208 = arith.maximumf %206, %207 : vector<1x128xf32>
    %209 = vector.extract_strided_slice %205 {offsets = [2, 0], sizes = [1, 128], strides = [1, 1]} : vector<3x128xf32> to vector<1x128xf32>
    %210 = arith.maximumf %208, %209 : vector<1x128xf32>
    %211 = vector.shape_cast %210 : vector<1x128xf32> to vector<1x1x128xf32>
    %c0_113 = arith.constant 0 : index
    %c0_114 = arith.constant 0 : index
    %c0_115 = arith.constant 0 : index
    %212 = vector.load %arg10[%c0_113, %c0_114, %c0_115] : memref<1x1x128xf32, #tpu.memory_space<vmem>>, vector<1x1x128xf32>
    tpu.vector_store %arg10[%c0_113, %c0_114, %c0_115], %211 {strides = array<i32>} : memref<1x1x128xf32, #tpu.memory_space<vmem>>, vector<1x1x128xf32>,
    return
  }
  func.func @transform_0(%arg0: i32) -> (i32, i32, i32) {
    %c0_i32 = arith.constant 0 : i32
    %c0_i32_0 = arith.constant 0 : i32
    %c0_i32_1 = arith.constant 0 : i32
    return %arg0, %c0_i32, %c0_i32_0 : i32, i32, i32
  }
  func.func @transform_1(%arg0: i32) -> (i32, i32) {
    %c0_i32 = arith.constant 0 : i32
    %c0_i32_0 = arith.constant 0 : i32
    %c0_i32_1 = arith.constant 0 : i32
    return %c0_i32, %c0_i32_0 : i32, i32
  }
  func.func @transform_2(%arg0: i32) -> (i32, i32) {
    %c0_i32 = arith.constant 0 : i32
    %c0_i32_0 = arith.constant 0 : i32
    %c0_i32_1 = arith.constant 0 : i32
    return %c0_i32, %c0_i32_0 : i32, i32
  }
  func.func @transform_3(%arg0: i32) -> (i32, i32) {
    %c0_i32 = arith.constant 0 : i32
    %c0_i32_0 = arith.constant 0 : i32
    %c0_i32_1 = arith.constant 0 : i32
    return %c0_i32, %c0_i32_0 : i32, i32
  }
  func.func @transform_4(%arg0: i32) -> (i32, i32) {
    %c0_i32 = arith.constant 0 : i32
    %c0_i32_0 = arith.constant 0 : i32
    %c0_i32_1 = arith.constant 0 : i32
    return %c0_i32, %c0_i32_0 : i32, i32
  }
  func.func @transform_5(%arg0: i32) -> (i32, i32) {
    %c0_i32 = arith.constant 0 : i32
    %c0_i32_0 = arith.constant 0 : i32
    %c0_i32_1 = arith.constant 0 : i32
    return %c0_i32, %c0_i32_0 : i32, i32
  }
  func.func @transform_6(%arg0: i32) -> (i32, i32) {
    %c0_i32 = arith.constant 0 : i32
    %c0_i32_0 = arith.constant 0 : i32
    %c0_i32_1 = arith.constant 0 : i32
    return %c0_i32, %c0_i32_0 : i32, i32
  }
  func.func @transform_7(%arg0: i32) -> (i32, i32) {
    %c0_i32 = arith.constant 0 : i32
    %c0_i32_0 = arith.constant 0 : i32
    %c0_i32_1 = arith.constant 0 : i32
    return %c0_i32, %c0_i32_0 : i32, i32
  }
  func.func @transform_8(%arg0: i32) -> (i32, i32) {
    %c0_i32 = arith.constant 0 : i32
    %c0_i32_0 = arith.constant 0 : i32
    %c0_i32_1 = arith.constant 0 : i32
    return %c0_i32, %c0_i32_0 : i32, i32
  }
  func.func @transform_9(%arg0: i32) -> (i32, i32, i32) {
    %c0_i32 = arith.constant 0 : i32
    %c0_i32_0 = arith.constant 0 : i32
    %c0_i32_1 = arith.constant 0 : i32
    return %arg0, %c0_i32, %c0_i32_0 : i32, i32, i32
  }
}

</mosaic_0001>

<bundles_post_ra>
// kernel: forward.1
= control target key start
LH: loop header
LB: loop body
LE: loop exit
PB: predicated region body
PF: predicated region fallthrough
CT: control target
= control target key end

     0   :  { %14 = vsyncpa [#allocation6], 0  ;;  %s15543_s0 = inlined_call_operand.vmem [shape: bf16[2,225,384], index: 0, kind: input, shape index: {}]   ;;  %s15544_s1 = inlined_call_operand.vmem [shape: bf16[384,128], index: 1, kind: input, shape index: {}]   ;;  %s15545_s2 = inlined_call_operand.vmem [shape: f32[1,128], index: 2, kind: input, shape index: {}]   ;;  %s15546_s3 = inlined_call_operand.vmem [shape: bf16[3200,128], index: 3, kind: input, shape index: {}]   ;;  %s15547_s4 = inlined_call_operand.vmem [shape: f32[1,128], index: 4, kind: input, shape index: {}]   ;;  %s15548_s5 = inlined_call_operand.vmem [shape: bf16[1152,256], index: 5, kind: input, shape index: {}]   ;;  %s15549_s6 = inlined_call_operand.vmem [shape: f32[1,256], index: 6, kind: input, shape index: {}]   ;;  %s15550_s7 = inlined_call_operand.vmem [shape: bf16[2304,128], index: 7, kind: input, shape index: {}]   ;;  %s15551_s8 = inlined_call_operand.vmem [shape: f32[1,128], index: 8, kind: input, shape index: {}]   ;;  %s15552_s9 = inlined_call_operand.hbm [shape: f32[2,1,128], index: 9, kind: output, shape index: {}]  }
   0x1   :  { %16 = vsyncpa [#allocation6 + $0x1], 0  ;;  %s11126_s30 = smov 0   ;;  %s11128_s10 = smov 0  }
   0x2   :  { %s11130_s11 = smov 0   ;;  %s11132_s12 = smov 0  }
   0x3 LB: > { %s11147_s13 = sadd.s32 4294967295, %s11073_s12   ;;  %s8149_s14 = sadd.s32 4294967294, %s11073_s12   ;;  %s11073_s12 = sphi %s11132_s12, %s15861_s12   ;;  %s11069_s11 = sphi %s11130_s11, %s15860_s11   ;;  %s11065_s10 = sphi %s11128_s10, %s15859_s10   ;;  %s11061_s30 = sphi %s11126_s30, %s15858_s30  }
   0x4   : > { %s11151_s15 = sadd.s32 1, %s11073_s12   ;;  %s223_s16 = sadd.s32 1, %s11069_s11 }
   0x5   : > { %s220_s17 = ssub.s32 %s11073_s12, %s11151_s15  ;;  %p233_p0 = scmp.ne.s32.totalorder %s11069_s11, %s11065_s10 }
   0x6   : > { %p221_p1 = scmp.eq.s32.totalorder %s220_s17, 0  ;;  %p234_p2 = scmp.eq.s32.totalorder %s11147_s13, 1 }
   0x7   : > { %p239_p3 = scmp.ne.s32.totalorder %s11065_s10, %s11061_s30  ;;  %p240_p4 = scmp.eq.s32.totalorder %s8149_s14, 1 }
   0x8   : > { %s11162_s18 = scalar_select %p221_p1, %s11069_s11, %s223_s16  }
   0x9   : > { %p11164_p5 = por %p234_p2, %p233_p0  ;;  %p11168_p6 = por %p240_p4, %p239_p3 }
   0xa   : > { %p8152_p7 = scmp.ge.s32.totalorder %s11073_s12, 1  ;;  %p290_p8 = scmp.lt.s32.totalorder %s11073_s12, 3 }
   0xc   : > { %p291_p9 = pnand %p8152_p7, %p290_p8 }
   0xe   : > { %294 = sbr.rel (%p291_p9) target bundleno = 1697 (0x6a1), region = 56 }
  0x13   : > { %v10434_v0 = vld [vmem:[%s15544_s1 + $0x38] sm:$0xff]  ;;  %v10433_v3 = vld [vmem:[%s15544_s1 + $0x30] sm:$0xff]  ;;  %v10432_v6 = vld [vmem:[%s15544_s1 + $0x28] sm:$0xff]  ;;  %p325_p10 = scmp.lt.s32.totalorder %s11147_s13, 1  ;;  %vm346_vm0 = vcmask 1040384   ;;  %vm1262_vm1 = vcmask 1041408   ;;  %s8090_s24 = scalar_lea.hbm %s15552_s9, %s11147_s13 }
  0x14   : > { %v10442_v1 = vld [vmem:[%s15544_s1 + $0x78] sm:$0xff]  ;;  %857 = vmatpush.bf16.msra.mxu0 %v10434_v0  ;;  %v10441_v4 = vld [vmem:[%s15544_s1 + $0x70] sm:$0xff]  ;;  %v10440_v7 = vld [vmem:[%s15544_s1 + $0x68] sm:$0xff]  ;;  %vm1385_vm2 = vcmask 1046528   ;;  %vm1463_vm3 = vcmask 1045504   ;;  %vm1557_vm4 = vcmask 1042432  }
  0x15   : > { %v10450_v2 = vld [vmem:[%s15544_s1 + $0xb8] sm:$0xff]  ;;  %940 = vmatpush.bf16.msra.mxu1 %v10442_v1  ;;  %v10449_v5 = vld [vmem:[%s15544_s1 + $0xb0] sm:$0xff]  ;;  %v10448_v8 = vld [vmem:[%s15544_s1 + $0xa8] sm:$0xff]  ;;  %s326_s25 = scalar_select %p325_p10, %s11147_s13, 1  ;;  %vm1559_vm5 = vcmask 1043456   ;;  %vm1561_vm6 = vcmask 1044480  }
  0x16   : > { %1023 = vmatpush.bf16.msra.mxu2 %v10450_v2  ;;  %v10431_v9 = vld [vmem:[%s15544_s1 + $0x20] sm:$0xff]  ;;  %v10430_v12 = vld [vmem:[%s15544_s1 + $0x18] sm:$0xff]  ;;  %v10429_v15 = vld [vmem:[%s15544_s1 + $0x10] sm:$0xff]  ;;  %vm1566_vm7 = vsmask.f32 3328  ;;  %vm1604_vm10 = vcmask 1043457  }
  0x17   : > { %v10439_v10 = vld [vmem:[%s15544_s1 + $0x60] sm:$0xff]  ;;  %v10438_v13 = vld [vmem:[%s15544_s1 + $0x58] sm:$0xff]  ;;  %v10437_v16 = vld [vmem:[%s15544_s1 + $0x50] sm:$0xff]  ;;  %s10966_s17 = smul.u32 348, %s326_s25  ;;  %vm1851_vm9 = vsmask.f32 7424 }
  0x18   : > { %858 = vmatpush.bf16.msra.mxu0 %v10433_v3  ;;  %v10447_v11 = vld [vmem:[%s15544_s1 + $0xa0] sm:$0xff]  ;;  %v10446_v14 = vld [vmem:[%s15544_s1 + $0x98] sm:$0xff]  ;;  %v10445_v17 = vld [vmem:[%s15544_s1 + $0x90] sm:$0xff]  ;;  %vm15560_vm11 = vsmask.f32 7942  ;;  %s8094_s27 = sshll.u32 %s8090_s24, 4  ;;  %s8095_s27 = int_to_ptr.hbm [resolvable:$true] %s8094_s27 }
  0x19   : > { %941 = vmatpush.bf16.msra.mxu1 %v10441_v4  ;;  %v10428_v18 = vld [vmem:[%s15544_s1 + $0x8] sm:$0xff]  ;;  %s11239_s14 = scalar_lea.vmem %s15543_s0, %s10966_s17  ;;  %v10427_v21 = vld [vmem:[%s15544_s1] sm:$0xff]  ;;  %vm11509_vm8 = vmand %vm1559_vm5, %vm1566_vm7  ;;  %vm1917_vm12 = vsmask.f32 6400  ;;  %vm1640_vm14 = vsmask.f32 2304 }
  0x1a   : > { %1024 = vmatpush.bf16.msra.mxu2 %v10449_v5  ;;  %v10436_v19 = vld [vmem:[%s15544_s1 + $0x48] sm:$0xff]  ;;  %v10435_v22 = vld [vmem:[%s15544_s1 + $0x40] sm:$0xff]  ;;  %v8158_v26 = vld [vmem:[%s11239_s14 + $0xc] sm:$0xf0]  ;;  %vm2053_vm7 = vsmask.f32 5376 }
  0x1b   : > { %v10444_v20 = vld [vmem:[%s15544_s1 + $0x88] sm:$0xff]  ;;  %v8156_v23 = vld [vmem:[%s11239_s14] sm:$0xf]  ;;  %v10385_v25 = vld [vmem:[%s11239_s14 + $0x4] sm:$0xf]  ;;  %s11025_s29 = sshra.s32 %s8095_s27, 4  ;;  %s11026_s29 = int_to_ptr.hbm [resolvable:$true] %s11025_s29 }
  0x1c   : > { %859 = vmatpush.bf16.msra.mxu0 %v10432_v6  ;;  %v10386_v24 = vld [vmem:[%s11239_s14 + $0x8] sm:$0xf0]  ;;  %v10443_v27 = vld [vmem:[%s15544_s1 + $0x80] sm:$0xff]  ;;  %v8164_v28 = vld [vmem:[%s11239_s14 + $0x8] sm:$0xf]  ;;  %v8161_v31 = vor.u32 %v10385_v25, %v8158_v26  ;;  %s11027_s25 = scalar_lea.hbm %s11026_s29, 1  ;;  %p11032_p0 = scmp.lt.s32.totalorder %s11026_s29, %s15552_s9 }
  0x1d   : > { %942 = vmatpush.bf16.msra.mxu1 %v10440_v7  ;;  %v10387_v29 = vld [vmem:[%s11239_s14 + $0x10] sm:$0xf0]  ;;  %v8157_v30 = vor.u32 %v10386_v24, %v8156_v23  ;;  %v8168_v33 = vld [vmem:[%s11239_s14 + $0x18] sm:$0xf]  ;;  %v10389_v34 = vld [vmem:[%s11239_s14 + $0x20] sm:$0xf0]  ;;  %p11028_p11 = scmp.ne.s32.totalorder %s11026_s29, %s11027_s25 }
  0x1e   : > { %1025 = vmatpush.bf16.msra.mxu2 %v10448_v8  ;;  %v8165_v32 = vor.u32 %v10387_v29, %v8164_v28  ;;  %v10388_v35 = vld [vmem:[%s11239_s14 + $0x1c] sm:$0xf]  ;;  %v8170_v36 = vld [vmem:[%s11239_s14 + $0x24] sm:$0xf0]  ;;  %v8176_v37 = vld [vmem:[%s11239_s14 + $0x20] sm:$0xf]  ;;  %v8169_v39 = vor.u32 %v10389_v34, %v8168_v33 }
  0x1f   : > { %v10390_v38 = vld [vmem:[%s11239_s14 + $0x28] sm:$0xf0]  ;;  %v8173_v40 = vor.u32 %v10388_v35, %v8170_v36  ;;  %v8180_v42 = vld [vmem:[%s11239_s14 + $0x30] sm:$0xf]  ;;  %v10392_v43 = vld [vmem:[%s11239_s14 + $0x38] sm:$0xf0]  ;;  %p11029_p12 = pnand %p11028_p11, %p11164_p5 }
  0x20   : > { %860 = vmatpush.bf16.msra.mxu0 %v10431_v9  ;;  %v8177_v41 = vor.u32 %v10390_v38, %v8176_v37  ;;  %v10391_v44 = vld [vmem:[%s11239_s14 + $0x34] sm:$0xf]  ;;  %v8182_v45 = vld [vmem:[%s11239_s14 + $0x3c] sm:$0xf0]  ;;  %v8188_v46 = vld [vmem:[%s11239_s14 + $0x38] sm:$0xf]  ;;  %v8181_v48 = vor.u32 %v10392_v43, %v8180_v42 }
  0x21   : > { %943 = vmatpush.bf16.msra.mxu1 %v10439_v10  ;;  %v10393_v47 = vld [vmem:[%s11239_s14 + $0x40] sm:$0xf0]  ;;  %v8185_v49 = vor.u32 %v10391_v44, %v8182_v45  ;;  %v8192_v51 = vld [vmem:[%s11239_s14 + $0x48] sm:$0xf]  ;;  %v10395_v52 = vld [vmem:[%s11239_s14 + $0x50] sm:$0xf0]  ;;  %p11030_p13 = pneg %p11029_p12 }
  0x22   : > { %1026 = vmatpush.bf16.msra.mxu2 %v10447_v11  ;;  %v8189_v50 = vor.u32 %v10393_v47, %v8188_v46  ;;  %v10394_v53 = vld [vmem:[%s11239_s14 + $0x4c] sm:$0xf]  ;;  %v8194_v54 = vld [vmem:[%s11239_s14 + $0x54] sm:$0xf0]  ;;  %v8200_v55 = vld [vmem:[%s11239_s14 + $0x50] sm:$0xf]  ;;  %v8193_v57 = vor.u32 %v10395_v52, %v8192_v51 }
  0x23   : > { %v10396_v56 = vld [vmem:[%s11239_s14 + $0x58] sm:$0xf0]  ;;  %v8197_v58 = vor.u32 %v10394_v53, %v8194_v54  ;;  %v8204_v60 = vld [vmem:[%s11239_s14 + $0x60] sm:$0xf]  ;;  %v10398_v61 = vld [vmem:[%s11239_s14 + $0x68] sm:$0xf0] }
  0x24   : > { %861 = vmatpush.bf16.msra.mxu0 %v10430_v12  ;;  %v8201_v59 = vor.u32 %v10396_v56, %v8200_v55  ;;  %v10397_v62 = vld [vmem:[%s11239_s14 + $0x64] sm:$0xf]  ;;  %v8206_v63 = vld [vmem:[%s11239_s14 + $0x6c] sm:$0xf0]  ;;  %v8212_v0 = vld [vmem:[%s11239_s14 + $0x68] sm:$0xf]  ;;  %v8205_v2 = vor.u32 %v10398_v61, %v8204_v60 }
  0x25   : > { %944 = vmatpush.bf16.msra.mxu1 %v10438_v13  ;;  %v10399_v1 = vld [vmem:[%s11239_s14 + $0x70] sm:$0xf0]  ;;  %v8209_v3 = vor.u32 %v10397_v62, %v8206_v63  ;;  %v8216_v5 = vld [vmem:[%s11239_s14 + $0x78] sm:$0xf]  ;;  %v10401_v6 = vld [vmem:[%s11239_s14 + $0x80] sm:$0xf0] }
  0x26   : > { %1027 = vmatpush.bf16.msra.mxu2 %v10446_v14  ;;  %v8213_v4 = vor.u32 %v10399_v1, %v8212_v0  ;;  %v10400_v7 = vld [vmem:[%s11239_s14 + $0x7c] sm:$0xf]  ;;  %v8218_v8 = vld [vmem:[%s11239_s14 + $0x84] sm:$0xf0]  ;;  %v8224_v9 = vld [vmem:[%s11239_s14 + $0x80] sm:$0xf]  ;;  %v8217_v11 = vor.u32 %v10401_v6, %v8216_v5 }
  0x27   : > { %v10402_v10 = vld [vmem:[%s11239_s14 + $0x88] sm:$0xf0]  ;;  %v8221_v12 = vor.u32 %v10400_v7, %v8218_v8  ;;  %v8228_v14 = vld [vmem:[%s11239_s14 + $0x90] sm:$0xf]  ;;  %v8240_v23 = vld [vmem:[%s11239_s14 + $0xa8] sm:$0xf] }
  0x28   : > { %862 = vmatpush.bf16.msra.mxu0 %v10429_v15  ;;  %v8225_v13 = vor.u32 %v10402_v10, %v8224_v9  ;;  %v10404_v15 = vld [vmem:[%s11239_s14 + $0x98] sm:$0xf0]  ;;  %v10407_v24 = vld [vmem:[%s11239_s14 + $0xb0] sm:$0xf0]  ;;  %v10406_v25 = vld [vmem:[%s11239_s14 + $0xac] sm:$0xf] }
  0x29   : > { %945 = vmatpush.bf16.msra.mxu1 %v10437_v16  ;;  %v10403_v16 = vld [vmem:[%s11239_s14 + $0x94] sm:$0xf]  ;;  %v8242_v26 = vld [vmem:[%s11239_s14 + $0xb4] sm:$0xf0]  ;;  %v10408_v28 = vld [vmem:[%s11239_s14 + $0xb8] sm:$0xf0]  ;;  %v8241_v29 = vor.u32 %v10407_v24, %v8240_v23 }
  0x2a   : > { %1028 = vmatpush.bf16.msra.mxu2 %v10445_v17  ;;  %v8230_v17 = vld [vmem:[%s11239_s14 + $0x9c] sm:$0xf0]  ;;  %v10410_v33 = vld [vmem:[%s11239_s14 + $0xc8] sm:$0xf0]  ;;  %v10409_v34 = vld [vmem:[%s11239_s14 + $0xc4] sm:$0xf] }
  0x2b   : > { %v8254_v35 = vld [vmem:[%s11239_s14 + $0xcc] sm:$0xf0]  ;;  %v8260_v36 = vld [vmem:[%s11239_s14 + $0xc8] sm:$0xf]  ;;  %v10411_v37 = vld [vmem:[%s11239_s14 + $0xd0] sm:$0xf0] }
  0x2c   : > { %863 = vmatpush.bf16.msra.mxu0 %v10428_v18  ;;  %v8236_v18 = vld [vmem:[%s11239_s14 + $0x98] sm:$0xf]  ;;  %v8261_v42 = vor.u32 %v10411_v37, %v8260_v36  ;;  %v8266_v51 = vld [vmem:[%s11239_s14 + $0xe4] sm:$0xf0]  ;;  %v8272_v52 = vld [vmem:[%s11239_s14 + $0xe0] sm:$0xf] }
  0x2d   : > { %946 = vmatpush.bf16.msra.mxu1 %v10436_v19  ;;  %v10405_v19 = vld [vmem:[%s11239_s14 + $0xa0] sm:$0xf0]  ;;  %v10458_v44 = vld [vmem:[%s15546_s3 + $0x38] sm:$0xff]  ;;  %v10414_v53 = vld [vmem:[%s11239_s14 + $0xe8] sm:$0xf0]  ;;  %s11031_s21 = scalar_lea.hbm %s15552_s9, 2 }
  0x2e   : > { %1029 = vmatpush.bf16.msra.mxu2 %v10444_v20  ;;  %v8229_v20 = vor.u32 %v10404_v15, %v8228_v14  ;;  %4164 = vmatpush.bf16.msra.mxu3 %v10458_v44  ;;  %v8264_v47 = vld [vmem:[%s11239_s14 + $0xd8] sm:$0xf]  ;;  %v8273_v60 = vor.u32 %v10414_v53, %v8272_v52  ;;  %v10455_v61 = vld [vmem:[%s15546_s3 + $0x20] sm:$0xff]  ;;  %v10416_v6 = vld [vmem:[%s11239_s14 + $0xf8] sm:$0xf0]  ;;  %p11033_p1 = scmp.lt.s32.totalorder %s11031_s21, %s11027_s25 }
  0x2f   : > { %v10454_v63 = vld [vmem:[%s15546_s3 + $0x18] sm:$0xff]  ;;  %v10415_v7 = vld [vmem:[%s11239_s14 + $0xf4] sm:$0xf]  ;;  %v8278_v8 = vld [vmem:[%s11239_s14 + $0xfc] sm:$0xf0] }
  0x30   : > { %864 = vmatpush.bf16.msra.mxu0 %v10427_v21  ;;  %v8233_v21 = vor.u32 %v10403_v16, %v8230_v17  ;;  %v8284_v9 = vld [vmem:[%s11239_s14 + $0xf8] sm:$0xf]  ;;  %v10417_v10 = vld [vmem:[%s11239_s14 + $0x100] sm:$0xf0]  ;;  %v8281_v14 = vor.u32 %v10415_v7, %v8278_v8  ;;  %v10452_v15 = vld [vmem:[%s15546_s3 + $0x8] sm:$0xff]  ;;  %p11034_p2 = por %p11033_p1, %p11032_p0 }
  0x31   : > { %947 = vmatpush.bf16.msra.mxu1 %v10435_v22  ;;  %v8237_v22 = vor.u32 %v10405_v19, %v8236_v18  ;;  %v10451_v24 = vld [vmem:[%s15546_s3] sm:$0xff]  ;;  %v8288_v44 = vld [vmem:[%s11239_s14 + $0x108] sm:$0xf]  ;;  %vm11656_vm13 = vmand %vm1604_vm10, %vm15560_vm11 }
  0x32   : > { %1030 = vmatpush.bf16.msra.mxu2 %v10443_v27  ;;  %v8248_v27 = vld [vmem:[%s11239_s14 + $0xb0] sm:$0xf]  ;;  %vm11733_vm15 = vmand %vm1557_vm4, %vm1640_vm14  ;;  %vm1707_vm14 = vsmask.f32 1280  ;;  %p11035_p3 = pnand %p11034_p2, %p11030_p13 }
  0x33   : > { %865 = vmatmul.bf16.vlgmr.msra.gmra.mxu0 %v8157_v30  ;;  %v8245_v30 = vor.u32 %v10406_v25, %v8242_v26 }
  0x34   : > { %948 = vmatmul.bf16.vlgmr.msra.gmra.mxu1 %v8161_v31  ;;  %v8249_v31 = vor.u32 %v10408_v28, %v8248_v27 }
  0x35   : > { %1031 = vmatmul.bf16.vlgmr.msra.gmra.mxu2 %v8165_v32  ;;  %v8252_v32 = vld [vmem:[%s11239_s14 + $0xc0] sm:$0xf] }
  0x36   : > { %v8253_v38 = vor.u32 %v10410_v33, %v8252_v32 }
  0x43   : > { %870 = vmatmul.bf16.gmra.mxu0 %v8169_v39  ;;  %v8257_v39 = vor.u32 %v10409_v34, %v8254_v35 }
  0x44   : > { %953 = vmatmul.bf16.gmra.mxu1 %v8173_v40 }
  0x45   : > { %1036 = vmatmul.bf16.gmra.mxu2 %v8177_v41 }
  0x53   : > { %875 = vmatmul.bf16.gmra.mxu0 %v8181_v48  ;;  %v10457_v48 = vld [vmem:[%s15546_s3 + $0x30] sm:$0xff] }
  0x54   : > { %958 = vmatmul.bf16.gmra.mxu1 %v8185_v49  ;;  %v10413_v49 = vld [vmem:[%s11239_s14 + $0xe0] sm:$0xf0]  ;;  %4165 = vmatpush.bf16.msra.mxu3 %v10457_v48 }
  0x55   : > { %1041 = vmatmul.bf16.gmra.mxu2 %v8189_v50  ;;  %v10412_v50 = vld [vmem:[%s11239_s14 + $0xdc] sm:$0xf]  ;;  %v8265_v55 = vor.u32 %v10413_v49, %v8264_v47  ;;  %v8290_v47 = vld [vmem:[%s11239_s14 + $0x114] sm:$0xf0]  ;;  %v8296_v49 = vld [vmem:[%s11239_s14 + $0x110] sm:$0xf] }
  0x56   : > { %v8269_v56 = vor.u32 %v10412_v50, %v8266_v51  ;;  %v10420_v50 = vld [vmem:[%s11239_s14 + $0x118] sm:$0xf0] }
  0x63   : > { %880 = vmatmul.bf16.gmra.mxu0 %v8193_v57  ;;  %v10456_v57 = vld [vmem:[%s15546_s3 + $0x28] sm:$0xff] }
  0x64   : > { %963 = vmatmul.bf16.gmra.mxu1 %v8197_v58  ;;  %4166 = vmatpush.bf16.msra.mxu3 %v10456_v57 }
  0x65   : > { %1046 = vmatmul.bf16.gmra.mxu2 %v8201_v59 }
  0x68   : > { %4167 = vmatpush.bf16.msra.mxu3 %v10455_v61 }
  0x6c   : > { %4168 = vmatpush.bf16.msra.mxu3 %v10454_v63 }
  0x73   : > { %885 = vmatmul.bf16.gmra.mxu0 %v8205_v2  ;;  %v11337_v2 = vld [vmem:[%s15545_s2] ss:$0 sm:$0xff] }
  0x74   : > { %968 = vmatmul.bf16.gmra.mxu1 %v8209_v3  ;;  %v8276_v3 = vld [vmem:[%s11239_s14 + $0xf0] sm:$0xf] }
  0x75   : > { %1051 = vmatmul.bf16.gmra.mxu2 %v8213_v4  ;;  %v10453_v4 = vld [vmem:[%s15546_s3 + $0x10] sm:$0xff] }
  0x76   : > { %4169 = vmatpush.bf16.msra.mxu3 %v10453_v4 }
  0x7a   : > { %4170 = vmatpush.bf16.msra.mxu3 %v10452_v15 }
  0x7e   : > { %4171 = vmatpush.bf16.msra.mxu3 %v10451_v24 }
  0x83   : > { %890 = vmatmul.bf16.gmra.mxu0 %v8217_v11 }
  0x84   : > { %973 = vmatmul.bf16.gmra.mxu1 %v8221_v12 }
  0x85   : > { %1056 = vmatmul.bf16.gmra.mxu2 %v8225_v13  ;;  %v8277_v13 = vor.u32 %v10416_v6, %v8276_v3  ;;  %v10482_v6 = vld [vmem:[%s15546_s3 + $0xf8] sm:$0xff] }
  0x86   : > { %4266 = vmatpush.bf16.msrb.mxu0 %v10482_v6 }
  0x93   : > { %895 = vmatmul.bf16.gmra.mxu0 %v8229_v20  ;;  %v8285_v20 = vor.u32 %v10417_v10, %v8284_v9  ;;  %v10490_v9 = vld [vmem:[%s15546_s3 + $0x138] sm:$0xff] }
  0x94   : > { %978 = vmatmul.bf16.gmra.mxu1 %v8233_v21  ;;  %v11075_v21 = vmov 0  }
  0x95   : > { %1061 = vmatmul.bf16.gmra.mxu2 %v8237_v22  ;;  %334 = vst [vmem:[#allocation2 + $0xc] sm:$0xf] %v11075_v21  ;;  %4300 = vmatpush.bf16.msrb.mxu1 %v10490_v9 }
  0x96   : > { %331 = vst [vmem:[#allocation2] sm:$0xf] %v11075_v21 }
  0x97   : > { %332 = vst [vmem:[#allocation2 + $0x4] sm:$0xf] %v11075_v21 }
  0x98   : > { %333 = vst [vmem:[#allocation2 + $0x8] sm:$0xf] %v11075_v21 }
  0x99   : > { %335 = vst [vmem:[#allocation2 + $0x10] sm:$0xf] %v11075_v21 }
  0x9a   : > { %336 = vst [vmem:[#allocation2 + $0x14] sm:$0xf] %v11075_v21 }
  0x9b   : > { %337 = vst [vmem:[#allocation2 + $0x18] sm:$0xf] %v11075_v21 }
  0x9c   : > { %338 = vst [vmem:[#allocation2 + $0x1c] sm:$0xf] %v11075_v21 }
  0x9d   : > { %339 = vst [vmem:[#allocation2 + $0x20] sm:$0xf] %v11075_v21 }
  0x9e   : > { %340 = vst [vmem:[#allocation2 + $0x24] sm:$0xf] %v11075_v21  ;;  %v11376_v37 = vld [vmem:[#allocation2] sm:$0xff]  }
  0x9f   : > { %341 = vst [vmem:[#allocation2 + $0x28] sm:$0xf] %v11075_v21  ;;  %4172 = vmatmul.bf16.vlgmr.msra.gmra.mxu3 %v11376_v37 }
  0xa0   : > { %342 = vst [vmem:[#allocation2 + $0x2c] sm:$0xf] %v11075_v21 }
  0xa1   : > { %343 = vst [vmem:[#allocation2 + $0x30] sm:$0xf] %v11075_v21 }
  0xa2   : > { %344 = vst [vmem:[#allocation2 + $0x34] sm:$0xf] %v11075_v21 }
  0xa3   : > { %900 = vmatmul.bf16.gmra.mxu0 %v8241_v29  ;;  %345 = vst [vmem:[#allocation2 + $0x38] sm:$0xf] %v11075_v21 }
  0xa4   : > { %983 = vmatmul.bf16.gmra.mxu1 %v8245_v30  ;;  %352 = vst [vmem:[#allocation3] sm:$0xf] %v11075_v21 }
  0xa5   : > { %1066 = vmatmul.bf16.gmra.mxu2 %v8249_v31  ;;  %353 = vst [vmem:[#allocation3 + $0x4] sm:$0xf] %v11075_v21 }
  0xa6   : > { %354 = vst [vmem:[#allocation3 + $0x8] sm:$0xf] %v11075_v21 }
  0xa7   : > { %358 = vst [vmem:[#allocation4] sm:$0xff] %v11075_v21 }
  0xa8   : > { %359 = vst [vmem:[#allocation4 + $0x8] sm:$0xff] %v11075_v21 }
  0xa9   : > { %360 = vst [vmem:[#allocation4 + $0x10] sm:$0xff] %v11075_v21 }
  0xb0   : > { %v11307_v40 = vpop.f32.mrf.mxu0 }
  0xb1   : > { %v11309_v41 = vpop.f32.mrf.mxu1  ;;  %v867_v28 = vadd.f32 %v11337_v2, %v11307_v40 }
  0xb3   : > { %905 = vmatmul.bf16.gmra.mxu0 %v8253_v38  ;;  %v950_v36 = vadd.f32 %v11309_v41, %v867_v28  ;;  %v10419_v41 = vld [vmem:[%s11239_s14 + $0x110] sm:$0xf0] }
  0xb4   : > { %988 = vmatmul.bf16.gmra.mxu1 %v8257_v39 }
  0xb5   : > { %1071 = vmatmul.bf16.gmra.mxu2 %v8261_v42 }
  0xb8   : > { %v11311_v43 = vpop.f32.mrf.mxu2  ;;  %v868_v45 = vpop.f32.mrf.mxu0 }
  0xb9   : > { %v951_v46 = vpop.f32.mrf.mxu1  ;;  %v869_v11 = vadd.f32 %v11337_v2, %v868_v45  ;;  %v10418_v45 = vld [vmem:[%s11239_s14 + $0x10c] sm:$0xf]  ;;  %v1033_v48 = vadd.f32 %v11311_v43, %v950_v36 }
  0xba   : > { %v8293_v57 = vor.u32 %v10418_v45, %v8290_v47  ;;  %v10422_v36 = vld [vmem:[%s11239_s14 + $0x128] sm:$0xf0]  ;;  %v8308_v45 = vld [vmem:[%s11239_s14 + $0x128] sm:$0xf] }
  0xbb   : > { %v952_v23 = vadd.f32 %v951_v46, %v869_v11  ;;  %v1106_v63 = vmax.f32 %v1033_v48, 0.0 }
  0xc0   : > { %v1034_v54 = vpop.f32.mrf.mxu2  ;;  %v871_v58 = vpop.f32.mrf.mxu0 }
  0xc1   : > { %v954_v59 = vpop.f32.mrf.mxu1  ;;  %v872_v5 = vadd.f32 %v11337_v2, %v871_v58  ;;  %v11368_v29 = vadd.f32 %v1034_v54, %v952_v23 }
  0xc3   : > { %910 = vmatmul.bf16.gmra.mxu0 %v8265_v55  ;;  %v955_v16 = vadd.f32 %v954_v59, %v872_v5  ;;  %v1107_v38 = vmax.f32 %v11368_v29, 0.0 }
  0xc4   : > { %993 = vmatmul.bf16.gmra.mxu1 %v8269_v56  ;;  %v8289_v56 = vor.u32 %v10419_v41, %v8288_v44  ;;  %v8302_v41 = vld [vmem:[%s11239_s14 + $0x12c] sm:$0xf0] }
  0xc5   : > { %1076 = vmatmul.bf16.gmra.mxu2 %v8273_v60  ;;  %v1162_v51 = vrot.slane %v1107_v38, 7 }
  0xc8   : > { %v1037_v62 = vpop.f32.mrf.mxu2  ;;  %v873_v0 = vpop.f32.mrf.mxu0 }
  0xc9   : > { %v956_v1 = vpop.f32.mrf.mxu1  ;;  %v874_v17 = vadd.f32 %v11337_v2, %v873_v0  ;;  %v11362_v25 = vadd.f32 %v1037_v62, %v955_v16  ;;  %v8297_v62 = vor.u32 %v10420_v50, %v8296_v49  ;;  %v10481_v16 = vld [vmem:[%s15546_s3 + $0xf0] sm:$0xff] }
  0xca   : > { %4267 = vmatpush.bf16.msrb.mxu0 %v10481_v16  ;;  %v10485_v16 = vld [vmem:[%s15546_s3 + $0x110] sm:$0xff] }
  0xcb   : > { %v957_v26 = vadd.f32 %v956_v1, %v874_v17  ;;  %v1108_v32 = vmax.f32 %v11362_v25, 0.0  ;;  %v10489_v17 = vld [vmem:[%s15546_s3 + $0x130] sm:$0xff]  ;;  %v10479_v25 = vld [vmem:[%s15546_s3 + $0xe0] sm:$0xff] }
  0xcc   : > { %4301 = vmatpush.bf16.msrb.mxu1 %v10489_v17 }
  0xcd   : > { %v1163_v46 = vrot.slane %v1108_v32, 7 }
  0xcf   : > { %v1164_v43 = vsel %vm346_vm0, %v1162_v51, %v1163_v46 }
  0xd0   : > { %v1039_v12 = vpop.f32.mrf.mxu2  ;;  %v876_v18 = vpop.f32.mrf.mxu0  ;;  %v1236_v5 = vmax.f32 %v1106_v63, %v1164_v43 }
  0xd1   : > { %v959_v19 = vpop.f32.mrf.mxu1  ;;  %v877_v22 = vadd.f32 %v11337_v2, %v876_v18  ;;  %v1040_v30 = vadd.f32 %v1039_v12, %v957_v26 }
  0xd3   : > { %915 = vmatmul.bf16.gmra.mxu0 %v8277_v13  ;;  %v960_v27 = vadd.f32 %v959_v19, %v877_v22  ;;  %v11379_v39 = vmax.f32 %v1040_v30, 0.0  ;;  %v8300_v30 = vld [vmem:[%s11239_s14 + $0x120] sm:$0xf] }
  0xd4   : > { %998 = vmatmul.bf16.gmra.mxu1 %v8281_v14 }
  0xd5   : > { %1081 = vmatmul.bf16.gmra.mxu2 %v8285_v20  ;;  %v1165_v52 = vrot.slane %v11379_v39, 7  ;;  %v1263_v58 = vrot.slane %v11379_v39, 6 }
  0xd7   : > { %v1166_v1 = vsel %vm346_vm0, %v1163_v46, %v1165_v52  ;;  %v10423_v46 = vld [vmem:[%s11239_s14 + $0x130] sm:$0xf0] }
  0xd8   : > { %v1042_v31 = vpop.f32.mrf.mxu2  ;;  %v878_v34 = vpop.f32.mrf.mxu0  ;;  %v1237_v10 = vmax.f32 %v1107_v38, %v1166_v1  ;;  %v10421_v38 = vld [vmem:[%s11239_s14 + $0x124] sm:$0xf]  ;;  %v8309_v43 = vor.u32 %v10423_v46, %v8308_v45  ;;  %v10486_v1 = vld [vmem:[%s15546_s3 + $0x118] sm:$0xff] }
  0xd9   : > { %v1043_v33 = vadd.f32 %v1042_v31, %v960_v27  ;;  %v961_v35 = vpop.f32.mrf.mxu1  ;;  %v879_v42 = vadd.f32 %v11337_v2, %v878_v34  ;;  %v10480_v31 = vld [vmem:[%s15546_s3 + $0xe8] sm:$0xff]  ;;  %v10425_v46 = vld [vmem:[%s11239_s14 + $0x140] sm:$0xf0] }
  0xda   : > { %4268 = vmatpush.bf16.msrb.mxu0 %v10480_v31 }
  0xdb   : > { %v11381_v40 = vmax.f32 %v1043_v33, 0.0  ;;  %v962_v54 = vadd.f32 %v961_v35, %v879_v42  ;;  %v10488_v33 = vld [vmem:[%s15546_s3 + $0x128] sm:$0xff] }
  0xdc   : > { %4302 = vmatpush.bf16.msrb.mxu1 %v10488_v33 }
  0xdd   : > { %v1264_v53 = vrot.slane %v11381_v40, 6  ;;  %v1167_v12 = vrot.slane %v11381_v40, 7 }
  0xde   : > { %4269 = vmatpush.bf16.msrb.mxu0 %v10479_v25  ;;  %v10426_v25 = vld [vmem:[%s11239_s14 + $0x148] sm:$0xf0] }
  0xdf   : > { %v1265_v3 = vsel %vm1262_vm1, %v1263_v58, %v1264_v53  ;;  %v1168_v24 = vsel %vm346_vm0, %v1165_v52, %v1167_v12  ;;  %v8301_v52 = vor.u32 %v10422_v36, %v8300_v30  ;;  %v1568_v30 = vld [vmem:[#allocation2 + $0xc] sm:$0xf] }
  0xe0   : > { %v1044_v55 = vpop.f32.mrf.mxu2  ;;  %v881_v60 = vpop.f32.mrf.mxu0  ;;  %v1337_v11 = vmax.f32 %v1236_v5, %v1265_v3  ;;  %v1238_v42 = vmax.f32 %v1108_v32, %v1168_v24  ;;  %v10487_v32 = vld [vmem:[%s15546_s3 + $0x120] sm:$0xff]  ;;  %v10476_v36 = vld [vmem:[%s15546_s3 + $0xc8] sm:$0xff] }
  0xe1   : > { %v1045_v59 = vadd.f32 %v1044_v55, %v962_v54  ;;  %v964_v61 = vpop.f32.mrf.mxu1  ;;  %v882_v0 = vadd.f32 %v11337_v2, %v881_v60  ;;  %4303 = vmatpush.bf16.msrb.mxu1 %v10487_v32 }
  0xe2   : > { %v1386_v21 = vrot.slane %v1337_v11, 1  ;;  %v1464_v28 = vrot.slane %v1337_v11, 2 }
  0xe3   : > { %v11409_v4 = vmax.f32 %v1045_v59, 0.0  ;;  %920 = vmatmul.bf16.gmra.mxu0 %v8289_v56  ;;  %v965_v8 = vadd.f32 %v964_v61, %v882_v0  ;;  %v10478_v0 = vld [vmem:[%s15546_s3 + $0xd8] sm:$0xff] }
  0xe4   : > { %1003 = vmatmul.bf16.gmra.mxu1 %v8293_v57  ;;  %v8305_v57 = vor.u32 %v10421_v38, %v8302_v41  ;;  %4270 = vmatpush.bf16.msrb.mxu0 %v10478_v0  ;;  %v10484_v38 = vld [vmem:[%s15546_s3 + $0x108] sm:$0xff]  ;;  %v1793_v0 = vld [vmem:[#allocation2] sm:$0xe] }
  0xe5   : > { %v1266_v7 = vrot.slane %v11409_v4, 6  ;;  %1086 = vmatmul.bf16.gmra.mxu2 %v8297_v62  ;;  %4304 = vmatpush.bf16.msrb.mxu1 %v10486_v1 }
  0xe7   : > { %v1267_v13 = vsel %vm1262_vm1, %v1264_v53, %v1266_v7 }
  0xe8   : > { %v11423_v14 = vmax.f32 %v1237_v10, %v1267_v13  ;;  %v1047_v15 = vpop.f32.mrf.mxu2  ;;  %v883_v19 = vpop.f32.mrf.mxu0 }
  0xe9   : > { %v1048_v18 = vadd.f32 %v1047_v15, %v965_v8  ;;  %v966_v20 = vpop.f32.mrf.mxu1  ;;  %v884_v27 = vadd.f32 %v11337_v2, %v883_v19  ;;  %v10477_v15 = vld [vmem:[%s15546_s3 + $0xd0] sm:$0xff]  ;;  %4305 = vmatpush.bf16.msrb.mxu1 %v10485_v16 }
  0xea   : > { %v1387_v22 = vrot.slane %v11423_v14, 1  ;;  %v1465_v23 = vrot.slane %v11423_v14, 2  ;;  %4271 = vmatpush.bf16.msrb.mxu0 %v10477_v15 }
  0xeb   : > { %v11436_v26 = vmax.f32 %v1048_v18, 0.0  ;;  %v967_v49 = vadd.f32 %v966_v20, %v884_v27 }
  0xec   : > { %v1388_v29 = vsel %vm1385_vm2, %v1386_v21, %v1387_v22  ;;  %v1466_v44 = vsel %vm1463_vm3, %v1464_v28, %v1465_v23 }
  0xed   : > { %v1445_v34 = vmax.f32 %v1337_v11, %v1388_v29  ;;  %v1268_v35 = vrot.slane %v11436_v26, 6  ;;  %v1171_v8 = vrot.slane %v11436_v26, 7  ;;  %4306 = vmatpush.bf16.msrb.mxu1 %v10484_v38 }
  0xee   : > { %4272 = vmatpush.bf16.msrb.mxu0 %v10476_v36  ;;  %v425_v36 = vld [vmem:[%s11239_s14 + $0x158] sm:$0x1] }
  0xef   : > { %v1523_v47 = vmax.f32 %v1445_v34, %v1466_v44  ;;  %v1269_v48 = vsel %vm1262_vm1, %v1266_v7, %v1268_v35  ;;  %v1169_v7 = vrot.slane %v11409_v4, 7  ;;  %v8312_v34 = vld [vmem:[%s11239_s14 + $0x138] sm:$0xf] }
  0xf0   : > { %v1339_v50 = vmax.f32 %v1238_v42, %v1269_v48  ;;  %v1049_v51 = vpop.f32.mrf.mxu2  ;;  %v886_v55 = vpop.f32.mrf.mxu0 }
  0xf1   : > { %v1542_v53 = vrot.slane %v1523_v47, 1  ;;  %v1050_v54 = vadd.f32 %v1049_v51, %v967_v49  ;;  %v969_v56 = vpop.f32.mrf.mxu1  ;;  %v887_v60 = vadd.f32 %v11337_v2, %v886_v55  ;;  %v1544_v61 = vrot.slane %v1523_v47, 2  ;;  %v8314_v51 = vld [vmem:[%s11239_s14 + $0x144] sm:$0xf0] }
  0xf2   : > { %v1389_v58 = vrot.slane %v1339_v50, 1  ;;  %v1467_v59 = vrot.slane %v1339_v50, 2  ;;  %v1546_v13 = vrot.slane %v1523_v47, 3  ;;  %v1172_v24 = vsel %vm346_vm0, %v1169_v7, %v1171_v8 }
  0xf3   : > { %v1555_v62 = vsel %vm346_vm0, %v1523_v47, %v1542_v53  ;;  %925 = vmatmul.bf16.gmra.mxu0 %v8301_v52  ;;  %v11475_v5 = vmax.f32 %v1050_v54, 0.0  ;;  %v970_v6 = vadd.f32 %v969_v56, %v887_v60  ;;  %v10424_v47 = vld [vmem:[%s11239_s14 + $0x13c] sm:$0xf]  ;;  %v1240_v49 = vmax.f32 %v11381_v40, %v1172_v24  ;;  %v8320_v52 = vld [vmem:[%s11239_s14 + $0x140] sm:$0xf] }
  0xf4   : > { %v1390_v63 = vsel %vm1385_vm2, %v1387_v22, %v1389_v58  ;;  %1008 = vmatmul.bf16.gmra.mxu1 %v8305_v57  ;;  %v1468_v9 = vsel %vm1463_vm3, %v1465_v23, %v1467_v59  ;;  %v1556_v11 = vsel %vm1262_vm1, %v1555_v62, %v1544_v61  ;;  %v1170_v23 = vsel %vm346_vm0, %v1167_v12, %v1169_v7  ;;  %v10475_v61 = vld [vmem:[%s15546_s3 + $0xc0] sm:$0xff] }
  0xf5   : > { %v1446_v3 = vmax.f32 %v11423_v14, %v1390_v63  ;;  %1091 = vmatmul.bf16.gmra.mxu2 %v8309_v43  ;;  %v1270_v19 = vrot.slane %v11475_v5, 6  ;;  %v1558_v27 = vsel %vm1557_vm4, %v1556_v11, %v1546_v13  ;;  %v1239_v48 = vmax.f32 %v11379_v39, %v1170_v23  ;;  %v10483_v62 = vld [vmem:[%s15546_s3 + $0x100] sm:$0xff]  ;;  %4273 = vmatpush.bf16.msrb.mxu0 %v10475_v61 }
  0xf6   : > { %v1173_v32 = vrot.slane %v11475_v5, 7  ;;  %v8313_v57 = vor.u32 %v10425_v46, %v8312_v34  ;;  %v8317_v59 = vor.u32 %v10424_v47, %v8314_v51  ;;  %v8321_v60 = vor.u32 %v10426_v25, %v8320_v52  ;;  %4307 = vmatpush.bf16.msrb.mxu1 %v10483_v62 }
  0xf7   : > { %v1524_v10 = vmax.f32 %v1446_v3, %v1468_v9  ;;  %v1271_v41 = vsel %vm1262_vm1, %v1268_v35, %v1270_v19  ;;  %v10945_v9 = vunpack.c.h.b16 %v11376_v37  ;;  %v622_v25 = vunpack.c.l.b16 %v425_v36 }
  0xf8   : > { %v1052_v14 = vpop.f32.mrf.mxu2  ;;  %v888_v21 = vpop.f32.mrf.mxu0  ;;  %v1340_v55 = vmax.f32 %v1239_v48, %v1271_v41  ;;  %v1174_v3 = vsel %vm346_vm0, %v1171_v8, %v1173_v32  ;;  %v1855_v8 = vshll.u32 %v11376_v37, 16 }
  0xf9   : > { %v1549_v17 = vrot.slane %v1524_v10, 4  ;;  %v1551_v18 = vrot.slane %v1524_v10, 5  ;;  %v1053_v20 = vadd.f32 %v1052_v14, %v970_v6  ;;  %v971_v22 = vpop.f32.mrf.mxu1  ;;  %v1553_v28 = vrot.slane %v1524_v10, 6 }
  0xfa   : > { %v889_v33 = vadd.f32 %v11337_v2, %v888_v21  ;;  %v1391_v7 = vrot.slane %v1340_v55, 1  ;;  %v1898_v10 = vunpack.c.l.b16 %v1793_v0  ;;  %v1241_v14 = vmax.f32 %v11409_v4, %v1174_v3 }
  0xfb   : > { %v1560_v29 = vsel %vm1559_vm5, %v1558_v27, %v1549_v17  ;;  %v11496_v31 = vmax.f32 %v1053_v20, 0.0  ;;  %v1853_v4 = vshrl.u32 %v11376_v37, 16  ;;  %v667_v0 = vpack.c.b16 %v622_v25, %v622_v25 }
  0xfc   : > { %v1562_v12 = vsel %vm1561_vm6, %v1560_v29, %v1551_v18  ;;  %v972_v54 = vadd.f32 %v971_v22, %v889_v33  ;;  %v11558_v23 = vpack.c.b16 %v10945_v9, %v1898_v10  ;;  %v424_v29 = vld [vmem:[%s11239_s14 + $0x150] sm:$0x11]  ;;  %v1857_v33 = vrot.slane %v1855_v8, 1  ;;  %s323_s14 = sand.u32 1, %s11065_s10  }
  0xfd   : > { %v1563_v42 = vsel %vm1463_vm3, %v1562_v12, %v1553_v28  ;;  %v1272_v45 = vrot.slane %v11496_v31, 6  ;;  %v1175_v16 = vrot.slane %v11496_v31, 7  ;;  %v620_v48 = vunpack.c.l.b16 %v424_v29  ;;  %s324_s17 = scalar_lea.vmem [#allocation5], %s323_s14  ;;  %s8082_s28 = scalar_lea.sflag [#allocation6], %s323_s14 }
  0xfe   : > { %v1564_v50 = vpack.c.bf16 %v1563_v42, %v1563_v42  ;;  %v1919_v10 = vshrl.u32 %v11558_v23, 16  ;;  %s8092_s26 = sshll.u32 %s324_s17, 4  ;;  %s8093_s26 = int_to_ptr.vmem [resolvable:$true] %s8092_s26 }
  0xff   : > { %v1273_v53 = vsel %vm1262_vm1, %v1270_v19, %v1272_v45  ;;  %v1176_v38 = vsel %vm346_vm0, %v1173_v32, %v1175_v16 }
 0x100   : > { %v1569_v35 = vsel %vm11509_vm8, %v1564_v50, %v1568_v30  ;;  %v11528_v56 = vmax.f32 %v1240_v49, %v1273_v53  ;;  %v1054_v39 = vpop.f32.mrf.mxu2  ;;  %v891_v43 = vpop.f32.mrf.mxu0  ;;  %v1469_v30 = vrot.slane %v1340_v55, 2  ;;  %v621_v49 = vunpack.c.h.b16 %v424_v29 }
 0x101   : > { %1570 = vst [vmem:[#allocation2 + $0xc] sm:$0xf] %v1569_v35  ;;  %v1055_v40 = vadd.f32 %v1054_v39, %v972_v54  ;;  %v974_v58 = vpop.f32.mrf.mxu1  ;;  %v892_v1 = vadd.f32 %v11337_v2, %v891_v43  ;;  %v1242_v32 = vmax.f32 %v11436_v26, %v1176_v38  ;;  %v1858_v35 = vor.u32 %v1857_v33, %v1853_v4 }
 0x102   : > { %v1392_v63 = vrot.slane %v11528_v56, 1  ;;  %v1470_v18 = vrot.slane %v11528_v56, 2  ;;  %v1921_v36 = vrot.slane %v1919_v10, 1  ;;  %v10495_v10 = vld [vmem:[%s15546_s3 + $0x160] sm:$0xff]  ;;  %vm1674_vm8 = vsmask.f32 7938 }
 0x103   : > { %v11541_v6 = vmax.f32 %v1055_v40, 0.0  ;;  %930 = vmatmul.bf16.gmra.mxu0 %v8313_v57  ;;  %v975_v13 = vadd.f32 %v974_v58, %v892_v1  ;;  %v665_v58 = vpack.c.b16 %v620_v48, %v620_v48  ;;  %vm11889_vm10 = vmand %vm1559_vm5, %vm1674_vm8  ;;  %vm347_vm8 = vsmask.f32 256 }
 0x104   : > { %1013 = vmatmul.bf16.gmra.mxu1 %v8317_v59  ;;  %v1393_v15 = vsel %vm1385_vm2, %v1391_v7, %v1392_v63  ;;  %v1471_v46 = vsel %vm1463_vm3, %v1469_v30, %v1470_v18  ;;  %v666_v59 = vpack.c.b16 %v621_v49, %v621_v49 }
 0x105   : > { %v1274_v11 = vrot.slane %v11541_v6, 6  ;;  %1096 = vmatmul.bf16.gmra.mxu2 %v8321_v60  ;;  %v1447_v22 = vmax.f32 %v1340_v55, %v1393_v15  ;;  %v1177_v4 = vrot.slane %v11541_v6, 7 }
 0x107   : > { %v1275_v17 = vsel %vm1262_vm1, %v1272_v45, %v1274_v11  ;;  %v1795_v45 = vld [vmem:[#allocation2] sm:$0xc]  ;;  %v1525_v50 = vmax.f32 %v1447_v22, %v1471_v46  ;;  %v10498_v22 = vld [vmem:[%s15546_s3 + $0x178] sm:$0xff]  ;;  %v10497_v46 = vld [vmem:[%s15546_s3 + $0x170] sm:$0xff] }
 0x108   : > { %v11551_v19 = vmax.f32 %v1241_v14, %v1275_v17  ;;  %v1057_v20 = vpop.f32.mrf.mxu2  ;;  %v11553_v21 = vld [vmem:[#allocation2 + $0x8] sm:$0xff]   ;;  %v893_v27 = vpop.f32.mrf.mxu0  ;;  %v1954_v54 = vunpack.c.l.b16 %v1795_v45  ;;  %v1922_v14 = vshll.u32 %v11558_v23, 16  ;;  %4334 = vmatpush.bf16.msrb.mxu2 %v10498_v22  ;;  %v1607_v22 = vld [vmem:[#allocation2 + $0x10] sm:$0xe] }
 0x109   : > { %v1058_v24 = vadd.f32 %v1057_v20, %v975_v13  ;;  %4177 = vmatmul.bf16.gmra.mxu3 %v11553_v21  ;;  %v976_v28 = vpop.f32.mrf.mxu1  ;;  %v894_v44 = vadd.f32 %v11337_v2, %v893_v27  ;;  %v1860_v41 = vshll.u32 %v11553_v21, 16  ;;  %v1572_v60 = vrot.slane %v1525_v50, 6 }
 0x10a   : > { %v1394_v12 = vrot.slane %v11551_v19, 1  ;;  %v1472_v34 = vrot.slane %v11551_v19, 2  ;;  %v11597_v20 = vpack.c.b16 %v10945_v9, %v1954_v54  ;;  %v1924_v45 = vrot.slane %v1922_v14, 2 }
 0x10b   : > { %v11568_v42 = vmax.f32 %v1058_v24, 0.0  ;;  %v977_v57 = vadd.f32 %v976_v28, %v894_v44  ;;  %v1862_v40 = vrot.slane %v1860_v41, 1 }
 0x10c   : > { %v1395_v47 = vsel %vm1385_vm2, %v1392_v63, %v1394_v12  ;;  %v1473_v53 = vsel %vm1463_vm3, %v1470_v18, %v1472_v34  ;;  %v1864_v18 = vshrl.u32 %v11553_v21, 16  ;;  %4335 = vmatpush.bf16.msrb.mxu2 %v10497_v46 }
 0x10d   : > { %v1448_v51 = vmax.f32 %v11528_v56, %v1395_v47  ;;  %v1276_v52 = vrot.slane %v11568_v42, 6  ;;  %v11590_v15 = vsel %vm1851_vm9, %v1858_v35, %v1862_v40  ;;  %v1179_v29 = vrot.slane %v11568_v42, 7 }
 0x10e   : > { %v11606_v37 = vor.u32 %v1864_v18, %v1862_v40  ;;  %v1178_v47 = vsel %vm346_vm0, %v1175_v16, %v1177_v4  ;;  %v1926_v54 = vrot.slane %v1864_v18, 1  ;;  %v1927_v35 = vrot.slane %v1860_v41, 2  ;;  %v10496_v41 = vld [vmem:[%s15546_s3 + $0x168] sm:$0xff] }
 0x10f   : > { %v1526_v55 = vmax.f32 %v1448_v51, %v1473_v53  ;;  %v1277_v39 = vsel %vm1262_vm1, %v1274_v11, %v1276_v52 }
 0x110   : > { %v1343_v43 = vmax.f32 %v1242_v32, %v1277_v39  ;;  %v1059_v56 = vpop.f32.mrf.mxu2  ;;  %v896_v62 = vpop.f32.mrf.mxu0  ;;  %v1180_v32 = vsel %vm346_vm0, %v1177_v4, %v1179_v29  ;;  %4336 = vmatpush.bf16.msrb.mxu2 %v10496_v41 }
 0x111   : > { %v1575_v26 = vrot.slane %v1526_v55, 7  ;;  %v1060_v61 = vadd.f32 %v1059_v56, %v977_v57  ;;  %v979_v63 = vpop.f32.mrf.mxu1  ;;  %v897_v7 = vadd.f32 %v11337_v2, %v896_v62  ;;  %v1577_v24 = vrot.slane %v1526_v55, 1 }
 0x112   : > { %v1396_v1 = vrot.slane %v1343_v43, 1  ;;  %v1474_v3 = vrot.slane %v1343_v43, 2  ;;  %v1579_v38 = vrot.slane %v1526_v55, 2  ;;  %v1243_v57 = vmax.f32 %v11475_v5, %v1178_v47 }
 0x113   : > { %v1586_v11 = vsel %vm346_vm0, %v1572_v60, %v1575_v26  ;;  %v11586_v13 = vmax.f32 %v1060_v61, 0.0  ;;  %935 = vmatmul.bf16.gmra.mxu0 %v665_v58  ;;  %v980_v28 = vadd.f32 %v979_v63, %v897_v7  ;;  %v1925_v43 = vor.u32 %v1924_v45, %v1921_v36 }
 0x114   : > { %v1587_v8 = vsel %vm1262_vm1, %v1586_v11, %v1526_v55  ;;  %v1397_v17 = vsel %vm1385_vm2, %v1394_v12, %v1396_v1  ;;  %1018 = vmatmul.bf16.gmra.mxu1 %v666_v59  ;;  %v1475_v30 = vsel %vm1463_vm3, %v1472_v34, %v1474_v3  ;;  %v1903_v34 = vrot.slane %v11558_v23, 1  ;;  %4337 = vmatpush.bf16.msrb.mxu2 %v10495_v10 }
 0x115   : > { %v1449_v27 = vmax.f32 %v11551_v19, %v1397_v17  ;;  %1101 = vmatmul.bf16.gmra.mxu2 %v667_v0  ;;  %v1588_v33 = vsel %vm1557_vm4, %v1587_v8, %v1577_v24  ;;  %v1278_v12 = vrot.slane %v11586_v13, 6  ;;  %v1959_v19 = vrot.slane %v11597_v20, 2 }
 0x116   : > { %v1589_v53 = vsel %vm1559_vm5, %v1588_v33, %v1579_v38  ;;  %v1904_v56 = vrot.slane %v11553_v21, 1  ;;  %v1244_v59 = vmax.f32 %v11496_v31, %v1180_v32  ;;  %v11639_v26 = vor.u32 %v1927_v35, %v1926_v54  ;;  %v10494_v38 = vld [vmem:[%s15546_s3 + $0x158] sm:$0xff] }
 0x117   : > { %v1527_v9 = vmax.f32 %v1449_v27, %v1475_v30  ;;  %v1279_v16 = vsel %vm1262_vm1, %v1276_v52, %v1278_v12  ;;  %v1181_v1 = vrot.slane %v11586_v13, 7  ;;  %v1960_v31 = vrot.slane %v11553_v21, 2 }
 0x118   : > { %v1062_v44 = vpop.f32.mrf.mxu2  ;;  %v898_v51 = vpop.f32.mrf.mxu0  ;;  %v1344_v60 = vmax.f32 %v1243_v57, %v1279_v16  ;;  %v11644_v5 = vsel %vm1385_vm2, %v1903_v34, %v1904_v56  ;;  %4338 = vmatpush.bf16.msrb.mxu2 %v10494_v38 }
 0x119   : > { %v1582_v48 = vrot.slane %v1527_v9, 3  ;;  %v1584_v49 = vrot.slane %v1527_v9, 4  ;;  %v1063_v50 = vadd.f32 %v1062_v44, %v980_v28  ;;  %v981_v25 = vpop.f32.mrf.mxu1  ;;  %v899_v39 = vadd.f32 %v11337_v2, %v898_v51 }
 0x11a   : > { %v1398_v4 = vrot.slane %v1344_v60, 1  ;;  %v1929_v9 = vsel %vm1917_vm12, %v1925_v43, %v11639_v26  ;;  %v1182_v33 = vsel %vm346_vm0, %v1179_v29, %v1181_v1  ;;  %v1961_v36 = vsel %vm1463_vm3, %v1959_v19, %v1960_v31 }
 0x11b   : > { %v1590_v23 = vsel %vm1561_vm6, %v1589_v53, %v1582_v48  ;;  %v11628_v55 = vmax.f32 %v1063_v50, 0.0  ;;  %v982_v0 = vadd.f32 %v981_v25, %v899_v39  ;;  %v1245_v19 = vmax.f32 %v11541_v6, %v1182_v33  ;;  %v10493_v25 = vld [vmem:[%s15546_s3 + $0x150] sm:$0xff] }
 0x11c   : > { %v1591_v40 = vsel %vm1463_vm3, %v1590_v23, %v1584_v49  ;;  %v1476_v49 = vrot.slane %v1344_v60, 2  ;;  %4339 = vmatpush.bf16.msrb.mxu2 %v10493_v25 }
 0x11d   : > { %v1592_v58 = vpack.c.bf16 %v1591_v40, %v1591_v40  ;;  %v1280_v52 = vrot.slane %v11628_v55, 6  ;;  %v1183_v29 = vrot.slane %v11628_v55, 7 }
 0x11f   : > { %v1594_v61 = vshrl.u32 %v1592_v58, 16  ;;  %v1597_v62 = vshll.u32 %v1592_v58, 16  ;;  %v1281_v63 = vsel %vm1262_vm1, %v1278_v12, %v1280_v52  ;;  %v1184_v16 = vsel %vm346_vm0, %v1181_v1, %v1183_v29 }
 0x120   : > { %v11648_v3 = vmax.f32 %v1244_v59, %v1281_v63  ;;  %v1064_v7 = vpop.f32.mrf.mxu2  ;;  %v901_v17 = vpop.f32.mrf.mxu0 }
 0x121   : > { %v1596_v11 = vrot.slane %v1594_v61, 6  ;;  %v1599_v14 = vrot.slane %v1597_v62, 7  ;;  %v1065_v8 = vadd.f32 %v1064_v7, %v982_v0  ;;  %v984_v18 = vpop.f32.mrf.mxu1  ;;  %v902_v27 = vadd.f32 %v11337_v2, %v901_v17 }
 0x122   : > { %v1399_v24 = vrot.slane %v11648_v3, 1  ;;  %v1477_v46 = vrot.slane %v11648_v3, 2  ;;  %v1246_v61 = vmax.f32 %v11568_v42, %v1184_v16  ;;  %v10491_v42 = vld [vmem:[%s15546_s3 + $0x140] sm:$0xff] }
 0x123   : > { %v1600_v28 = vor.u32 %v1599_v14, %v1596_v11  ;;  %v11662_v30 = vmax.f32 %v1065_v8, 0.0  ;;  %4274 = vmatmul.bf16.vlgmr.msrb.gmra.mxu0 %v1929_v9  ;;  %v985_v34 = vadd.f32 %v984_v18, %v902_v27  ;;  %v1797_v18 = vld [vmem:[#allocation2 + $0x4] sm:$0xe] }
 0x124   : > { %v1400_v12 = vsel %vm1385_vm2, %v1398_v4, %v1399_v24  ;;  %4308 = vmatmul.bf16.vlgmr.msrb.gmra.mxu1 %v1961_v36  ;;  %v1478_v32 = vsel %vm1463_vm3, %v1476_v49, %v1477_v46  ;;  %v1800_v9 = vld [vmem:[#allocation2 + $0x4] sm:$0xc]  ;;  %v10948_v36 = vunpack.c.l.b16 %v11553_v21  ;;  %v1976_v38 = vunpack.c.l.b16 %v1797_v18 }
 0x125   : > { %v1601_v44 = vrot.slane %v1600_v28, 4  ;;  %v1608_v45 = vsel %vm11656_vm13, %v1600_v28, %v1607_v22  ;;  %v1450_v47 = vmax.f32 %v1344_v60, %v1400_v12  ;;  %v1282_v48 = vrot.slane %v11662_v30, 6 }
 0x126   : > { %1609 = vst [vmem:[#allocation2 + $0x10] sm:$0xe] %v1608_v45  ;;  %v2035_v49 = vunpack.c.l.b16 %v1800_v9  ;;  %vm362_vm13 = vsmask.f32 4352 }
 0x127   : > { %1610 = vst [vmem:[#allocation2 + $0x14] sm:$0x1] %v1601_v44  ;;  %v1283_v50 = vsel %vm1262_vm1, %v1280_v52, %v1282_v48  ;;  %v1528_v39 = vmax.f32 %v1450_v47, %v1478_v32  ;;  %v10492_v52 = vld [vmem:[%s15546_s3 + $0x148] sm:$0xff]  ;;  %v1185_v44 = vrot.slane %v11662_v30, 7 }
 0x128   : > { %v1067_v51 = vpop.f32.mrf.mxu2  ;;  %v1346_v53 = vmax.f32 %v1245_v19, %v1283_v50  ;;  %v903_v35 = vpop.f32.mrf.mxu0  ;;  %4340 = vmatpush.bf16.msrb.mxu2 %v10492_v52  ;;  %v1802_v19 = vld [vmem:[#allocation2 + $0x4] sm:$0x8]  ;;  %v1804_v52 = vld [vmem:[#allocation2 + $0x8] sm:$0x8] }
 0x129   : > { %v1068_v54 = vadd.f32 %v1067_v51, %v985_v34  ;;  %v986_v23 = vpop.f32.mrf.mxu1  ;;  %v904_v43 = vadd.f32 %v11337_v2, %v903_v35  ;;  %v1612_v59 = vrot.slane %v1528_v39, 4  ;;  %v1614_v62 = vrot.slane %v1528_v39, 5 }
 0x12a   : > { %v1401_v6 = vrot.slane %v1346_v53, 1  ;;  %v1479_v57 = vrot.slane %v1346_v53, 2  ;;  %v1979_v35 = vpack.c.b16 %v10948_v36, %v1976_v38 }
 0x12b   : > { %v1120_v40 = vmax.f32 %v1068_v54, 0.0  ;;  %v987_v1 = vadd.f32 %v986_v23, %v904_v43 }
 0x12c   : > { %v1402_v41 = vsel %vm1385_vm2, %v1399_v24, %v1401_v6  ;;  %v1480_v63 = vsel %vm1463_vm3, %v1477_v46, %v1479_v57  ;;  %v1626_v24 = vsel %vm346_vm0, %v1612_v59, %v1614_v62  ;;  %4341 = vmatpush.bf16.msrb.mxu2 %v10491_v42 }
 0x12d   : > { %v1284_v58 = vrot.slane %v1120_v40, 6  ;;  %v1451_v60 = vmax.f32 %v11648_v3, %v1402_v41  ;;  %v1187_v34 = vrot.slane %v1120_v40, 7  ;;  %v11719_v41 = vpack.c.b16 %v10948_v36, %v2035_v49 }
 0x12f   : > { %v1285_v0 = vsel %vm1262_vm1, %v1282_v48, %v1284_v58  ;;  %v1529_v7 = vmax.f32 %v1451_v60, %v1480_v63  ;;  %v1188_v40 = vsel %vm346_vm0, %v1185_v44, %v1187_v34  ;;  %15617 = vst [vmem:[#allocation8_spill] sm:$0xff] %v11719_v41 }
 0x130   : > { %v1347_v10 = vmax.f32 %v1246_v61, %v1285_v0  ;;  %v1069_v11 = vpop.f32.mrf.mxu2  ;;  %v906_v8 = vpop.f32.mrf.mxu0  ;;  %v1985_v0 = vshrl.u32 %v1979_v35, 16 }
 0x131   : > { %v1070_v14 = vadd.f32 %v1069_v11, %v987_v1  ;;  %v989_v17 = vpop.f32.mrf.mxu1  ;;  %v1617_v20 = vrot.slane %v1529_v7, 6  ;;  %v1619_v22 = vrot.slane %v1529_v7, 7  ;;  %v907_v28 = vadd.f32 %v11337_v2, %v906_v8 }
 0x132   : > { %v1403_v4 = vrot.slane %v1347_v10, 1  ;;  %v1481_v3 = vrot.slane %v1347_v10, 2  ;;  %v1621_v32 = vrot.slane %v1529_v7, 1  ;;  %v2145_v11 = vunpack.c.l.b16 %v1804_v52 }
 0x133   : > { %v11703_v27 = vmax.f32 %v1070_v14, 0.0  ;;  %v1627_v12 = vsel %vm1262_vm1, %v1626_v24, %v1617_v20  ;;  %v990_v48 = vadd.f32 %v989_v17, %v907_v28  ;;  %v10949_v14 = vunpack.c.h.b16 %v11553_v21 }
 0x134   : > { %v1404_v33 = vsel %vm1385_vm2, %v1401_v6, %v1403_v4  ;;  %v1628_v46 = vsel %vm1557_vm4, %v1627_v12, %v1619_v22  ;;  %v1482_v47 = vsel %vm1463_vm3, %v1479_v57, %v1481_v3  ;;  %v2090_v57 = vunpack.c.l.b16 %v1802_v19 }
 0x135   : > { %v1452_v45 = vmax.f32 %v1346_v53, %v1404_v33  ;;  %v1629_v51 = vsel %vm1559_vm5, %v1628_v46, %v1529_v7  ;;  %v1286_v25 = vrot.slane %v11703_v27, 6  ;;  %v1186_v53 = vsel %vm346_vm0, %v1183_v29, %v1185_v44 }
 0x136   : > { %v1630_v43 = vsel %vm1561_vm6, %v1629_v51, %v1621_v32  ;;  %v1247_v62 = vmax.f32 %v11586_v13, %v1186_v53  ;;  %v1988_v7 = vshll.u32 %v1979_v35, 16  ;;  %v11728_v10 = vpack.c.b16 %v10948_v36, %v2090_v57  ;;  %v1642_v13 = vld [vmem:[#allocation2 + $0x18] sm:$0x7] }
 0x137   : > { %v1530_v50 = vmax.f32 %v1452_v45, %v1482_v47  ;;  %v1287_v60 = vsel %vm1262_vm1, %v1284_v58, %v1286_v25  ;;  %v1248_v8 = vmax.f32 %v11628_v55, %v1188_v40  ;;  %v1189_v18 = vrot.slane %v11703_v27, 7 }
 0x138   : > { %v1072_v54 = vpop.f32.mrf.mxu2  ;;  %v908_v39 = vpop.f32.mrf.mxu0  ;;  %v1348_v17 = vmax.f32 %v1247_v62, %v1287_v60  ;;  %v2055_v4 = vshrl.u32 %v11719_v41, 16  ;;  %v11742_v24 = vrot.slane %v1985_v0, 1  ;;  %v2058_v28 = vshll.u32 %v11719_v41, 16 }
 0x139   : > { %v1624_v23 = vrot.slane %v1530_v50, 2  ;;  %v1073_v16 = vadd.f32 %v1072_v54, %v990_v48  ;;  %v991_v6 = vpop.f32.mrf.mxu1  ;;  %v909_v29 = vadd.f32 %v11337_v2, %v908_v39  ;;  %v11745_v36 = vrot.slane %v1988_v7, 2  ;;  %v11766_v54 = vld [vmem:[%s15545_s2] ss:$0 sm:$0xff] }
 0x13a   : > { %v2110_v38 = vshrl.u32 %v11728_v10, 16  ;;  %v2113_v44 = vshll.u32 %v11728_v10, 16  ;;  %v1405_v46 = vrot.slane %v1348_v17, 1  ;;  %v1190_v19 = vsel %vm346_vm0, %v1187_v34, %v1189_v18 }
 0x13b   : > { %v1631_v59 = vsel %vm1463_vm3, %v1630_v43, %v1624_v23  ;;  %v11723_v61 = vmax.f32 %v1073_v16, 0.0  ;;  %v992_v22 = vadd.f32 %v991_v6, %v909_v29  ;;  %v11756_v50 = vrot.slane %v2055_v4, 2 }
 0x13c   : > { %v1632_v63 = vpack.c.bf16 %v1631_v59, %v1631_v59  ;;  %v11760_v51 = vpack.c.b16 %v10949_v14, %v2145_v11  ;;  %v11769_v53 = vrot.slane %v2058_v28, 3  ;;  %v11772_v16 = vrot.slane %v2110_v38, 3 }
 0x13d   : > { %v1288_v1 = vrot.slane %v11723_v61, 6  ;;  %v11774_v39 = vrot.slane %v2113_v44, 4  ;;  %v1249_v6 = vmax.f32 %v11662_v30, %v1190_v19 }
 0x13e   : > { %v1634_v58 = vrot.slane %v1632_v63, 5  ;;  %v2165_v59 = vshrl.u32 %v11760_v51, 16  ;;  %v1991_v63 = vor.u32 %v11745_v36, %v11742_v24  ;;  %v2168_v0 = vshll.u32 %v11760_v51, 16 }
 0x13f   : > { %v1289_v20 = vsel %vm1262_vm1, %v1286_v25, %v1288_v1  ;;  %v1483_v25 = vrot.slane %v1348_v17, 2 }
 0x140   : > { %v1635_v3 = vrot.slane %v1634_v58, 4  ;;  %1638 = vst [vmem:[#allocation2 + $0x14] sm:$0x8] %v1634_v58  ;;  %v11740_v42 = vmax.f32 %v1248_v8, %v1289_v20  ;;  %v1074_v55 = vpop.f32.mrf.mxu2  ;;  %v911_v33 = vpop.f32.mrf.mxu0  ;;  %v2116_v58 = vor.u32 %v11774_v39, %v11772_v16 }
 0x141   : > { %v1075_v9 = vadd.f32 %v1074_v55, %v992_v22  ;;  %v994_v12 = vpop.f32.mrf.mxu1  ;;  %v912_v35 = vadd.f32 %v11766_v54, %v911_v33  ;;  %v1191_v55 = vrot.slane %v11723_v61, 7  ;;  %v11803_v33 = vrot.slane %v2168_v0, 4 }
 0x142   : > { %v1643_v45 = vsel %vm11733_vm15, %v1635_v3, %v1642_v13  ;;  %v1406_v47 = vrot.slane %v11740_v42, 1  ;;  %v1484_v48 = vrot.slane %v11740_v42, 2  ;;  %v11799_v3 = vrot.slane %v2165_v59, 3  ;;  %vm12048_vm15 = vmand %vm1262_vm1, %vm1707_vm14 }
 0x143   : > { %1644 = vst [vmem:[#allocation2 + $0x18] sm:$0x7] %v1643_v45  ;;  %v11754_v49 = vmax.f32 %v1075_v9, 0.0  ;;  %v995_v29 = vadd.f32 %v994_v12, %v912_v35  ;;  %vm1746_vm14 = vsmask.f32 7950 }
 0x144   : > { %v1407_v32 = vsel %vm1385_vm2, %v1405_v46, %v1406_v47  ;;  %v1485_v57 = vsel %vm1463_vm3, %v1483_v25, %v1484_v48 }
 0x145   : > { %v1453_v34 = vmax.f32 %v1348_v17, %v1407_v32  ;;  %v1290_v23 = vrot.slane %v11754_v49, 6 }
 0x147   : > { %v1531_v40 = vmax.f32 %v1453_v34, %v1485_v57  ;;  %v1291_v43 = vsel %vm1262_vm1, %v1288_v1, %v1290_v23  ;;  %v11779_v52 = vld [vmem:[#allocation2 + $0x10] sm:$0xff]   ;;  %v2061_v1 = vor.u32 %v11769_v53, %v11756_v50 }
 0x148   : > { %15620 = vst [vmem:[#allocation9_spill] sm:$0xff] %v11779_v52  ;;  %v1350_v60 = vmax.f32 %v1249_v6, %v1291_v43  ;;  %v1077_v62 = vpop.f32.mrf.mxu2  ;;  %4182 = vmatmul.bf16.gmra.mxu3 %v11779_v52  ;;  %v913_v11 = vpop.f32.mrf.mxu0  ;;  %v15553_v13 = vunpack.c.l.b16 %v11779_v52  ;;  %v1962_v18 = vrot.slane %v11779_v52, 2  ;;  %v11794_v22 = vshll.u32 %v11779_v52, 16 }
 0x149   : > { %v1646_v30 = vrot.slane %v1531_v40, 2  ;;  %v1648_v7 = vrot.slane %v1531_v40, 3  ;;  %v996_v8 = vpop.f32.mrf.mxu1  ;;  %v914_v20 = vadd.f32 %v11766_v54, %v913_v11  ;;  %v11797_v4 = vshrl.u32 %v11779_v52, 16 }
 0x14a   : > { %v1408_v17 = vrot.slane %v1350_v60, 1  ;;  %v1486_v2 = vrot.slane %v1350_v60, 2  ;;  %v1078_v9 = vadd.f32 %v1077_v62, %v995_v29  ;;  %v1650_v12 = vrot.slane %v1531_v40, 4 }
 0x14b   : > { %v1659_v38 = vsel %vm346_vm0, %v1646_v30, %v1648_v7  ;;  %v1963_v45 = vsel %vm1463_vm3, %v1960_v31, %v1962_v18  ;;  %v1930_v19 = vrot.slane %v11797_v4, 1  ;;  %v11819_v25 = vpack.c.b16 %v15553_v13, %v10949_v14 }
 0x14c   : > { %v1409_v28 = vsel %vm1385_vm2, %v1406_v47, %v1408_v17  ;;  %v1487_v46 = vsel %vm1463_vm3, %v1484_v48, %v1486_v2  ;;  %4313 = vmatmul.bf16.gmra.mxu1 %v1963_v45  ;;  %v1931_v47 = vrot.slane %v11794_v22, 2  ;;  %v997_v35 = vadd.f32 %v996_v8, %v914_v20 }
 0x14d   : > { %v1454_v44 = vmax.f32 %v11740_v42, %v1409_v28  ;;  %v1192_v42 = vrot.slane %v11754_v49, 7  ;;  %v1870_v34 = vrot.slane %v11794_v22, 1  ;;  %v11823_v31 = vmax.f32 %v1078_v9, 0.0 }
 0x14e   : > { %v11825_v48 = vor.u32 %v1931_v47, %v1930_v19  ;;  %v11828_v6 = vshrl.u32 %v11819_v25, 16  ;;  %v11831_v57 = vshll.u32 %v11819_v25, 16  ;;  %v1660_v14 = vsel %vm1262_vm1, %v1659_v38, %v1650_v12  ;;  %v1811_v12 = vld [vmem:[#allocation2 + $0x10] sm:$0xe] }
 0x14f   : > { %v1532_v32 = vmax.f32 %v1454_v44, %v1487_v46  ;;  %v11845_v2 = vsel %vm1851_vm9, %v11606_v37, %v1870_v34  ;;  %v1193_v20 = vsel %vm346_vm0, %v1191_v55, %v1192_v42  ;;  %v1194_v44 = vrot.slane %v11823_v31, 7 }
 0x150   : > { %v1079_v23 = vpop.f32.mrf.mxu2  ;;  %v916_v60 = vpop.f32.mrf.mxu0  ;;  %v1933_v62 = vsel %vm1917_vm12, %v11639_v26, %v11825_v48  ;;  %v1995_v30 = vrot.slane %v11828_v6, 1  ;;  %v1998_v7 = vrot.slane %v11831_v57, 2  ;;  %v2062_v9 = vrot.slane %v11828_v6, 2 }
 0x151   : > { %v1653_v40 = vrot.slane %v1532_v32, 5  ;;  %v1655_v43 = vrot.slane %v1532_v32, 6  ;;  %v1080_v59 = vadd.f32 %v1079_v23, %v997_v35  ;;  %v999_v29 = vpop.f32.mrf.mxu1  ;;  %v917_v0 = vadd.f32 %v11766_v54, %v916_v60  ;;  %4279 = vmatmul.bf16.gmra.mxu0 %v1933_v62 }
 0x152   : > { %v1657_v11 = vrot.slane %v1532_v32, 7  ;;  %v11849_v28 = vor.u32 %v1998_v7, %v1995_v30  ;;  %v2063_v55 = vrot.slane %v11831_v57, 3  ;;  %v11863_v47 = vor.u32 %v11797_v4, %v1870_v34 }
 0x153   : > { %v1661_v8 = vsel %vm1557_vm4, %v1660_v14, %v1653_v40  ;;  %v11841_v17 = vmax.f32 %v1080_v59, 0.0  ;;  %v1000_v46 = vadd.f32 %v999_v29, %v917_v0  ;;  %v2280_v23 = vunpack.c.l.b16 %v1811_v12 }
 0x154   : > { %v1662_v26 = vsel %vm1559_vm5, %v1661_v8, %v1655_v43  ;;  %v2000_v37 = vsel %vm1917_vm12, %v1991_v63, %v11849_v28  ;;  %v2171_v14 = vor.u32 %v11803_v33, %v11799_v3  ;;  %v2150_v40 = vrot.slane %v11760_v51, 3 }
 0x155   : > { %v1663_v38 = vsel %vm1561_vm6, %v1662_v26, %v1657_v11  ;;  %v1293_v45 = vrot.slane %v11841_v17, 6  ;;  %4342 = vmatmul.bf16.vlgmr.msrb.gmra.mxu2 %v2000_v37  ;;  %v11869_v24 = vor.u32 %v2063_v55, %v2062_v9  ;;  %v1906_v36 = vrot.slane %v11779_v52, 1 }
 0x156   : > { %v1664_v19 = vsel %vm1463_vm3, %v1663_v38, %v1532_v32  ;;  %v1292_v32 = vrot.slane %v11823_v31, 6  ;;  %v1250_v63 = vmax.f32 %v11703_v27, %v1193_v20  ;;  %v1195_v51 = vsel %vm346_vm0, %v1192_v42, %v1194_v44  ;;  %v1676_v42 = vld [vmem:[#allocation2 + $0x1c] sm:$0xf] }
 0x157   : > { %v1665_v35 = vpack.c.bf16 %v1664_v19, %v1664_v19  ;;  %v2117_v33 = vrot.slane %v11828_v6, 3  ;;  %v11886_v27 = vsel %vm2053_vm7, %v2061_v1, %v11869_v24  ;;  %v11894_v8 = vunpack.c.h.b16 %v11779_v52 }
 0x158   : > { %v1082_v43 = vpop.f32.mrf.mxu2  ;;  %v918_v60 = vpop.f32.mrf.mxu0  ;;  %v1294_v3 = vsel %vm1262_vm1, %v1292_v32, %v1293_v45  ;;  %v2118_v20 = vrot.slane %v11831_v57, 4  ;;  %v11902_v50 = vsel %vm1385_vm2, %v1904_v56, %v1906_v36  ;;  %v2172_v53 = vrot.slane %v11797_v4, 3 }
 0x159   : > { %v1667_v34 = vshrl.u32 %v1665_v35, 16  ;;  %v1083_v59 = vadd.f32 %v1082_v43, %v1000_v46  ;;  %v1001_v29 = vpop.f32.mrf.mxu1  ;;  %v1670_v62 = vshll.u32 %v1665_v35, 16  ;;  %v919_v7 = vadd.f32 %v11766_v54, %v918_v60 }
 0x15a   : > { %v1351_v26 = vmax.f32 %v1250_v63, %v1294_v3  ;;  %v1251_v12 = vmax.f32 %v11723_v61, %v1195_v51  ;;  %v11907_v38 = vor.u32 %v2118_v20, %v2117_v33  ;;  %v2173_v46 = vrot.slane %v11794_v22, 4 }
 0x15b   : > { %v1669_v0 = vrot.slane %v1667_v34, 7  ;;  %v11878_v30 = vmax.f32 %v1083_v59, 0.0  ;;  %v2211_v19 = vrot.slane %v11831_v57, 1  ;;  %v1196_v56 = vrot.slane %v11841_v17, 7 }
 0x15c   : > { %v1002_v37 = vadd.f32 %v1001_v29, %v919_v7  ;;  %v11918_v61 = vpack.c.b16 %v11894_v8, %v2280_v23  ;;  %v11925_v22 = vsel %vm362_vm13, %v2116_v58, %v11907_v38  ;;  %v11927_v57 = vor.u32 %v2173_v46, %v2172_v53 }
 0x15d   : > { %v1672_v1 = vor.u32 %v1670_v62, %v1669_v0  ;;  %v1295_v9 = vrot.slane %v11878_v30, 6  ;;  %v1410_v32 = vrot.slane %v1351_v26, 1  ;;  %v11930_v34 = vor.u32 %v2211_v19, %v11828_v6 }
 0x15e   : > { %v15555_v59 = vrot.slane %v11779_v52, 3  ;;  %v11938_v39 = vsel %vm362_vm13, %v2171_v14, %v11927_v57  ;;  %v1197_v58 = vsel %vm346_vm0, %v1194_v44, %v1196_v56  ;;  %v1488_v62 = vrot.slane %v1351_v26, 2 }
 0x15f   : > { %v1677_v21 = vsel %vm11889_vm10, %v1672_v1, %v1676_v42  ;;  %v1296_v4 = vsel %vm1262_vm1, %v1293_v45, %v1295_v9  ;;  %v2287_v14 = vshll.u32 %v11918_v61, 16  ;;  %v1252_v7 = vmax.f32 %v11754_v49, %v1197_v58  ;;  %vm12190_vm10 = vmand %vm346_vm0, %vm347_vm8 }
 0x160   : > { %1678 = vst [vmem:[#allocation2 + $0x1c] sm:$0xf] %v1677_v21  ;;  %v11915_v55 = vmax.f32 %v1251_v12, %v1296_v4  ;;  %v1084_v35 = vpop.f32.mrf.mxu2  ;;  %v921_v45 = vpop.f32.mrf.mxu0  ;;  %v11948_v6 = vsel %vm1561_vm6, %v2150_v40, %v15555_v59  ;;  %v1198_v11 = vrot.slane %v11878_v30, 7  ;;  %vm1745_vm8 = vcmask 1043459  }
 0x161   : > { %v1085_v43 = vadd.f32 %v1084_v35, %v1002_v37  ;;  %v1004_v63 = vpop.f32.mrf.mxu1  ;;  %v922_v16 = vadd.f32 %v11766_v54, %v921_v45  ;;  %15623 = vst [vmem:[#allocation10_spill] sm:$0xff] %v11948_v6  ;;  %v2289_v4 = vrot.slane %v2287_v14, 1  ;;  %vm12212_vm11 = vmand %vm1745_vm8, %vm1746_vm14 }
 0x162   : > { %v1411_v23 = vrot.slane %v11915_v55, 1  ;;  %v1489_v60 = vrot.slane %v11915_v55, 2 }
 0x163   : > { %v11943_v29 = vmax.f32 %v1085_v43, 0.0  ;;  %v1005_v0 = vadd.f32 %v1004_v63, %v922_v16  ;;  %v1199_v43 = vsel %vm346_vm0, %v1196_v56, %v1198_v11 }
 0x164   : > { %v1412_v51 = vsel %vm1385_vm2, %v1410_v32, %v1411_v23  ;;  %v1490_v44 = vsel %vm1463_vm3, %v1488_v62, %v1489_v60  ;;  %v2285_v32 = vshrl.u32 %v11918_v61, 16 }
 0x165   : > { %v1455_v3 = vmax.f32 %v1351_v26, %v1412_v51  ;;  %v1297_v33 = vrot.slane %v11943_v29, 6  ;;  %v1200_v56 = vrot.slane %v11943_v29, 7 }
 0x166   : > { %v2290_v14 = vor.u32 %v2289_v4, %v2285_v32 }
 0x167   : > { %v1533_v42 = vmax.f32 %v1455_v3, %v1490_v44  ;;  %v1298_v40 = vsel %vm1262_vm1, %v1295_v9, %v1297_v33  ;;  %v11959_v20 = vld [vmem:[#allocation2 + $0x18] sm:$0xff]  }
 0x168   : > { %v1353_v53 = vmax.f32 %v1252_v7, %v1298_v40  ;;  %v1087_v1 = vpop.f32.mrf.mxu2  ;;  %4187 = vmatmul.bf16.gmra.mxu3 %v11959_v20  ;;  %v15554_v26 = vrot.slane %v11959_v20, 2  ;;  %v11964_v12 = vshll.u32 %v11959_v20, 16  ;;  %v923_v19 = vpop.f32.mrf.mxu0  ;;  %v11975_v16 = vshrl.u32 %v11959_v20, 16 }
 0x169   : > { %v1680_v49 = vrot.slane %v1533_v42, 1  ;;  %v1088_v46 = vadd.f32 %v1087_v1, %v1005_v0  ;;  %v1006_v21 = vpop.f32.mrf.mxu1  ;;  %v1682_v45 = vrot.slane %v1533_v42, 2  ;;  %v924_v63 = vadd.f32 %v11766_v54, %v923_v19 }
 0x16a   : > { %v1413_v37 = vrot.slane %v1353_v53, 1  ;;  %v1491_v35 = vrot.slane %v1353_v53, 2  ;;  %v1965_v9 = vsel %vm1463_vm3, %v1962_v18, %v15554_v26  ;;  %v1935_v3 = vrot.slane %v11964_v12, 2  ;;  %v10466_v18 = vld [vmem:[%s15546_s3 + $0x78] sm:$0xff]  ;;  %v10465_v53 = vld [vmem:[%s15546_s3 + $0x70] sm:$0xff] }
 0x16b   : > { %4318 = vmatmul.bf16.gmra.mxu1 %v1965_v9  ;;  %v1693_v58 = vsel %vm346_vm0, %v1533_v42, %v1680_v49  ;;  %v11979_v51 = vmax.f32 %v1088_v46, 0.0  ;;  %v1253_v7 = vmax.f32 %v11823_v31, %v1199_v43  ;;  %v11991_v40 = vunpack.c.l.b16 %v11959_v20  ;;  %4198 = vmatpush.bf16.msrb.mxu3 %v10466_v18 }
 0x16c   : > { %v1414_v62 = vsel %vm1385_vm2, %v1411_v23, %v1413_v37  ;;  %v1492_v44 = vsel %vm1463_vm3, %v1489_v60, %v1491_v35  ;;  %v1934_v23 = vrot.slane %v11975_v16, 1  ;;  %v1684_v1 = vrot.slane %v1533_v42, 3 }
 0x16d   : > { %v1456_v0 = vmax.f32 %v11915_v55, %v1414_v62  ;;  %v1694_v49 = vsel %vm1262_vm1, %v1693_v58, %v1682_v45  ;;  %v1007_v46 = vadd.f32 %v1006_v21, %v924_v63  ;;  %v1299_v31 = vrot.slane %v11979_v51, 6 }
 0x16e   : > { %v11998_v19 = vor.u32 %v1935_v3, %v1934_v23  ;;  %v12002_v4 = vpack.c.b16 %v11991_v40, %v11894_v8  ;;  %v1878_v37 = vrot.slane %v11964_v12, 1  ;;  %v1201_v35 = vsel %vm346_vm0, %v1198_v11, %v1200_v56 }
 0x16f   : > { %v1534_v55 = vmax.f32 %v1456_v0, %v1492_v44  ;;  %v1695_v45 = vsel %vm1557_vm4, %v1694_v49, %v1684_v1  ;;  %4199 = vmatpush.bf16.msrb.mxu3 %v10465_v53 }
 0x170   : > { %v1089_v60 = vpop.f32.mrf.mxu2  ;;  %v926_v43 = vpop.f32.mrf.mxu0  ;;  %v1937_v63 = vsel %vm1917_vm12, %v11825_v48, %v11998_v19  ;;  %v12017_v11 = vshrl.u32 %v12002_v4, 16  ;;  %v12020_v0 = vshll.u32 %v12002_v4, 16  ;;  %v1300_v48 = vsel %vm1262_vm1, %v1297_v33, %v1299_v31 }
 0x171   : > { %v1687_v42 = vrot.slane %v1534_v55, 4  ;;  %v1689_v9 = vrot.slane %v1534_v55, 5  ;;  %v1090_v32 = vadd.f32 %v1089_v60, %v1007_v46  ;;  %v1691_v21 = vrot.slane %v1534_v55, 6  ;;  %v1009_v62 = vpop.f32.mrf.mxu1  ;;  %4284 = vmatmul.bf16.gmra.mxu0 %v1937_v63 }
 0x172   : > { %v927_v58 = vadd.f32 %v11766_v54, %v926_v43  ;;  %v12028_v23 = vsel %vm1851_vm9, %v11863_v47, %v1878_v37  ;;  %v12031_v53 = vsel %vm1851_vm9, %v2290_v14, %v1878_v37  ;;  %v2004_v46 = vrot.slane %v12017_v11, 1 }
 0x173   : > { %v1696_v3 = vsel %vm1559_vm5, %v1695_v45, %v1687_v42  ;;  %v12014_v18 = vmax.f32 %v1090_v32, 0.0  ;;  %v1254_v60 = vmax.f32 %v11841_v17, %v1201_v35  ;;  %v2007_v33 = vrot.slane %v12020_v0, 2  ;;  %v1709_v35 = vld [vmem:[#allocation2 + $0x24] sm:$0x3] }
 0x174   : > { %v1697_v44 = vsel %vm1561_vm6, %v1696_v3, %v1689_v9  ;;  %v1010_v55 = vadd.f32 %v1009_v62, %v927_v58  ;;  %v1202_v9 = vrot.slane %v11979_v51, 7  ;;  %v2066_v32 = vrot.slane %v12017_v11, 2 }
 0x175   : > { %v1698_v1 = vsel %vm1463_vm3, %v1697_v44, %v1691_v21  ;;  %v1301_v49 = vrot.slane %v12014_v18, 6  ;;  %v2067_v14 = vrot.slane %v12020_v0, 3  ;;  %v1354_v21 = vmax.f32 %v1253_v7, %v1300_v48 }
 0x176   : > { %v1699_v42 = vpack.c.bf16 %v1698_v1, %v1698_v1  ;;  %v12044_v63 = vor.u32 %v2007_v33, %v2004_v46  ;;  %v15624_v17 = vmov 0  ;;  %v12055_v44 = vor.u32 %v11975_v16, %v1878_v37 }
 0x177   : > { %v1302_v47 = vsel %vm1262_vm1, %v1299_v31, %v1301_v49  ;;  %v15625_v17 = vsel %vm12048_vm15, 4294967295, %v15624_v17  ;;  %v12052_v3 = vor.u32 %v2067_v14, %v2066_v32  ;;  %v1203_v48 = vsel %vm346_vm0, %v1200_v56, %v1202_v9 }
 0x178   : > { %v1701_v43 = vrot.slane %v1699_v42, 6  ;;  %v12042_v45 = vmax.f32 %v1254_v60, %v1302_v47  ;;  %v1092_v58 = vpop.f32.mrf.mxu2  ;;  %15626 = vst [vmem:[#allocation11_spill] sm:$0xff] %v15625_v17  ;;  %v928_v31 = vpop.f32.mrf.mxu0  ;;  %v2009_v46 = vsel %vm1917_vm12, %v11849_v28, %v12044_v63  ;;  %v2121_v33 = vrot.slane %v12017_v11, 3 }
 0x179   : > { %v1093_v62 = vadd.f32 %v1092_v58, %v1010_v55  ;;  %v1011_v60 = vpop.f32.mrf.mxu1  ;;  %4347 = vmatmul.bf16.gmra.mxu2 %v2009_v46  ;;  %v929_v42 = vadd.f32 %v11766_v54, %v928_v31  ;;  %v12070_v37 = vsel %vm2053_vm7, %v11869_v24, %v12052_v3  ;;  %v1415_v47 = vrot.slane %v1354_v21, 1 }
 0x17a   : > { %v1702_v7 = vrot.slane %v1701_v43, 4  ;;  %1705 = vst [vmem:[#allocation2 + $0x20] sm:$0xc] %v1701_v43  ;;  %v1416_v1 = vrot.slane %v12042_v45, 1  ;;  %v2122_v32 = vrot.slane %v12020_v0, 4  ;;  %v2439_v14 = vrot.slane %v11918_v61, 1 }
 0x17b   : > { %v12064_v55 = vmax.f32 %v1093_v62, 0.0  ;;  %v1255_v43 = vmax.f32 %v11878_v30, %v1203_v48  ;;  %v12083_v24 = vrot.slane %v11959_v20, 1  ;;  %v1493_v31 = vrot.slane %v1354_v21, 2 }
 0x17c   : > { %v1710_v56 = vsel %vm12048_vm15, %v1702_v7, %v1709_v35  ;;  %v1417_v58 = vsel %vm1385_vm2, %v1415_v47, %v1416_v1  ;;  %v12080_v62 = vor.u32 %v2122_v32, %v2121_v33  ;;  %v15559_v35 = vrot.slane %v12014_v18, 7  ;;  %v10463_v32 = vld [vmem:[%s15546_s3 + $0x60] sm:$0xff] }
 0x17d   : > { %1711 = vst [vmem:[#allocation2 + $0x24] sm:$0x3] %v1710_v56  ;;  %v1303_v28 = vrot.slane %v12064_v55, 6  ;;  %v1012_v46 = vadd.f32 %v1011_v60, %v929_v42  ;;  %v10464_v56 = vld [vmem:[%s15546_s3 + $0x68] sm:$0xff]  ;;  %v1494_v61 = vrot.slane %v12042_v45, 2  ;;  %v12100_v47 = vsel %vm1385_vm2, %v1906_v36, %v12083_v24 }
 0x17e   : > { %v12094_v33 = vsel %vm362_vm13, %v11907_v38, %v12080_v62  ;;  %4200 = vmatpush.bf16.msrb.mxu3 %v10464_v56  ;;  %v2213_v36 = vrot.slane %v12020_v0, 1  ;;  %v12116_v56 = vsel %vm1385_vm2, %v2439_v14, %v12083_v24 }
 0x17f   : > { %v1304_v7 = vsel %vm1262_vm1, %v1301_v49, %v1303_v28  ;;  %v1457_v49 = vmax.f32 %v1354_v21, %v1417_v58  ;;  %v1205_v21 = vsel %vm346_vm0, %v1202_v9, %v15559_v35  ;;  %15627 = vst [vmem:[#allocation12_spill] sm:$0xff] %v12116_v56 }
 0x180   : > { %v1356_v30 = vmax.f32 %v1255_v43, %v1304_v7  ;;  %v1094_v48 = vpop.f32.mrf.mxu2  ;;  %v931_v42 = vpop.f32.mrf.mxu0  ;;  %v2176_v43 = vrot.slane %v11975_v16, 3  ;;  %v2177_v7 = vrot.slane %v11964_v12, 4  ;;  %v1495_v12 = vsel %vm1463_vm3, %v1493_v31, %v1494_v61 }
 0x181   : > { %v1095_v60 = vadd.f32 %v1094_v48, %v1012_v46  ;;  %v932_v26 = vadd.f32 %v11766_v54, %v931_v42  ;;  %v1014_v59 = vpop.f32.mrf.mxu1  ;;  %v12122_v48 = vsel %vm1851_vm9, %v11930_v34, %v2213_v36  ;;  %v1535_v0 = vmax.f32 %v1457_v49, %v1495_v12 }
 0x182   : > { %v1418_v38 = vrot.slane %v1356_v30, 1  ;;  %v1496_v13 = vrot.slane %v1356_v30, 2  ;;  %v12112_v46 = vor.u32 %v2177_v7, %v2176_v43  ;;  %4201 = vmatpush.bf16.msrb.mxu3 %v10463_v32  ;;  %v1256_v43 = vmax.f32 %v11943_v29, %v1205_v21 }
 0x183   : > { %v1131_v58 = vmax.f32 %v1095_v60, 0.0  ;;  %v1015_v9 = vadd.f32 %v1014_v59, %v932_v26  ;;  %v10462_v59 = vld [vmem:[%s15546_s3 + $0x58] sm:$0xff]  ;;  %v15558_v26 = vrot.slane %v11959_v20, 3  ;;  %v1713_v29 = vrot.slane %v1535_v0, 6 }
 0x184   : > { %v1419_v16 = vsel %vm1385_vm2, %v1416_v1, %v1418_v38  ;;  %v1497_v60 = vsel %vm1463_vm3, %v1494_v61, %v1496_v13  ;;  %v12130_v14 = vsel %vm362_vm13, %v11927_v57, %v12112_v46  ;;  %v12133_v1 = vor.u32 %v2213_v36, %v12017_v11 }
 0x185   : > { %v1458_v42 = vmax.f32 %v12042_v45, %v1419_v16  ;;  %v1305_v17 = vrot.slane %v1131_v58, 6 }
 0x186   : > { %4202 = vmatpush.bf16.msrb.mxu3 %v10462_v59  ;;  %v12155_v59 = vrot.slane %v1131_v58, 7  ;;  %v10514_v58 = vld [vmem:[%s15546_s3 + $0x1f8] sm:$0xff] }
 0x187   : > { %v1536_v34 = vmax.f32 %v1458_v42, %v1497_v60  ;;  %v1306_v31 = vsel %vm1262_vm1, %v1303_v28, %v1305_v17  ;;  %v15628_v28 = vrot.slane %v11779_v52, 3  ;;  %v1813_v42 = vld [vmem:[#allocation2 + $0x10] sm:$0xc]  ;;  %4402 = vmatpush.bf16.msra.mxu0 %v10514_v58 }
 0x188   : > { %v1357_v49 = vmax.f32 %v1256_v43, %v1306_v31  ;;  %v1097_v45 = vpop.f32.mrf.mxu2  ;;  %v933_v57 = vpop.f32.mrf.mxu0  ;;  %v1206_v43 = vrot.slane %v12064_v55, 7 }
 0x189   : > { %v1716_v61 = vrot.slane %v1536_v34, 7  ;;  %v12140_v32 = vadd.f32 %v1097_v45, %v1015_v9  ;;  %v934_v11 = vadd.f32 %v11766_v54, %v933_v57  ;;  %v1016_v36 = vpop.f32.mrf.mxu1  ;;  %v12148_v12 = vsel %vm1561_vm6, %v15628_v28, %v15558_v26 }
 0x18a   : > { %v1420_v7 = vrot.slane %v1357_v49, 1  ;;  %v1498_v21 = vrot.slane %v1357_v49, 2  ;;  %15629 = vst [vmem:[#allocation13_spill] sm:$0xff] %v12148_v12  ;;  %v1718_v31 = vrot.slane %v1536_v34, 1  ;;  %v2302_v26 = vunpack.c.l.b16 %v1813_v42 }
 0x18b   : > { %v1727_v16 = vsel %vm346_vm0, %v1713_v29, %v1716_v61  ;;  %v1132_v0 = vmax.f32 %v12140_v32, 0.0  ;;  %v1017_v45 = vadd.f32 %v1016_v36, %v934_v11  ;;  %v10522_v61 = vld [vmem:[%s15546_s3 + $0x238] sm:$0xff]  ;;  %v1720_v32 = vrot.slane %v1536_v34, 2 }
 0x18c   : > { %v1728_v9 = vsel %vm1262_vm1, %v1727_v16, %v1536_v34  ;;  %v1421_v60 = vsel %vm1385_vm2, %v1418_v38, %v1420_v7  ;;  %v1499_v57 = vsel %vm1463_vm3, %v1496_v13, %v1498_v21  ;;  %v10461_v38 = vld [vmem:[%s15546_s3 + $0x50] sm:$0xff]  ;;  %v12169_v13 = vpack.c.b16 %v11894_v8, %v2302_v26  ;;  %4436 = vmatpush.bf16.msra.mxu1 %v10522_v61  ;;  %v355_v61 = vld [vmem:[#allocation3 + $0xc] sm:$0x1] }
 0x18d   : > { %v1459_v49 = vmax.f32 %v1356_v30, %v1421_v60  ;;  %v1307_v28 = vrot.slane %v1132_v0, 6  ;;  %v1729_v29 = vsel %vm1557_vm4, %v1728_v9, %v1718_v31  ;;  %v15630_v7 = vrot.slane %v12014_v18, 7  ;;  %4203 = vmatpush.bf16.msrb.mxu3 %v10461_v38  ;;  %v10521_v34 = vld [vmem:[%s15546_s3 + $0x230] sm:$0xff]  ;;  %v10460_v9 = vld [vmem:[%s15546_s3 + $0x48] sm:$0xff] }
 0x18e   : > { %v10513_v8 = vld [vmem:[%s15546_s3 + $0x1f0] sm:$0xff]  ;;  %v1209_v26 = vsel %vm346_vm0, %v1206_v43, %v12155_v59 }
 0x18f   : > { %v1537_v35 = vmax.f32 %v1459_v49, %v1499_v57  ;;  %v1207_v21 = vsel %vm346_vm0, %v15630_v7, %v1206_v43  ;;  %v1308_v60 = vsel %vm1262_vm1, %v1305_v17, %v1307_v28  ;;  %v349_v57 = vld [vmem:[#allocation2 + $0x3c] sm:$0x1]  ;;  %v356_v17 = vsel %vm12190_vm10, 0, %v355_v61  ;;  %4403 = vmatpush.bf16.msra.mxu0 %v10513_v8 }
 0x190   : > { %v1099_v30 = vpop.f32.mrf.mxu2  ;;  %v936_v42 = vpop.f32.mrf.mxu0  ;;  %v350_v43 = vsel %vm12190_vm10, 0, %v349_v57  ;;  %4437 = vmatpush.bf16.msra.mxu1 %v10521_v34  ;;  %357 = vst [vmem:[#allocation3 + $0xc] sm:$0x1] %v356_v17 }
 0x191   : > { %v1723_v11 = vrot.slane %v1537_v35, 3  ;;  %v1725_v36 = vrot.slane %v1537_v35, 4  ;;  %v1100_v16 = vadd.f32 %v1099_v30, %v1017_v45  ;;  %v1730_v35 = vsel %vm1559_vm5, %v1729_v29, %v1720_v32  ;;  %v1019_v49 = vpop.f32.mrf.mxu1  ;;  %351 = vst [vmem:[#allocation2 + $0x3c] sm:$0x1] %v350_v43  ;;  %4204 = vmatpush.bf16.msrb.mxu3 %v10460_v9 }
 0x192   : > { %v937_v31 = vadd.f32 %v11766_v54, %v936_v42  ;;  %v15631_v45 = vmov 0  ;;  %v1257_v29 = vmax.f32 %v11979_v51, %v1207_v21  ;;  %v1210_v42 = vrot.slane %v1132_v0, 7 }
 0x193   : > { %v15632_v45 = vsel %vm12190_vm10, 4294967295, %v15631_v45  ;;  %v1731_v38 = vsel %vm1561_vm6, %v1730_v35, %v1723_v11  ;;  %v1133_v30 = vmax.f32 %v1100_v16, 0.0  ;;  %v10520_v11 = vld [vmem:[%s15546_s3 + $0x228] sm:$0xff]  ;;  %v10459_v16 = vld [vmem:[%s15546_s3 + $0x40] sm:$0xff]  ;;  %v2306_v9 = vrot.slane %v12169_v13, 1 }
 0x194   : > { %15633 = vst [vmem:[#allocation14_spill] sm:$0xff] %v15632_v45  ;;  %v1732_v54 = vsel %vm1463_vm3, %v1731_v38, %v1725_v36  ;;  %v1020_v7 = vadd.f32 %v1019_v49, %v937_v31  ;;  %v1258_v36 = vmax.f32 %v12014_v18, %v1209_v26  ;;  %v1358_v51 = vmax.f32 %v1257_v29, %v1308_v60  ;;  %v1748_v49 = vld [vmem:[#allocation2 + $0x24] sm:$0x8]  ;;  %v10512_v18 = vld [vmem:[%s15546_s3 + $0x1e8] sm:$0xff]  ;;  %v10518_v31 = vld [vmem:[%s15546_s3 + $0x218] sm:$0xff] }
 0x195   : > { %v1733_v32 = vpack.c.bf16 %v1732_v54, %v1732_v54  ;;  %v1309_v58 = vrot.slane %v1133_v30, 6  ;;  %4438 = vmatpush.bf16.msra.mxu1 %v10520_v11  ;;  %4205 = vmatpush.bf16.msrb.mxu3 %v10459_v16  ;;  %v10519_v26 = vld [vmem:[%s15546_s3 + $0x220] sm:$0xff]  ;;  %v12226_v38 = vsel %vm1385_vm2, %v2306_v9, %v12083_v24 }
 0x196   : > { %15636 = vst [vmem:[#allocation15_spill] sm:$0xff] %v12226_v38  ;;  %v1422_v30 = vrot.slane %v1358_v51, 1  ;;  %4404 = vmatpush.bf16.msra.mxu0 %v10512_v18  ;;  %v10511_v16 = vld [vmem:[%s15546_s3 + $0x1e0] sm:$0xff] }
 0x197   : > { %v1735_v21 = vshll.u32 %v1733_v32, 16  ;;  %v1738_v35 = vshrl.u32 %v1733_v32, 16  ;;  %v1310_v34 = vsel %vm1262_vm1, %v1307_v28, %v1309_v58  ;;  %v1792_v18 = vld [vmem:[#allocation2 + $0x24] sm:$0x1] }
 0x198   : > { %v12216_v57 = vmax.f32 %v1258_v36, %v1310_v34  ;;  %v1102_v61 = vpop.f32.mrf.mxu2  ;;  %v938_v60 = vpop.f32.mrf.mxu0  ;;  %v1500_v36 = vrot.slane %v1358_v51, 2 }
 0x199   : > { %v1737_v0 = vrot.slane %v1735_v21, 5  ;;  %v1740_v8 = vrot.slane %v1738_v35, 4  ;;  %v1103_v28 = vadd.f32 %v1102_v61, %v1020_v7  ;;  %v1021_v54 = vpop.f32.mrf.mxu1  ;;  %v1211_v7 = vsel %vm346_vm0, %v12155_v59, %v1210_v42  ;;  %4439 = vmatpush.bf16.msra.mxu1 %v10519_v26  ;;  %v1794_v26 = vld [vmem:[#allocation2 + $0x24] sm:$0x3] }
 0x19a   : > { %v1423_v43 = vrot.slane %v12216_v57, 1  ;;  %v1501_v17 = vrot.slane %v12216_v57, 2  ;;  %4405 = vmatpush.bf16.msra.mxu0 %v10511_v16  ;;  %v10957_v54 = vunpack.c.h.b16 %v11959_v20 }
 0x19b   : > { %v1741_v29 = vor.u32 %v1740_v8, %v1737_v0  ;;  %v1749_v32 = vsel %vm12212_vm11, %v1737_v0, %v1748_v49  ;;  %v1134_v11 = vmax.f32 %v1103_v28, 0.0  ;;  %v1259_v49 = vmax.f32 %v12064_v55, %v1211_v7  ;;  %v1796_v28 = vld [vmem:[#allocation2 + $0x24] sm:$0x7]  ;;  %v10517_v55 = vld [vmem:[%s15546_s3 + $0x210] sm:$0xff] }
 0x19c   : > { %1750 = vst [vmem:[#allocation2 + $0x24] sm:$0x8] %v1749_v32  ;;  %v1424_v21 = vsel %vm1385_vm2, %v1422_v30, %v1423_v43  ;;  %v1502_v59 = vsel %vm1463_vm3, %v1500_v36, %v1501_v17  ;;  %v1840_v32 = vunpack.c.l.b16 %v1792_v18  ;;  %v1955_v36 = vunpack.c.l.b16 %v1796_v28 }
 0x19d   : > { %v1742_v35 = vrot.slane %v1741_v29, 4  ;;  %v1460_v34 = vmax.f32 %v1358_v51, %v1424_v21  ;;  %v1311_v9 = vrot.slane %v1134_v11, 6  ;;  %v10510_v51 = vld [vmem:[%s15546_s3 + $0x1d8] sm:$0xff]  ;;  %4440 = vmatpush.bf16.msra.mxu1 %v10518_v31  ;;  %v1899_v21 = vunpack.c.l.b16 %v1794_v26 }
 0x19e   : > { %4406 = vmatpush.bf16.msra.mxu0 %v10510_v51  ;;  %vm6439_vm11 = vcmask 1046533  }
 0x19f   : > { %1751 = vst [vmem:[#allocation2 + $0x28] sm:$0x7] %v1742_v35  ;;  %v1538_v42 = vmax.f32 %v1460_v34, %v1502_v59  ;;  %v1312_v61 = vsel %vm1262_vm1, %v1309_v58, %v1311_v9  ;;  %v10509_v58 = vld [vmem:[%s15546_s3 + $0x1d0] sm:$0xff] }
 0x1a0   : > { %v1360_v0 = vmax.f32 %v1259_v49, %v1312_v61  ;;  %v1104_v8 = vpop.f32.mrf.mxu2  ;;  %v10516_v49 = vld [vmem:[%s15546_s3 + $0x208] sm:$0xff] }
 0x1a1   : > { %v1753_v7 = vrot.slane %v1538_v42, 4  ;;  %v1755_v11 = vrot.slane %v1538_v42, 5  ;;  %4441 = vmatpush.bf16.msra.mxu1 %v10517_v55 }
 0x1a2   : > { %v1425_v60 = vrot.slane %v1360_v0, 1  ;;  %v1503_v30 = vrot.slane %v1360_v0, 2  ;;  %4407 = vmatpush.bf16.msra.mxu0 %v10509_v58 }
 0x1a3   : > { %v12254_v29 = vld [vmem:[#allocation2 + $0x20] sm:$0xff]  }
 0x1a4   : > { %v1839_v16 = vunpack.c.l.b16 %v12254_v29  ;;  %v1426_v35 = vsel %vm1385_vm2, %v1423_v43, %v1425_v60  ;;  %v1462_v9 = vmax.f32 %v1360_v0, %v1425_v60  ;;  %v1504_v31 = vsel %vm1463_vm3, %v1501_v17, %v1503_v30  ;;  %v10508_v60 = vld [vmem:[%s15546_s3 + $0x1c8] sm:$0xff] }
 0x1a5   : > { %v1461_v34 = vmax.f32 %v12216_v57, %v1426_v35  ;;  %v1767_v57 = vsel %vm346_vm0, %v1753_v7, %v1755_v11  ;;  %v12273_v17 = vunpack.c.h.b16 %v12254_v29  ;;  %4442 = vmatpush.bf16.msra.mxu1 %v10516_v49  ;;  %v10515_v11 = vld [vmem:[%s15546_s3 + $0x200] sm:$0xff] }
 0x1a6   : > { %v12263_v59 = vpack.c.b16 %v1840_v32, %v1839_v16  ;;  %v12265_v61 = vpack.c.b16 %v1839_v16, %v10957_v54  ;;  %v12267_v42 = vpack.c.b16 %v1955_v36, %v1839_v16  ;;  %v12269_v18 = vpack.c.b16 %v1899_v21, %v1839_v16  ;;  %v1799_v43 = vld [vmem:[#allocation2 + $0x28] sm:$0x3]  ;;  %v10530_v16 = vld [vmem:[%s15546_s3 + $0x278] sm:$0xff]  ;;  %4408 = vmatpush.bf16.msra.mxu0 %v10508_v60 }
 0x1a7   : > { %v1539_v0 = vmax.f32 %v1461_v34, %v1504_v31  ;;  %v1978_v51 = vunpack.c.l.b16 %v1799_v43  ;;  %v1540_v54 = vmax.f32 %v1462_v9, %v1503_v30  ;;  %v15638_v36 = vrot.slane %v11959_v20, 2  ;;  %v1801_v9 = vld [vmem:[#allocation2 + $0x28] sm:$0x7]  ;;  %v10507_v43 = vld [vmem:[%s15546_s3 + $0x1c0] sm:$0xff]  ;;  %4470 = vmatpush.bf16.msra.mxu2 %v10530_v16 }
 0x1a8   : > { %15637 = vst [vmem:[#allocation16_spill] sm:$0xff] %v12269_v18  ;;  %4192 = vmatmul.bf16.gmra.mxu3 %v12263_v59  ;;  %v15562_v8 = vrot.slane %v12267_v42, 2  ;;  %v12278_v28 = vshrl.u32 %v12265_v61, 16  ;;  %v12281_v26 = vshll.u32 %v12265_v61, 16  ;;  %v1939_v55 = vshrl.u32 %v12269_v18, 16 }
 0x1a9   : > { %v1942_v58 = vshll.u32 %v12269_v18, 16  ;;  %v1758_v32 = vrot.slane %v1539_v0, 6  ;;  %v1760_v7 = vrot.slane %v1539_v0, 7  ;;  %v1983_v38 = vpack.c.b16 %v1978_v51, %v12273_v17  ;;  %4443 = vmatpush.bf16.msra.mxu1 %v10515_v11 }
 0x1aa   : > { %v1967_v21 = vsel %vm1463_vm3, %v15638_v36, %v15562_v8  ;;  %v2013_v35 = vrot.slane %v12278_v28, 1  ;;  %v2016_v30 = vrot.slane %v12281_v26, 2  ;;  %v1941_v34 = vrot.slane %v1939_v55, 1  ;;  %4409 = vmatpush.bf16.msra.mxu0 %v10507_v43 }
 0x1ab   : > { %4323 = vmatmul.bf16.gmra.mxu1 %v1967_v21  ;;  %v1944_v31 = vrot.slane %v1942_v58, 2  ;;  %v1768_v49 = vsel %vm1262_vm1, %v1767_v57, %v1758_v32  ;;  %v1762_v36 = vrot.slane %v1539_v0, 1  ;;  %v1765_v55 = vrot.slane %v1540_v54, 2  ;;  %v10529_v57 = vld [vmem:[%s15546_s3 + $0x270] sm:$0xff] }
 0x1ac   : > { %v12306_v52 = vor.u32 %v2016_v30, %v2013_v35  ;;  %v1769_v8 = vsel %vm1557_vm4, %v1768_v49, %v1760_v7  ;;  %v2036_v58 = vunpack.c.l.b16 %v1801_v9  ;;  %v2023_v7 = vshll.u32 %v1983_v38, 16  ;;  %4471 = vmatpush.bf16.msra.mxu2 %v10529_v57 }
 0x1ad   : > { %v12309_v12 = vor.u32 %v1944_v31, %v1941_v34  ;;  %v1770_v60 = vsel %vm1559_vm5, %v1769_v8, %v1539_v0  ;;  %v2020_v8 = vshrl.u32 %v1983_v38, 16  ;;  %v2070_v16 = vrot.slane %v12278_v28, 2  ;;  %v1780_v34 = vld [vmem:[#allocation2 + $0x30] sm:$0x1] }
 0x1ae   : > { %v2018_v51 = vsel %vm1917_vm12, %v12044_v63, %v12306_v52  ;;  %v1771_v32 = vsel %vm1561_vm6, %v1770_v60, %v1762_v36  ;;  %v2071_v21 = vrot.slane %v12281_v26, 3  ;;  %v12326_v63 = vpack.c.b16 %v2036_v58, %v12273_v17  ;;  %v10528_v36 = vld [vmem:[%s15546_s3 + $0x268] sm:$0xff] }
 0x1af   : > { %4352 = vmatmul.bf16.gmra.mxu2 %v2018_v51  ;;  %v1946_v54 = vsel %vm1917_vm12, %v11998_v19, %v12309_v12  ;;  %v1772_v0 = vsel %vm1463_vm3, %v1771_v32, %v1765_v55  ;;  %v2125_v35 = vrot.slane %v12278_v28, 3  ;;  %v2126_v31 = vrot.slane %v12281_v26, 4 }
 0x1b0   : > { %4289 = vmatmul.bf16.gmra.mxu0 %v1946_v54  ;;  %v1773_v11 = vpack.c.bf16 %v1772_v0, %v1772_v0  ;;  %15639 = vst [vmem:[#allocation17_spill] sm:$0xff] %v12326_v63  ;;  %v12329_v9 = vor.u32 %v2071_v21, %v2070_v16  ;;  %v15563_v38 = vrot.slane %v12269_v18, 1  ;;  %v2022_v49 = vrot.slane %v2020_v8, 1  ;;  %4472 = vmatpush.bf16.msra.mxu2 %v10528_v36  ;;  %v10527_v16 = vld [vmem:[%s15546_s3 + $0x260] sm:$0xff] }
 0x1b1   : > { %v2025_v43 = vrot.slane %v2023_v7, 2  ;;  %v2075_v55 = vshrl.u32 %v12326_v63, 16  ;;  %v2078_v60 = vshll.u32 %v12326_v63, 16  ;;  %v12343_v51 = vor.u32 %v2126_v31, %v2125_v35 }
 0x1b2   : > { %v1775_v30 = vrot.slane %v1773_v11, 7  ;;  %v12341_v58 = vsel %vm2053_vm7, %v12052_v3, %v12329_v9  ;;  %v12349_v32 = vsel %vm1385_vm2, %v12083_v24, %v15563_v38  ;;  %v2216_v8 = vrot.slane %v12281_v26, 1  ;;  %v1815_v11 = vld [vmem:[#allocation2 + $0x14] sm:$0xc] }
 0x1b3   : > { %v2077_v54 = vrot.slane %v2075_v55, 2  ;;  %v2080_v0 = vrot.slane %v2078_v60, 3  ;;  %v12357_v3 = vsel %vm362_vm13, %v12080_v62, %v12343_v51  ;;  %v12365_v35 = vshrl.u32 %v12254_v29, 16 }
 0x1b4   : > { %v1776_v57 = vrot.slane %v1775_v30, 4  ;;  %1779 = vst [vmem:[#allocation2 + $0x2c] sm:$0xe] %v1775_v30  ;;  %v12368_v26 = vshll.u32 %v12254_v29, 16  ;;  %v12372_v30 = vsel %vm1851_vm9, %v12133_v1, %v2216_v8  ;;  %v12375_v62 = vor.u32 %v2025_v43, %v2022_v49  ;;  %4473 = vmatpush.bf16.msra.mxu2 %v10527_v16  ;;  %v10526_v43 = vld [vmem:[%s15546_s3 + $0x258] sm:$0xff] }
 0x1b5   : > { %v12362_v21 = vor.u32 %v2080_v0, %v2077_v54  ;;  %15640 = vst [vmem:[#allocation18_spill] sm:$0xff] %v12372_v30  ;;  %v2308_v31 = vrot.slane %v12254_v29, 1  ;;  %v2183_v55 = vrot.slane %v12365_v35, 3  ;;  %v2343_v49 = vunpack.c.l.b16 %v1815_v11 }
 0x1b6   : > { %v1781_v7 = vsel %vm12190_vm10, %v1776_v57, %v1780_v34  ;;  %v2218_v34 = vor.u32 %v2216_v8, %v12278_v28  ;;  %v2186_v60 = vrot.slane %v12368_v26, 4  ;;  %v2260_v1 = vrot.slane %v12368_v26, 1 }
 0x1b7   : > { %1782 = vst [vmem:[#allocation2 + $0x30] sm:$0x1] %v1781_v7  ;;  %v12382_v36 = vsel %vm2053_vm7, %v12329_v9, %v12362_v21  ;;  %v15642_v28 = vrot.slane %v12267_v42, 2  ;;  %v1812_v7 = vld [vmem:[#allocation2 + $0x34] sm:$0x3]  ;;  %v12423_v38 = vpack.c.b16 %v11991_v40, %v2343_v49  ;;  %vm5173_vm4 = vcmask 1042433  }
 0x1b8   : > { %4206 = vmatmul.bf16.vlgmr.msrb.gmra.mxu3 %v11590_v15  ;;  %v12389_v15 = vsel %vm1385_vm2, %v12083_v24, %v2308_v31  ;;  %v2187_v54 = vor.u32 %v2186_v60, %v2183_v55  ;;  %v12400_v0 = vsel %vm1851_vm9, %v12055_v44, %v2260_v1  ;;  %v2262_v8 = vor.u32 %v2260_v1, %v12365_v35 }
 0x1b9   : > { %15641 = vst [vmem:[#allocation19_spill] sm:$0xff] %v12389_v15  ;;  %v2315_v24 = vshrl.u32 %v12169_v13, 16  ;;  %v2027_v55 = vsel %vm1917_vm12, %v12306_v52, %v12375_v62  ;;  %4474 = vmatpush.bf16.msra.mxu2 %v10526_v43  ;;  %v2281_v43 = vunpack.c.l.b16 %v1812_v7  ;;  %v2442_v18 = vrot.slane %v12400_v0, 1 }
 0x1ba   : > { %15644 = vst [vmem:[#allocation21_spill] sm:$0xff] %v12400_v0  ;;  %v12417_v60 = vsel %vm362_vm13, %v12112_v46, %v2187_v54  ;;  %v10525_v46 = vld [vmem:[%s15546_s3 + $0x250] sm:$0xff]  ;;  %vm15850_vm5 = vsmask.f32 7942 }
 0x1bb   : > { %4328 = vmatmul.bf16.gmra.mxu1 %v15642_v28  ;;  %v12396_v57 = vld [vmem:[#allocation2 + $0x28] sm:$0xff]   ;;  %v2318_v28 = vshll.u32 %v12169_v13, 16  ;;  %15645 = vst [vmem:[#allocation22_spill] sm:$0xff] %v12417_v60 }
 0x1bc   : > { %15643 = vst [vmem:[#allocation20_spill] sm:$0xff] %v12396_v57  ;;  %v10960_v11 = vunpack.c.l.b16 %v12396_v57  ;;  %v12406_v42 = vshrl.u32 %v12396_v57, 16  ;;  %v12409_v16 = vshll.u32 %v12396_v57, 16  ;;  %v12420_v1 = vrot.slane %v12396_v57, 1 }
 0x1bd   : > { %15646 = vst [vmem:[#allocation23_spill] sm:$0xff] %v12423_v38  ;;  %v12434_v56 = vunpack.c.h.b16 %v12396_v57  ;;  %4475 = vmatpush.bf16.msra.mxu2 %v10525_v46 }
 0x1be   : > { %v12426_v45 = vpack.c.b16 %v10960_v11, %v12273_v17  ;;  %v2192_v13 = vrot.slane %v12406_v42, 3  ;;  %v2195_v6 = vrot.slane %v12409_v16, 4  ;;  %v1806_v63 = vld [vmem:[#allocation2 + $0x30] sm:$0x1]  ;;  %v12438_v17 = vsel %vm1385_vm2, %v2308_v31, %v12420_v1 }
 0x1bf   : > { %v1809_v15 = vld [vmem:[#allocation2 + $0x30] sm:$0xf]  ;;  %4357 = vmatmul.bf16.gmra.mxu2 %v2027_v55  ;;  %v2204_v49 = vunpack.c.l.b16 %v1806_v63  ;;  %15648 = vst [vmem:[#allocation25_spill] sm:$0xff] %v12438_v17  ;;  %v2263_v11 = vrot.slane %v12409_v16, 1  ;;  %v2441_v17 = vrot.slane %v12031_v53, 1 }
 0x1c0   : > { %15647 = vst [vmem:[#allocation24_spill] sm:$0xff] %v12426_v45  ;;  %4294 = vmatmul.bf16.gmra.mxu0 %v12309_v12  ;;  %v12443_v41 = vshll.u32 %v12426_v45, 16  ;;  %v12445_v7 = vor.u32 %v2195_v6, %v2192_v13  ;;  %v12447_v55 = vunpack.c.l.b16 %v1809_v15  ;;  %v2356_v6 = vshrl.u32 %v12423_v38, 16  ;;  %v10524_v13 = vld [vmem:[%s15546_s3 + $0x248] sm:$0xff] }
 0x1c1   : > { %v12451_v63 = vpack.c.b16 %v2204_v49, %v12434_v56  ;;  %v12454_v31 = vsel %vm1851_vm9, %v2262_v8, %v2263_v11  ;;  %v2359_v15 = vshll.u32 %v12423_v38, 16  ;;  %v12467_v46 = vshrl.u32 %v12426_v45, 16  ;;  %4476 = vmatpush.bf16.msra.mxu2 %v10524_v13 }
 0x1c2   : > { %15649 = vst [vmem:[#allocation26_spill] sm:$0xff] %v12445_v7  ;;  %v12459_v12 = vsel %vm362_vm13, %v2187_v54, %v12445_v7  ;;  %v2219_v8 = vrot.slane %v12443_v41, 1  ;;  %v2465_v53 = vrot.slane %v12454_v31, 1  ;;  %v12473_v54 = vsel %vm1385_vm2, %v2441_v17, %v2442_v18 }
 0x1c3   : > { %15650 = vst [vmem:[#allocation27_spill] sm:$0xff] %v12451_v63  ;;  %v2223_v49 = vshll.u32 %v12451_v63, 16  ;;  %v12476_v0 = vpack.c.b16 %v2281_v43, %v12447_v55  ;;  %v2317_v38 = vrot.slane %v2315_v24, 1  ;;  %v2320_v7 = vrot.slane %v2318_v28, 2  ;;  %v10523_v24 = vld [vmem:[%s15546_s3 + $0x240] sm:$0xff] }
 0x1c4   : > { %15651 = vst [vmem:[#allocation28_spill] sm:$0xff] %v12454_v31  ;;  %v2221_v60 = vor.u32 %v2219_v8, %v12467_v46  ;;  %v12485_v63 = vor.u32 %v2263_v11, %v12406_v42  ;;  %v2096_v31 = vrot.slane %v11819_v25, 3  ;;  %v12489_v17 = vsel %vm1385_vm2, %v2442_v18, %v2465_v53  ;;  %v10474_v18 = vld [vmem:[%s15546_s3 + $0xb8] sm:$0xff] }
 0x1c5   : > { %15652 = vst [vmem:[#allocation29_spill] sm:$0xff] %v12459_v12  ;;  %v12479_v12 = vsel %vm1851_vm9, %v2218_v34, %v2219_v8  ;;  %v12482_v30 = vrot.slane %v2223_v49, 1  ;;  %v2358_v43 = vrot.slane %v2356_v6, 1  ;;  %v2293_v28 = vshll.u32 %v12476_v0, 16  ;;  %4477 = vmatpush.bf16.msra.mxu2 %v10523_v24  ;;  %v1818_v49 = vld [vmem:[#allocation2 + $0x14] sm:$0x8]  ;;  %4232 = vmatpush.bf16.msra.mxu3 %v10474_v18 }
 0x1c6   : > { %15653 = vst [vmem:[#allocation30_spill] sm:$0xff] %v12473_v54  ;;  %v2361_v54 = vrot.slane %v2359_v15, 2  ;;  %v2095_v11 = vrot.slane %v11728_v10, 3  ;;  %v2321_v6 = vor.u32 %v2320_v7, %v2317_v38  ;;  %v2323_v13 = vrot.slane %v12365_v35, 1  ;;  %v10473_v10 = vld [vmem:[%s15546_s3 + $0xb0] sm:$0xff] }
 0x1c7   : > { %15654 = vst [vmem:[#allocation31_spill] sm:$0xff] %v12476_v0  ;;  %v12496_v34 = vsel %vm1851_vm9, %v2221_v60, %v12482_v30  ;;  %v12504_v15 = vrot.slane %v2293_v28, 1  ;;  %v2324_v8 = vrot.slane %v12368_v26, 2  ;;  %v2155_v60 = vrot.slane %v12254_v29, 3 }
 0x1c8   : > { %4211 = vmatmul.bf16.gmra.mxu3 %v11845_v2  ;;  %v2097_v0 = vsel %vm1561_vm6, %v2095_v11, %v2096_v31  ;;  %v2362_v2 = vor.u32 %v2361_v54, %v2358_v43  ;;  %v2322_v35 = vsel %vm1917_vm12, %v2321_v6, %v11998_v19  ;;  %v15657_v7 = vrot.slane %v11959_v20, 3 }
 0x1c9   : > { %15655 = vst [vmem:[#allocation32_spill] sm:$0xff] %v12504_v15  ;;  %v12516_v38 = vsel %vm1851_vm9, %v12485_v63, %v12504_v15  ;;  %v2325_v26 = vor.u32 %v2324_v8, %v2323_v13  ;;  %v2388_v43 = vunpack.c.l.b16 %v1818_v49  ;;  %4233 = vmatpush.bf16.msra.mxu3 %v10473_v10  ;;  %v2447_v18 = vrot.slane %v2322_v35, 1 }
 0x1ca   : > { %15656 = vst [vmem:[#allocation33_spill] sm:$0xff] %v12516_v38  ;;  %v12523_v24 = vsel %vm1561_vm6, %v15657_v7, %v2155_v60  ;;  %v12528_v54 = vsel %vm1917_vm12, %v2362_v2, %v12306_v52  ;;  %v15581_v49 = vrot.slane %v12254_v29, 7 }
 0x1cb   : > { %4444 = vmatmul.bf16.vlgmr.msra.gmra.mxu1 %v2097_v0  ;;  %15658 = vst [vmem:[#allocation34_spill] sm:$0xff] %v12523_v24  ;;  %v15579_v0 = vrot.slane %v12516_v38, 1  ;;  %v12532_v28 = vsel %vm1917_vm12, %v11998_v19, %v2325_v26  ;;  %v12541_v13 = vpack.c.b16 %v11991_v40, %v2388_v43  ;;  %v10472_v19 = vld [vmem:[%s15546_s3 + $0xa8] sm:$0xff]  ;;  %v10471_v40 = vld [vmem:[%s15546_s3 + $0xa0] sm:$0xff] }
 0x1cc   : > { %v15584_v6 = vrot.slane %v12532_v28, 1 }
 0x1cd   : > { %v12537_v11 = vsel %vm1385_vm2, %v2465_v53, %v15579_v0  ;;  %15659 = vst [vmem:[#allocation35_spill] sm:$0xff] %v12541_v13  ;;  %v2430_v53 = vrot.slane %v11959_v20, 7  ;;  %4234 = vmatpush.bf16.msra.mxu3 %v10472_v19  ;;  %v15583_v20 = vrot.slane %v12002_v4, 3  ;;  %v10470_v19 = vld [vmem:[%s15546_s3 + $0x98] sm:$0xff] }
 0x1ce   : > { %v12551_v8 = vsel %vm1385_vm2, %v2447_v18, %v15584_v6 }
 0x1cf   : > { %4362 = vmatmul.bf16.gmra.mxu2 %v12375_v62  ;;  %15660 = vst [vmem:[#allocation36_spill] sm:$0xff] %v12551_v8  ;;  %v2404_v62 = vshll.u32 %v12541_v13, 16  ;;  %v12563_v2 = vsel %vm346_vm0, %v2430_v53, %v15581_v49  ;;  %v2462_v10 = vrot.slane %v2430_v53, 1  ;;  %v2099_v53 = vsel %vm1561_vm6, %v2096_v31, %v15583_v20  ;;  %v10545_v20 = vld [vmem:[%s15546_s3 + $0x2f0] sm:$0xff] }
 0x1d0   : > { %4410 = vmatmul.bf16.vlgmr.msra.gmra.mxu0 %v11886_v27  ;;  %v2401_v27 = vshrl.u32 %v12541_v13, 16  ;;  %v15580_v35 = vrot.slane %v12563_v2, 1  ;;  %v1884_v49 = vshll.u32 %v12263_v59, 16 }
 0x1d1   : > { %4235 = vmatpush.bf16.msra.mxu3 %v10471_v40  ;;  %v2406_v18 = vrot.slane %v2404_v62, 3  ;;  %v15582_v40 = vrot.slane %v12396_v57, 3  ;;  %v10469_v62 = vld [vmem:[%s15546_s3 + $0x90] sm:$0xff] }
 0x1d2   : > { %v12570_v7 = vsel %vm1385_vm2, %v2462_v10, %v15580_v35  ;;  %v2403_v43 = vrot.slane %v2401_v27, 2  ;;  %v10554_v27 = vld [vmem:[%s15546_s3 + $0x338] sm:$0xff]  ;;  %v2327_v10 = vrot.slane %v12406_v42, 1  ;;  %v2328_v35 = vrot.slane %v12409_v16, 2 }
 0x1d3   : > { %15661 = vst [vmem:[#allocation37_spill] sm:$0xff] %v12570_v7  ;;  %v12591_v31 = vsel %vm1561_vm6, %v2155_v60, %v15582_v40  ;;  %4572 = vmatpush.bf16.msrb.mxu1 %v10554_v27  ;;  %v12601_v42 = vpack.c.b16 %v12447_v55, %v12434_v56  ;;  %v10546_v16 = vld [vmem:[%s15546_s3 + $0x2f8] sm:$0xff]  ;;  %v10553_v60 = vld [vmem:[%s15546_s3 + $0x330] sm:$0xff]  ;;  %v2364_v27 = vrot.slane %v12467_v46, 1  ;;  %v1886_v7 = vrot.slane %v1884_v49, 1 }
 0x1d4   : > { %v2407_v0 = vor.u32 %v2406_v18, %v2403_v43  ;;  %15662 = vst [vmem:[#allocation38_spill] sm:$0xff] %v12591_v31  ;;  %v1814_v18 = vld [vmem:[#allocation2 + $0x34] sm:$0x7]  ;;  %v1817_v40 = vld [vmem:[#allocation2 + $0x38] sm:$0x7]  ;;  %4538 = vmatpush.bf16.msrb.mxu0 %v10546_v16  ;;  %v10467_v16 = vld [vmem:[%s15546_s3 + $0x80] sm:$0xff] }
 0x1d5   : > { %4236 = vmatpush.bf16.msra.mxu3 %v10470_v19  ;;  %v2329_v19 = vor.u32 %v2328_v35, %v2327_v10  ;;  %v15589_v31 = vshrl.u32 %v12601_v42, 16  ;;  %v2345_v38 = vunpack.c.l.b16 %v1817_v40  ;;  %v15588_v49 = vrot.slane %v12265_v61, 3 }
 0x1d6   : > { %v12595_v43 = vsel %vm2053_vm7, %v2407_v0, %v12329_v9  ;;  %v10468_v0 = vld [vmem:[%s15546_s3 + $0x88] sm:$0xff]  ;;  %v1887_v40 = vsel %vm1851_vm9, %v12055_v44, %v1886_v7 }
 0x1d7   : > { %4573 = vmatpush.bf16.msrb.mxu1 %v10553_v60  ;;  %v15663_v60 = vrot.slane %v12532_v28, 1  ;;  %v2371_v24 = vrot.slane %v15589_v31, 1  ;;  %v15668_v31 = vrot.slane %v12254_v29, 7 }
 0x1d8   : > { %4216 = vmatmul.bf16.gmra.mxu3 %v12028_v23  ;;  %4539 = vmatpush.bf16.msrb.mxu0 %v10545_v20 }
 0x1d9   : > { %4237 = vmatpush.bf16.msra.mxu3 %v10469_v62  ;;  %v12619_v62 = vpop.f32.mrf.mxu3 }
 0x1db   : > { %4449 = vmatmul.bf16.gmra.mxu1 %v2099_v53  ;;  %v2303_v53 = vunpack.c.l.b16 %v1814_v18  ;;  %v1816_v18 = vld [vmem:[#allocation2 + $0x34] sm:$0xf] }
 0x1dc   : > { %v12639_v8 = vunpack.c.l.b16 %v1816_v18 }
 0x1dd   : > { %v12615_v35 = vpack.c.b16 %v2303_v53, %v12447_v55  ;;  %4238 = vmatpush.bf16.msra.mxu3 %v10468_v0 }
 0x1de   : > { %v2428_v29 = vpack.c.b16 %v12639_v8, %v12447_v55 }
 0x1df   : > { %4478 = vmatmul.bf16.vlgmr.msra.gmra.mxu2 %v11925_v22  ;;  %v2330_v22 = vsel %vm1917_vm12, %v2325_v26, %v2329_v19  ;;  %v10552_v26 = vld [vmem:[%s15546_s3 + $0x328] sm:$0xff]  ;;  %v2332_v53 = vshrl.u32 %v12615_v35, 16  ;;  %v2335_v6 = vshll.u32 %v12615_v35, 16 }
 0x1e0   : > { %4415 = vmatmul.bf16.gmra.mxu0 %v12070_v37  ;;  %v2365_v37 = vrot.slane %v12443_v41, 2  ;;  %v2469_v10 = vrot.slane %v2330_v22, 1  ;;  %4574 = vmatpush.bf16.msrb.mxu1 %v10552_v26 }
 0x1e1   : > { %v2334_v15 = vrot.slane %v2332_v53, 1  ;;  %4239 = vmatpush.bf16.msra.mxu3 %v10467_v16 }
 0x1e2   : > { %v2366_v13 = vor.u32 %v2365_v37, %v2364_v27  ;;  %v12635_v22 = vsel %vm1385_vm2, %v15663_v60, %v2469_v10  ;;  %v2337_v27 = vrot.slane %v2335_v6, 2  ;;  %v2453_v37 = vrot.slane %v12528_v54, 1 }
 0x1e3   : > { %v15665_v6 = vshll.u32 %v12601_v42, 16  ;;  %v12660_v54 = vpack.c.b16 %v2345_v38, %v12639_v8  ;;  %v2433_v38 = vrot.slane %v12396_v57, 7 }
 0x1e4   : > { %v2367_v0 = vsel %vm1917_vm12, %v12306_v52, %v2366_v13  ;;  %v12644_v28 = vor.u32 %v2337_v27, %v2334_v15  ;;  %v10544_v52 = vld [vmem:[%s15546_s3 + $0x2e8] sm:$0xff]  ;;  %v10551_v15 = vld [vmem:[%s15546_s3 + $0x320] sm:$0xff]  ;;  %v15666_v27 = vrot.slane %v12002_v4, 3 }
 0x1e5   : > { %v2454_v60 = vrot.slane %v2367_v0, 1  ;;  %v2374_v18 = vrot.slane %v15665_v6, 2  ;;  %4540 = vmatpush.bf16.msrb.mxu0 %v10544_v52  ;;  %4575 = vmatpush.bf16.msrb.mxu1 %v10551_v15 }
 0x1e6   : > { %15664 = vst [vmem:[#allocation39_spill] sm:$0xff] %v12644_v28  ;;  %v2339_v20 = vsel %vm1917_vm12, %v2329_v19, %v12644_v28  ;;  %v15592_v26 = vrot.slane %v12644_v28, 1  ;;  %v2101_v0 = vsel %vm1561_vm6, %v15666_v27, %v15588_v49  ;;  %v1888_v19 = vshrl.u32 %v12263_v59, 16  ;;  %v1808_v27 = vld [vmem:[#allocation2 + $0x30] sm:$0x3] }
 0x1e7   : > { %v12665_v44 = vsel %vm1385_vm2, %v2453_v37, %v2454_v60  ;;  %v2485_v53 = vrot.slane %v2339_v20, 1  ;;  %v2375_v16 = vor.u32 %v2374_v18, %v2371_v24  ;;  %v10543_v37 = vld [vmem:[%s15546_s3 + $0x2e0] sm:$0xff]  ;;  %v10550_v24 = vld [vmem:[%s15546_s3 + $0x318] sm:$0xff]  ;;  %v2378_v59 = vshrl.u32 %v12660_v54, 16 }
 0x1e8   : > { %4221 = vmatmul.bf16.gmra.mxu3 %v1887_v40  ;;  %v12674_v40 = vpop.f32.mrf.mxu3  ;;  %v2381_v20 = vshll.u32 %v12660_v54, 16  ;;  %v2238_v57 = vunpack.c.l.b16 %v1808_v27  ;;  %v1819_v28 = vld [vmem:[#allocation2 + $0x38] sm:$0xf]  ;;  %v10541_v27 = vld [vmem:[%s15546_s3 + $0x2d0] sm:$0xff]  ;;  %v15675_v49 = vshll.u32 %v12601_v42, 16 }
 0x1e9   : > { %v12684_v6 = vsel %vm1385_vm2, %v2469_v10, %v2485_v53  ;;  %v12689_v18 = vsel %vm1385_vm2, %v2485_v53, %v15592_v26  ;;  %v2376_v52 = vsel %vm1917_vm12, %v2366_v13, %v2375_v16  ;;  %v2434_v10 = vsel %vm346_vm0, %v15668_v31, %v2433_v38  ;;  %4541 = vmatpush.bf16.msrb.mxu0 %v10543_v37  ;;  %v10549_v37 = vld [vmem:[%s15546_s3 + $0x310] sm:$0xff] }
 0x1ea   : > { %15667 = vst [vmem:[#allocation40_spill] sm:$0xff] %v12684_v6  ;;  %v2473_v15 = vrot.slane %v2376_v52, 1  ;;  %v1820_v6 = vld [vmem:[#allocation2 + $0x3c] sm:$0x1]  ;;  %4576 = vmatpush.bf16.msrb.mxu1 %v10550_v24  ;;  %v2380_v53 = vrot.slane %v2378_v59, 1  ;;  %v2383_v52 = vrot.slane %v2381_v20, 2  ;;  %v2389_v31 = vunpack.c.l.b16 %v1819_v28 }
 0x1eb   : > { %4454 = vmatmul.bf16.gmra.mxu1 %v2101_v0  ;;  %v1890_v0 = vor.u32 %v1888_v19, %v1886_v7  ;;  %v2479_v26 = vrot.slane %v2434_v10, 1  ;;  %v12703_v7 = vpack.c.b16 %v2238_v57, %v12434_v56  ;;  %v2427_v19 = vunpack.c.l.b16 %v1820_v6 }
 0x1ec   : > { %v12699_v13 = vsel %vm1385_vm2, %v2454_v60, %v2473_v15  ;;  %v10542_v60 = vld [vmem:[%s15546_s3 + $0x2d8] sm:$0xff]  ;;  %v12714_v24 = vor.u32 %v2383_v52, %v2380_v53  ;;  %v2410_v56 = vrot.slane %v12443_v41, 3  ;;  %v15671_v57 = vrot.slane %v12563_v2, 1  ;;  %v10548_v2 = vld [vmem:[%s15546_s3 + $0x308] sm:$0xff] }
 0x1ed   : > { %15669 = vst [vmem:[#allocation41_spill] sm:$0xff] %v12703_v7  ;;  %v2435_v59 = vrot.slane %v2428_v29, 7  ;;  %v2391_v20 = vpack.c.b16 %v2389_v31, %v12639_v8  ;;  %4542 = vmatpush.bf16.msrb.mxu0 %v10542_v60  ;;  %v2429_v52 = vpack.c.b16 %v2427_v19, %v2389_v31  ;;  %v2312_v29 = vrot.slane %v12615_v35, 1 }
 0x1ee   : > { %15670 = vst [vmem:[#allocation42_spill] sm:$0xff] %v12714_v24  ;;  %v12721_v28 = vsel %vm1385_vm2, %v15671_v57, %v2479_v26  ;;  %4577 = vmatpush.bf16.msrb.mxu1 %v10549_v37  ;;  %v12736_v10 = vsel %vm1917_vm12, %v2375_v16, %v12714_v24  ;;  %v12739_v57 = vpop.f32.mrf.mxu1  ;;  %v15674_v60 = vshrl.u32 %v12601_v42, 16  ;;  %v2414_v6 = vrot.slane %v15675_v49, 3 }
 0x1ef   : > { %4483 = vmatmul.bf16.gmra.mxu2 %v12094_v33  ;;  %v2409_v33 = vrot.slane %v12467_v46, 2  ;;  %15672 = vst [vmem:[#allocation43_spill] sm:$0xff] %v12721_v28  ;;  %v15596_v8 = vrot.slane %v12736_v10, 1  ;;  %v15676_v28 = vrot.slane %v12703_v7, 1  ;;  %v2459_v35 = vrot.slane %v12595_v43, 1 }
 0x1f0   : > { %4420 = vmatmul.bf16.gmra.mxu0 %v12341_v58  ;;  %v12724_v58 = vrot.slane %v12426_v45, 1  ;;  %15673 = vst [vmem:[#allocation44_spill] sm:$0xff] %v12736_v10  ;;  %v2413_v37 = vrot.slane %v15674_v60, 2  ;;  %v2436_v19 = vsel %vm346_vm0, %v2433_v38, %v2435_v59  ;;  %v12765_v43 = vsel %vm1385_vm2, %v12420_v1, %v2312_v29 }
 0x1f1   : > { %v2411_v53 = vor.u32 %v2410_v56, %v2409_v33  ;;  %v2418_v33 = vshrl.u32 %v2391_v20, 16  ;;  %v12756_v56 = vpop.f32.mrf.mxu3  ;;  %v12761_v49 = vsel %vm1385_vm2, %v2473_v15, %v15596_v8  ;;  %v2495_v24 = vrot.slane %v2436_v19, 1  ;;  %4543 = vmatpush.bf16.msrb.mxu0 %v10541_v27  ;;  %15678 = vst [vmem:[#allocation46_spill] sm:$0xff] %v12765_v43  ;;  %v10540_v27 = vld [vmem:[%s15546_s3 + $0x2c8] sm:$0xff] }
 0x1f2   : > { %v12750_v16 = vsel %vm1385_vm2, %v12724_v58, %v15676_v28  ;;  %v2415_v7 = vor.u32 %v2414_v6, %v2413_v37  ;;  %4578 = vmatpush.bf16.msrb.mxu1 %v10548_v2  ;;  %v15597_v6 = vrot.slane %v12765_v43, 1  ;;  %v12775_v37 = vpop.f32.mrf.mxu0  ;;  %v10547_v2 = vld [vmem:[%s15546_s3 + $0x300] sm:$0xff]  ;;  %vm6440_vm12 = vsmask.f32 7958 }
 0x1f3   : > { %15677 = vst [vmem:[#allocation45_spill] sm:$0xff] %v12750_v16  ;;  %v2412_v31 = vsel %vm2053_vm7, %v12329_v9, %v2411_v53  ;;  %v2420_v28 = vrot.slane %v2418_v33, 2  ;;  %v2421_v16 = vshll.u32 %v2391_v20, 16  ;;  %v2437_v9 = vrot.slane %v2429_v52, 7  ;;  %vm15221_vm14 = vmand %vm6439_vm11, %vm6440_vm12 }
 0x1f4   : > { %v2460_v60 = vrot.slane %v2412_v31, 1  ;;  %v2416_v10 = vsel %vm2053_vm7, %v2411_v53, %v2415_v7  ;;  %v12772_v15 = vsel %vm1385_vm2, %v2479_v26, %v2495_v24  ;;  %v15682_v26 = vrot.slane %v12426_v45, 3 }
 0x1f5   : > { %15680 = vst [vmem:[#allocation48_spill] sm:$0xff] %v12772_v15  ;;  %v2477_v52 = vrot.slane %v2416_v10, 1  ;;  %v2423_v31 = vrot.slane %v2421_v16, 3  ;;  %v12784_v53 = vsel %vm346_vm0, %v2435_v59, %v2437_v9  ;;  %v12792_v33 = vrot.slane %v2312_v29, 1  ;;  %4544 = vmatpush.bf16.msrb.mxu0 %v10540_v27  ;;  %v10539_v9 = vld [vmem:[%s15546_s3 + $0x2c0] sm:$0xff] }
 0x1f6   : > { %v12768_v38 = vsel %vm1385_vm2, %v2459_v35, %v2460_v60  ;;  %15681 = vst [vmem:[#allocation49_spill] sm:$0xff] %v12784_v53  ;;  %v15683_v35 = vrot.slane %v12265_v61, 3  ;;  %4579 = vmatpush.bf16.msrb.mxu1 %v10547_v2  ;;  %v15599_v59 = vrot.slane %v12426_v45, 2  ;;  %v2396_v16 = vrot.slane %v12601_v42, 2  ;;  %v15700_v15 = vld [vmem:[#allocation22_spill] sm:$0xff] }
 0x1f7   : > { %15679 = vst [vmem:[#allocation47_spill] sm:$0xff] %v12768_v38  ;;  %v12795_v8 = vsel %vm1385_vm2, %v2460_v60, %v2477_v52  ;;  %v12797_v10 = vor.u32 %v2423_v31, %v2420_v28  ;;  %v12813_v60 = vsel %vm1385_vm2, %v15597_v6, %v12792_v33  ;;  %v2398_v28 = vrot.slane %v2391_v20, 2 }
 0x1f8   : > { %4226 = vmatmul.bf16.gmra.mxu3 %v1890_v0  ;;  %v2103_v19 = vsel %vm1561_vm6, %v15683_v35, %v15682_v26  ;;  %v15598_v0 = vrot.slane %v12784_v53, 1  ;;  %15684 = vst [vmem:[#allocation50_spill] sm:$0xff] %v12792_v33  ;;  %v12821_v31 = vsel %vm1463_vm3, %v15599_v59, %v2396_v16  ;;  %v12823_v26 = vpop.f32.mrf.mxu1  ;;  %v10578_v33 = vld [vmem:[%s15546_s3 + $0x3f8] sm:$0xff]  ;;  %v10583_v53 = vld [vmem:[%s15546_s3 + $0x420] sm:$0xff] }
 0x1f9   : > { %15685 = vst [vmem:[#allocation51_spill] sm:$0xff] %v12795_v8  ;;  %v2425_v27 = vsel %vm2053_vm7, %v2415_v7, %v12797_v10  ;;  %v15601_v2 = vrot.slane %v12797_v10, 1  ;;  %v15600_v35 = vrot.slane %v12821_v31, 1  ;;  %v12827_v6 = vrot.slane %v2398_v28, 1  ;;  %4545 = vmatpush.bf16.msrb.mxu0 %v10539_v9  ;;  %v15703_v8 = vld [vmem:[#allocation16_spill] sm:$0xff] }
 0x1fa   : > { %15686 = vst [vmem:[#allocation52_spill] sm:$0xff] %v12797_v10  ;;  %v12807_v29 = vsel %vm1385_vm2, %v2495_v24, %v15598_v0  ;;  %v2493_v24 = vrot.slane %v2425_v27, 1  ;;  %v12829_v0 = vpop.f32.mrf.mxu3  ;;  %v2132_v27 = vrot.slane %v12467_v46, 3  ;;  %v10576_v10 = vld [vmem:[%s15546_s3 + $0x3e8] sm:$0xff] }
 0x1fb   : > { %4459 = vmatmul.bf16.gmra.mxu1 %v2103_v19  ;;  %15687 = vst [vmem:[#allocation53_spill] sm:$0xff] %v12807_v29  ;;  %v2399_v19 = vsel %vm1463_vm3, %v2396_v16, %v2398_v28  ;;  %v10562_v16 = vld [vmem:[%s15546_s3 + $0x378] sm:$0xff] }
 0x1fc   : > { %15688 = vst [vmem:[#allocation54_spill] sm:$0xff] %v12813_v60  ;;  %v2491_v20 = vrot.slane %v2399_v19, 1  ;;  %v12833_v7 = vsel %vm1385_vm2, %v2477_v52, %v2493_v24  ;;  %v12838_v59 = vsel %vm1385_vm2, %v2493_v24, %v15601_v2  ;;  %v12853_v52 = vpop.f32.mrf.mxu0  ;;  %4606 = vmatpush.bf16.msrb.mxu2 %v10562_v16  ;;  %v2135_v24 = vrot.slane %v12443_v41, 4  ;;  %v10559_v41 = vld [vmem:[%s15546_s3 + $0x360] sm:$0xff]  ;;  %v10500_v60 = vld [vmem:[%s15546_s3 + $0x188] sm:$0xff] }
 0x1fd   : > { %15689 = vst [vmem:[#allocation55_spill] sm:$0xff] %v12821_v31  ;;  %v15695_v2 = vrot.slane %v12426_v45, 3  ;;  %4674 = vmatpush.bf16.msra.mxu0 %v10578_v33  ;;  %v10499_v33 = vld [vmem:[%s15546_s3 + $0x180] sm:$0xff] }
 0x1fe   : > { %15690 = vst [vmem:[#allocation56_spill] sm:$0xff] %v12827_v6  ;;  %v12847_v9 = vsel %vm1385_vm2, %v15600_v35, %v2491_v20  ;;  %v2136_v35 = vor.u32 %v2135_v24, %v2132_v27  ;;  %v10558_v27 = vld [vmem:[%s15546_s3 + $0x358] sm:$0xff]  ;;  %v10557_v24 = vld [vmem:[%s15546_s3 + $0x350] sm:$0xff] }
 0x1ff   : > { %4488 = vmatmul.bf16.gmra.mxu2 %v12357_v3  ;;  %15691 = vst [vmem:[#allocation57_spill] sm:$0xff] %v12833_v7  ;;  %v12851_v3 = vsel %vm1385_vm2, %v2491_v20, %v12827_v6  ;;  %v10560_v20 = vld [vmem:[%s15546_s3 + $0x368] sm:$0xff]  ;;  %v10575_v7 = vld [vmem:[%s15546_s3 + $0x3e0] sm:$0xff] }
 0x200   : > { %15692 = vst [vmem:[#allocation58_spill] sm:$0xff] %v12838_v59  ;;  %4425 = vmatmul.bf16.gmra.mxu0 %v12382_v36  ;;  %v10561_v36 = vld [vmem:[%s15546_s3 + $0x370] sm:$0xff]  ;;  %v12858_v28 = vpop.f32.mrf.mxu1  ;;  %v2137_v46 = vsel %vm362_vm13, %v12343_v51, %v2136_v35  ;;  %v10504_v6 = vld [vmem:[%s15546_s3 + $0x1a8] sm:$0xff] }
 0x201   : > { %15693 = vst [vmem:[#allocation59_spill] sm:$0xff] %v12847_v9  ;;  %4607 = vmatpush.bf16.msrb.mxu2 %v10561_v36  ;;  %v10503_v9 = vld [vmem:[%s15546_s3 + $0x1a0] sm:$0xff] }
 0x202   : > { %15694 = vst [vmem:[#allocation60_spill] sm:$0xff] %v12851_v3  ;;  %v12862_v19 = vpop.f32.mrf.mxu3 }
 0x204   : > { %v12868_v16 = vpop.f32.mrf.mxu0 }
 0x205   : > { %4608 = vmatpush.bf16.msrb.mxu2 %v10560_v20  ;;  %v12892_v20 = vpop.f32.mrf.mxu2 }
 0x208   : > { %4240 = vmatmul.bf16.vlgmr.msra.gmra.mxu3 %v11644_v5  ;;  %v12877_v36 = vpop.f32.mrf.mxu1 }
 0x209   : > { %4609 = vmatpush.bf16.msrb.mxu2 %v10559_v41  ;;  %v10506_v41 = vld [vmem:[%s15546_s3 + $0x1b8] sm:$0xff] }
 0x20a   : > { %v12880_v5 = vpop.f32.mrf.mxu3  ;;  %4368 = vmatpush.bf16.msrb.mxu3 %v10506_v41 }
 0x20b   : > { %4464 = vmatmul.bf16.gmra.mxu1 %v15695_v2 }
 0x20c   : > { %v12885_v2 = vpop.f32.mrf.mxu0 }
 0x20d   : > { %4610 = vmatpush.bf16.msrb.mxu2 %v10558_v27  ;;  %v12918_v41 = vpop.f32.mrf.mxu2 }
 0x20f   : > { %4493 = vmatmul.bf16.gmra.mxu2 %v2137_v46  ;;  %v10556_v46 = vld [vmem:[%s15546_s3 + $0x348] sm:$0xff] }
 0x210   : > { %4430 = vmatmul.bf16.gmra.mxu0 %v12362_v21  ;;  %v12890_v51 = vpop.f32.mrf.mxu1 }
 0x211   : > { %4611 = vmatpush.bf16.msrb.mxu2 %v10557_v24  ;;  %v10555_v24 = vld [vmem:[%s15546_s3 + $0x340] sm:$0xff] }
 0x212   : > { %v12895_v21 = vpop.f32.mrf.mxu3 }
 0x214   : > { %v12904_v27 = vpop.f32.mrf.mxu0 }
 0x215   : > { %4612 = vmatpush.bf16.msrb.mxu2 %v10556_v46 }
 0x218   : > { %4245 = vmatmul.bf16.gmra.mxu3 %v11902_v50  ;;  %v10505_v50 = vld [vmem:[%s15546_s3 + $0x1b0] sm:$0xff]  ;;  %v12916_v3 = vpop.f32.mrf.mxu1 }
 0x219   : > { %4369 = vmatpush.bf16.msrb.mxu3 %v10505_v50  ;;  %4613 = vmatpush.bf16.msrb.mxu2 %v10555_v24  ;;  %v10502_v50 = vld [vmem:[%s15546_s3 + $0x198] sm:$0xff]  ;;  %v12933_v24 = vpop.f32.mrf.mxu2 }
 0x21a   : > { %v12920_v46 = vpop.f32.mrf.mxu3 }
 0x21b   : > { %4580 = vmatmul.bf16.vlgmr.msrb.gmra.mxu1 %v11819_v25 }
 0x21d   : > { %4370 = vmatpush.bf16.msrb.mxu3 %v10504_v6  ;;  %v10586_v6 = vld [vmem:[%s15546_s3 + $0x438] sm:$0xff] }
 0x21e   : > { %4708 = vmatpush.bf16.msra.mxu1 %v10586_v6  ;;  %v10577_v6 = vld [vmem:[%s15546_s3 + $0x3f0] sm:$0xff] }
 0x21f   : > { %4498 = vmatmul.bf16.gmra.mxu2 %v2136_v35  ;;  %v12925_v35 = vpop.f32.mrf.mxu0  ;;  %4675 = vmatpush.bf16.msra.mxu0 %v10577_v6 }
 0x220   : > { %4546 = vmatmul.bf16.vlgmr.msrb.gmra.mxu0 %v11938_v39 }
 0x221   : > { %4371 = vmatpush.bf16.msrb.mxu3 %v10503_v9 }
 0x223   : > { %4676 = vmatpush.bf16.msra.mxu0 %v10576_v10  ;;  %v10581_v10 = vld [vmem:[%s15546_s3 + $0x410] sm:$0xff] }
 0x225   : > { %4372 = vmatpush.bf16.msrb.mxu3 %v10502_v50  ;;  %v10585_v50 = vld [vmem:[%s15546_s3 + $0x430] sm:$0xff] }
 0x226   : > { %4709 = vmatpush.bf16.msra.mxu1 %v10585_v50  ;;  %v12975_v50 = vld [vmem:[%s15547_s4] ss:$0 sm:$0xff] }
 0x227   : > { %v4174_v6 = vadd.f32 %v12975_v50, %v12619_v62  ;;  %v15699_v62 = vld [vmem:[#allocation18_spill] sm:$0xff]  ;;  %4677 = vmatpush.bf16.msra.mxu0 %v10575_v7  ;;  %v10573_v7 = vld [vmem:[%s15546_s3 + $0x3d0] sm:$0xff] }
 0x228   : > { %4250 = vmatmul.bf16.gmra.mxu3 %v12100_v47  ;;  %v12928_v39 = vpop.f32.mrf.mxu1  ;;  %v10501_v47 = vld [vmem:[%s15546_s3 + $0x190] sm:$0xff] }
 0x229   : > { %4373 = vmatpush.bf16.msrb.mxu3 %v10501_v47  ;;  %v10584_v47 = vld [vmem:[%s15546_s3 + $0x428] sm:$0xff] }
 0x22a   : > { %4710 = vmatpush.bf16.msra.mxu1 %v10584_v47 }
 0x22b   : > { %v12935_v31 = vpop.f32.mrf.mxu3  ;;  %4585 = vmatmul.bf16.gmra.mxu1 %v12002_v4 }
 0x22d   : > { %v12944_v9 = vpop.f32.mrf.mxu0  ;;  %4374 = vmatpush.bf16.msrb.mxu3 %v10500_v60 }
 0x22e   : > { %4711 = vmatpush.bf16.msra.mxu1 %v10583_v53  ;;  %v10574_v53 = vld [vmem:[%s15546_s3 + $0x3d8] sm:$0xff] }
 0x22f   : > { %4614 = vmatmul.bf16.vlgmr.msrb.gmra.mxu2 %v12122_v48  ;;  %4678 = vmatpush.bf16.msra.mxu0 %v10574_v53  ;;  %v10572_v53 = vld [vmem:[%s15546_s3 + $0x3c8] sm:$0xff] }
 0x230   : > { %4551 = vmatmul.bf16.gmra.mxu0 %v12130_v14  ;;  %v12957_v43 = vpop.f32.mrf.mxu1  ;;  %v12961_v14 = vpop.f32.mrf.mxu2 }
 0x231   : > { %15696 = vst [vmem:[#allocation61_spill] sm:$0xff] %v12957_v43  ;;  %4375 = vmatpush.bf16.msrb.mxu3 %v10499_v33  ;;  %v10582_v33 = vld [vmem:[%s15546_s3 + $0x418] sm:$0xff]  ;;  %v15713_v43 = vld [vmem:[#allocation27_spill] sm:$0xff] }
 0x232   : > { %4712 = vmatpush.bf16.msra.mxu1 %v10582_v33 }
 0x233   : > { %v12959_v48 = vpop.f32.mrf.mxu3  ;;  %4679 = vmatpush.bf16.msra.mxu0 %v10573_v7 }
 0x235   : > { %v12977_v60 = vpop.f32.mrf.mxu0 }
 0x236   : > { %15697 = vst [vmem:[#allocation62_spill] sm:$0xff] %v12977_v60  ;;  %4713 = vmatpush.bf16.msra.mxu1 %v10581_v10  ;;  %v10579_v10 = vld [vmem:[%s15546_s3 + $0x400] sm:$0xff]  ;;  %v10537_v60 = vld [vmem:[%s15546_s3 + $0x2b0] sm:$0xff] }
 0x237   : > { %4680 = vmatpush.bf16.msra.mxu0 %v10572_v53 }
 0x238   : > { %4255 = vmatmul.bf16.gmra.mxu3 %v12349_v32  ;;  %v12989_v59 = vpop.f32.mrf.mxu2  ;;  %v12993_v32 = vpop.f32.mrf.mxu1 }
 0x239   : > { %15698 = vst [vmem:[#allocation63_spill] sm:$0xff] %v12993_v32  ;;  %v15704_v32 = vrot.slane %v15703_v8, 1 }
 0x23b   : > { %v4207_v47 = vpop.f32.mrf.mxu3  ;;  %4590 = vmatmul.bf16.gmra.mxu1 %v12265_v61 }
 0x23c   : > { %v12991_v29 = vadd.f32 %v4207_v47, %v4174_v6 }
 0x23d   : > { %v13009_v6 = vpop.f32.mrf.mxu0 }
 0x23e   : > { %15701 = vst [vmem:[#allocation18_spill] sm:$0xff] %v13009_v6  ;;  %v4179_v6 = vadd.f32 %v12975_v50, %v12756_v56  ;;  %v10594_v56 = vld [vmem:[%s15546_s3 + $0x478] sm:$0xff] }
 0x23f   : > { %4619 = vmatmul.bf16.gmra.mxu2 %v15699_v62 }
 0x240   : > { %4556 = vmatmul.bf16.gmra.mxu0 %v15700_v15  ;;  %v10580_v15 = vld [vmem:[%s15546_s3 + $0x408] sm:$0xff]  ;;  %v13019_v33 = vpop.f32.mrf.mxu2  ;;  %v13021_v62 = vpop.f32.mrf.mxu1  ;;  %4742 = vmatpush.bf16.msra.mxu2 %v10594_v56 }
 0x241   : > { %15702 = vst [vmem:[#allocation22_spill] sm:$0xff] %v13021_v62  ;;  %4714 = vmatpush.bf16.msra.mxu1 %v10580_v15  ;;  %v15706_v15 = vld [vmem:[#allocation29_spill] sm:$0xff]  ;;  %v10592_v56 = vld [vmem:[%s15546_s3 + $0x468] sm:$0xff] }
 0x243   : > { %v13011_v47 = vpop.f32.mrf.mxu3 }
 0x245   : > { %v13034_v7 = vpop.f32.mrf.mxu0  ;;  %4715 = vmatpush.bf16.msra.mxu1 %v10579_v10  ;;  %v15709_v10 = vld [vmem:[#allocation8_spill] sm:$0xff] }
 0x246   : > { %15705 = vst [vmem:[#allocation16_spill] sm:$0xff] %v13034_v7 }
 0x248   : > { %4260 = vmatmul.bf16.gmra.mxu3 %v15704_v32  ;;  %v10571_v32 = vld [vmem:[%s15546_s3 + $0x3c0] sm:$0xff]  ;;  %v13043_v62 = vpop.f32.mrf.mxu2  ;;  %v13048_v53 = vpop.f32.mrf.mxu1 }
 0x249   : > { %4681 = vmatpush.bf16.msra.mxu0 %v10571_v32  ;;  %15707 = vst [vmem:[#allocation29_spill] sm:$0xff] %v13043_v62 }
 0x24a   : > { %15708 = vst [vmem:[#allocation64_spill] sm:$0xff] %v13048_v53  ;;  %v4184_v53 = vadd.f32 %v12975_v50, %v12862_v19  ;;  %v10590_v19 = vld [vmem:[%s15546_s3 + $0x458] sm:$0xff] }
 0x24b   : > { %v4212_v38 = vpop.f32.mrf.mxu3  ;;  %4595 = vmatmul.bf16.gmra.mxu1 %v12426_v45  ;;  %v2039_v45 = vrot.slane %v15709_v10, 2 }
 0x24c   : > { %v13036_v8 = vadd.f32 %v4212_v38, %v4179_v6  ;;  %v2040_v6 = vrot.slane %v11819_v25, 2 }
 0x24d   : > { %v13057_v32 = vpop.f32.mrf.mxu0 }
 0x24e   : > { %15710 = vst [vmem:[#allocation8_spill] sm:$0xff] %v13057_v32 }
 0x24f   : > { %4624 = vmatmul.bf16.gmra.mxu2 %v12479_v12  ;;  %v10593_v12 = vld [vmem:[%s15546_s3 + $0x470] sm:$0xff] }
 0x250   : > { %4561 = vmatmul.bf16.gmra.mxu0 %v15706_v15  ;;  %v2041_v15 = vsel %vm1463_vm3, %v2039_v45, %v2040_v6  ;;  %4743 = vmatpush.bf16.msra.mxu2 %v10593_v12  ;;  %v13065_v25 = vpop.f32.mrf.mxu2  ;;  %v13067_v10 = vpop.f32.mrf.mxu1  ;;  %v10591_v45 = vld [vmem:[%s15546_s3 + $0x460] sm:$0xff] }
 0x251   : > { %15711 = vst [vmem:[#allocation65_spill] sm:$0xff] %v13065_v25  ;;  %v15719_v25 = vld [vmem:[#allocation12_spill] sm:$0xff] }
 0x252   : > { %15712 = vst [vmem:[#allocation66_spill] sm:$0xff] %v13067_v10 }
 0x253   : > { %v13050_v38 = vpop.f32.mrf.mxu3 }
 0x254   : > { %4744 = vmatpush.bf16.msra.mxu2 %v10592_v56 }
 0x255   : > { %v13076_v12 = vpop.f32.mrf.mxu0 }
 0x256   : > { %15714 = vst [vmem:[#allocation27_spill] sm:$0xff] %v13076_v12  ;;  %v10588_v12 = vld [vmem:[%s15546_s3 + $0x448] sm:$0xff] }
 0x258   : > { %4376 = vmatmul.bf16.vlgmr.msrb.gmra.mxu3 %v2041_v15  ;;  %v15715_v15 = vld [vmem:[#allocation26_spill] sm:$0xff]  ;;  %4745 = vmatpush.bf16.msra.mxu2 %v10591_v45  ;;  %v13087_v56 = vpop.f32.mrf.mxu1  ;;  %v10538_v45 = vld [vmem:[%s15546_s3 + $0x2b8] sm:$0xff] }
 0x259   : > { %15717 = vst [vmem:[#allocation67_spill] sm:$0xff] %v13087_v56  ;;  %4504 = vmatpush.bf16.msra.mxu3 %v10538_v45 }
 0x25b   : > { %v4217_v7 = vpop.f32.mrf.mxu3  ;;  %4600 = vmatmul.bf16.gmra.mxu1 %v15713_v43 }
 0x25c   : > { %v13070_v32 = vadd.f32 %v4217_v7, %v4184_v53  ;;  %v2042_v7 = vrot.slane %v12002_v4, 2  ;;  %v13085_v53 = vpop.f32.mrf.mxu2  ;;  %4746 = vmatpush.bf16.msra.mxu2 %v10590_v19  ;;  %v4189_v19 = vadd.f32 %v12975_v50, %v12895_v21  ;;  %v10587_v21 = vld [vmem:[%s15546_s3 + $0x440] sm:$0xff] }
 0x25d   : > { %15716 = vst [vmem:[#allocation26_spill] sm:$0xff] %v13085_v53  ;;  %v13101_v56 = vpop.f32.mrf.mxu0  ;;  %4505 = vmatpush.bf16.msra.mxu3 %v10537_v60 }
 0x25e   : > { %15718 = vst [vmem:[#allocation68_spill] sm:$0xff] %v13101_v56 }
 0x25f   : > { %4629 = vmatmul.bf16.gmra.mxu2 %v12496_v34  ;;  %v10589_v34 = vld [vmem:[%s15546_s3 + $0x450] sm:$0xff] }
 0x260   : > { %4566 = vmatmul.bf16.gmra.mxu0 %v15715_v15  ;;  %v2043_v15 = vsel %vm1463_vm3, %v2040_v6, %v2042_v7  ;;  %4747 = vmatpush.bf16.msra.mxu2 %v10589_v34  ;;  %v2227_v6 = vshrl.u32 %v15713_v43, 16  ;;  %v13116_v45 = vpop.f32.mrf.mxu1 }
 0x261   : > { %15720 = vst [vmem:[#allocation12_spill] sm:$0xff] %v13116_v45 }
 0x263   : > { %v13082_v10 = vpop.f32.mrf.mxu3 }
 0x264   : > { %4748 = vmatpush.bf16.msra.mxu2 %v10588_v12  ;;  %v13108_v62 = vpop.f32.mrf.mxu2 }
 0x265   : > { %v13127_v12 = vpop.f32.mrf.mxu0 }
 0x266   : > { %15722 = vst [vmem:[#allocation70_spill] sm:$0xff] %v13127_v12  ;;  %v15727_v12 = vld [vmem:[#allocation21_spill] sm:$0xff] }
 0x268   : > { %4381 = vmatmul.bf16.gmra.mxu3 %v2043_v15  ;;  %v2229_v15 = vor.u32 %v2227_v6, %v12482_v30  ;;  %v10536_v30 = vld [vmem:[%s15546_s3 + $0x2a8] sm:$0xff]  ;;  %4749 = vmatpush.bf16.msra.mxu2 %v10587_v21  ;;  %v10534_v6 = vld [vmem:[%s15546_s3 + $0x298] sm:$0xff] }
 0x269   : > { %4506 = vmatpush.bf16.msra.mxu3 %v10536_v30  ;;  %v15724_v30 = vld [vmem:[#allocation19_spill] sm:$0xff] }
 0x26b   : > { %v4222_v53 = vpop.f32.mrf.mxu3  ;;  %4716 = vmatmul.bf16.vlgmr.msra.gmra.mxu1 %v15719_v25  ;;  %v13125_v25 = vrot.slane %v12265_v61, 2 }
 0x26c   : > { %v13105_v34 = vadd.f32 %v4222_v53, %v4189_v19  ;;  %v10535_v53 = vld [vmem:[%s15546_s3 + $0x2a0] sm:$0xff]  ;;  %v13134_v60 = vpop.f32.mrf.mxu2  ;;  %v13136_v19 = vpop.f32.mrf.mxu1 }
 0x26d   : > { %15721 = vst [vmem:[#allocation69_spill] sm:$0xff] %v13125_v25  ;;  %4507 = vmatpush.bf16.msra.mxu3 %v10535_v53  ;;  %v10533_v53 = vld [vmem:[%s15546_s3 + $0x290] sm:$0xff] }
 0x26e   : > { %15723 = vst [vmem:[#allocation71_spill] sm:$0xff] %v13136_v19  ;;  %v15726_v19 = vld [vmem:[#allocation30_spill] sm:$0xff] }
 0x26f   : > { %4634 = vmatmul.bf16.gmra.mxu2 %v2229_v15  ;;  %v4194_v15 = vadd.f32 %v12975_v50, %v12935_v31  ;;  %v10610_v31 = vld [vmem:[%s15546_s3 + $0x4f8] sm:$0xff] }
 0x270   : > { %4682 = vmatmul.bf16.vlgmr.msra.gmra.mxu0 %v12028_v23  ;;  %v2045_v23 = vsel %vm1463_vm3, %v2042_v7, %v13125_v25  ;;  %v13146_v7 = vpop.f32.mrf.mxu0 }
 0x271   : > { %4508 = vmatpush.bf16.msra.mxu3 %v10534_v6  ;;  %15725 = vst [vmem:[#allocation72_spill] sm:$0xff] %v13146_v7  ;;  %v10617_v6 = vld [vmem:[%s15546_s3 + $0x530] sm:$0xff]  ;;  %4810 = vmatpush.bf16.msrb.mxu0 %v10610_v31  ;;  %v10531_v31 = vld [vmem:[%s15546_s3 + $0x280] sm:$0xff] }
 0x273   : > { %v13122_v43 = vpop.f32.mrf.mxu3 }
 0x275   : > { %4509 = vmatpush.bf16.msra.mxu3 %v10533_v53  ;;  %v10609_v53 = vld [vmem:[%s15546_s3 + $0x4f0] sm:$0xff] }
 0x276   : > { %4811 = vmatpush.bf16.msrb.mxu0 %v10609_v53 }
 0x278   : > { %4386 = vmatmul.bf16.gmra.mxu3 %v2045_v23  ;;  %v10618_v23 = vld [vmem:[%s15546_s3 + $0x538] sm:$0xff] }
 0x279   : > { %4844 = vmatpush.bf16.msrb.mxu1 %v10618_v23 }
 0x27b   : > { %v4227_v21 = vpop.f32.mrf.mxu3  ;;  %4721 = vmatmul.bf16.gmra.mxu1 %v15724_v30  ;;  %v15730_v30 = vld [vmem:[#allocation17_spill] sm:$0xff] }
 0x27c   : > { %v13144_v45 = vadd.f32 %v4227_v21, %v4194_v15  ;;  %v10532_v15 = vld [vmem:[%s15546_s3 + $0x288] sm:$0xff]  ;;  %v4196_v21 = vadd.f32 %v12975_v50, %v12959_v48  ;;  %v2046_v7 = vrot.slane %v15730_v30, 2  ;;  %v13185_v30 = vpop.f32.mrf.mxu0 }
 0x27d   : > { %4845 = vmatpush.bf16.msrb.mxu1 %v10617_v6  ;;  %4510 = vmatpush.bf16.msra.mxu3 %v10532_v15  ;;  %v10616_v48 = vld [vmem:[%s15546_s3 + $0x528] sm:$0xff]  ;;  %15731 = vst [vmem:[#allocation17_spill] sm:$0xff] %v13185_v30  ;;  %v10615_v15 = vld [vmem:[%s15546_s3 + $0x520] sm:$0xff] }
 0x27e   : > { %v10608_v6 = vld [vmem:[%s15546_s3 + $0x4e8] sm:$0xff] }
 0x27f   : > { %4750 = vmatmul.bf16.vlgmr.msra.gmra.mxu2 %v15726_v19  ;;  %v13167_v19 = vpop.f32.mrf.mxu2  ;;  %4812 = vmatpush.bf16.msrb.mxu0 %v10608_v6  ;;  %v10606_v6 = vld [vmem:[%s15546_s3 + $0x4d8] sm:$0xff] }
 0x280   : > { %4687 = vmatmul.bf16.gmra.mxu0 %v15727_v12  ;;  %15728 = vst [vmem:[#allocation30_spill] sm:$0xff] %v13167_v19  ;;  %v13169_v12 = vpop.f32.mrf.mxu1 }
 0x281   : > { %15729 = vst [vmem:[#allocation21_spill] sm:$0xff] %v13169_v12  ;;  %v2047_v12 = vsel %vm1463_vm3, %v13125_v25, %v2046_v7  ;;  %4846 = vmatpush.bf16.msrb.mxu1 %v10616_v48  ;;  %4511 = vmatpush.bf16.msra.mxu3 %v10531_v31  ;;  %v10607_v48 = vld [vmem:[%s15546_s3 + $0x4e0] sm:$0xff]  ;;  %v10614_v31 = vld [vmem:[%s15546_s3 + $0x518] sm:$0xff] }
 0x283   : > { %v4229_v23 = vpop.f32.mrf.mxu3  ;;  %4813 = vmatpush.bf16.msrb.mxu0 %v10607_v48 }
 0x284   : > { %v13172_v56 = vadd.f32 %v4229_v23, %v4196_v21  ;;  %v15732_v23 = vld [vmem:[#allocation25_spill] sm:$0xff] }
 0x285   : > { %4847 = vmatpush.bf16.msrb.mxu1 %v10615_v15  ;;  %v10613_v15 = vld [vmem:[%s15546_s3 + $0x510] sm:$0xff] }
 0x287   : > { %v13194_v19 = vpop.f32.mrf.mxu2  ;;  %4814 = vmatpush.bf16.msrb.mxu0 %v10606_v6 }
 0x288   : > { %4391 = vmatmul.bf16.gmra.mxu3 %v2047_v12  ;;  %15733 = vst [vmem:[#allocation73_spill] sm:$0xff] %v13194_v19  ;;  %v1810_v12 = vld [vmem:[#allocation2 + $0x34] sm:$0x1]  ;;  %v13199_v53 = vpop.f32.mrf.mxu1 }
 0x289   : > { %15734 = vst [vmem:[#allocation74_spill] sm:$0xff] %v13199_v53  ;;  %v2258_v30 = vunpack.c.l.b16 %v1810_v12  ;;  %4848 = vmatpush.bf16.msrb.mxu1 %v10614_v31  ;;  %v13218_v12 = vpop.f32.mrf.mxu0  ;;  %v15737_v31 = vld [vmem:[#allocation31_spill] sm:$0xff] }
 0x28a   : > { %v10605_v19 = vld [vmem:[%s15546_s3 + $0x4d0] sm:$0xff] }
 0x28b   : > { %v4241_v21 = vpop.f32.mrf.mxu3  ;;  %4726 = vmatmul.bf16.gmra.mxu1 %v15732_v23  ;;  %v2259_v23 = vpack.c.b16 %v2258_v30, %v12447_v55  ;;  %4815 = vmatpush.bf16.msrb.mxu0 %v10605_v19  ;;  %v10604_v55 = vld [vmem:[%s15546_s3 + $0x4c8] sm:$0xff]  ;;  %v10611_v30 = vld [vmem:[%s15546_s3 + $0x500] sm:$0xff] }
 0x28c   : > { %v13197_v25 = vadd.f32 %v4241_v21, %v12991_v29  ;;  %v4176_v29 = vadd.f32 %v12975_v50, %v12674_v40  ;;  %v15735_v21 = vld [vmem:[#allocation28_spill] sm:$0xff]  ;;  %v10603_v19 = vld [vmem:[%s15546_s3 + $0x4c0] sm:$0xff] }
 0x28d   : > { %15736 = vst [vmem:[#allocation28_spill] sm:$0xff] %v13218_v12  ;;  %4849 = vmatpush.bf16.msrb.mxu1 %v10613_v15  ;;  %v2267_v12 = vshll.u32 %v2259_v23, 16 }
 0x28e   : > { %v4210_v53 = vadd.f32 %v13011_v47, %v4176_v29  ;;  %v10612_v47 = vld [vmem:[%s15546_s3 + $0x508] sm:$0xff] }
 0x28f   : > { %4755 = vmatmul.bf16.gmra.mxu2 %v12489_v17  ;;  %v13223_v48 = vpop.f32.mrf.mxu2  ;;  %v2269_v15 = vrot.slane %v2267_v12, 1  ;;  %4816 = vmatpush.bf16.msrb.mxu0 %v10604_v55 }
 0x290   : > { %4692 = vmatmul.bf16.gmra.mxu0 %v15735_v21  ;;  %v2497_v21 = vrot.slane %v15737_v31, 1  ;;  %v13232_v29 = vpop.f32.mrf.mxu1 }
 0x291   : > { %15738 = vst [vmem:[#allocation31_spill] sm:$0xff] %v13232_v29  ;;  %4850 = vmatpush.bf16.msrb.mxu1 %v10612_v47  ;;  %v2270_v47 = vsel %vm1851_vm9, %v12485_v63, %v2269_v15  ;;  %vm14259_vm9 = vmand %vm5173_vm4, %vm15850_vm5  ;;  %vm6451_vm4 = vcmask 1045508  }
 0x292   : > { %vm6442_vm8 = vmor %vm15221_vm14, %vm14259_vm9 }
 0x293   : > { %v4243_v17 = vpop.f32.mrf.mxu3  ;;  %4817 = vmatpush.bf16.msrb.mxu0 %v10603_v19  ;;  %vm6452_vm5 = vmand %vm6451_vm4, %vm2053_vm7 }
 0x294   : > { %v13221_v40 = vadd.f32 %v4243_v17, %v4210_v53  ;;  %v2498_v53 = vsel %vm1385_vm2, %v12420_v1, %v2497_v21  ;;  %v13242_v17 = vpop.f32.mrf.mxu0  ;;  %v4181_v1 = vadd.f32 %v12975_v50, %v12829_v0  ;;  %v15741_v0 = vld [vmem:[#allocation32_spill] sm:$0xff] }
 0x295   : > { %15739 = vst [vmem:[#allocation75_spill] sm:$0xff] %v13242_v17  ;;  %4851 = vmatpush.bf16.msrb.mxu1 %v10611_v30  ;;  %v15742_v17 = vld [vmem:[#allocation10_spill] sm:$0xff] }
 0x296   : > { %v4215_v30 = vadd.f32 %v13050_v38, %v4181_v1  ;;  %v10624_v38 = vld [vmem:[%s15546_s3 + $0x568] sm:$0xff] }
 0x297   : > { %v13255_v12 = vpop.f32.mrf.mxu2 }
 0x298   : > { %4396 = vmatmul.bf16.gmra.mxu3 %v2046_v7  ;;  %v13260_v55 = vpop.f32.mrf.mxu1 }
 0x299   : > { %15740 = vst [vmem:[#allocation76_spill] sm:$0xff] %v13260_v55  ;;  %v10623_v55 = vld [vmem:[%s15546_s3 + $0x560] sm:$0xff] }
 0x29b   : > { %v4246_v6 = vpop.f32.mrf.mxu3  ;;  %4731 = vmatmul.bf16.gmra.mxu1 %v2498_v53 }
 0x29c   : > { %v13245_v7 = vadd.f32 %v4246_v6, %v13036_v8  ;;  %v10626_v8 = vld [vmem:[%s15546_s3 + $0x578] sm:$0xff]  ;;  %v13266_v6 = vpop.f32.mrf.mxu0 }
 0x29d   : > { %4878 = vmatpush.bf16.msrb.mxu2 %v10626_v8 }
 0x29f   : > { %4760 = vmatmul.bf16.gmra.mxu2 %v12537_v11  ;;  %v2297_v11 = vshrl.u32 %v15737_v31, 16  ;;  %v13276_v19 = vpop.f32.mrf.mxu2 }
 0x2a0   : > { %4697 = vmatmul.bf16.gmra.mxu0 %v2270_v47  ;;  %v10625_v47 = vld [vmem:[%s15546_s3 + $0x570] sm:$0xff]  ;;  %v13278_v8 = vpop.f32.mrf.mxu1 }
 0x2a1   : > { %v2299_v29 = vor.u32 %v2297_v11, %v15741_v0  ;;  %4879 = vmatpush.bf16.msrb.mxu2 %v10625_v47  ;;  %15743 = vst [vmem:[#allocation32_spill] sm:$0xff] %v13278_v8  ;;  %v15744_v0 = vld [vmem:[#allocation33_spill] sm:$0xff] }
 0x2a3   : > { %v4248_v53 = vpop.f32.mrf.mxu3  ;;  %v2499_v1 = vrot.slane %v2299_v29, 1  ;;  %v4186_v29 = vadd.f32 %v12975_v50, %v12880_v5  ;;  %v15746_v5 = vld [vmem:[#allocation23_spill] sm:$0xff] }
 0x2a4   : > { %v13263_v63 = vadd.f32 %v4248_v53, %v4215_v30  ;;  %v2271_v53 = vshrl.u32 %v2259_v23, 16  ;;  %v13291_v8 = vpop.f32.mrf.mxu0  ;;  %v13297_v23 = vrot.slane %v12265_v61, 1 }
 0x2a5   : > { %4880 = vmatpush.bf16.msrb.mxu2 %v10624_v38 }
 0x2a6   : > { %v2273_v11 = vor.u32 %v2271_v53, %v2269_v15  ;;  %v13303_v38 = vsel %vm1385_vm2, %v13297_v23, %v12724_v58 }
 0x2a7   : > { %v13306_v53 = vpop.f32.mrf.mxu2 }
 0x2a8   : > { %4512 = vmatmul.bf16.vlgmr.msra.gmra.mxu3 %v15742_v17  ;;  %v15745_v17 = vrot.slane %v15744_v0, 1  ;;  %v10621_v0 = vld [vmem:[%s15546_s3 + $0x550] sm:$0xff] }
 0x2a9   : > { %4881 = vmatpush.bf16.msrb.mxu2 %v10623_v55 }
 0x2aa   : > { %v2500_v47 = vsel %vm1385_vm2, %v15745_v17, %v2499_v1  ;;  %v15748_v17 = vld [vmem:[#allocation13_spill] sm:$0xff] }
 0x2ab   : > { %v4251_v31 = vpop.f32.mrf.mxu3  ;;  %4736 = vmatmul.bf16.gmra.mxu1 %v2497_v21  ;;  %v4220_v21 = vadd.f32 %v13082_v10, %v4186_v29  ;;  %v2451_v10 = vrot.slane %v13303_v38, 1  ;;  %v10570_v29 = vld [vmem:[%s15546_s3 + $0x3b8] sm:$0xff] }
 0x2ac   : > { %v13281_v30 = vadd.f32 %v4251_v31, %v13070_v32  ;;  %v10622_v32 = vld [vmem:[%s15546_s3 + $0x558] sm:$0xff]  ;;  %v2349_v31 = vrot.slane %v15746_v5, 1  ;;  %4640 = vmatpush.bf16.msrb.mxu3 %v10570_v29 }
 0x2ad   : > { %4882 = vmatpush.bf16.msrb.mxu2 %v10622_v32  ;;  %v10620_v32 = vld [vmem:[%s15546_s3 + $0x548] sm:$0xff]  ;;  %v15751_v29 = vld [vmem:[#allocation36_spill] sm:$0xff] }
 0x2ae   : > { %v2350_v61 = vsel %vm1385_vm2, %v2349_v31, %v13297_v23 }
 0x2af   : > { %4765 = vmatmul.bf16.gmra.mxu2 %v2500_v47  ;;  %v2450_v47 = vrot.slane %v2350_v61, 1  ;;  %v13331_v61 = vpop.f32.mrf.mxu2 }
 0x2b0   : > { %4702 = vmatmul.bf16.gmra.mxu0 %v2273_v11  ;;  %v13310_v11 = vpop.f32.mrf.mxu1 }
 0x2b1   : > { %15747 = vst [vmem:[#allocation10_spill] sm:$0xff] %v13310_v11  ;;  %4883 = vmatpush.bf16.msrb.mxu2 %v10621_v0  ;;  %v10569_v0 = vld [vmem:[%s15546_s3 + $0x3b0] sm:$0xff] }
 0x2b2   : > { %4641 = vmatpush.bf16.msrb.mxu3 %v10569_v0  ;;  %v15752_v0 = vld [vmem:[#allocation34_spill] sm:$0xff] }
 0x2b3   : > { %v4253_v15 = vpop.f32.mrf.mxu3 }
 0x2b4   : > { %v13308_v55 = vadd.f32 %v4253_v15, %v4220_v21  ;;  %v13325_v21 = vpop.f32.mrf.mxu0  ;;  %v2452_v15 = vsel %vm1385_vm2, %v2450_v47, %v2451_v10  ;;  %v2351_v47 = vrot.slane %v12601_v42, 1 }
 0x2b5   : > { %15749 = vst [vmem:[#allocation33_spill] sm:$0xff] %v13325_v21  ;;  %4884 = vmatpush.bf16.msrb.mxu2 %v10620_v32  ;;  %v10568_v32 = vld [vmem:[%s15546_s3 + $0x3a8] sm:$0xff] }
 0x2b6   : > { %4642 = vmatpush.bf16.msrb.mxu3 %v10568_v32  ;;  %v10650_v32 = vld [vmem:[%s15546_s3 + $0x638] sm:$0xff] }
 0x2b7   : > { %4980 = vmatpush.bf16.msra.mxu1 %v10650_v32 }
 0x2b8   : > { %4517 = vmatmul.bf16.gmra.mxu3 %v15748_v17  ;;  %v10619_v17 = vld [vmem:[%s15546_s3 + $0x540] sm:$0xff]  ;;  %v13339_v11 = vpop.f32.mrf.mxu1 }
 0x2b9   : > { %15750 = vst [vmem:[#allocation23_spill] sm:$0xff] %v13339_v11  ;;  %4885 = vmatpush.bf16.msrb.mxu2 %v10619_v17  ;;  %v2352_v11 = vsel %vm1385_vm2, %v12724_v58, %v2351_v47  ;;  %v10566_v58 = vld [vmem:[%s15546_s3 + $0x398] sm:$0xff] }
 0x2bb   : > { %v4256_v5 = vpop.f32.mrf.mxu3  ;;  %4852 = vmatmul.bf16.vlgmr.msrb.gmra.mxu1 %v2452_v15 }
 0x2bc   : > { %v13329_v31 = vadd.f32 %v4256_v5, %v13105_v34  ;;  %v4191_v34 = vadd.f32 %v12975_v50, %v12920_v46  ;;  %v13351_v21 = vpop.f32.mrf.mxu0  ;;  %v2471_v46 = vrot.slane %v2352_v11, 1  ;;  %v10567_v50 = vld [vmem:[%s15546_s3 + $0x3a0] sm:$0xff] }
 0x2bd   : > { %4643 = vmatpush.bf16.msrb.mxu3 %v10567_v50  ;;  %v10564_v50 = vld [vmem:[%s15546_s3 + $0x388] sm:$0xff] }
 0x2be   : > { %v4225_v15 = vadd.f32 %v13122_v43, %v4191_v34  ;;  %v2472_v43 = vsel %vm1385_vm2, %v2451_v10, %v2471_v46  ;;  %v10649_v10 = vld [vmem:[%s15546_s3 + $0x630] sm:$0xff] }
 0x2bf   : > { %4770 = vmatmul.bf16.gmra.mxu2 %v2499_v1  ;;  %v13358_v1 = vpop.f32.mrf.mxu2  ;;  %4981 = vmatpush.bf16.msra.mxu1 %v10649_v10  ;;  %v4278_v10 = vadd.f32 %v12853_v52, %v13221_v40  ;;  %v10639_v52 = vld [vmem:[%s15546_s3 + $0x5e0] sm:$0xff]  ;;  %v15754_v40 = vld [vmem:[#allocation40_spill] sm:$0xff] }
 0x2c0   : > { %4818 = vmatmul.bf16.vlgmr.msrb.gmra.mxu0 %v15751_v29  ;;  %v13361_v17 = vpop.f32.mrf.mxu1 }
 0x2c1   : > { %4644 = vmatpush.bf16.msrb.mxu3 %v10566_v58 }
 0x2c3   : > { %v4258_v5 = vpop.f32.mrf.mxu3 }
 0x2c4   : > { %v13353_v42 = vadd.f32 %v4258_v5, %v4225_v15  ;;  %v13370_v29 = vpop.f32.mrf.mxu0  ;;  %v10565_v15 = vld [vmem:[%s15546_s3 + $0x390] sm:$0xff]  ;;  %v2353_v5 = vrot.slane %v12660_v54, 1  ;;  %v4276_v54 = vadd.f32 %v12775_v37, %v13197_v25  ;;  %v10648_v25 = vld [vmem:[%s15546_s3 + $0x628] sm:$0xff] }
 0x2c5   : > { %4645 = vmatpush.bf16.msrb.mxu3 %v10565_v15  ;;  %v10641_v37 = vld [vmem:[%s15546_s3 + $0x5f0] sm:$0xff]  ;;  %4982 = vmatpush.bf16.msra.mxu1 %v10648_v25 }
 0x2c6   : > { %v2354_v58 = vsel %vm1385_vm2, %v2351_v47, %v2353_v5  ;;  %v10563_v47 = vld [vmem:[%s15546_s3 + $0x380] sm:$0xff] }
 0x2c7   : > { %v2487_v32 = vrot.slane %v2354_v58, 1 }
 0x2c8   : > { %4522 = vmatmul.bf16.gmra.mxu3 %v15752_v0 }
 0x2c9   : > { %4646 = vmatpush.bf16.msrb.mxu3 %v10564_v50 }
 0x2cb   : > { %v4261_v34 = vpop.f32.mrf.mxu3  ;;  %4857 = vmatmul.bf16.gmra.mxu1 %v2472_v43 }
 0x2cc   : > { %v13368_v11 = vadd.f32 %v4261_v34, %v13144_v45  ;;  %v10642_v45 = vld [vmem:[%s15546_s3 + $0x5f8] sm:$0xff]  ;;  %v4310_v34 = vadd.f32 %v12739_v57, %v4276_v54  ;;  %v13410_v15 = vpop.f32.mrf.mxu0  ;;  %v10640_v57 = vld [vmem:[%s15546_s3 + $0x5e8] sm:$0xff]  ;;  %v2488_v54 = vsel %vm1385_vm2, %v2471_v46, %v2487_v32 }
 0x2cd   : > { %4946 = vmatpush.bf16.msra.mxu0 %v10642_v45  ;;  %4647 = vmatpush.bf16.msrb.mxu3 %v10563_v47  ;;  %v10647_v45 = vld [vmem:[%s15546_s3 + $0x620] sm:$0xff]  ;;  %v4312_v47 = vadd.f32 %v12823_v26, %v4278_v10  ;;  %v10638_v46 = vld [vmem:[%s15546_s3 + $0x5d8] sm:$0xff]  ;;  %v10645_v26 = vld [vmem:[%s15546_s3 + $0x610] sm:$0xff] }
 0x2ce   : > { %v4344_v50 = vadd.f32 %v12892_v20, %v4310_v34  ;;  %4983 = vmatpush.bf16.msra.mxu1 %v10647_v45  ;;  %v10646_v20 = vld [vmem:[%s15546_s3 + $0x618] sm:$0xff]  ;;  %v4281_v34 = vadd.f32 %v12868_v16, %v13245_v7  ;;  %v10644_v16 = vld [vmem:[%s15546_s3 + $0x608] sm:$0xff] }
 0x2cf   : > { %4886 = vmatmul.bf16.vlgmr.msrb.gmra.mxu2 %v12665_v44  ;;  %v13392_v44 = vpop.f32.mrf.mxu2 }
 0x2d0   : > { %4823 = vmatmul.bf16.gmra.mxu0 %v12635_v22  ;;  %v13394_v22 = vpop.f32.mrf.mxu1 }
 0x2d1   : > { %4947 = vmatpush.bf16.msra.mxu0 %v10641_v37 }
 0x2d2   : > { %4984 = vmatpush.bf16.msra.mxu1 %v10646_v20 }
 0x2d3   : > { %v4263_v0 = vpop.f32.mrf.mxu3 }
 0x2d4   : > { %v13398_v43 = vadd.f32 %v4263_v0, %v13172_v56  ;;  %v15753_v56 = vld [vmem:[#allocation38_spill] sm:$0xff] }
 0x2d5   : > { %4948 = vmatpush.bf16.msra.mxu0 %v10640_v57  ;;  %v4346_v57 = vadd.f32 %v12918_v41, %v4312_v47  ;;  %v15755_v41 = vld [vmem:[#allocation20_spill] sm:$0xff] }
 0x2d6   : > { %4985 = vmatpush.bf16.msra.mxu1 %v10645_v26  ;;  %v15756_v47 = vrot.slane %v15755_v41, 3 }
 0x2d7   : > { %v13423_v58 = vpop.f32.mrf.mxu2 }
 0x2d8   : > { %4527 = vmatmul.bf16.gmra.mxu3 %v15753_v56  ;;  %v13427_v25 = vpop.f32.mrf.mxu1  ;;  %v13446_v56 = vpop.f32.mrf.mxu0 }
 0x2d9   : > { %4949 = vmatpush.bf16.msra.mxu0 %v10639_v52  ;;  %v4283_v52 = vadd.f32 %v12885_v2, %v13263_v63 }
 0x2da   : > { %4986 = vmatpush.bf16.msra.mxu1 %v10644_v16 }
 0x2db   : > { %v4377_v0 = vpop.f32.mrf.mxu3  ;;  %4862 = vmatmul.bf16.gmra.mxu1 %v2488_v54  ;;  %v2505_v54 = vrot.slane %v2353_v5, 1  ;;  %v10643_v5 = vld [vmem:[%s15546_s3 + $0x600] sm:$0xff] }
 0x2dc   : > { %v13425_v37 = vadd.f32 %v4377_v0, %v4344_v50  ;;  %v4315_v50 = vadd.f32 %v12858_v28, %v4281_v34  ;;  %v10637_v0 = vld [vmem:[%s15546_s3 + $0x5d0] sm:$0xff]  ;;  %v10636_v28 = vld [vmem:[%s15546_s3 + $0x5c8] sm:$0xff] }
 0x2dd   : > { %4950 = vmatpush.bf16.msra.mxu0 %v10638_v46 }
 0x2de   : > { %v4349_v20 = vadd.f32 %v12933_v24, %v4315_v50  ;;  %4987 = vmatpush.bf16.msra.mxu1 %v10643_v5 }
 0x2df   : > { %4891 = vmatmul.bf16.gmra.mxu2 %v12699_v13  ;;  %v13451_v10 = vpop.f32.mrf.mxu2 }
 0x2e0   : > { %4828 = vmatmul.bf16.gmra.mxu0 %v15754_v40  ;;  %v13460_v7 = vpop.f32.mrf.mxu1  ;;  %v2506_v40 = vsel %vm1385_vm2, %v2487_v32, %v2505_v54  ;;  %v13474_v26 = vpop.f32.mrf.mxu0  ;;  %v15757_v32 = vld [vmem:[#allocation9_spill] sm:$0xff] }
 0x2e1   : > { %4951 = vmatpush.bf16.msra.mxu0 %v10637_v0  ;;  %v10635_v0 = vld [vmem:[%s15546_s3 + $0x5c0] sm:$0xff]  ;;  %v15758_v50 = vunpack.c.l.b16 %v15757_v32 }
 0x2e3   : > { %v4379_v13 = vpop.f32.mrf.mxu3 }
 0x2e4   : > { %v13449_v45 = vadd.f32 %v4379_v13, %v4346_v57  ;;  %v1807_v57 = vld [vmem:[#allocation2 + $0xc] sm:$0xe]  ;;  %v4317_v13 = vadd.f32 %v12877_v36, %v4283_v52  ;;  %v4286_v36 = vadd.f32 %v12904_v27, %v13281_v30 }
 0x2e5   : > { %4952 = vmatpush.bf16.msra.mxu0 %v10636_v28  ;;  %v2237_v2 = vunpack.c.l.b16 %v1807_v57  ;;  %v2242_v28 = vrot.slane %v12002_v4, 1 }
 0x2e6   : > { %v4351_v41 = vadd.f32 %v12961_v14, %v4317_v13  ;;  %v15759_v14 = vld [vmem:[#allocation42_spill] sm:$0xff] }
 0x2e7   : > { %v13483_v24 = vpop.f32.mrf.mxu2  ;;  %v2239_v16 = vpack.c.b16 %v15758_v50, %v2237_v2  ;;  %v2507_v30 = vrot.slane %v15759_v14, 1  ;;  %v15767_v14 = vld [vmem:[#allocation37_spill] sm:$0xff] }
 0x2e8   : > { %4532 = vmatmul.bf16.gmra.mxu3 %v15756_v47  ;;  %v13486_v63 = vpop.f32.mrf.mxu1  ;;  %v13496_v52 = vpop.f32.mrf.mxu0 }
 0x2e9   : > { %4953 = vmatpush.bf16.msra.mxu0 %v10635_v0  ;;  %v15761_v0 = vld [vmem:[#allocation44_spill] sm:$0xff] }
 0x2ea   : > { %v15762_v2 = vrot.slane %v15761_v0, 1 }
 0x2eb   : > { %v4382_v46 = vpop.f32.mrf.mxu3  ;;  %4867 = vmatmul.bf16.gmra.mxu1 %v2506_v40  ;;  %v4288_v40 = vadd.f32 %v12925_v35, %v13308_v55  ;;  %v15763_v55 = vld [vmem:[#allocation39_spill] sm:$0xff] }
 0x2ec   : > { %v13476_v34 = vadd.f32 %v4382_v46, %v4349_v20  ;;  %v2508_v32 = vsel %vm1385_vm2, %v15762_v2, %v2507_v30  ;;  %v15764_v50 = vrot.slane %v15763_v55, 1  ;;  %v10600_v2 = vld [vmem:[%s15546_s3 + $0x4a8] sm:$0xff] }
 0x2ef   : > { %4896 = vmatmul.bf16.gmra.mxu2 %v12761_v49  ;;  %v2241_v49 = vrot.slane %v2239_v16, 1  ;;  %v13502_v46 = vpop.f32.mrf.mxu2 }
 0x2f0   : > { %4833 = vmatmul.bf16.gmra.mxu0 %v12689_v18  ;;  %v4320_v18 = vadd.f32 %v12890_v51, %v4286_v36  ;;  %v13506_v4 = vpop.f32.mrf.mxu1  ;;  %v4322_v51 = vadd.f32 %v12916_v3, %v4288_v40  ;;  %v13514_v35 = vpop.f32.mrf.mxu0 }
 0x2f1   : > { %v2243_v20 = vsel %vm1385_vm2, %v2241_v49, %v2242_v28  ;;  %15760 = vst [vmem:[#allocation13_spill] sm:$0xff] %v13506_v4  ;;  %v2245_v49 = vsel %vm1385_vm2, %v2242_v28, %v13297_v23  ;;  %v10601_v28 = vld [vmem:[%s15546_s3 + $0x4b0] sm:$0xff] }
 0x2f2   : > { %v4354_v27 = vadd.f32 %v12989_v59, %v4320_v18  ;;  %v4291_v59 = vadd.f32 %v12944_v9, %v13329_v31  ;;  %v4356_v16 = vadd.f32 %v13019_v33, %v4322_v51  ;;  %v10602_v18 = vld [vmem:[%s15546_s3 + $0x4b8] sm:$0xff]  ;;  %v15765_v9 = vld [vmem:[#allocation62_spill] sm:$0xff] }
 0x2f3   : > { %v4384_v47 = vpop.f32.mrf.mxu3  ;;  %v4293_v33 = vadd.f32 %v15765_v9, %v13353_v42  ;;  %4776 = vmatpush.bf16.msra.mxu3 %v10602_v18  ;;  %v15770_v42 = vld [vmem:[#allocation47_spill] sm:$0xff]  ;;  %v10599_v18 = vld [vmem:[%s15546_s3 + $0x4a0] sm:$0xff] }
 0x2f4   : > { %v13494_v5 = vadd.f32 %v4384_v47, %v4351_v41  ;;  %v4325_v47 = vadd.f32 %v12928_v39, %v4291_v59 }
 0x2f7   : > { %v13525_v3 = vpop.f32.mrf.mxu2  ;;  %4777 = vmatpush.bf16.msra.mxu3 %v10601_v28 }
 0x2f8   : > { %4648 = vmatmul.bf16.vlgmr.msrb.gmra.mxu3 %v2243_v20  ;;  %v13523_v41 = vpop.f32.mrf.mxu1  ;;  %v13535_v31 = vpop.f32.mrf.mxu0  ;;  %v15766_v20 = vld [vmem:[#allocation29_spill] sm:$0xff] }
 0x2f9   : > { %v4359_v40 = vadd.f32 %v15766_v20, %v4325_v47 }
 0x2fb   : > { %v4387_v57 = vpop.f32.mrf.mxu3  ;;  %4872 = vmatmul.bf16.gmra.mxu1 %v2505_v54  ;;  %4778 = vmatpush.bf16.msra.mxu3 %v10600_v2  ;;  %v10597_v2 = vld [vmem:[%s15546_s3 + $0x490] sm:$0xff] }
 0x2fc   : > { %v13508_v13 = vadd.f32 %v4387_v57, %v4354_v27  ;;  %v15768_v57 = vld [vmem:[#allocation61_spill] sm:$0xff] }
 0x2fd   : > { %v4327_v23 = vadd.f32 %v15768_v57, %v4293_v33  ;;  %v15775_v33 = vld [vmem:[#allocation16_spill] sm:$0xff]  ;;  %v15777_v57 = vld [vmem:[#allocation43_spill] sm:$0xff] }
 0x2fe   : > { %v4298_v20 = vadd.f32 %v15775_v33, %v13398_v43  ;;  %v10596_v43 = vld [vmem:[%s15546_s3 + $0x488] sm:$0xff]  ;;  %v10595_v33 = vld [vmem:[%s15546_s3 + $0x480] sm:$0xff] }
 0x2ff   : > { %4901 = vmatmul.bf16.gmra.mxu2 %v2508_v32  ;;  %v13547_v0 = vpop.f32.mrf.mxu2  ;;  %v15771_v32 = vld [vmem:[#allocation18_spill] sm:$0xff]  ;;  %4779 = vmatpush.bf16.msra.mxu3 %v10599_v18  ;;  %v15781_v18 = vld [vmem:[#allocation64_spill] sm:$0xff] }
 0x300   : > { %4838 = vmatmul.bf16.gmra.mxu0 %v15764_v50  ;;  %v13545_v51 = vpop.f32.mrf.mxu1  ;;  %v4296_v55 = vadd.f32 %v15771_v32, %v13368_v11  ;;  %v15772_v50 = vld [vmem:[#allocation65_spill] sm:$0xff]  ;;  %v15779_v32 = vld [vmem:[#allocation51_spill] sm:$0xff] }
 0x301   : > { %15769 = vst [vmem:[#allocation36_spill] sm:$0xff] %v13545_v51  ;;  %v4361_v59 = vadd.f32 %v15772_v50, %v4327_v23  ;;  %v10598_v11 = vld [vmem:[%s15546_s3 + $0x498] sm:$0xff] }
 0x303   : > { %v4389_v54 = vpop.f32.mrf.mxu3  ;;  %4780 = vmatpush.bf16.msra.mxu3 %v10598_v11 }
 0x304   : > { %v13521_v36 = vadd.f32 %v4389_v54, %v4356_v16  ;;  %v13556_v54 = vpop.f32.mrf.mxu0 }
 0x305   : > { %15773 = vst [vmem:[#allocation34_spill] sm:$0xff] %v13556_v54 }
 0x307   : > { %4781 = vmatpush.bf16.msra.mxu3 %v10597_v2  ;;  %v15785_v2 = vld [vmem:[#allocation66_spill] sm:$0xff] }
 0x308   : > { %4653 = vmatmul.bf16.gmra.mxu3 %v2245_v49  ;;  %v15774_v49 = vld [vmem:[#allocation63_spill] sm:$0xff]  ;;  %v13565_v9 = vpop.f32.mrf.mxu1 }
 0x30b   : > { %v4392_v27 = vpop.f32.mrf.mxu3  ;;  %4988 = vmatmul.bf16.vlgmr.msra.gmra.mxu1 %v15767_v14  ;;  %4782 = vmatpush.bf16.msra.mxu3 %v10596_v43  ;;  %v15786_v43 = vld [vmem:[#allocation57_spill] sm:$0xff] }
 0x30c   : > { %v13539_v39 = vadd.f32 %v4392_v27, %v4359_v40  ;;  %v15776_v40 = vld [vmem:[#allocation26_spill] sm:$0xff]  ;;  %v13576_v28 = vpop.f32.mrf.mxu0 }
 0x30f   : > { %4906 = vmatmul.bf16.gmra.mxu2 %v2507_v30  ;;  %v4330_v30 = vadd.f32 %v15774_v49, %v4296_v55  ;;  %v15780_v55 = vld [vmem:[#allocation8_spill] sm:$0xff]  ;;  %4783 = vmatpush.bf16.msra.mxu3 %v10595_v33 }
 0x310   : > { %4954 = vmatmul.bf16.vlgmr.msra.gmra.mxu0 %v15770_v42  ;;  %v4412_v50 = vadd.f32 %v15780_v55, %v13425_v37  ;;  %v15783_v37 = vld [vmem:[#allocation27_spill] sm:$0xff]  ;;  %v15787_v55 = vld [vmem:[#allocation68_spill] sm:$0xff] }
 0x311   : > { %v4364_v27 = vadd.f32 %v15776_v40, %v4330_v30  ;;  %v15782_v40 = vld [vmem:[#allocation45_spill] sm:$0xff] }
 0x312   : > { %v4446_v11 = vadd.f32 %v15781_v18, %v4412_v50  ;;  %v4417_v50 = vadd.f32 %v15787_v55, %v13476_v34 }
 0x313   : > { %v4394_v16 = vpop.f32.mrf.mxu3 }
 0x314   : > { %v13558_v47 = vadd.f32 %v4394_v16, %v4361_v59  ;;  %v13589_v16 = vpop.f32.mrf.mxu1 }
 0x318   : > { %4658 = vmatmul.bf16.gmra.mxu3 %v13303_v38  ;;  %v15778_v38 = vld [vmem:[#allocation22_spill] sm:$0xff] }
 0x319   : > { %v4332_v42 = vadd.f32 %v15778_v38, %v4298_v20  ;;  %v13597_v20 = vpop.f32.mrf.mxu0 }
 0x31b   : > { %v4397_v14 = vpop.f32.mrf.mxu3  ;;  %4993 = vmatmul.bf16.gmra.mxu1 %v15777_v57  ;;  %v4366_v59 = vadd.f32 %v13108_v62, %v4332_v42  ;;  %v4414_v62 = vadd.f32 %v15783_v37, %v13449_v45  ;;  %v15784_v57 = vld [vmem:[#allocation48_spill] sm:$0xff]  ;;  %v15790_v37 = vld [vmem:[#allocation41_spill] sm:$0xff] }
 0x31c   : > { %v13574_v23 = vadd.f32 %v4397_v14, %v4364_v27  ;;  %v4480_v27 = vadd.f32 %v13134_v60, %v4446_v11  ;;  %v13606_v42 = vpop.f32.mrf.mxu1  ;;  %v15789_v11 = vld [vmem:[#allocation67_spill] sm:$0xff] }
 0x31d   : > { %v4451_v33 = vadd.f32 %v15789_v11, %v4417_v50  ;;  %v15796_v50 = vld [vmem:[#allocation58_spill] sm:$0xff]  ;;  %v15797_v11 = vld [vmem:[#allocation72_spill] sm:$0xff] }
 0x320   : > { %4959 = vmatmul.bf16.gmra.mxu0 %v15779_v32  ;;  %v4448_v32 = vadd.f32 %v15785_v2, %v4414_v62  ;;  %v15792_v62 = vld [vmem:[#allocation70_spill] sm:$0xff] }
 0x323   : > { %v4399_v49 = vpop.f32.mrf.mxu3 }
 0x324   : > { %v13591_v30 = vadd.f32 %v4399_v49, %v4366_v59  ;;  %v13612_v59 = vpop.f32.mrf.mxu0  ;;  %v15788_v49 = vld [vmem:[#allocation30_spill] sm:$0xff] }
 0x325   : > { %v4482_v45 = vadd.f32 %v15788_v49, %v4448_v32  ;;  %v15795_v49 = vld [vmem:[#allocation12_spill] sm:$0xff] }
 0x328   : > { %4663 = vmatmul.bf16.gmra.mxu3 %v15782_v40  ;;  %v13618_v40 = vpop.f32.mrf.mxu1 }
 0x32b   : > { %v4513_v14 = vpop.f32.mrf.mxu3  ;;  %4998 = vmatmul.bf16.gmra.mxu1 %v15784_v57  ;;  %v15793_v57 = vld [vmem:[#allocation73_spill] sm:$0xff] }
 0x32c   : > { %v13604_v38 = vadd.f32 %v4513_v14, %v4480_v27  ;;  %v15791_v27 = vrot.slane %v15790_v37, 1  ;;  %v4419_v14 = vadd.f32 %v15792_v62, %v13494_v5  ;;  %v4485_v2 = vadd.f32 %v15793_v57, %v4451_v33  ;;  %v13626_v55 = vpop.f32.mrf.mxu0 }
 0x32d   : > { %v4422_v37 = vadd.f32 %v15797_v11, %v13508_v13  ;;  %v15803_v11 = vld [vmem:[#allocation49_spill] sm:$0xff] }
 0x330   : > { %4964 = vmatmul.bf16.gmra.mxu0 %v15786_v43  ;;  %v15794_v43 = vld [vmem:[#allocation53_spill] sm:$0xff] }
 0x333   : > { %v4515_v18 = vpop.f32.mrf.mxu3 }
 0x334   : > { %v13615_v60 = vadd.f32 %v4515_v18, %v4482_v45  ;;  %v4453_v45 = vadd.f32 %v15795_v49, %v4419_v14  ;;  %v13632_v18 = vpop.f32.mrf.mxu1 }
 0x336   : > { %v4487_v5 = vadd.f32 %v13223_v48, %v4453_v45 }
 0x338   : > { %4668 = vmatmul.bf16.gmra.mxu3 %v15791_v27  ;;  %v15798_v27 = vld [vmem:[#allocation19_spill] sm:$0xff] }
 0x339   : > { %v2445_v33 = vrot.slane %v15798_v27, 1 }
 0x33b   : > { %v4518_v34 = vpop.f32.mrf.mxu3  ;;  %5003 = vmatmul.bf16.gmra.mxu1 %v15794_v43  ;;  %v15799_v43 = vld [vmem:[#allocation15_spill] sm:$0xff] }
 0x33c   : > { %v13628_v32 = vadd.f32 %v4518_v34, %v4485_v2  ;;  %v2444_v51 = vrot.slane %v15799_v43, 1  ;;  %v13641_v2 = vpop.f32.mrf.mxu0  ;;  %v15800_v34 = vld [vmem:[#allocation71_spill] sm:$0xff]  ;;  %v13648_v48 = vpop.f32.mrf.mxu1 }
 0x33d   : > { %v4456_v14 = vadd.f32 %v15800_v34, %v4422_v37  ;;  %15802 = vst [vmem:[#allocation38_spill] sm:$0xff] %v13648_v48  ;;  %v15806_v37 = vld [vmem:[#allocation52_spill] sm:$0xff] }
 0x33e   : > { %v2446_v49 = vsel %vm1385_vm2, %v2444_v51, %v2445_v33  ;;  %v15807_v51 = vrot.slane %v15806_v37, 1  ;;  %v15808_v34 = vld [vmem:[#allocation28_spill] sm:$0xff]  ;;  %v15812_v37 = vld [vmem:[#allocation31_spill] sm:$0xff] }
 0x33f   : > { %v4490_v13 = vadd.f32 %v13255_v12, %v4456_v14  ;;  %v15809_v14 = vld [vmem:[#allocation25_spill] sm:$0xff] }
 0x340   : > { %4969 = vmatmul.bf16.gmra.mxu0 %v15796_v50  ;;  %v15801_v50 = vld [vmem:[#allocation17_spill] sm:$0xff] }
 0x341   : > { %v4424_v54 = vadd.f32 %v15801_v50, %v13521_v36  ;;  %v4427_v36 = vadd.f32 %v15808_v34, %v13539_v39  ;;  %v10632_v34 = vld [vmem:[%s15546_s3 + $0x5a8] sm:$0xff] }
 0x343   : > { %v4520_v62 = vpop.f32.mrf.mxu3 }
 0x344   : > { %v13638_v57 = vadd.f32 %v4520_v62, %v4487_v5  ;;  %v15804_v5 = vrot.slane %v15803_v11, 1  ;;  %v15805_v62 = vld [vmem:[#allocation21_spill] sm:$0xff]  ;;  %v13655_v4 = vpop.f32.mrf.mxu0  ;;  %v15810_v11 = vld [vmem:[#allocation74_spill] sm:$0xff] }
 0x345   : > { %v4458_v43 = vadd.f32 %v15805_v62, %v4424_v54  ;;  %v10634_v54 = vld [vmem:[%s15546_s3 + $0x5b8] sm:$0xff] }
 0x346   : > { %4912 = vmatpush.bf16.msrb.mxu3 %v10634_v54 }
 0x347   : > { %v4492_v12 = vadd.f32 %v13276_v19, %v4458_v43 }
 0x348   : > { %4784 = vmatmul.bf16.vlgmr.msra.gmra.mxu3 %v2446_v49  ;;  %v2467_v49 = vrot.slane %v15809_v14, 1  ;;  %v15813_v14 = vld [vmem:[#allocation76_spill] sm:$0xff] }
 0x34b   : > { %v4523_v45 = vpop.f32.mrf.mxu3  ;;  %5008 = vmatmul.bf16.gmra.mxu1 %v15804_v5  ;;  %v15811_v5 = vld [vmem:[#allocation75_spill] sm:$0xff] }
 0x34c   : > { %v13652_v27 = vadd.f32 %v4523_v45, %v4490_v13  ;;  %v4461_v13 = vadd.f32 %v15810_v11, %v4427_v36  ;;  %v2468_v45 = vsel %vm1385_vm2, %v2445_v33, %v2467_v49  ;;  %v4429_v62 = vadd.f32 %v15811_v5, %v13558_v47  ;;  %v10633_v33 = vld [vmem:[%s15546_s3 + $0x5b0] sm:$0xff]  ;;  %v10631_v11 = vld [vmem:[%s15546_s3 + $0x5a0] sm:$0xff] }
 0x34d   : > { %4913 = vmatpush.bf16.msrb.mxu3 %v10633_v33  ;;  %v4432_v47 = vadd.f32 %v13266_v6, %v13574_v23  ;;  %v10630_v6 = vld [vmem:[%s15546_s3 + $0x598] sm:$0xff] }
 0x34e   : > { %v4495_v39 = vadd.f32 %v13306_v53, %v4461_v13  ;;  %v15814_v13 = vld [vmem:[#allocation46_spill] sm:$0xff] }
 0x350   : > { %4974 = vmatmul.bf16.gmra.mxu0 %v15807_v51  ;;  %v4463_v51 = vadd.f32 %v15812_v37, %v4429_v62  ;;  %v10628_v37 = vld [vmem:[%s15546_s3 + $0x588] sm:$0xff] }
 0x351   : > { %4914 = vmatpush.bf16.msrb.mxu3 %v10632_v34  ;;  %v15818_v34 = vld [vmem:[#allocation10_spill] sm:$0xff] }
 0x352   : > { %v4497_v53 = vadd.f32 %v13331_v61, %v4463_v51  ;;  %v4434_v61 = vadd.f32 %v13291_v8, %v13591_v30  ;;  %v15817_v51 = vld [vmem:[#allocation33_spill] sm:$0xff] }
 0x353   : > { %v4525_v50 = vpop.f32.mrf.mxu3  ;;  %v4548_v8 = vadd.f32 %v15817_v51, %v13604_v38 }
 0x354   : > { %v13663_v48 = vadd.f32 %v4525_v50, %v4492_v12  ;;  %v4466_v50 = vadd.f32 %v15813_v14, %v4432_v47  ;;  %v4550_v14 = vadd.f32 %v13351_v21, %v13615_v60  ;;  %v15821_v60 = vld [vmem:[#allocation50_spill] sm:$0xff] }
 0x355   : > { %4915 = vmatpush.bf16.msrb.mxu3 %v10631_v11  ;;  %v4582_v47 = vadd.f32 %v15818_v34, %v4548_v8 }
 0x356   : > { %v4500_v23 = vadd.f32 %v13358_v1, %v4466_v50  ;;  %v4630_v50 = vpop.f32.mrf.mxu2 }
 0x357   : > { %v4616_v38 = vadd.f32 %v13423_v58, %v4582_v47  ;;  %v15825_v47 = vld [vmem:[#allocation69_spill] sm:$0xff] }
 0x358   : > { %4789 = vmatmul.bf16.gmra.mxu3 %v2468_v45  ;;  %v15815_v45 = vrot.slane %v15814_v13, 1  ;;  %v15820_v13 = vld [vmem:[#allocation23_spill] sm:$0xff] }
 0x359   : > { %4916 = vmatpush.bf16.msrb.mxu3 %v10630_v6  ;;  %v13727_v6 = vpop.f32.mrf.mxu1 }
 0x35a   : > { %v2484_v54 = vsel %vm1385_vm2, %v2467_v49, %v15815_v45  ;;  %v10629_v49 = vld [vmem:[%s15546_s3 + $0x590] sm:$0xff]  ;;  %v4584_v45 = vadd.f32 %v15820_v13, %v4550_v14 }
 0x35b   : > { %v4528_v19 = vpop.f32.mrf.mxu3 }
 0x35c   : > { %v13673_v43 = vadd.f32 %v4528_v19, %v4495_v39  ;;  %v15816_v39 = vld [vmem:[#allocation32_spill] sm:$0xff] }
 0x35d   : > { %v4468_v19 = vadd.f32 %v15816_v39, %v4434_v61  ;;  %4917 = vmatpush.bf16.msrb.mxu3 %v10629_v49  ;;  %v4553_v61 = vadd.f32 %v13370_v29, %v13628_v32  ;;  %v4555_v49 = vadd.f32 %v13410_v15, %v13638_v57  ;;  %v4558_v15 = vadd.f32 %v13446_v56, %v13652_v27 }
 0x35e   : > { %v13734_v21 = vpop.f32.mrf.mxu2 }
 0x35f   : > { %v4502_v1 = vadd.f32 %v13392_v44, %v4468_v19  ;;  %v4587_v58 = vadd.f32 %v13361_v17, %v4553_v61  ;;  %v4589_v32 = vadd.f32 %v13394_v22, %v4555_v49  ;;  %v15823_v17 = vld [vmem:[#allocation24_spill] sm:$0xff] }
 0x360   : > { %v15824_v34 = vrot.slane %v15823_v17, 2 }
 0x361   : > { %4918 = vmatpush.bf16.msrb.mxu3 %v10628_v37  ;;  %v4621_v37 = vadd.f32 %v13483_v24, %v4587_v58  ;;  %v13743_v51 = vpop.f32.mrf.mxu1  ;;  %v4623_v24 = vadd.f32 %v13502_v46, %v4589_v32  ;;  %v4560_v46 = vadd.f32 %v13474_v26, %v13663_v48  ;;  %v15826_v48 = vld [vmem:[#allocation55_spill] sm:$0xff] }
 0x363   : > { %v4530_v36 = vpop.f32.mrf.mxu3 }
 0x364   : > { %v13685_v12 = vadd.f32 %v4530_v36, %v4497_v53  ;;  %v10627_v53 = vld [vmem:[%s15546_s3 + $0x580] sm:$0xff] }
 0x365   : > { %v15819_v36 = vld [vmem:[#allocation54_spill] sm:$0xff]  ;;  %4919 = vmatpush.bf16.msrb.mxu3 %v10627_v53  ;;  %v2395_v53 = vsel %vm1463_vm3, %v15825_v47, %v15824_v34 }
 0x366   : > { %v4635_v8 = vpop.f32.mrf.mxu2  ;;  %v2457_v22 = vrot.slane %v2395_v53, 1 }
 0x368   : > { %4794 = vmatmul.bf16.gmra.mxu3 %v2484_v54  ;;  %v13725_v54 = vpop.f32.mrf.mxu0 }
 0x36b   : > { %v4533_v5 = vpop.f32.mrf.mxu3 }
 0x36c   : > { %v13700_v62 = vadd.f32 %v4533_v5, %v4500_v23  ;;  %v4618_v23 = vadd.f32 %v13451_v10, %v4584_v45  ;;  %v4592_v45 = vadd.f32 %v13427_v25, %v4558_v15  ;;  %v4563_v25 = vadd.f32 %v13496_v52, %v13673_v43 }
 0x36e   : > { %v13766_v56 = vpop.f32.mrf.mxu2  ;;  %v4626_v27 = vadd.f32 %v13525_v3, %v4592_v45  ;;  %v4597_v26 = vadd.f32 %v13486_v63, %v4563_v25  ;;  %v4568_v53 = vadd.f32 %v13535_v31, %v13700_v62 }
 0x370   : > { %v13738_v19 = vpop.f32.mrf.mxu0  ;;  %v4631_v34 = vadd.f32 %v4630_v50, %v4597_v26 }
 0x373   : > { %v4535_v30 = vpop.f32.mrf.mxu3 }
 0x374   : > { %v13712_v33 = vadd.f32 %v4535_v30, %v4502_v1  ;;  %v15822_v1 = vld [vmem:[#allocation35_spill] sm:$0xff] }
 0x375   : > { %v2392_v30 = vrot.slane %v15822_v1, 2 }
 0x377   : > { %v2393_v57 = vsel %vm1463_vm3, %v2392_v30, %v15825_v47  ;;  %v15827_v30 = vrot.slane %v15826_v48, 1 }
 0x378   : > { %4799 = vmatmul.bf16.gmra.mxu3 %v15819_v36  ;;  %v13758_v36 = vpop.f32.mrf.mxu0  ;;  %v2456_v13 = vrot.slane %v2393_v57, 1 }
 0x379   : > { %v2476_v17 = vsel %vm1385_vm2, %v2457_v22, %v15827_v30 }
 0x37a   : > { %v2458_v61 = vsel %vm1385_vm2, %v2456_v13, %v2457_v22 }
 0x37b   : > { %v4649_v44 = vpop.f32.mrf.mxu3 }
 0x37c   : > { %v13722_v11 = vadd.f32 %v4649_v44, %v4616_v38  ;;  %v13762_v44 = vpop.f32.mrf.mxu1 }
 0x37e   : > { %v4684_v31 = vadd.f32 %v13576_v28, %v13722_v11 }
 0x380   : > { %v13771_v58 = vpop.f32.mrf.mxu0 }
 0x383   : > { %v4651_v5 = vpop.f32.mrf.mxu3 }
 0x384   : > { %v13732_v39 = vadd.f32 %v4651_v5, %v4618_v23  ;;  %v13774_v49 = vpop.f32.mrf.mxu1 }
 0x388   : > { %4804 = vmatmul.bf16.gmra.mxu3 %v15821_v60  ;;  %v4594_v60 = vadd.f32 %v13460_v7, %v4560_v46  ;;  %v13782_v3 = vpop.f32.mrf.mxu0 }
 0x38b   : > { %v4654_v29 = vpop.f32.mrf.mxu3 }
 0x38c   : > { %v13745_v10 = vadd.f32 %v4654_v29, %v4621_v37  ;;  %v4628_v37 = vadd.f32 %v13547_v0, %v4594_v60  ;;  %v4751_v29 = vpop.f32.mrf.mxu2  ;;  %v13787_v7 = vpop.f32.mrf.mxu1 }
 0x38e   : > { %v4689_v28 = vadd.f32 %v13612_v59, %v13745_v10 }
 0x390   : > { %v13791_v0 = vpop.f32.mrf.mxu0 }
 0x393   : > { %v4656_v14 = vpop.f32.mrf.mxu3 }
 0x394   : > { %v13760_v38 = vadd.f32 %v4656_v14, %v4623_v24  ;;  %v13789_v43 = vpop.f32.mrf.mxu2  ;;  %v13795_v63 = vpop.f32.mrf.mxu1  ;;  %v4602_v24 = vadd.f32 %v13523_v41, %v4568_v53  ;;  %v15828_v14 = vld [vmem:[#allocation59_spill] sm:$0xff]  ;;  %v4718_v41 = vadd.f32 %v13565_v9, %v4684_v31  ;;  %v4723_v9 = vadd.f32 %v13606_v42, %v4689_v28 }
 0x396   : > { %v4636_v22 = vadd.f32 %v4635_v8, %v4602_v24  ;;  %v15829_v8 = vld [vmem:[#allocation60_spill] sm:$0xff]  ;;  %v4752_v60 = vadd.f32 %v4751_v29, %v4718_v41 }
 0x398   : > { %4920 = vmatmul.bf16.vlgmr.msrb.gmra.mxu3 %v2458_v61  ;;  %v13801_v50 = vpop.f32.mrf.mxu0 }
 0x39b   : > { %v4659_v23 = vpop.f32.mrf.mxu3 }
 0x39c   : > { %v4660_v5 = vadd.f32 %v4659_v23, %v4626_v27  ;;  %v4756_v57 = vpop.f32.mrf.mxu2  ;;  %v13803_v61 = vpop.f32.mrf.mxu1 }
 0x39d   : > { %v4757_v29 = vadd.f32 %v4756_v57, %v4723_v9 }
 0x3a0   : > { %v13811_v27 = vpop.f32.mrf.mxu0 }
 0x3a3   : > { %v4661_v32 = vpop.f32.mrf.mxu3 }
 0x3a4   : > { %v13779_v1 = vadd.f32 %v4661_v32, %v4628_v37  ;;  %v13805_v46 = vpop.f32.mrf.mxu2  ;;  %v13814_v23 = vpop.f32.mrf.mxu1 }
 0x3a8   : > { %4925 = vmatmul.bf16.gmra.mxu3 %v2476_v17  ;;  %v13817_v26 = vpop.f32.mrf.mxu0  ;;  %v15830_v17 = vld [vmem:[#allocation56_spill] sm:$0xff] }
 0x3ab   : > { %v4664_v47 = vpop.f32.mrf.mxu3 }
 0x3ac   : > { %v4665_v52 = vadd.f32 %v4664_v47, %v4631_v34  ;;  %v4761_v25 = vpop.f32.mrf.mxu2  ;;  %v13819_v48 = vpop.f32.mrf.mxu1 }
 0x3ae   : > { %v4699_v28 = vadd.f32 %v13725_v54, %v4665_v52 }
 0x3b0   : > { %v13827_v34 = vpop.f32.mrf.mxu0  ;;  %v4733_v9 = vadd.f32 %v13727_v6, %v4699_v28 }
 0x3b3   : > { %v13797_v15 = vpop.f32.mrf.mxu3 }
 0x3b4   : > { %v13823_v30 = vpop.f32.mrf.mxu2  ;;  %v13829_v47 = vpop.f32.mrf.mxu1 }
 0x3b8   : > { %4930 = vmatmul.bf16.gmra.mxu3 %v15828_v14 }
 0x3bb   : > { %v4669_v13 = vpop.f32.mrf.mxu3 }
 0x3bc   : > { %v4670_v45 = vadd.f32 %v4669_v13, %v4636_v22  ;;  %v4766_v14 = vpop.f32.mrf.mxu2  ;;  %v4694_v22 = vadd.f32 %v13641_v2, %v4660_v5  ;;  %v13832_v13 = vpop.f32.mrf.mxu0 }
 0x3bd   : > { %v13834_v10 = vpop.f32.mrf.mxu1 }
 0x3be   : > { %v4728_v31 = vadd.f32 %v13632_v18, %v4694_v22 }
 0x3c0   : > { %v4762_v41 = vadd.f32 %v4761_v25, %v4728_v31 }
 0x3c3   : > { %v13809_v62 = vpop.f32.mrf.mxu3 }
 0x3c4   : > { %v13837_v42 = vpop.f32.mrf.mxu2  ;;  %v13841_v57 = vpop.f32.mrf.mxu0 }
 0x3c8   : > { %4935 = vmatmul.bf16.gmra.mxu3 %v15829_v8 }
 0x3cb   : > { %v4785_v37 = vpop.f32.mrf.mxu3 }
 0x3cc   : > { %v4786_v32 = vadd.f32 %v4785_v37, %v4752_v60  ;;  %v13843_v37 = vpop.f32.mrf.mxu1  ;;  %v4771_v2 = vpop.f32.mrf.mxu2 }
 0x3d3   : > { %v4787_v11 = vpop.f32.mrf.mxu3 }
 0x3d4   : > { %v13851_v18 = vpop.f32.mrf.mxu1  ;;  %v13855_v22 = vpop.f32.mrf.mxu2 }
 0x3d5   : > { %15832 = vst [vmem:[#allocation20_spill] sm:$0xff] %v13851_v18 }
 0x3d6   : > { %15833 = vst [vmem:[#allocation9_spill] sm:$0xff] %v13855_v22 }
 0x3d8   : > { %4940 = vmatmul.bf16.gmra.mxu3 %v15830_v17  ;;  %v13849_v17 = vpop.f32.mrf.mxu0 }
 0x3d9   : > { %15831 = vst [vmem:[#allocation40_spill] sm:$0xff] %v13849_v17 }
 0x3db   : > { %v4790_v53 = vpop.f32.mrf.mxu3 }
 0x3dc   : > { %v4791_v24 = vadd.f32 %v4790_v53, %v4757_v29  ;;  %v4767_v29 = vadd.f32 %v4766_v14, %v4733_v9  ;;  %v13860_v54 = vpop.f32.mrf.mxu1  ;;  %v4686_v14 = vadd.f32 %v13597_v20, %v13732_v39  ;;  %v4691_v20 = vadd.f32 %v13626_v55, %v13760_v38 }
 0x3dd   : > { %15835 = vst [vmem:[#allocation44_spill] sm:$0xff] %v13860_v54 }
 0x3e0   : > { %v13857_v31 = vpop.f32.mrf.mxu0 }
 0x3e1   : > { %15834 = vst [vmem:[#allocation42_spill] sm:$0xff] %v13857_v31 }
 0x3e3   : > { %v4792_v59 = vpop.f32.mrf.mxu3 }
 0x3e8   : > { %v4955_v17 = vpop.f32.mrf.mxu0 }
 0x3eb   : > { %v4795_v8 = vpop.f32.mrf.mxu3 }
 0x3ec   : > { %v13839_v60 = vadd.f32 %v4795_v8, %v4762_v41  ;;  %v4704_v41 = vadd.f32 %v13758_v36, %v4670_v45  ;;  %v4887_v8 = vpop.f32.mrf.mxu2 }
 0x3ee   : > { %v4738_v6 = vadd.f32 %v13762_v44, %v4704_v41 }
 0x3f0   : > { %v4772_v28 = vadd.f32 %v4771_v2, %v4738_v6  ;;  %v4957_v54 = vpop.f32.mrf.mxu0 }
 0x3f3   : > { %v13846_v5 = vpop.f32.mrf.mxu3 }
 0x3f4   : > { %v4889_v31 = vpop.f32.mrf.mxu2 }
 0x3fb   : > { %v4800_v25 = vpop.f32.mrf.mxu3 }
 0x3fc   : > { %v13853_v53 = vadd.f32 %v4800_v25, %v4767_v29  ;;  %v4989_v29 = vpop.f32.mrf.mxu1  ;;  %v4720_v25 = vadd.f32 %v13589_v16, %v4686_v14  ;;  %v4892_v41 = vpop.f32.mrf.mxu2  ;;  %v4820_v16 = vadd.f32 %v13782_v3, %v4786_v32 }
 0x3fe   : > { %v4754_v45 = vadd.f32 %v13789_v43, %v4720_v25  ;;  %v4825_v43 = vadd.f32 %v13801_v50, %v4791_v24  ;;  %v4565_v50 = vadd.f32 %v13514_v35, %v13685_v12  ;;  %v4830_v35 = vadd.f32 %v13817_v26, %v13839_v60 }
 0x400   : > { %v4788_v22 = vadd.f32 %v4787_v11, %v4754_v45  ;;  %v4854_v11 = vadd.f32 %v13787_v7, %v4820_v16  ;;  %v4859_v55 = vadd.f32 %v13803_v61, %v4825_v43  ;;  %v4696_v7 = vadd.f32 %v13655_v4, %v13779_v1  ;;  %v15839_v16 = vld [vmem:[#allocation38_spill] sm:$0xff] }
 0x402   : > { %v4822_v2 = vadd.f32 %v13791_v0, %v4788_v22  ;;  %v4888_v38 = vadd.f32 %v4887_v8, %v4854_v11  ;;  %v4893_v32 = vadd.f32 %v4892_v41, %v4859_v55  ;;  %v15838_v8 = vld [vmem:[#allocation13_spill] sm:$0xff] }
 0x403   : > { %v13862_v52 = vpop.f32.mrf.mxu3 }
 0x404   : > { %v4991_v44 = vpop.f32.mrf.mxu1  ;;  %v4856_v39 = vadd.f32 %v13795_v63, %v4822_v2 }
 0x406   : > { %v4890_v25 = vadd.f32 %v4889_v31, %v4856_v39 }
 0x40b   : > { %v4805_v18 = vpop.f32.mrf.mxu3 }
 0x40c   : > { %v13867_v9 = vadd.f32 %v4805_v18, %v4772_v28  ;;  %v4960_v18 = vpop.f32.mrf.mxu0  ;;  %v4725_v28 = vadd.f32 %v13618_v40, %v4691_v20  ;;  %v4994_v14 = vpop.f32.mrf.mxu1 }
 0x40e   : > { %15836 = vst [vmem:[#allocation39_spill] sm:$0xff] %v13867_v9  ;;  %v4759_v0 = vadd.f32 %v13805_v46, %v4725_v28 }
 0x410   : > { %v4793_v9 = vadd.f32 %v4792_v59, %v4759_v0 }
 0x412   : > { %v4827_v40 = vadd.f32 %v13811_v27, %v4793_v9  ;;  %v4730_v27 = vadd.f32 %v15839_v16, %v4696_v7 }
 0x413   : > { %v13870_v36 = vpop.f32.mrf.mxu3 }
 0x414   : > { %15837 = vst [vmem:[#allocation62_spill] sm:$0xff] %v13870_v36  ;;  %v4894_v36 = vpop.f32.mrf.mxu2  ;;  %v4962_v2 = vpop.f32.mrf.mxu0  ;;  %v4861_v61 = vadd.f32 %v13814_v23, %v4827_v40 }
 0x415   : > { %v4996_v24 = vpop.f32.mrf.mxu1 }
 0x416   : > { %v4895_v4 = vadd.f32 %v4894_v36, %v4861_v61  ;;  %v4864_v36 = vadd.f32 %v13819_v48, %v4830_v35  ;;  %v10667_v48 = vld [vmem:[%s15548_s5 + $0x74] sm:$0xf0]  ;;  %v4835_v35 = vadd.f32 %v13832_v13, %v13853_v53  ;;  %v10681_v13 = vld [vmem:[%s15548_s5 + $0xe4] sm:$0xf0] }
 0x41b   : > { %v4921_v6 = vpop.f32.mrf.mxu3 }
 0x41c   : > { %v4922_v3 = vadd.f32 %v4921_v6, %v4888_v38  ;;  %v4599_v6 = vadd.f32 %v15838_v8, %v4565_v50  ;;  %v4965_v1 = vpop.f32.mrf.mxu0  ;;  %v10665_v50 = vld [vmem:[%s15548_s5 + $0x64] sm:$0xf0] }
 0x41d   : > { %v4999_v11 = vpop.f32.mrf.mxu1 }
 0x41e   : > { %v4956_v59 = vadd.f32 %v4955_v17, %v4922_v3  ;;  %v4633_v17 = vadd.f32 %v13734_v21, %v4599_v6 }
 0x420   : > { %v4990_v28 = vadd.f32 %v4989_v29, %v4956_v59 }
 0x423   : > { %v4923_v45 = vpop.f32.mrf.mxu3 }
 0x424   : > { %v4924_v22 = vadd.f32 %v4923_v45, %v4890_v25  ;;  %v5014_v45 = vmax.f32 %v4990_v28, 0.0 }
 0x425   : > { %v5001_v8 = vpop.f32.mrf.mxu1 }
 0x426   : > { %v4958_v63 = vadd.f32 %v4957_v54, %v4924_v22  ;;  %v4897_v54 = vpop.f32.mrf.mxu2 }
 0x428   : > { %v4992_v31 = vadd.f32 %v4991_v44, %v4958_v63  ;;  %v4764_v44 = vadd.f32 %v13823_v30, %v4730_v27 }
 0x42a   : > { %v5015_v9 = vmax.f32 %v4992_v31, 0.0  ;;  %v4798_v29 = vadd.f32 %v13846_v5, %v4764_v44  ;;  %v9280_v5 = vld [vmem:[%s15548_s5 + $0x70] sm:$0xf] }
 0x42b   : > { %v4926_v46 = vpop.f32.mrf.mxu3 }
 0x42c   : > { %v4927_v20 = vadd.f32 %v4926_v46, %v4893_v32  ;;  %v4832_v55 = vadd.f32 %v13827_v34, %v4798_v29  ;;  %v9281_v32 = vor.u32 %v10667_v48, %v9280_v5  ;;  %v4967_v46 = vpop.f32.mrf.mxu0 }
 0x42e   : > { %v4961_v39 = vadd.f32 %v4960_v18, %v4927_v20  ;;  %v5031_v18 = vrot.slane %v5015_v9, 3  ;;  %v4899_v22 = vpop.f32.mrf.mxu2  ;;  %v4866_v20 = vadd.f32 %v13829_v47, %v4832_v55  ;;  %6173 = vmatpush.bf16.msra.mxu2 %v9281_v32  ;;  %v9264_v47 = vld [vmem:[%s15548_s5 + $0x50] sm:$0xf] }
 0x430   : > { %v4995_v41 = vadd.f32 %v4994_v14, %v4961_v39  ;;  %v4667_v14 = vadd.f32 %v13797_v15, %v4633_v17  ;;  %v4898_v15 = vadd.f32 %v4897_v54, %v4864_v36  ;;  %v4869_v36 = vadd.f32 %v13834_v10, %v4835_v35 }
 0x432   : > { %v13893_v12 = vmax.f32 %v4995_v41, 0.0  ;;  %v4701_v30 = vadd.f32 %v13738_v19, %v4667_v14  ;;  %v9272_v19 = vld [vmem:[%s15548_s5 + $0x60] sm:$0xf]  ;;  %v15841_v41 = vld [vmem:[#allocation36_spill] sm:$0xff] }
 0x433   : > { %v4928_v23 = vpop.f32.mrf.mxu3  ;;  %v9273_v54 = vor.u32 %v10665_v50, %v9272_v19 }
 0x434   : > { %v5032_v43 = vrot.slane %v13893_v12, 3  ;;  %v4929_v25 = vadd.f32 %v4928_v23, %v4895_v4  ;;  %v5060_v38 = vrot.slane %v13893_v12, 6  ;;  %v4735_v31 = vadd.f32 %v13743_v51, %v4701_v30  ;;  %v10683_v51 = vld [vmem:[%s15548_s5 + $0xf4] sm:$0xf0]  ;;  %v4970_v55 = vpop.f32.mrf.mxu0 }
 0x435   : > { %v10663_v4 = vld [vmem:[%s15548_s5 + $0x54] sm:$0xf0]  ;;  %v4900_v23 = vadd.f32 %v4899_v22, %v4866_v20  ;;  %6174 = vmatpush.bf16.msra.mxu2 %v9273_v54 }
 0x436   : > { %v5033_v26 = vsel %vm1561_vm6, %v5031_v18, %v5032_v43  ;;  %v4963_v60 = vadd.f32 %v4962_v2, %v4929_v25  ;;  %v4769_v17 = vadd.f32 %v13837_v42, %v4735_v31  ;;  %v9265_v18 = vor.u32 %v10663_v4, %v9264_v47  ;;  %v4902_v53 = vpop.f32.mrf.mxu2  ;;  %v10661_v42 = vld [vmem:[%s15548_s5 + $0x44] sm:$0xf0] }
 0x437   : > { %v5051_v0 = vmax.f32 %v5014_v45, %v5033_v26  ;;  %v15842_v47 = vld [vmem:[#allocation39_spill] sm:$0xff] }
 0x438   : > { %v4997_v21 = vadd.f32 %v4996_v24, %v4963_v60  ;;  %v15840_v24 = vld [vmem:[#allocation34_spill] sm:$0xff]  ;;  %v4803_v14 = vadd.f32 %v13862_v52, %v4769_v17 }
 0x439   : > { %v4570_v7 = vadd.f32 %v15840_v24, %v13712_v33  ;;  %v9344_v33 = vld [vmem:[%s15548_s5 + $0xf0] sm:$0xf]  ;;  %6175 = vmatpush.bf16.msra.mxu2 %v9265_v18 }
 0x43a   : > { %v13905_v63 = vmax.f32 %v4997_v21, 0.0 }
 0x43b   : > { %v4931_v3 = vpop.f32.mrf.mxu3  ;;  %v4604_v28 = vadd.f32 %v15841_v41, %v4570_v7  ;;  %v15843_v41 = vld [vmem:[#allocation40_spill] sm:$0xff] }
 0x43c   : > { %v5034_v34 = vrot.slane %v13905_v63, 3  ;;  %v5061_v2 = vrot.slane %v13905_v63, 6  ;;  %v4932_v40 = vadd.f32 %v4931_v3, %v4898_v15  ;;  %v4837_v3 = vadd.f32 %v13841_v57, %v4803_v14  ;;  %v15846_v14 = vld [vmem:[#allocation62_spill] sm:$0xff] }
 0x43d   : > { %v4638_v60 = vadd.f32 %v13766_v56, %v4604_v28  ;;  %v5004_v56 = vpop.f32.mrf.mxu1  ;;  %v4840_v28 = vadd.f32 %v15843_v41, %v15842_v47  ;;  %v9312_v41 = vld [vmem:[%s15548_s5 + $0xb0] sm:$0xf] }
 0x43e   : > { %v5035_v59 = vsel %vm1561_vm6, %v5032_v43, %v5034_v34  ;;  %v5062_v39 = vsel %vm1262_vm1, %v5060_v38, %v5061_v2  ;;  %v4966_v61 = vadd.f32 %v4965_v1, %v4932_v40  ;;  %v9336_v1 = vld [vmem:[%s15548_s5 + $0xe0] sm:$0xf]  ;;  %v4904_v31 = vpop.f32.mrf.mxu2  ;;  %v4871_v20 = vadd.f32 %v13843_v37, %v4837_v3 }
 0x43f   : > { %v5052_v6 = vmax.f32 %v5015_v9, %v5035_v59  ;;  %v5082_v16 = vmax.f32 %v5051_v0, %v5062_v39  ;;  %v9345_v9 = vor.u32 %v10683_v51, %v9344_v33  ;;  %v9337_v25 = vor.u32 %v10681_v13, %v9336_v1  ;;  %v4972_v51 = vpop.f32.mrf.mxu0  ;;  %v15844_v1 = vld [vmem:[#allocation9_spill] sm:$0xff] }
 0x440   : > { %v5000_v27 = vadd.f32 %v4999_v11, %v4966_v61  ;;  %v9256_v11 = vld [vmem:[%s15548_s5 + $0x40] sm:$0xf]  ;;  %v4672_v38 = vadd.f32 %v13809_v62, %v4638_v60  ;;  %v10679_v60 = vld [vmem:[%s15548_s5 + $0xd4] sm:$0xf0] }
 0x441   : > { %6187 = vmatpush.bf16.msra.mxu3 %v9345_v9  ;;  %v9257_v30 = vor.u32 %v10661_v42, %v9256_v11  ;;  %v5096_v48 = vrot.slane %v5082_v16, 1  ;;  %v5117_v10 = vrot.slane %v5082_v16, 2  ;;  %v4905_v9 = vadd.f32 %v4904_v31, %v4871_v20  ;;  %v10869_v20 = vld [vmem:[%s15550_s7 + $0x238] sm:$0xff] }
 0x442   : > { %v13946_v44 = vmax.f32 %v5000_v27, 0.0  ;;  %v4706_v32 = vadd.f32 %v13771_v58, %v4672_v38  ;;  %v9248_v38 = vld [vmem:[%s15548_s5 + $0x30] sm:$0xf] }
 0x443   : > { %v4933_v43 = vpop.f32.mrf.mxu3  ;;  %6176 = vmatpush.bf16.msra.mxu2 %v9257_v30 }
 0x444   : > { %v5036_v29 = vrot.slane %v13946_v44, 3  ;;  %v5063_v45 = vrot.slane %v13946_v44, 6  ;;  %v4934_v26 = vadd.f32 %v4933_v43, %v4900_v23  ;;  %v4740_v54 = vadd.f32 %v13774_v49, %v4706_v32  ;;  %v9656_v32 = vld [vmem:[%s15548_s5 + $0x360] sm:$0xf] }
 0x445   : > { %6188 = vmatpush.bf16.msra.mxu3 %v9337_v25  ;;  %v5006_v4 = vpop.f32.mrf.mxu1  ;;  %v15845_v25 = vld [vmem:[#allocation20_spill] sm:$0xff] }
 0x446   : > { %v5037_v0 = vsel %vm1561_vm6, %v5034_v34, %v5036_v29  ;;  %v5064_v21 = vsel %vm1262_vm1, %v5061_v2, %v5063_v45  ;;  %v4968_v22 = vadd.f32 %v4967_v46, %v4934_v26  ;;  %v4903_v2 = vadd.f32 %v4902_v53, %v4869_v36  ;;  %v4907_v42 = vpop.f32.mrf.mxu2  ;;  %v9328_v26 = vld [vmem:[%s15548_s5 + $0xd0] sm:$0xf] }
 0x447   : > { %v5053_v52 = vmax.f32 %v13893_v12, %v5037_v0  ;;  %v5083_v15 = vmax.f32 %v5052_v6, %v5064_v21  ;;  %v4774_v17 = vadd.f32 %v15844_v1, %v4740_v54  ;;  %v4874_v11 = vadd.f32 %v15845_v25, %v4840_v28  ;;  %v9664_v36 = vld [vmem:[%s15548_s5 + $0x370] sm:$0xf]  ;;  %v4975_v31 = vpop.f32.mrf.mxu0  ;;  %v9240_v54 = vld [vmem:[%s15548_s5 + $0x20] sm:$0xf]  ;;  %v10675_v1 = vld [vmem:[%s15548_s5 + $0xb4] sm:$0xf0] }
 0x448   : > { %v5002_v5 = vadd.f32 %v5001_v8, %v4968_v22  ;;  %v9329_v3 = vor.u32 %v10679_v60, %v9328_v26  ;;  %v9720_v25 = vld [vmem:[%s15548_s5 + $0x3e0] sm:$0xf]  ;;  %v9232_v26 = vld [vmem:[%s15548_s5 + $0x10] sm:$0xf]  ;;  %v10655_v60 = vld [vmem:[%s15548_s5 + $0x14] sm:$0xf0] }
 0x449   : > { %v5097_v19 = vrot.slane %v5083_v15, 1  ;;  %v5118_v34 = vrot.slane %v5083_v15, 2 }
 0x44a   : > { %v13967_v40 = vmax.f32 %v5002_v5, 0.0  ;;  %6189 = vmatpush.bf16.msra.mxu3 %v9329_v3 }
 0x44b   : > { %v5098_v62 = vsel %vm1385_vm2, %v5096_v48, %v5097_v19  ;;  %v5119_v12 = vsel %vm1463_vm3, %v5117_v10, %v5118_v34  ;;  %v4936_v50 = vpop.f32.mrf.mxu3  ;;  %v9320_v48 = vld [vmem:[%s15548_s5 + $0xc0] sm:$0xf]  ;;  %v10677_v10 = vld [vmem:[%s15548_s5 + $0xc4] sm:$0xf0] }
 0x44c   : > { %v5112_v24 = vmax.f32 %v5082_v16, %v5098_v62  ;;  %v5038_v57 = vrot.slane %v13967_v40, 3  ;;  %v5065_v7 = vrot.slane %v13967_v40, 6  ;;  %v4937_v46 = vadd.f32 %v4936_v50, %v4903_v2  ;;  %v15847_v62 = vld [vmem:[#allocation42_spill] sm:$0xff] }
 0x44e   : > { %v5133_v59 = vmax.f32 %v5112_v24, %v5119_v12  ;;  %v5039_v39 = vsel %vm1561_vm6, %v5036_v29, %v5038_v57  ;;  %v5066_v61 = vsel %vm1262_vm1, %v5063_v45, %v5065_v7  ;;  %v4971_v58 = vadd.f32 %v4970_v55, %v4937_v46  ;;  %v5152_v45 = vld [vmem:[#allocation3 + $0x4] sm:$0x1]  ;;  %v10763_v55 = vld [vmem:[%s15548_s5 + $0x374] sm:$0xf0]  ;;  %v9728_v46 = vld [vmem:[%s15548_s5 + $0x3f0] sm:$0xf] }
 0x44f   : > { %v5054_v8 = vmax.f32 %v13905_v63, %v5039_v39  ;;  %v13979_v6 = vmax.f32 %v5053_v52, %v5066_v61  ;;  %v4808_v29 = vadd.f32 %v15846_v14, %v4774_v17  ;;  %v9665_v5 = vor.u32 %v10763_v55, %v9664_v36  ;;  %v9648_v17 = vld [vmem:[%s15548_s5 + $0x350] sm:$0xf]  ;;  %v4909_v36 = vpop.f32.mrf.mxu2  ;;  %v9640_v55 = vld [vmem:[%s15548_s5 + $0x340] sm:$0xf] }
 0x450   : > { %v5139_v16 = vrot.slane %v5133_v59, 1  ;;  %v5141_v27 = vrot.slane %v5133_v59, 2  ;;  %v5005_v33 = vadd.f32 %v5004_v56, %v4971_v58  ;;  %v10659_v56 = vld [vmem:[%s15548_s5 + $0x34] sm:$0xf0] }
 0x451   : > { %v5099_v63 = vrot.slane %v13979_v6, 1  ;;  %v5120_v34 = vrot.slane %v13979_v6, 2  ;;  %v4842_v12 = vadd.f32 %v15847_v62, %v4808_v29  ;;  %6257 = vmatpush.bf16.msrb.mxu0 %v9665_v5  ;;  %v10779_v58 = vld [vmem:[%s15548_s5 + $0x3f4] sm:$0xf0] }
 0x452   : > { %v5143_v37 = vsel %vm346_vm0, %v5133_v59, %v5139_v16  ;;  %v13984_v35 = vmax.f32 %v5005_v33, 0.0  ;;  %v9729_v33 = vor.u32 %v10779_v58, %v9728_v46  ;;  %v10671_v58 = vld [vmem:[%s15548_s5 + $0x94] sm:$0xf0] }
 0x453   : > { %v5144_v49 = vsel %vm1262_vm1, %v5143_v37, %v5141_v27  ;;  %v4938_v23 = vpop.f32.mrf.mxu3 }
 0x454   : > { %v5145_v18 = vpack.c.bf16 %v5144_v49, %v5144_v49  ;;  %v5040_v13 = vrot.slane %v13984_v35, 3  ;;  %v5067_v53 = vrot.slane %v13984_v35, 6  ;;  %v4939_v43 = vadd.f32 %v4938_v23, %v4905_v9  ;;  %v5009_v49 = vpop.f32.mrf.mxu1  ;;  %6271 = vmatpush.bf16.msrb.mxu1 %v9729_v33  ;;  %v9704_v33 = vld [vmem:[%s15548_s5 + $0x3c0] sm:$0xf] }
 0x456   : > { %v5147_v0 = vrot.slane %v5145_v18, 5  ;;  %v14005_v21 = vsel %vm1561_vm6, %v5038_v57, %v5040_v13  ;;  %v5068_v22 = vsel %vm1262_vm1, %v5065_v7, %v5067_v53  ;;  %v4973_v30 = vadd.f32 %v4972_v51, %v4939_v43  ;;  %v10761_v7 = vld [vmem:[%s15548_s5 + $0x364] sm:$0xf0]  ;;  %v10759_v43 = vld [vmem:[%s15548_s5 + $0x354] sm:$0xf0] }
 0x457   : > { %v14016_v52 = vmax.f32 %v5054_v8, %v5068_v22  ;;  %v5055_v15 = vmax.f32 %v13946_v44, %v14005_v21  ;;  %v9249_v44 = vor.u32 %v10659_v56, %v9248_v38  ;;  %v9321_v57 = vor.u32 %v10677_v10, %v9320_v48  ;;  %v10657_v51 = vld [vmem:[%s15548_s5 + $0x24] sm:$0xf0]  ;;  %v9712_v56 = vld [vmem:[%s15548_s5 + $0x3d0] sm:$0xf]  ;;  %v10775_v48 = vld [vmem:[%s15548_s5 + $0x3d4] sm:$0xf0] }
 0x458   : > { %v5148_v19 = vrot.slane %v5147_v0, 4  ;;  %5151 = vst [vmem:[#allocation3] sm:$0x8] %v5147_v0  ;;  %v5007_v2 = vadd.f32 %v5006_v4, %v4973_v30  ;;  %v9657_v61 = vor.u32 %v10761_v7, %v9656_v32  ;;  %v4908_v8 = vadd.f32 %v4907_v42, %v4874_v11  ;;  %v10777_v11 = vld [vmem:[%s15548_s5 + $0x3e4] sm:$0xf0] }
 0x459   : > { %v5100_v50 = vrot.slane %v14016_v52, 1  ;;  %v5121_v24 = vrot.slane %v14016_v52, 2  ;;  %6177 = vmatpush.bf16.msra.mxu2 %v9249_v44  ;;  %v9241_v4 = vor.u32 %v10657_v51, %v9240_v54  ;;  %6190 = vmatpush.bf16.msra.mxu3 %v9321_v57  ;;  %v9649_v21 = vor.u32 %v10759_v43, %v9648_v17  ;;  %v10757_v38 = vld [vmem:[%s15548_s5 + $0x344] sm:$0xf0]  ;;  %v10699_v57 = vld [vmem:[%s15548_s5 + $0x174] sm:$0xf0] }
 0x45a   : > { %v5153_v59 = vsel %vm12190_vm10, %v5148_v19, %v5152_v45  ;;  %v5021_v39 = vmax.f32 %v5007_v2, 0.0  ;;  %6258 = vmatpush.bf16.msrb.mxu0 %v9657_v61  ;;  %v9721_v22 = vor.u32 %v10777_v11, %v9720_v25  ;;  %v9641_v2 = vor.u32 %v10757_v38, %v9640_v55  ;;  %v10653_v44 = vld [vmem:[%s15548_s5 + $0x4] sm:$0xf0]  ;;  %v9296_v7 = vld [vmem:[%s15548_s5 + $0x90] sm:$0xf] }
 0x45b   : > { %5154 = vst [vmem:[#allocation3 + $0x4] sm:$0x1] %v5153_v59  ;;  %v5101_v16 = vsel %vm1385_vm2, %v5099_v63, %v5100_v50  ;;  %v5122_v27 = vsel %vm1463_vm3, %v5120_v34, %v5121_v24  ;;  %v4941_v47 = vpop.f32.mrf.mxu3  ;;  %v15849_v63 = vld [vmem:[#allocation44_spill] sm:$0xff]  ;;  %v9713_v62 = vor.u32 %v10775_v48, %v9712_v56  ;;  %v10773_v51 = vld [vmem:[%s15548_s5 + $0x3c4] sm:$0xf0] }
 0x45c   : > { %v5113_v28 = vmax.f32 %v13979_v6, %v5101_v16  ;;  %v14063_v37 = vrot.slane %v5021_v39, 3  ;;  %v14065_v9 = vrot.slane %v5021_v39, 6  ;;  %v4876_v23 = vadd.f32 %v15849_v63, %v4842_v12  ;;  %6272 = vmatpush.bf16.msrb.mxu1 %v9721_v22  ;;  %v9408_v12 = vld [vmem:[%s15548_s5 + $0x170] sm:$0xf]  ;;  %v10697_v63 = vld [vmem:[%s15548_s5 + $0x164] sm:$0xf0] }
 0x45d   : > { %v4942_v18 = vadd.f32 %v4941_v47, %v4908_v8  ;;  %v9313_v6 = vor.u32 %v10675_v1, %v9312_v41  ;;  %6178 = vmatpush.bf16.msra.mxu2 %v9241_v4  ;;  %v9632_v54 = vld [vmem:[%s15548_s5 + $0x330] sm:$0xf]  ;;  %v4977_v8 = vpop.f32.mrf.mxu0  ;;  %v9400_v4 = vld [vmem:[%s15548_s5 + $0x160] sm:$0xf]  ;;  %v9705_v17 = vor.u32 %v10773_v51, %v9704_v33  ;;  %v10715_v11 = vld [vmem:[%s15548_s5 + $0x1f4] sm:$0xf0] }
 0x45e   : > { %v14083_v42 = vmax.f32 %v5113_v28, %v5122_v27  ;;  %v14089_v14 = vsel %vm1561_vm6, %v5040_v13, %v14063_v37  ;;  %v5057_v29 = vmax.f32 %v13984_v35, %v14063_v37  ;;  %v5070_v45 = vsel %vm1262_vm1, %v5067_v53, %v14065_v9  ;;  %v9304_v13 = vld [vmem:[%s15548_s5 + $0xa0] sm:$0xf]  ;;  %v10673_v53 = vld [vmem:[%s15548_s5 + $0xa4] sm:$0xf0]  ;;  %6259 = vmatpush.bf16.msrb.mxu0 %v9649_v21  ;;  %v9472_v25 = vld [vmem:[%s15548_s5 + $0x1f0] sm:$0xf] }
 0x45f   : > { %v5086_v0 = vmax.f32 %v5055_v15, %v5070_v45  ;;  %v4976_v30 = vadd.f32 %v4975_v31, %v4942_v18  ;;  %v5056_v3 = vmax.f32 %v13967_v40, %v14089_v14  ;;  %v9233_v15 = vor.u32 %v10655_v60, %v9232_v26  ;;  %6191 = vmatpush.bf16.msra.mxu3 %v9313_v6  ;;  %v9224_v40 = vld [vmem:[%s15548_s5] sm:$0xf]  ;;  %v10669_v18 = vld [vmem:[%s15548_s5 + $0x84] sm:$0xf0]  ;;  %v5011_v6 = vpop.f32.mrf.mxu1  ;;  %v10771_v21 = vld [vmem:[%s15548_s5 + $0x3b4] sm:$0xf0] }
 0x460   : > { %v9305_v5 = vor.u32 %v10673_v53, %v9304_v13  ;;  %v4910_v32 = vadd.f32 %v4909_v36, %v4876_v23  ;;  %v9225_v39 = vor.u32 %v10653_v44, %v9224_v40  ;;  %v5156_v47 = vrot.slane %v14083_v42, 6  ;;  %6273 = vmatpush.bf16.msrb.mxu1 %v9713_v62  ;;  %v9288_v23 = vld [vmem:[%s15548_s5 + $0x80] sm:$0xf]  ;;  %v9696_v13 = vld [vmem:[%s15548_s5 + $0x3b0] sm:$0xf] }
 0x461   : > { %v5102_v10 = vrot.slane %v5086_v0, 1  ;;  %v5123_v19 = vrot.slane %v5086_v0, 2  ;;  %v5010_v34 = vadd.f32 %v5009_v49, %v4976_v30  ;;  %6179 = vmatpush.bf16.msra.mxu2 %v9233_v15  ;;  %v9624_v42 = vld [vmem:[%s15548_s5 + $0x320] sm:$0xf]  ;;  %v9401_v60 = vor.u32 %v10697_v63, %v9400_v4  ;;  %v9392_v22 = vld [vmem:[%s15548_s5 + $0x150] sm:$0xf] }
 0x462   : > { %6260 = vmatpush.bf16.msrb.mxu0 %v9641_v2  ;;  %v9289_v36 = vor.u32 %v10669_v18, %v9288_v23  ;;  %v10695_v30 = vld [vmem:[%s15548_s5 + $0x154] sm:$0xf0]  ;;  %v9464_v15 = vld [vmem:[%s15548_s5 + $0x1e0] sm:$0xf]  ;;  %v9697_v56 = vor.u32 %v10771_v21, %v9696_v13  ;;  %v10713_v48 = vld [vmem:[%s15548_s5 + $0x1e4] sm:$0xf0] }
 0x463   : > { %v5103_v46 = vsel %vm1385_vm2, %v5100_v50, %v5102_v10  ;;  %v5124_v31 = vsel %vm1463_vm3, %v5121_v24, %v5123_v19  ;;  %v5022_v59 = vmax.f32 %v5010_v34, 0.0  ;;  %v4943_v61 = vpop.f32.mrf.mxu3  ;;  %v9409_v50 = vor.u32 %v10699_v57, %v9408_v12  ;;  %v10755_v24 = vld [vmem:[%s15548_s5 + $0x334] sm:$0xf0]  ;;  %6192 = vmatpush.bf16.msra.mxu3 %v9305_v5  ;;  %v9616_v10 = vld [vmem:[%s15548_s5 + $0x310] sm:$0xf] }
 0x464   : > { %v5114_v16 = vmax.f32 %v14016_v52, %v5103_v46  ;;  %v4944_v27 = vadd.f32 %v4943_v61, %v4910_v32  ;;  %v9297_v52 = vor.u32 %v10671_v58, %v9296_v7  ;;  %v9633_v28 = vor.u32 %v10755_v24, %v9632_v54  ;;  %6274 = vmatpush.bf16.msrb.mxu1 %v9705_v17  ;;  %v10751_v19 = vld [vmem:[%s15548_s5 + $0x314] sm:$0xf0]  ;;  %v9688_v32 = vld [vmem:[%s15548_s5 + $0x3a0] sm:$0xf]  ;;  %v10769_v62 = vld [vmem:[%s15548_s5 + $0x3a4] sm:$0xf0] }
 0x465   : > { %v5071_v41 = vrot.slane %v5022_v59, 6  ;;  %6180 = vmatpush.bf16.msra.mxu2 %v9225_v39  ;;  %v9393_v44 = vor.u32 %v10695_v30, %v9392_v22  ;;  %v9465_v12 = vor.u32 %v10713_v48, %v9464_v15  ;;  %v9617_v57 = vor.u32 %v10751_v19, %v9616_v10  ;;  %v9384_v7 = vld [vmem:[%s15548_s5 + $0x140] sm:$0xf]  ;;  %v10693_v46 = vld [vmem:[%s15548_s5 + $0x144] sm:$0xf0] }
 0x466   : > { %v5135_v1 = vmax.f32 %v5114_v16, %v5124_v31  ;;  %v4978_v49 = vadd.f32 %v4977_v8, %v4944_v27  ;;  %6261 = vmatpush.bf16.msrb.mxu0 %v9633_v28  ;;  %v9456_v31 = vld [vmem:[%s15548_s5 + $0x1d0] sm:$0xf]  ;;  %v9689_v58 = vor.u32 %v10769_v62, %v9688_v32  ;;  %v10711_v54 = vld [vmem:[%s15548_s5 + $0x1d4] sm:$0xf0]  ;;  %v9608_v8 = vld [vmem:[%s15548_s5 + $0x300] sm:$0xf] }
 0x467   : > { %v5072_v43 = vsel %vm1262_vm1, %v14065_v9, %v5071_v41  ;;  %v10753_v9 = vld [vmem:[%s15548_s5 + $0x324] sm:$0xf0]  ;;  %6193 = vmatpush.bf16.msra.mxu3 %v9297_v52  ;;  %v5175_v16 = vld [vmem:[#allocation3 + $0x4] sm:$0x6]  ;;  %v9680_v24 = vld [vmem:[%s15548_s5 + $0x390] sm:$0xf]  ;;  %v9457_v63 = vor.u32 %v10711_v54, %v9456_v31 }
 0x468   : > { %v5159_v14 = vrot.slane %v5135_v1, 7  ;;  %v14184_v45 = vmax.f32 %v5056_v3, %v5072_v43  ;;  %v5012_v26 = vadd.f32 %v5011_v6, %v4978_v49  ;;  %v9625_v0 = vor.u32 %v10753_v9, %v9624_v42  ;;  %6275 = vmatpush.bf16.msrb.mxu1 %v9697_v56  ;;  %v10749_v27 = vld [vmem:[%s15548_s5 + $0x304] sm:$0xf0]  ;;  %v10767_v33 = vld [vmem:[%s15548_s5 + $0x394] sm:$0xf0] }
 0x469   : > { %6201 = vmatpush.bf16.msrb.mxu2 %v9409_v50  ;;  %v9473_v3 = vor.u32 %v10715_v11, %v9472_v25  ;;  %v10682_v35 = vld [vmem:[%s15548_s5 + $0xf4] sm:$0xf]  ;;  %v9346_v37 = vld [vmem:[%s15548_s5 + $0xf8] sm:$0xf0]  ;;  %v9609_v4 = vor.u32 %v10749_v27, %v9608_v8  ;;  %v10691_v17 = vld [vmem:[%s15548_s5 + $0x134] sm:$0xf0]  ;;  %v9681_v23 = vor.u32 %v10767_v33, %v9680_v24 }
 0x46a   : > { %v5161_v53 = vsel %vm346_vm0, %v5156_v47, %v5159_v14  ;;  %v5104_v55 = vrot.slane %v14184_v45, 1  ;;  %v5023_v38 = vmax.f32 %v5012_v26, 0.0  ;;  %v5125_v2 = vrot.slane %v14184_v45, 2  ;;  %6262 = vmatpush.bf16.msrb.mxu0 %v9625_v0  ;;  %v9448_v18 = vld [vmem:[%s15548_s5 + $0x1c0] sm:$0xf] }
 0x46b   : > { %v5162_v5 = vsel %vm1262_vm1, %v5161_v53, %v5135_v1  ;;  %6194 = vmatpush.bf16.msra.mxu3 %v9289_v36  ;;  %v9376_v1 = vld [vmem:[%s15548_s5 + $0x130] sm:$0xf]  ;;  %v10709_v6 = vld [vmem:[%s15548_s5 + $0x1c4] sm:$0xf0]  ;;  %v9349_v42 = vor.u32 %v10682_v35, %v9346_v37  ;;  %v9672_v14 = vld [vmem:[%s15548_s5 + $0x380] sm:$0xf] }
 0x46c   : > { %v5163_v34 = vpack.c.bf16 %v5162_v5, %v5162_v5  ;;  %v5073_v40 = vrot.slane %v5023_v38, 6  ;;  %6276 = vmatpush.bf16.msrb.mxu1 %v9689_v58  ;;  %v10765_v26 = vld [vmem:[%s15548_s5 + $0x384] sm:$0xf0]  ;;  %v9377_v36 = vor.u32 %v10691_v17, %v9376_v1  ;;  %v9338_v0 = vld [vmem:[%s15548_s5 + $0xe8] sm:$0xf0]  ;;  %v9449_v38 = vor.u32 %v10709_v6, %v9448_v18 }
 0x46d   : > { %6202 = vmatpush.bf16.msrb.mxu2 %v9401_v60  ;;  %v10680_v60 = vld [vmem:[%s15548_s5 + $0xe4] sm:$0xf]  ;;  %v10698_v21 = vld [vmem:[%s15548_s5 + $0x174] sm:$0xf]  ;;  %v9410_v22 = vld [vmem:[%s15548_s5 + $0x178] sm:$0xf0] }
 0x46e   : > { %v5165_v59 = vshrl.u32 %v5163_v34, 16  ;;  %v5168_v39 = vshll.u32 %v5163_v34, 16  ;;  %v5074_v61 = vsel %vm1262_vm1, %v5071_v41, %v5073_v40  ;;  %v9385_v41 = vor.u32 %v10693_v46, %v9384_v7  ;;  %6263 = vmatpush.bf16.msrb.mxu0 %v9617_v57  ;;  %v10689_v53 = vld [vmem:[%s15548_s5 + $0x124] sm:$0xf0]  ;;  %v9440_v15 = vld [vmem:[%s15548_s5 + $0x1b0] sm:$0xf] }
 0x46f   : > { %6215 = vmatpush.bf16.msrb.mxu3 %v9473_v3  ;;  %v5088_v50 = vmax.f32 %v5057_v29, %v5074_v61  ;;  %v9673_v3 = vor.u32 %v10765_v26, %v9672_v14  ;;  %v9341_v5 = vor.u32 %v10680_v60, %v9338_v0  ;;  %v9413_v56 = vor.u32 %v10698_v21, %v9410_v22  ;;  %v10707_v48 = vld [vmem:[%s15548_s5 + $0x1b4] sm:$0xf0]  ;;  %v10678_v10 = vld [vmem:[%s15548_s5 + $0xd4] sm:$0xf]  ;;  %v9330_v19 = vld [vmem:[%s15548_s5 + $0xd8] sm:$0xf0] }
 0x470   : > { %v5167_v51 = vrot.slane %v5165_v59, 6  ;;  %v5170_v47 = vrot.slane %v5168_v39, 7  ;;  %6277 = vmatpush.bf16.msrb.mxu1 %v9681_v23  ;;  %v9402_v32 = vld [vmem:[%s15548_s5 + $0x168] sm:$0xf0]  ;;  %v10687_v57 = vld [vmem:[%s15548_s5 + $0x114] sm:$0xf0]  ;;  %v9441_v31 = vor.u32 %v10707_v48, %v9440_v15  ;;  %v9333_v58 = vor.u32 %v10678_v10, %v9330_v19 }
 0x471   : > { %6203 = vmatpush.bf16.msrb.mxu2 %v9393_v44  ;;  %v5105_v52 = vrot.slane %v5088_v50, 1  ;;  %v5126_v28 = vrot.slane %v5088_v50, 2  ;;  %v10696_v44 = vld [vmem:[%s15548_s5 + $0x164] sm:$0xf]  ;;  %v5189_v46 = vld [vmem:[#allocation3 + $0x8] sm:$0x3] }
 0x472   : > { %v5171_v49 = vor.u32 %v5170_v47, %v5167_v51  ;;  %6264 = vmatpush.bf16.msrb.mxu0 %v9609_v4  ;;  %v9432_v59 = vld [vmem:[%s15548_s5 + $0x1a0] sm:$0xf]  ;;  %v10705_v39 = vld [vmem:[%s15548_s5 + $0x1a4] sm:$0xf0]  ;;  %v9405_v54 = vor.u32 %v10696_v44, %v9402_v32  ;;  %v10676_v8 = vld [vmem:[%s15548_s5 + $0xc4] sm:$0xf] }
 0x473   : > { %6216 = vmatpush.bf16.msrb.mxu3 %v9465_v12  ;;  %v5106_v43 = vsel %vm1385_vm2, %v5104_v55, %v5105_v52  ;;  %v5116_v25 = vmax.f32 %v5088_v50, %v5105_v52  ;;  %v5127_v11 = vsel %vm1463_vm3, %v5125_v2, %v5126_v28  ;;  %v9360_v12 = vld [vmem:[%s15548_s5 + $0x110] sm:$0xf]  ;;  %v10694_v50 = vld [vmem:[%s15548_s5 + $0x154] sm:$0xf]  ;;  %v9394_v33 = vld [vmem:[%s15548_s5 + $0x158] sm:$0xf0]  ;;  %v9433_v1 = vor.u32 %v10705_v39, %v9432_v59 }
 0x474   : > { %v5176_v9 = vsel %vm14259_vm9, %v5171_v49, %v5175_v16  ;;  %v5115_v13 = vmax.f32 %v14184_v45, %v5106_v43  ;;  %v9368_v45 = vld [vmem:[%s15548_s5 + $0x120] sm:$0xf]  ;;  %6278 = vmatpush.bf16.msrb.mxu1 %v9673_v3  ;;  %v9322_v16 = vld [vmem:[%s15548_s5 + $0xc8] sm:$0xf0]  ;;  %v9361_v24 = vor.u32 %v10687_v57, %v9360_v12  ;;  %v10685_v35 = vld [vmem:[%s15548_s5 + $0x104] sm:$0xf0]  ;;  %v9397_v18 = vor.u32 %v10694_v50, %v9394_v33 }
 0x475   : > { %6204 = vmatpush.bf16.msrb.mxu2 %v9385_v41  ;;  %5177 = vst [vmem:[#allocation3 + $0x4] sm:$0x6] %v5176_v9  ;;  %v5137_v30 = vmax.f32 %v5116_v25, %v5126_v28  ;;  %v9369_v40 = vor.u32 %v10689_v53, %v9368_v45  ;;  %v9220_v51 = vld [vmem:[#allocation3] sm:$0xf]  ;;  %v9536_v52 = vld [vmem:[%s15548_s5 + $0x270] sm:$0xf]  ;;  %v9325_v23 = vor.u32 %v10676_v8, %v9322_v16  ;;  %vm6453_vm9 = vmor %vm6452_vm5, %vm12048_vm15 }
 0x476   : > { %v5136_v55 = vmax.f32 %v5115_v13, %v5127_v11  ;;  %6313 = vmatpush.bf16.msra.mxu0 %v9349_v42  ;;  %v9352_v41 = vld [vmem:[%s15548_s5 + $0x100] sm:$0xf]  ;;  %v10731_v17 = vld [vmem:[%s15548_s5 + $0x274] sm:$0xf0]  ;;  %v9424_v49 = vld [vmem:[%s15548_s5 + $0x190] sm:$0xf] }
 0x477   : > { %6217 = vmatpush.bf16.msrb.mxu3 %v9457_v63  ;;  %v5184_v62 = vrot.slane %v5137_v30, 6  ;;  %v10703_v63 = vld [vmem:[%s15548_s5 + $0x194] sm:$0xf0]  ;;  %v10674_v6 = vld [vmem:[%s15548_s5 + $0xb4] sm:$0xf]  ;;  %v9353_v25 = vor.u32 %v10685_v35, %v9352_v41  ;;  %v9537_v26 = vor.u32 %v10731_v17, %v9536_v52 }
 0x478   : > { %v5179_v34 = vrot.slane %v5136_v55, 4  ;;  %v5181_v2 = vrot.slane %v5136_v55, 5  ;;  %6327 = vmatpush.bf16.msra.mxu1 %v9413_v56  ;;  %v9314_v43 = vld [vmem:[%s15548_s5 + $0xb8] sm:$0xf0]  ;;  %v10692_v11 = vld [vmem:[%s15548_s5 + $0x144] sm:$0xf]  ;;  %v9425_v60 = vor.u32 %v10703_v63, %v9424_v49 }
 0x479   : > { %6205 = vmatpush.bf16.msrb.mxu2 %v9377_v36  ;;  %v9386_v42 = vld [vmem:[%s15548_s5 + $0x148] sm:$0xf0]  ;;  %v9528_v9 = vld [vmem:[%s15548_s5 + $0x260] sm:$0xf]  ;;  %v10729_v13 = vld [vmem:[%s15548_s5 + $0x264] sm:$0xf0]  ;;  %v9317_v21 = vor.u32 %v10674_v6, %v9314_v43 }
 0x47a   : > { %v5186_v7 = vsel %vm346_vm0, %v5179_v34, %v5181_v2  ;;  %6314 = vmatpush.bf16.msra.mxu0 %v9341_v5  ;;  %v9389_v22 = vor.u32 %v10692_v11, %v9386_v42  ;;  %v9416_v30 = vld [vmem:[%s15548_s5 + $0x180] sm:$0xf]  ;;  %v10701_v45 = vld [vmem:[%s15548_s5 + $0x184] sm:$0xf0]  ;;  %v9600_v53 = vld [vmem:[%s15548_s5 + $0x2f0] sm:$0xf]  ;;  %v9529_v5 = vor.u32 %v10729_v13, %v9528_v9 }
 0x47b   : > { %6218 = vmatpush.bf16.msrb.mxu3 %v9449_v38  ;;  %v5187_v61 = vsel %vm1262_vm1, %v5186_v7, %v5184_v62  ;;  %v10747_v38 = vld [vmem:[%s15548_s5 + $0x2f4] sm:$0xf0]  ;;  %v10672_v3 = vld [vmem:[%s15548_s5 + $0xa4] sm:$0xf]  ;;  %v9306_v15 = vld [vmem:[%s15548_s5 + $0xa8] sm:$0xf0]  ;;  %v9417_v10 = vor.u32 %v10701_v45, %v9416_v30 }
 0x47c   : > { %v5188_v27 = vpack.c.bf16 %v5187_v61, %v5187_v61  ;;  %v10651_v47 = vld [vmem:[#allocation3] sm:$0x70]  ;;  %6328 = vmatpush.bf16.msra.mxu1 %v9405_v54  ;;  %v10690_v56 = vld [vmem:[%s15548_s5 + $0x134] sm:$0xf]  ;;  %v9378_v48 = vld [vmem:[%s15548_s5 + $0x138] sm:$0xf0]  ;;  %v9309_v44 = vor.u32 %v10672_v3, %v9306_v15 }
 0x47d   : > { %6206 = vmatpush.bf16.msrb.mxu2 %v9369_v40  ;;  %v14354_v37 = vor.u32 %v10651_v47, %v9220_v51  ;;  %v9520_v19 = vld [vmem:[%s15548_s5 + $0x250] sm:$0xf]  ;;  %v10727_v34 = vld [vmem:[%s15548_s5 + $0x254] sm:$0xf0]  ;;  %v9592_v2 = vld [vmem:[%s15548_s5 + $0x2e0] sm:$0xf]  ;;  %v9601_v40 = vor.u32 %v10747_v38, %v9600_v53  ;;  %v9381_v57 = vor.u32 %v10690_v56, %v9378_v48 }
 0x47e   : > { %v5190_v4 = vsel %vm12048_vm15, %v5188_v27, %v5189_v46  ;;  %6315 = vmatpush.bf16.msra.mxu0 %v9333_v58  ;;  %v10745_v32 = vld [vmem:[%s15548_s5 + $0x2e4] sm:$0xf0]  ;;  %v5200_v62 = vld [vmem:[#allocation3 + $0x4] sm:$0xe]  ;;  %v10670_v7 = vld [vmem:[%s15548_s5 + $0x94] sm:$0xf]  ;;  %v9521_v61 = vor.u32 %v10727_v34, %v9520_v19 }
 0x47f   : > { %6219 = vmatpush.bf16.msrb.mxu3 %v9441_v31  ;;  %5191 = vst [vmem:[#allocation3 + $0x8] sm:$0x3] %v5190_v4  ;;  %v5213_v14 = vshll.u32 %v14354_v37, 16  ;;  %6181 = vmatmul.bf16.vlgmr.msra.gmra.mxu2 %v14354_v37  ;;  %v5211_v36 = vshrl.u32 %v14354_v37, 16  ;;  %v9298_v46 = vld [vmem:[%s15548_s5 + $0x98] sm:$0xf0]  ;;  %v5279_v59 = vunpack.c.l.b16 %v5200_v62  ;;  %v9593_v51 = vor.u32 %v10745_v32, %v9592_v2 }
 0x480   : > { %6329 = vmatpush.bf16.msra.mxu1 %v9397_v18  ;;  %v10688_v31 = vld [vmem:[%s15548_s5 + $0x124] sm:$0xf]  ;;  %v9370_v58 = vld [vmem:[%s15548_s5 + $0x128] sm:$0xf0]  ;;  %v9512_v54 = vld [vmem:[%s15548_s5 + $0x240] sm:$0xf]  ;;  %v9301_v47 = vor.u32 %v10670_v7, %v9298_v46 }
 0x481   : > { %6207 = vmatpush.bf16.msrb.mxu2 %v9361_v24  ;;  %v5215_v0 = vrot.slane %v5213_v14, 1  ;;  %v10725_v8 = vld [vmem:[%s15548_s5 + $0x244] sm:$0xf0]  ;;  %v9584_v50 = vld [vmem:[%s15548_s5 + $0x2d0] sm:$0xf]  ;;  %vm361_vm0 = vcmask 1044484  }
 0x482   : > { %6316 = vmatpush.bf16.msra.mxu0 %v9325_v23  ;;  %v10743_v27 = vld [vmem:[%s15548_s5 + $0x2d4] sm:$0xf0]  ;;  %v5194_v33 = vld [vmem:[#allocation3] sm:$0xe]  ;;  %v10668_v41 = vld [vmem:[%s15548_s5 + $0x84] sm:$0xf]  ;;  %v9513_v18 = vor.u32 %v10725_v8, %v9512_v54 }
 0x483   : > { %6220 = vmatpush.bf16.msrb.mxu3 %v9433_v1  ;;  %v14400_v55 = vor.u32 %v5215_v0, %v5211_v36  ;;  %v9290_v35 = vld [vmem:[%s15548_s5 + $0x88] sm:$0xf0]  ;;  %v10686_v52 = vld [vmem:[%s15548_s5 + $0x114] sm:$0xf]  ;;  %v5220_v4 = vunpack.c.l.b16 %v5194_v33  ;;  %v9373_v1 = vor.u32 %v10688_v31, %v9370_v58  ;;  %v9362_v49 = vld [vmem:[%s15548_s5 + $0x118] sm:$0xf0]  ;;  %v9585_v9 = vor.u32 %v10743_v27, %v9584_v50 }
 0x484   : > { %6330 = vmatpush.bf16.msra.mxu1 %v9389_v22  ;;  %v10746_v6 = vld [vmem:[%s15548_s5 + $0x2f4] sm:$0xf]  ;;  %v9602_v43 = vld [vmem:[%s15548_s5 + $0x2f8] sm:$0xf0]  ;;  %v9504_v11 = vld [vmem:[%s15548_s5 + $0x230] sm:$0xf]  ;;  %v9293_v13 = vor.u32 %v10668_v41, %v9290_v35  ;;  %v9365_v36 = vor.u32 %v10686_v52, %v9362_v49 }
 0x485   : > { %6208 = vmatpush.bf16.msrb.mxu2 %v9353_v25  ;;  %6195 = vmatmul.bf16.vlgmr.msra.gmra.mxu3 %v14400_v55  ;;  %v10723_v42 = vld [vmem:[%s15548_s5 + $0x234] sm:$0xf0]  ;;  %v9576_v14 = vld [vmem:[%s15548_s5 + $0x2c0] sm:$0xf]  ;;  %v10741_v0 = vld [vmem:[%s15548_s5 + $0x2c4] sm:$0xf0]  ;;  %v9605_v30 = vor.u32 %v10746_v6, %v9602_v43 }
 0x486   : > { %6317 = vmatpush.bf16.msra.mxu0 %v9317_v21  ;;  %v14429_v12 = vld [vmem:[#allocation3 + $0x4] sm:$0xff]   ;;  %v5196_v22 = vld [vmem:[#allocation3] sm:$0xc]  ;;  %v9354_v38 = vld [vmem:[%s15548_s5 + $0x108] sm:$0xf0]  ;;  %v9577_v32 = vor.u32 %v10741_v0, %v9576_v14 }
 0x487   : > { %6221 = vmatpush.bf16.msrb.mxu3 %v9425_v60  ;;  %v5280_v39 = vunpack.c.h.b16 %v14429_v12  ;;  %v14452_v16 = vunpack.c.l.b16 %v14429_v12  ;;  %v10684_v21 = vld [vmem:[%s15548_s5 + $0x104] sm:$0xf]  ;;  %v5197_v3 = vld [vmem:[#allocation3 + $0x8] sm:$0x1]  ;;  %v5227_v15 = vunpack.c.l.b16 %v5196_v22  ;;  %v9594_v48 = vld [vmem:[%s15548_s5 + $0x2e8] sm:$0xf0] }
 0x488   : > { %6331 = vmatpush.bf16.msra.mxu1 %v9381_v57  ;;  %v10744_v56 = vld [vmem:[%s15548_s5 + $0x2e4] sm:$0xf]  ;;  %v5228_v19 = vunpack.c.l.b16 %v5197_v3  ;;  %v9666_v34 = vld [vmem:[%s15548_s5 + $0x378] sm:$0xf0]  ;;  %v9496_v2 = vld [vmem:[%s15548_s5 + $0x220] sm:$0xf]  ;;  %v9357_v46 = vor.u32 %v10684_v21, %v9354_v38 }
 0x489   : > { %6229 = vmatpush.bf16.msra.mxu2 %v9537_v26  ;;  %v14462_v24 = vpack.c.b16 %v5280_v39, %v5279_v59  ;;  %v14486_v25 = vpack.c.b16 %v14452_v16, %v5220_v4  ;;  %v9568_v57 = vld [vmem:[%s15548_s5 + $0x2b0] sm:$0xf]  ;;  %v10739_v7 = vld [vmem:[%s15548_s5 + $0x2b4] sm:$0xf0]  ;;  %v9597_v31 = vor.u32 %v10744_v56, %v9594_v48  ;;  %v10742_v58 = vld [vmem:[%s15548_s5 + $0x2d4] sm:$0xf] }
 0x48a   : > { %6318 = vmatpush.bf16.msra.mxu0 %v9309_v44  ;;  %v5229_v44 = vpack.c.b16 %v14452_v16, %v5227_v15  ;;  %v5230_v62 = vpack.c.b16 %v5228_v19, %v5228_v19  ;;  %v9586_v54 = vld [vmem:[%s15548_s5 + $0x2d8] sm:$0xf0]  ;;  %v9488_v52 = vld [vmem:[%s15548_s5 + $0x210] sm:$0xf]  ;;  %v10719_v4 = vld [vmem:[%s15548_s5 + $0x214] sm:$0xf0] }
 0x48b   : > { %6222 = vmatpush.bf16.msrb.mxu3 %v9417_v10  ;;  %v5282_v17 = vrot.slane %v14462_v24, 1  ;;  %v5285_v63 = vshrl.u32 %v14462_v24, 16  ;;  %v5288_v23 = vshll.u32 %v14462_v24, 16  ;;  %v5223_v45 = vrot.slane %v14486_v25, 1  ;;  %v10762_v10 = vld [vmem:[%s15548_s5 + $0x374] sm:$0xf]  ;;  %vm15097_vm1 = vmand %vm361_vm0, %vm362_vm13 }
 0x48c   : > { %6332 = vmatpush.bf16.msra.mxu1 %v9373_v1  ;;  %v5232_v59 = vshrl.u32 %v5229_v44, 16  ;;  %v9669_v8 = vor.u32 %v10762_v10, %v9666_v34  ;;  %v5240_v27 = vshrl.u32 %v5230_v62, 16  ;;  %v5243_v33 = vshll.u32 %v5230_v62, 16  ;;  %v10758_v14 = vld [vmem:[%s15548_s5 + $0x354] sm:$0xf]  ;;  %vm364_vm2 = vmor %vm15097_vm1, %vm12190_vm10 }
 0x48d   : > { %6230 = vmatpush.bf16.msra.mxu2 %v9529_v5  ;;  %6265 = vmatmul.bf16.vlgmr.msrb.gmra.mxu0 %v5282_v17  ;;  %v5287_v26 = vrot.slane %v5285_v63, 1  ;;  %v5290_v60 = vrot.slane %v5288_v23, 2  ;;  %v9505_v5 = vor.u32 %v10723_v42, %v9504_v11  ;;  %v9569_v63 = vor.u32 %v10739_v7, %v9568_v57  ;;  %v9560_v23 = vld [vmem:[%s15548_s5 + $0x2a0] sm:$0xf]  ;;  %v10740_v11 = vld [vmem:[%s15548_s5 + $0x2c4] sm:$0xf] }
 0x48e   : > { %6319 = vmatpush.bf16.msra.mxu0 %v9301_v47  ;;  %v9658_v47 = vld [vmem:[%s15548_s5 + $0x368] sm:$0xf0]  ;;  %v5234_v41 = vrot.slane %v5232_v59, 2  ;;  %v5242_v1 = vrot.slane %v5240_v27, 2  ;;  %v5245_v49 = vrot.slane %v5243_v33, 3  ;;  %v9589_v43 = vor.u32 %v10742_v58, %v9586_v54 }
 0x48f   : > { %6243 = vmatpush.bf16.msra.mxu3 %v9601_v40  ;;  %v14506_v53 = vor.u32 %v5290_v60, %v5287_v26  ;;  %6209 = vmatmul.bf16.vlgmr.msrb.gmra.mxu2 %v5223_v45  ;;  %v10721_v40 = vld [vmem:[%s15548_s5 + $0x224] sm:$0xf0]  ;;  %v9578_v42 = vld [vmem:[%s15548_s5 + $0x2c8] sm:$0xf0]  ;;  %v5198_v0 = vld [vmem:[#allocation3] sm:$0x8] }
 0x490   : > { %6333 = vmatpush.bf16.msra.mxu1 %v9365_v36  ;;  %v9497_v50 = vor.u32 %v10721_v40, %v9496_v2  ;;  %v5246_v26 = vor.u32 %v5245_v49, %v5242_v1  ;;  %v9480_v36 = vld [vmem:[%s15548_s5 + $0x200] sm:$0xf]  ;;  %v10717_v21 = vld [vmem:[%s15548_s5 + $0x204] sm:$0xf0]  ;;  %v9792_v22 = vld [vmem:[%s15548_s5 + $0x470] sm:$0xf]  ;;  %v5251_v38 = vunpack.c.l.b16 %v5198_v0  ;;  %v9581_v19 = vor.u32 %v10740_v11, %v9578_v42 }
 0x491   : > { %6231 = vmatpush.bf16.msra.mxu2 %v9521_v61  ;;  %6279 = vmatmul.bf16.vlgmr.msrb.gmra.mxu1 %v14506_v53  ;;  %v5235_v61 = vshll.u32 %v5229_v44, 16  ;;  %v9552_v56 = vld [vmem:[%s15548_s5 + $0x290] sm:$0xf]  ;;  %v10735_v48 = vld [vmem:[%s15548_s5 + $0x294] sm:$0xf0] }
 0x492   : > { %6320 = vmatpush.bf16.msra.mxu0 %v9293_v13  ;;  %v9650_v13 = vld [vmem:[%s15548_s5 + $0x358] sm:$0xf0]  ;;  %v10738_v34 = vld [vmem:[%s15548_s5 + $0x2b4] sm:$0xf]  ;;  %v5253_v40 = vpack.c.b16 %v14452_v16, %v5251_v38  ;;  %v10756_v62 = vld [vmem:[%s15548_s5 + $0x344] sm:$0xf]  ;;  %v9553_v59 = vor.u32 %v10735_v48, %v9552_v56 }
 0x493   : > { %6244 = vmatpush.bf16.msra.mxu3 %v9593_v51  ;;  %v10760_v51 = vld [vmem:[%s15548_s5 + $0x364] sm:$0xf]  ;;  %v5237_v35 = vrot.slane %v5235_v61, 3  ;;  %v9570_v2 = vld [vmem:[%s15548_s5 + $0x2b8] sm:$0xf0]  ;;  %v9653_v44 = vor.u32 %v10758_v14, %v9650_v13 }
 0x494   : > { %6334 = vmatpush.bf16.msra.mxu1 %v9357_v46  ;;  %v9661_v60 = vor.u32 %v10760_v51, %v9658_v47  ;;  %v9642_v57 = vld [vmem:[%s15548_s5 + $0x348] sm:$0xf0]  ;;  %v9784_v46 = vld [vmem:[%s15548_s5 + $0x460] sm:$0xf]  ;;  %v5255_v16 = vrot.slane %v5253_v40, 3  ;;  %v5260_v54 = vshrl.u32 %v5253_v40, 16 }
 0x495   : > { %6232 = vmatpush.bf16.msra.mxu2 %v9513_v18  ;;  %v10737_v18 = vld [vmem:[%s15548_s5 + $0x2a4] sm:$0xf0]  ;;  %v5238_v6 = vor.u32 %v5237_v35, %v5234_v41  ;;  %v9544_v58 = vld [vmem:[%s15548_s5 + $0x280] sm:$0xf]  ;;  %v5263_v27 = vshll.u32 %v5253_v40, 16  ;;  %v9645_v35 = vor.u32 %v10756_v62, %v9642_v57 }
 0x496   : > { %6369 = vmatpush.bf16.msrb.mxu0 %v9605_v30  ;;  %v5199_v30 = vld [vmem:[#allocation3 + $0x8] sm:$0x3]  ;;  %v9561_v15 = vor.u32 %v10737_v18, %v9560_v23  ;;  %v10666_v47 = vld [vmem:[%s15548_s5 + $0x74] sm:$0xf]  ;;  %v9282_v41 = vld [vmem:[%s15548_s5 + $0x78] sm:$0xf0] }
 0x497   : > { %6245 = vmatpush.bf16.msra.mxu3 %v9585_v9  ;;  %v9489_v9 = vor.u32 %v10719_v4, %v9488_v52  ;;  %v14585_v3 = vsel %vm2053_vm7, %v5238_v6, %v5246_v26  ;;  %v5252_v10 = vunpack.c.l.b16 %v5199_v30  ;;  %v10793_v61 = vld [vmem:[%s15548_s5 + $0x464] sm:$0xf0]  ;;  %v10736_v52 = vld [vmem:[%s15548_s5 + $0x2a4] sm:$0xf]  ;;  %v9562_v4 = vld [vmem:[%s15548_s5 + $0x2a8] sm:$0xf0]  ;;  %v9285_v14 = vor.u32 %v10666_v47, %v9282_v41 }
 0x498   : > { %6383 = vmatpush.bf16.msrb.mxu1 %v9669_v8  ;;  %6223 = vmatmul.bf16.vlgmr.msrb.gmra.mxu3 %v14585_v3  ;;  %v10754_v1 = vld [vmem:[%s15548_s5 + $0x334] sm:$0xf]  ;;  %v9785_v49 = vor.u32 %v10793_v61, %v9784_v46  ;;  %v9634_v23 = vld [vmem:[%s15548_s5 + $0x338] sm:$0xf0]  ;;  %v9776_v18 = vld [vmem:[%s15548_s5 + $0x450] sm:$0xf]  ;;  %v9565_v26 = vor.u32 %v10736_v52, %v9562_v4 }
 0x499   : > { %6233 = vmatpush.bf16.msra.mxu2 %v9505_v5  ;;  %v10795_v5 = vld [vmem:[%s15548_s5 + $0x474] sm:$0xf0]  ;;  %v5254_v7 = vpack.c.b16 %v5252_v10, %v5252_v10  ;;  %v5262_v6 = vrot.slane %v5260_v54, 3  ;;  %v5265_v42 = vrot.slane %v5263_v27, 4  ;;  %v10734_v13 = vld [vmem:[%s15548_s5 + $0x294] sm:$0xf] }
 0x49a   : > { %6370 = vmatpush.bf16.msrb.mxu0 %v9597_v31  ;;  %v9793_v31 = vor.u32 %v10795_v5, %v9792_v22  ;;  %v10791_v11 = vld [vmem:[%s15548_s5 + $0x454] sm:$0xf0]  ;;  %v10752_v22 = vld [vmem:[%s15548_s5 + $0x324] sm:$0xf]  ;;  %v9626_v30 = vld [vmem:[%s15548_s5 + $0x328] sm:$0xf0] }
 0x49b   : > { %6246 = vmatpush.bf16.msra.mxu3 %v9577_v32  ;;  %v9481_v32 = vor.u32 %v10717_v21, %v9480_v36  ;;  %v5256_v8 = vrot.slane %v5254_v7, 3  ;;  %v5268_v33 = vshrl.u32 %v5254_v7, 16  ;;  %v5271_v51 = vshll.u32 %v5254_v7, 16  ;;  %v9554_v36 = vld [vmem:[%s15548_s5 + $0x298] sm:$0xf0] }
 0x49c   : > { %6384 = vmatpush.bf16.msrb.mxu1 %v9661_v60  ;;  %v9637_v60 = vor.u32 %v10754_v1, %v9634_v23  ;;  %v9777_v0 = vor.u32 %v10791_v11, %v9776_v18  ;;  %v9274_v21 = vld [vmem:[%s15548_s5 + $0x68] sm:$0xf0]  ;;  %v5266_v38 = vor.u32 %v5265_v42, %v5262_v6  ;;  %v9768_v5 = vld [vmem:[%s15548_s5 + $0x440] sm:$0xf]  ;;  %v10789_v56 = vld [vmem:[%s15548_s5 + $0x444] sm:$0xf0]  ;;  %v9557_v48 = vor.u32 %v10734_v13, %v9554_v36 }
 0x49d   : > { %6234 = vmatpush.bf16.msra.mxu2 %v9497_v50  ;;  %6321 = vmatmul.bf16.vlgmr.msra.gmra.mxu0 %v14400_v55  ;;  %v10733_v50 = vld [vmem:[%s15548_s5 + $0x284] sm:$0xf0]  ;;  %v9573_v55 = vor.u32 %v10738_v34, %v9570_v2  ;;  %v5270_v25 = vrot.slane %v5268_v33, 3  ;;  %v10662_v34 = vld [vmem:[%s15548_s5 + $0x54] sm:$0xf] }
 0x49e   : > { %6371 = vmatpush.bf16.msrb.mxu0 %v9589_v43  ;;  %v14647_v43 = vsel %vm1561_vm6, %v5255_v16, %v5256_v8  ;;  %v10732_v2 = vld [vmem:[%s15548_s5 + $0x284] sm:$0xf]  ;;  %v9546_v40 = vld [vmem:[%s15548_s5 + $0x288] sm:$0xf0]  ;;  %v10750_v62 = vld [vmem:[%s15548_s5 + $0x314] sm:$0xf] }
 0x49f   : > { %6247 = vmatpush.bf16.msra.mxu3 %v9569_v63  ;;  %v9545_v63 = vor.u32 %v10733_v50, %v9544_v58  ;;  %v9618_v57 = vld [vmem:[%s15548_s5 + $0x318] sm:$0xf0]  ;;  %v9760_v46 = vld [vmem:[%s15548_s5 + $0x430] sm:$0xf]  ;;  %v10660_v58 = vld [vmem:[%s15548_s5 + $0x44] sm:$0xf] }
 0x4a0   : > { %6385 = vmatpush.bf16.msrb.mxu1 %v9653_v44  ;;  %v9769_v44 = vor.u32 %v10789_v56, %v9768_v5  ;;  %v9621_v61 = vor.u32 %v10750_v62, %v9618_v57  ;;  %v9258_v8 = vld [vmem:[%s15548_s5 + $0x48] sm:$0xf0]  ;;  %v10748_v50 = vld [vmem:[%s15548_s5 + $0x304] sm:$0xf]  ;;  %v9752_v33 = vld [vmem:[%s15548_s5 + $0x420] sm:$0xf] }
 0x4a1   : > { %6235 = vmatpush.bf16.msra.mxu2 %v9489_v9  ;;  %6335 = vmatmul.bf16.vlgmr.msra.gmra.mxu1 %v5223_v45  ;;  %v5273_v45 = vrot.slane %v5271_v51, 4  ;;  %v10664_v9 = vld [vmem:[%s15548_s5 + $0x64] sm:$0xf]  ;;  %v9610_v27 = vld [vmem:[%s15548_s5 + $0x308] sm:$0xf0] }
 0x4a2   : > { %6372 = vmatpush.bf16.msrb.mxu0 %v9581_v19  ;;  %v9277_v10 = vor.u32 %v10664_v9, %v9274_v21  ;;  %v9629_v19 = vor.u32 %v10752_v22, %v9626_v30  ;;  %v10785_v51 = vld [vmem:[%s15548_s5 + $0x424] sm:$0xf0]  ;;  %v9613_v47 = vor.u32 %v10748_v50, %v9610_v27  ;;  %v5203_v41 = vld [vmem:[#allocation3 + $0xc] sm:$0x1]  ;;  %v10658_v52 = vld [vmem:[%s15548_s5 + $0x34] sm:$0xf] }
 0x4a3   : > { %6248 = vmatpush.bf16.msra.mxu3 %v9561_v15  ;;  %v5274_v15 = vor.u32 %v5273_v45, %v5270_v25  ;;  %v9250_v4 = vld [vmem:[%s15548_s5 + $0x38] sm:$0xf0]  ;;  %v9744_v1 = vld [vmem:[%s15548_s5 + $0x410] sm:$0xf]  ;;  %v5296_v23 = vunpack.c.l.b16 %v5203_v41  ;;  %v10656_v11 = vld [vmem:[%s15548_s5 + $0x24] sm:$0xf] }
 0x4a4   : > { %6386 = vmatpush.bf16.msrb.mxu1 %v9645_v35  ;;  %v9753_v35 = vor.u32 %v10785_v51, %v9752_v33  ;;  %v9253_v18 = vor.u32 %v10658_v52, %v9250_v4  ;;  %v9242_v42 = vld [vmem:[%s15548_s5 + $0x28] sm:$0xf0]  ;;  %v9736_v45 = vld [vmem:[%s15548_s5 + $0x400] sm:$0xf]  ;;  %v10654_v24 = vld [vmem:[%s15548_s5 + $0x14] sm:$0xf] }
 0x4a5   : > { %6236 = vmatpush.bf16.msra.mxu2 %v9481_v32  ;;  %v9266_v32 = vld [vmem:[%s15548_s5 + $0x58] sm:$0xf0]  ;;  %v5275_v7 = vsel %vm362_vm13, %v5266_v38, %v5274_v15  ;;  %v5298_v13 = vpack.c.b16 %v5296_v23, %v5296_v23  ;;  %v9245_v36 = vor.u32 %v10656_v11, %v9242_v42  ;;  %v10712_v12 = vld [vmem:[%s15548_s5 + $0x1e4] sm:$0xf]  ;;  %v9226_v5 = vld [vmem:[%s15548_s5 + $0x8] sm:$0xf0] }
 0x4a6   : > { %6373 = vmatpush.bf16.msrb.mxu0 %v9573_v55  ;;  %v9269_v16 = vor.u32 %v10662_v34, %v9266_v32  ;;  %v9261_v55 = vor.u32 %v10660_v58, %v9258_v8  ;;  %v10652_v15 = vld [vmem:[%s15548_s5 + $0x4] sm:$0xf]  ;;  %v10710_v34 = vld [vmem:[%s15548_s5 + $0x1d4] sm:$0xf]  ;;  %v9530_v57 = vld [vmem:[%s15548_s5 + $0x268] sm:$0xf0] }
 0x4a7   : > { %6249 = vmatpush.bf16.msra.mxu3 %v9553_v59  ;;  %v9549_v59 = vor.u32 %v10732_v2, %v9546_v40  ;;  %v5300_v30 = vrot.slane %v5298_v13, 2  ;;  %v9458_v2 = vld [vmem:[%s15548_s5 + $0x1d8] sm:$0xf0]  ;;  %v9229_v40 = vor.u32 %v10652_v15, %v9226_v5  ;;  %v10728_v62 = vld [vmem:[%s15548_s5 + $0x264] sm:$0xf] }
 0x4a8   : > { %6237 = vmatmul.bf16.vlgmr.msra.gmra.mxu2 %v14647_v43  ;;  %6387 = vmatpush.bf16.msrb.mxu1 %v9637_v60  ;;  %v9474_v60 = vld [vmem:[%s15548_s5 + $0x1f8] sm:$0xf0]  ;;  %v9461_v32 = vor.u32 %v10710_v34, %v9458_v2  ;;  %v10706_v58 = vld [vmem:[%s15548_s5 + $0x1b4] sm:$0xf]  ;;  %v10724_v27 = vld [vmem:[%s15548_s5 + $0x244] sm:$0xf] }
 0x4a9   : > { %6285 = vmatpush.bf16.msrb.mxu2 %v9793_v31  ;;  %v10787_v31 = vld [vmem:[%s15548_s5 + $0x434] sm:$0xf0]  ;;  %v10704_v33 = vld [vmem:[%s15548_s5 + $0x1a4] sm:$0xf]  ;;  %v9434_v51 = vld [vmem:[%s15548_s5 + $0x1a8] sm:$0xf0] }
 0x4aa   : > { %6374 = vmatpush.bf16.msrb.mxu0 %v9565_v26  ;;  %v9761_v54 = vor.u32 %v10787_v31, %v9760_v46  ;;  %v10714_v26 = vld [vmem:[%s15548_s5 + $0x1f4] sm:$0xf]  ;;  %v9450_v46 = vld [vmem:[%s15548_s5 + $0x1c8] sm:$0xf0]  ;;  %v9533_v31 = vor.u32 %v10728_v62, %v9530_v57  ;;  %v9426_v4 = vld [vmem:[%s15548_s5 + $0x198] sm:$0xf0] }
 0x4ab   : > { %6250 = vmatpush.bf16.msra.mxu3 %v9545_v63  ;;  %v5202_v63 = vld [vmem:[#allocation3 + $0x4] sm:$0xc]  ;;  %v9477_v21 = vor.u32 %v10714_v26, %v9474_v60  ;;  %v10722_v41 = vld [vmem:[%s15548_s5 + $0x234] sm:$0xf]  ;;  %v9498_v23 = vld [vmem:[%s15548_s5 + $0x228] sm:$0xf0] }
 0x4ac   : > { %6388 = vmatpush.bf16.msrb.mxu1 %v9629_v19  ;;  %v5295_v25 = vunpack.c.l.b16 %v5202_v63  ;;  %v10702_v52 = vld [vmem:[%s15548_s5 + $0x194] sm:$0xf]  ;;  %v10720_v63 = vld [vmem:[%s15548_s5 + $0x224] sm:$0xf]  ;;  %v9730_v42 = vld [vmem:[%s15548_s5 + $0x3f8] sm:$0xf0] }
 0x4ad   : > { %6286 = vmatpush.bf16.msrb.mxu2 %v9785_v49  ;;  %v10783_v49 = vld [vmem:[%s15548_s5 + $0x414] sm:$0xf0]  ;;  %v10778_v11 = vld [vmem:[%s15548_s5 + $0x3f4] sm:$0xf]  ;;  %v9490_v26 = vld [vmem:[%s15548_s5 + $0x218] sm:$0xf0] }
 0x4ae   : > { %6251 = vmatmul.bf16.vlgmr.msra.gmra.mxu3 %v5275_v7  ;;  %6375 = vmatpush.bf16.msrb.mxu0 %v9557_v48  ;;  %v9745_v6 = vor.u32 %v10783_v49, %v9744_v1  ;;  %v5297_v9 = vpack.c.b16 %v5280_v39, %v5295_v25  ;;  %v9466_v39 = vld [vmem:[%s15548_s5 + $0x1e8] sm:$0xf0]  ;;  %v10730_v48 = vld [vmem:[%s15548_s5 + $0x274] sm:$0xf]  ;;  %v9429_v49 = vor.u32 %v10702_v52, %v9426_v4  ;;  %v10792_v5 = vld [vmem:[%s15548_s5 + $0x464] sm:$0xf] }
 0x4af   : > { %6299 = vmatpush.bf16.msrb.mxu3 %v9285_v14  ;;  %v10781_v14 = vld [vmem:[%s15548_s5 + $0x404] sm:$0xf0]  ;;  %v9469_v56 = vor.u32 %v10712_v12, %v9466_v39  ;;  %v9501_v25 = vor.u32 %v10720_v63, %v9498_v23  ;;  %v9733_v60 = vor.u32 %v10778_v11, %v9730_v42  ;;  %v9722_v13 = vld [vmem:[%s15548_s5 + $0x3e8] sm:$0xf0]  ;;  %v9714_v12 = vld [vmem:[%s15548_s5 + $0x3d8] sm:$0xf0] }
 0x4b0   : > { %6389 = vmatpush.bf16.msrb.mxu1 %v9621_v61  ;;  %v5299_v22 = vrot.slane %v5297_v9, 2  ;;  %v9522_v61 = vld [vmem:[%s15548_s5 + $0x258] sm:$0xf0]  ;;  %v10776_v9 = vld [vmem:[%s15548_s5 + $0x3e4] sm:$0xf] }
 0x4b1   : > { %6287 = vmatpush.bf16.msrb.mxu2 %v9777_v0  ;;  %v9737_v0 = vor.u32 %v10781_v14, %v9736_v45  ;;  %v10718_v14 = vld [vmem:[%s15548_s5 + $0x214] sm:$0xf]  ;;  %v9746_v52 = vld [vmem:[%s15548_s5 + $0x418] sm:$0xf0]  ;;  %v14964_v23 = vld [vmem:[%s15549_s6] sm:$0x3] }
 0x4b2   : > { %6376 = vmatpush.bf16.msrb.mxu0 %v9549_v59  ;;  %v14779_v19 = vsel %vm1463_vm3, %v5299_v22, %v5300_v30  ;;  %v9794_v22 = vld [vmem:[%s15548_s5 + $0x478] sm:$0xf0]  ;;  %v10774_v30 = vld [vmem:[%s15548_s5 + $0x3d4] sm:$0xf] }
 0x4b3   : > { %6300 = vmatpush.bf16.msrb.mxu3 %v9277_v10  ;;  %v9538_v10 = vld [vmem:[%s15548_s5 + $0x278] sm:$0xf0]  ;;  %v9717_v15 = vor.u32 %v10774_v30, %v9714_v12  ;;  %v10790_v2 = vld [vmem:[%s15548_s5 + $0x454] sm:$0xf]  ;;  %v10803_v12 = vld [vmem:[%s15550_s7 + $0x28] sm:$0xff] }
 0x4b4   : > { %6390 = vmatpush.bf16.msrb.mxu1 %v9613_v47  ;;  %v9437_v47 = vor.u32 %v10704_v33, %v9434_v51  ;;  %v9754_v33 = vld [vmem:[%s15548_s5 + $0x428] sm:$0xf0]  ;;  %v10764_v51 = vld [vmem:[%s15548_s5 + $0x384] sm:$0xf] }
 0x4b5   : > { %6288 = vmatpush.bf16.msrb.mxu2 %v9769_v44  ;;  %6377 = vmatmul.bf16.vlgmr.msrb.gmra.mxu0 %v5275_v7  ;;  %v9541_v44 = vor.u32 %v10730_v48, %v9538_v10  ;;  %v10708_v7 = vld [vmem:[%s15548_s5 + $0x1c4] sm:$0xf] }
 0x4b6   : > { %v9453_v59 = vor.u32 %v10708_v7, %v9450_v46  ;;  %v10772_v48 = vld [vmem:[%s15548_s5 + $0x3c4] sm:$0xf] }
 0x4b7   : > { %6301 = vmatpush.bf16.msrb.mxu3 %v9269_v16  ;;  %6391 = vmatmul.bf16.vlgmr.msrb.gmra.mxu1 %v5282_v17  ;;  %v9234_v17 = vld [vmem:[%s15548_s5 + $0x18] sm:$0xf0]  ;;  %v10726_v16 = vld [vmem:[%s15548_s5 + $0x254] sm:$0xf]  ;;  %v10788_v7 = vld [vmem:[%s15548_s5 + $0x444] sm:$0xf] }
 0x4b8   : > { %v9237_v38 = vor.u32 %v10654_v24, %v9234_v17  ;;  %v9525_v8 = vor.u32 %v10726_v16, %v9522_v61  ;;  %v9482_v24 = vld [vmem:[%s15548_s5 + $0x208] sm:$0xf0]  ;;  %v9725_v17 = vor.u32 %v10776_v9, %v9722_v13  ;;  %v10768_v46 = vld [vmem:[%s15548_s5 + $0x3a4] sm:$0xf]  ;;  %v10786_v61 = vld [vmem:[%s15548_s5 + $0x434] sm:$0xf] }
 0x4b9   : > { %6289 = vmatpush.bf16.msrb.mxu2 %v9761_v54  ;;  %v9442_v54 = vld [vmem:[%s15548_s5 + $0x1b8] sm:$0xf0] }
 0x4ba   : > { %v9445_v50 = vor.u32 %v10706_v58, %v9442_v54  ;;  %v9762_v58 = vld [vmem:[%s15548_s5 + $0x438] sm:$0xf0]  ;;  %v10766_v54 = vld [vmem:[%s15548_s5 + $0x394] sm:$0xf] }
 0x4bb   : > { %6302 = vmatpush.bf16.msrb.mxu3 %v9261_v55  ;;  %v10813_v9 = vld [vmem:[%s15550_s7 + $0x78] sm:$0xff] }
 0x4bc   : > { %7825 = vmatpush.bf16.msra.mxu1 %v10813_v9 }
 0x4bd   : > { %6290 = vmatpush.bf16.msrb.mxu2 %v9753_v35  ;;  %v9506_v35 = vld [vmem:[%s15548_s5 + $0x238] sm:$0xf0] }
 0x4be   : > { %v9509_v1 = vor.u32 %v10722_v41, %v9506_v35  ;;  %v10782_v35 = vld [vmem:[%s15548_s5 + $0x414] sm:$0xf] }
 0x4bf   : > { %6303 = vmatpush.bf16.msrb.mxu3 %v9253_v18  ;;  %v10700_v18 = vld [vmem:[%s15548_s5 + $0x184] sm:$0xf]  ;;  %v9749_v4 = vor.u32 %v10782_v35, %v9746_v52  ;;  %v10836_v52 = vld [vmem:[%s15550_s7 + $0x130] sm:$0xff] }
 0x4c1   : > { %6291 = vmatpush.bf16.msrb.mxu2 %v9745_v6  ;;  %v9418_v6 = vld [vmem:[%s15548_s5 + $0x188] sm:$0xf0] }
 0x4c2   : > { %v9421_v45 = vor.u32 %v10700_v18, %v9418_v6  ;;  %v5449_v6 = vperm.slane %v14964_v23, 0 }
 0x4c3   : > { %6304 = vmatpush.bf16.msrb.mxu3 %v9245_v36  ;;  %v9493_v36 = vor.u32 %v10718_v14, %v9490_v26 }
 0x4c5   : > { %6292 = vmatpush.bf16.msrb.mxu2 %v9737_v0  ;;  %v10716_v0 = vld [vmem:[%s15548_s5 + $0x204] sm:$0xf] }
 0x4c6   : > { %v9485_v39 = vor.u32 %v10716_v0, %v9482_v24  ;;  %v10804_v0 = vld [vmem:[%s15550_s7 + $0x30] sm:$0xff] }
 0x4c7   : > { %6305 = vmatpush.bf16.msrb.mxu3 %v9237_v38  ;;  %v10812_v24 = vld [vmem:[%s15550_s7 + $0x70] sm:$0xff] }
 0x4c8   : > { %6293 = vmatmul.bf16.vlgmr.msrb.gmra.mxu2 %v14779_v19  ;;  %7826 = vmatpush.bf16.msra.mxu1 %v10812_v24 }
 0x4c9   : > { %6341 = vmatpush.bf16.msra.mxu2 %v9477_v21  ;;  %v10794_v21 = vld [vmem:[%s15548_s5 + $0x474] sm:$0xf] }
 0x4ca   : > { %v9797_v38 = vor.u32 %v10794_v21, %v9794_v22  ;;  %v10829_v21 = vld [vmem:[%s15550_s7 + $0xf8] sm:$0xff] }
 0x4cb   : > { %6306 = vmatpush.bf16.msrb.mxu3 %v9229_v40  ;;  %v9778_v40 = vld [vmem:[%s15548_s5 + $0x458] sm:$0xf0] }
 0x4cc   : > { %v9781_v62 = vor.u32 %v10790_v2, %v9778_v40  ;;  %v10801_v40 = vld [vmem:[%s15550_s7 + $0x18] sm:$0xff] }
 0x4cd   : > { %6342 = vmatpush.bf16.msra.mxu2 %v9469_v56  ;;  %v9786_v56 = vld [vmem:[%s15548_s5 + $0x468] sm:$0xf0] }
 0x4ce   : > { %6307 = vmatmul.bf16.vlgmr.msrb.gmra.mxu3 %v14354_v37  ;;  %v9514_v37 = vld [vmem:[%s15548_s5 + $0x248] sm:$0xf0]  ;;  %v9789_v10 = vor.u32 %v10792_v5, %v9786_v56  ;;  %v10802_v5 = vld [vmem:[%s15550_s7 + $0x20] sm:$0xff] }
 0x4cf   : > { %6355 = vmatpush.bf16.msra.mxu3 %v9541_v44  ;;  %v9517_v55 = vor.u32 %v10724_v27, %v9514_v37  ;;  %v10770_v44 = vld [vmem:[%s15548_s5 + $0x3b4] sm:$0xf]  ;;  %v10784_v37 = vld [vmem:[%s15548_s5 + $0x424] sm:$0xf] }
 0x4d0   : > { %v10810_v56 = vld [vmem:[%s15550_s7 + $0x60] sm:$0xff] }
 0x4d1   : > { %6343 = vmatpush.bf16.msra.mxu2 %v9461_v32  ;;  %v9698_v32 = vld [vmem:[%s15548_s5 + $0x3b8] sm:$0xf0] }
 0x4d2   : > { %v9701_v57 = vor.u32 %v10770_v44, %v9698_v32  ;;  %v10809_v44 = vld [vmem:[%s15550_s7 + $0x58] sm:$0xff]  ;;  %v10818_v32 = vld [vmem:[%s15550_s7 + $0xa0] sm:$0xff] }
 0x4d3   : > { %6356 = vmatpush.bf16.msra.mxu3 %v9533_v31  ;;  %v9690_v31 = vld [vmem:[%s15548_s5 + $0x3a8] sm:$0xf0] }
 0x4d4   : > { %v9693_v16 = vor.u32 %v10768_v46, %v9690_v31  ;;  %v10825_v46 = vld [vmem:[%s15550_s7 + $0xd8] sm:$0xff] }
 0x4d5   : > { %6344 = vmatpush.bf16.msra.mxu2 %v9453_v59 }
 0x4d7   : > { %6357 = vmatpush.bf16.msra.mxu3 %v9525_v8  ;;  %v9682_v8 = vld [vmem:[%s15548_s5 + $0x398] sm:$0xf0] }
 0x4d8   : > { %v9685_v27 = vor.u32 %v10766_v54, %v9682_v8  ;;  %v10824_v54 = vld [vmem:[%s15550_s7 + $0xd0] sm:$0xff] }
 0x4d9   : > { %6345 = vmatpush.bf16.msra.mxu2 %v9445_v50  ;;  %v9765_v50 = vor.u32 %v10786_v61, %v9762_v58  ;;  %v10807_v61 = vld [vmem:[%s15550_s7 + $0x48] sm:$0xff]  ;;  %v10816_v58 = vld [vmem:[%s15550_s7 + $0x90] sm:$0xff] }
 0x4db   : > { %6358 = vmatpush.bf16.msra.mxu3 %v9517_v55  ;;  %v9674_v55 = vld [vmem:[%s15548_s5 + $0x388] sm:$0xf0] }
 0x4dc   : > { %v9677_v41 = vor.u32 %v10764_v51, %v9674_v55  ;;  %v10845_v51 = vld [vmem:[%s15550_s7 + $0x178] sm:$0xff]  ;;  %v10815_v55 = vld [vmem:[%s15550_s7 + $0x88] sm:$0xff] }
 0x4dd   : > { %6346 = vmatpush.bf16.msra.mxu2 %v9437_v47  ;;  %v9757_v47 = vor.u32 %v10784_v37, %v9754_v33  ;;  %v10806_v37 = vld [vmem:[%s15550_s7 + $0x40] sm:$0xff]  ;;  %v10837_v33 = vld [vmem:[%s15550_s7 + $0x138] sm:$0xff] }
 0x4df   : > { %6359 = vmatpush.bf16.msra.mxu3 %v9509_v1  ;;  %v10780_v1 = vld [vmem:[%s15548_s5 + $0x404] sm:$0xf] }
 0x4e1   : > { %6347 = vmatpush.bf16.msra.mxu2 %v9429_v49  ;;  %v9738_v49 = vld [vmem:[%s15548_s5 + $0x408] sm:$0xf0] }
 0x4e2   : > { %v9741_v63 = vor.u32 %v10780_v1, %v9738_v49  ;;  %v10844_v1 = vld [vmem:[%s15550_s7 + $0x170] sm:$0xff]  ;;  %v365_v49 = vld [vmem:[#allocation4 + $0x18] sm:$0x11] }
 0x4e3   : > { %6360 = vmatpush.bf16.msra.mxu3 %v9501_v25 }
 0x4e5   : > { %6348 = vmatpush.bf16.msra.mxu2 %v9421_v45 }
 0x4e7   : > { %6361 = vmatpush.bf16.msra.mxu3 %v9493_v36 }
 0x4e8   : > { %6349 = vmatmul.bf16.vlgmr.msra.gmra.mxu2 %v14585_v3  ;;  %v9706_v3 = vld [vmem:[%s15548_s5 + $0x3c8] sm:$0xf0] }
 0x4e9   : > { %6397 = vmatpush.bf16.msrb.mxu2 %v9733_v60  ;;  %v9709_v34 = vor.u32 %v10772_v48, %v9706_v3  ;;  %v10819_v48 = vld [vmem:[%s15550_s7 + $0xa8] sm:$0xff] }
 0x4ea   : > { %v10827_v3 = vld [vmem:[%s15550_s7 + $0xe8] sm:$0xff] }
 0x4eb   : > { %6362 = vmatpush.bf16.msra.mxu3 %v9485_v39  ;;  %v10811_v39 = vld [vmem:[%s15550_s7 + $0x68] sm:$0xff] }
 0x4ec   : > { %7827 = vmatpush.bf16.msra.mxu1 %v10811_v39  ;;  %v10843_v39 = vld [vmem:[%s15550_s7 + $0x168] sm:$0xff] }
 0x4ed   : > { %6398 = vmatpush.bf16.msrb.mxu2 %v9725_v17  ;;  %v10821_v17 = vld [vmem:[%s15550_s7 + $0xb8] sm:$0xff] }
 0x4ee   : > { %6363 = vmatmul.bf16.vlgmr.msra.gmra.mxu3 %v14647_v43  ;;  %v9770_v43 = vld [vmem:[%s15548_s5 + $0x448] sm:$0xf0] }
 0x4ef   : > { %6411 = vmatpush.bf16.msrb.mxu3 %v9797_v38  ;;  %v9773_v59 = vor.u32 %v10788_v7, %v9770_v43  ;;  %v10820_v38 = vld [vmem:[%s15550_s7 + $0xb0] sm:$0xff]  ;;  %v10817_v43 = vld [vmem:[%s15550_s7 + $0x98] sm:$0xff] }
 0x4f0   : > { %7828 = vmatpush.bf16.msra.mxu1 %v10810_v56  ;;  %v10808_v7 = vld [vmem:[%s15550_s7 + $0x50] sm:$0xff]  ;;  %v10834_v56 = vld [vmem:[%s15550_s7 + $0x120] sm:$0xff] }
 0x4f1   : > { %6399 = vmatpush.bf16.msrb.mxu2 %v9717_v15  ;;  %v10828_v15 = vld [vmem:[%s15550_s7 + $0xf0] sm:$0xff] }
 0x4f3   : > { %6412 = vmatpush.bf16.msrb.mxu3 %v9789_v10 }
 0x4f4   : > { %7829 = vmatpush.bf16.msra.mxu1 %v10809_v44 }
 0x4f5   : > { %6400 = vmatpush.bf16.msrb.mxu2 %v9709_v34 }
 0x4f7   : > { %6413 = vmatpush.bf16.msrb.mxu3 %v9781_v62  ;;  %v10826_v62 = vld [vmem:[%s15550_s7 + $0xe0] sm:$0xff] }
 0x4f8   : > { %7830 = vmatpush.bf16.msra.mxu1 %v10808_v7 }
 0x4f9   : > { %6401 = vmatpush.bf16.msrb.mxu2 %v9701_v57  ;;  %v10800_v57 = vld [vmem:[%s15550_s7 + $0x10] sm:$0xff] }
 0x4fb   : > { %6414 = vmatpush.bf16.msrb.mxu3 %v9773_v59 }
 0x4fc   : > { %7831 = vmatpush.bf16.msra.mxu1 %v10807_v61 }
 0x4fd   : > { %6402 = vmatpush.bf16.msrb.mxu2 %v9693_v16  ;;  %v10799_v16 = vld [vmem:[%s15550_s7 + $0x8] sm:$0xff] }
 0x4ff   : > { %6415 = vmatpush.bf16.msrb.mxu3 %v9765_v50 }
 0x500   : > { %7832 = vmatpush.bf16.msra.mxu1 %v10806_v37  ;;  %v10832_v37 = vld [vmem:[%s15550_s7 + $0x110] sm:$0xff] }
 0x501   : > { %6403 = vmatpush.bf16.msrb.mxu2 %v9685_v27  ;;  %v10798_v27 = vld [vmem:[%s15550_s7] sm:$0xff] }
 0x502   : > { %v6182_v18 = vpop.f32.mrf.mxu2 }
 0x503   : > { %6416 = vmatpush.bf16.msrb.mxu3 %v9757_v47  ;;  %v6183_v11 = vadd.f32 %v6182_v18, %v5449_v6  ;;  %v10823_v47 = vld [vmem:[%s15550_s7 + $0xc8] sm:$0xff]  ;;  %v10822_v18 = vld [vmem:[%s15550_s7 + $0xc0] sm:$0xff] }
 0x504   : > { %7881 = vmatpush.bf16.msrb.mxu1 %v10845_v51 }
 0x505   : > { %6404 = vmatpush.bf16.msrb.mxu2 %v9677_v41 }
 0x507   : > { %6417 = vmatpush.bf16.msrb.mxu3 %v9749_v4  ;;  %v10877_v4 = vld [vmem:[%s15550_s7 + $0x278] sm:$0xff] }
 0x508   : > { %6405 = vmatmul.bf16.vlgmr.msrb.gmra.mxu2 %v14506_v53  ;;  %v6196_v42 = vpop.f32.mrf.mxu3  ;;  %7882 = vmatpush.bf16.msrb.mxu1 %v10844_v1 }
 0x509   : > { %v14967_v25 = vadd.f32 %v6196_v42, %v6183_v11  ;;  %7839 = vmatpush.bf16.msra.mxu2 %v10821_v17  ;;  %v10853_v11 = vld [vmem:[%s15550_s7 + $0x1b8] sm:$0xff] }
 0x50a   : > { %v6184_v45 = vpop.f32.mrf.mxu2  ;;  %v15025_v34 = vpop.f32.mrf.mxu0  ;;  %v10861_v42 = vld [vmem:[%s15550_s7 + $0x1f8] sm:$0xff] }
 0x50b   : > { %6418 = vmatpush.bf16.msrb.mxu3 %v9741_v63  ;;  %v6185_v14 = vadd.f32 %v6184_v45, %v5449_v6  ;;  %v10814_v63 = vld [vmem:[%s15550_s7 + $0x80] sm:$0xff]  ;;  %v366_v6 = vsel %vm364_vm2, 0, %v365_v49 }
 0x50c   : > { %367 = vst [vmem:[#allocation4 + $0x18] sm:$0x11] %v366_v6  ;;  %7883 = vmatpush.bf16.msrb.mxu1 %v10843_v39  ;;  %v10839_v6 = vld [vmem:[%s15550_s7 + $0x148] sm:$0xff] }
 0x50d   : > { %7840 = vmatpush.bf16.msra.mxu2 %v10820_v38 }
 0x50e   : > { %6419 = vmatmul.bf16.vlgmr.msrb.gmra.mxu3 %v14779_v19  ;;  %v10805_v19 = vld [vmem:[%s15550_s7 + $0x38] sm:$0xff]  ;;  %v15053_v31 = vpop.f32.mrf.mxu1 }
 0x50f   : > { %7811 = vmatpush.bf16.msra.mxu0 %v10805_v19  ;;  %7853 = vmatpush.bf16.msra.mxu3 %v10829_v21 }
 0x510   : > { %v6198_v26 = vpop.f32.mrf.mxu3 }
 0x511   : > { %v14969_v53 = vadd.f32 %v6198_v26, %v6185_v14  ;;  %7841 = vmatpush.bf16.msra.mxu2 %v10819_v48  ;;  %v5450_v26 = vperm.slane %v14964_v23, 1  ;;  %v10860_v23 = vld [vmem:[%s15550_s7 + $0x1f0] sm:$0xff]  ;;  %v10842_v48 = vld [vmem:[%s15550_s7 + $0x160] sm:$0xff] }
 0x512   : > { %v14971_v60 = vpop.f32.mrf.mxu2  ;;  %v15071_v50 = vpop.f32.mrf.mxu0  ;;  %7884 = vmatpush.bf16.msrb.mxu1 %v10842_v48 }
 0x513   : > { %7812 = vmatpush.bf16.msra.mxu0 %v10804_v0  ;;  %7854 = vmatpush.bf16.msra.mxu3 %v10828_v15  ;;  %v10852_v15 = vld [vmem:[%s15550_s7 + $0x1b0] sm:$0xff] }
 0x515   : > { %7842 = vmatpush.bf16.msra.mxu2 %v10818_v32 }
 0x516   : > { %v15091_v41 = vpop.f32.mrf.mxu1 }
 0x517   : > { %7813 = vmatpush.bf16.msra.mxu0 %v10803_v12  ;;  %7855 = vmatpush.bf16.msra.mxu3 %v10827_v3  ;;  %v10835_v12 = vld [vmem:[%s15550_s7 + $0x128] sm:$0xff] }
 0x519   : > { %7843 = vmatpush.bf16.msra.mxu2 %v10817_v43  ;;  %v10833_v43 = vld [vmem:[%s15550_s7 + $0x118] sm:$0xff] }
 0x51a   : > { %v14981_v36 = vpop.f32.mrf.mxu2  ;;  %v6322_v14 = vpop.f32.mrf.mxu0 }
 0x51b   : > { %v14979_v13 = vpop.f32.mrf.mxu3  ;;  %7814 = vmatpush.bf16.msra.mxu0 %v10802_v5  ;;  %7856 = vmatpush.bf16.msra.mxu3 %v10826_v62  ;;  %v6211_v5 = vadd.f32 %v14971_v60, %v14967_v25  ;;  %v10859_v25 = vld [vmem:[%s15550_s7 + $0x1e8] sm:$0xff] }
 0x51d   : > { %7844 = vmatpush.bf16.msra.mxu2 %v10816_v58  ;;  %v6225_v60 = vadd.f32 %v14979_v13, %v6211_v5  ;;  %v10850_v13 = vld [vmem:[%s15550_s7 + $0x1a0] sm:$0xff] }
 0x51e   : > { %v6336_v19 = vpop.f32.mrf.mxu1  ;;  %v10846_v5 = vld [vmem:[%s15550_s7 + $0x180] sm:$0xff] }
 0x51f   : > { %7815 = vmatpush.bf16.msra.mxu0 %v10801_v40  ;;  %7857 = vmatpush.bf16.msra.mxu3 %v10825_v46  ;;  %v10851_v40 = vld [vmem:[%s15550_s7 + $0x1a8] sm:$0xff]  ;;  %v10841_v46 = vld [vmem:[%s15550_s7 + $0x158] sm:$0xff] }
 0x520   : > { %7885 = vmatpush.bf16.msrb.mxu1 %v10841_v46 }
 0x521   : > { %7845 = vmatpush.bf16.msra.mxu2 %v10815_v55 }
 0x522   : > { %v6324_v17 = vpop.f32.mrf.mxu0 }
 0x523   : > { %v14995_v22 = vpop.f32.mrf.mxu3  ;;  %7816 = vmatpush.bf16.msra.mxu0 %v10800_v57  ;;  %7858 = vmatpush.bf16.msra.mxu3 %v10824_v54 }
 0x525   : > { %7846 = vmatpush.bf16.msra.mxu2 %v10814_v63 }
 0x526   : > { %v6338_v3 = vpop.f32.mrf.mxu1 }
 0x527   : > { %7817 = vmatpush.bf16.msra.mxu0 %v10799_v16  ;;  %7859 = vmatpush.bf16.msra.mxu3 %v10823_v47 }
 0x529   : > { %7895 = vmatpush.bf16.msrb.mxu2 %v10853_v11 }
 0x52b   : > { %v14997_v30 = vpop.f32.mrf.mxu2  ;;  %7818 = vmatpush.bf16.msra.mxu0 %v10798_v27  ;;  %7860 = vmatpush.bf16.msra.mxu3 %v10822_v18  ;;  %v6213_v27 = vadd.f32 %v14981_v36, %v14969_v53  ;;  %v10857_v53 = vld [vmem:[%s15550_s7 + $0x1d8] sm:$0xff]  ;;  %v10831_v18 = vld [vmem:[%s15550_s7 + $0x108] sm:$0xff] }
 0x52c   : > { %v6239_v57 = vadd.f32 %v14997_v30, %v6225_v60  ;;  %v10858_v30 = vld [vmem:[%s15550_s7 + $0x1e0] sm:$0xff] }
 0x52d   : > { %7896 = vmatpush.bf16.msrb.mxu2 %v10852_v15  ;;  %v6227_v36 = vadd.f32 %v14995_v22, %v6213_v27  ;;  %v10848_v22 = vld [vmem:[%s15550_s7 + $0x190] sm:$0xff] }
 0x52f   : > { %7867 = vmatpush.bf16.msrb.mxu0 %v10837_v33  ;;  %7909 = vmatpush.bf16.msrb.mxu3 %v10861_v42  ;;  %v10840_v33 = vld [vmem:[%s15550_s7 + $0x150] sm:$0xff] }
 0x530   : > { %7886 = vmatpush.bf16.msrb.mxu1 %v10840_v33 }
 0x531   : > { %v15023_v10 = vpop.f32.mrf.mxu3  ;;  %7897 = vmatpush.bf16.msrb.mxu2 %v10851_v40 }
 0x532   : > { %v6253_v16 = vadd.f32 %v15023_v10, %v6239_v57  ;;  %v6378_v54 = vpop.f32.mrf.mxu0  ;;  %v10849_v10 = vld [vmem:[%s15550_s7 + $0x198] sm:$0xff] }
 0x533   : > { %v15027_v2 = vpop.f32.mrf.mxu2  ;;  %7868 = vmatpush.bf16.msrb.mxu0 %v10836_v52  ;;  %7910 = vmatpush.bf16.msrb.mxu3 %v10860_v23 }
 0x534   : > { %v6267_v55 = vadd.f32 %v15025_v34, %v6253_v16  ;;  %v6392_v52 = vpop.f32.mrf.mxu1  ;;  %v6241_v49 = vadd.f32 %v15027_v2, %v6227_v36  ;;  %v10856_v34 = vld [vmem:[%s15550_s7 + $0x1d0] sm:$0xff]  ;;  %7887 = vmatpush.bf16.msrb.mxu1 %v10839_v6  ;;  %v10893_v6 = vld [vmem:[%s15550_s7 + $0x2f8] sm:$0xff] }
 0x535   : > { %7898 = vmatpush.bf16.msrb.mxu2 %v10850_v13  ;;  %v10868_v36 = vld [vmem:[%s15550_s7 + $0x230] sm:$0xff] }
 0x536   : > { %v6281_v11 = vadd.f32 %v15053_v31, %v6267_v55  ;;  %v10847_v31 = vld [vmem:[%s15550_s7 + $0x188] sm:$0xff]  ;;  %v10876_v55 = vld [vmem:[%s15550_s7 + $0x270] sm:$0xff] }
 0x537   : > { %7869 = vmatpush.bf16.msrb.mxu0 %v10835_v12  ;;  %7911 = vmatpush.bf16.msrb.mxu3 %v10859_v25 }
 0x539   : > { %v15055_v59 = vpop.f32.mrf.mxu3  ;;  %7899 = vmatpush.bf16.msrb.mxu2 %v10849_v10 }
 0x53a   : > { %v6255_v2 = vadd.f32 %v15055_v59, %v6241_v49  ;;  %v10855_v59 = vld [vmem:[%s15550_s7 + $0x1c8] sm:$0xff] }
 0x53b   : > { %7870 = vmatpush.bf16.msrb.mxu0 %v10834_v56  ;;  %7912 = vmatpush.bf16.msrb.mxu3 %v10858_v30  ;;  %v6454_v30 = vld [vmem:[#allocation4 + $0x10] sm:$0x33] }
 0x53c   : > { %v6394_v15 = vpop.f32.mrf.mxu1 }
 0x53d   : > { %7900 = vmatpush.bf16.msrb.mxu2 %v10848_v22 }
 0x53f   : > { %7871 = vmatpush.bf16.msrb.mxu0 %v10833_v43  ;;  %7913 = vmatpush.bf16.msrb.mxu3 %v10857_v53 }
 0x541   : > { %7901 = vmatpush.bf16.msrb.mxu2 %v10847_v31 }
 0x543   : > { %7872 = vmatpush.bf16.msrb.mxu0 %v10832_v37  ;;  %7914 = vmatpush.bf16.msrb.mxu3 %v10856_v34 }
 0x545   : > { %7902 = vmatpush.bf16.msrb.mxu2 %v10846_v5 }
 0x547   : > { %7873 = vmatpush.bf16.msrb.mxu0 %v10831_v18  ;;  %7915 = vmatpush.bf16.msrb.mxu3 %v10855_v59  ;;  %v10885_v18 = vld [vmem:[%s15550_s7 + $0x2b8] sm:$0xff]  ;;  %v10884_v59 = vld [vmem:[%s15550_s7 + $0x2b0] sm:$0xff] }
 0x54b   : > { %v15069_v8 = vpop.f32.mrf.mxu2 }
 0x551   : > { %v6308_v35 = vpop.f32.mrf.mxu3 }
 0x552   : > { %v6309_v24 = vadd.f32 %v6308_v35, %v5450_v26 }
 0x553   : > { %v15125_v45 = vpop.f32.mrf.mxu2 }
 0x554   : > { %v6323_v21 = vadd.f32 %v6322_v14, %v6309_v24  ;;  %v6380_v24 = vpop.f32.mrf.mxu0 }
 0x556   : > { %v6337_v32 = vadd.f32 %v6336_v19, %v6323_v21 }
 0x559   : > { %v6310_v9 = vpop.f32.mrf.mxu3 }
 0x55a   : > { %v6311_v44 = vadd.f32 %v6310_v9, %v5450_v26  ;;  %v6295_v26 = vadd.f32 %v15069_v8, %v6281_v11  ;;  %v10830_v9 = vld [vmem:[%s15550_s7 + $0x100] sm:$0xff]  ;;  %v6269_v8 = vadd.f32 %v15071_v50, %v6255_v2 }
 0x55b   : > { %7874 = vmatpush.bf16.msrb.mxu0 %v10830_v9  ;;  %v10854_v50 = vld [vmem:[%s15550_s7 + $0x1c0] sm:$0xff] }
 0x55c   : > { %v6325_v61 = vadd.f32 %v6324_v17, %v6311_v44  ;;  %v6425_v39 = vmax.f32 %v6295_v26, 0.0  ;;  %v6283_v56 = vadd.f32 %v15091_v41, %v6269_v8  ;;  %7916 = vmatpush.bf16.msrb.mxu3 %v10854_v50  ;;  %v10867_v26 = vld [vmem:[%s15550_s7 + $0x228] sm:$0xff]  ;;  %v10892_v8 = vld [vmem:[%s15550_s7 + $0x2f0] sm:$0xff] }
 0x55e   : > { %v6339_v35 = vadd.f32 %v6338_v3, %v6325_v61  ;;  %v6297_v25 = vadd.f32 %v15125_v45, %v6283_v56 }
 0x560   : > { %v6427_v43 = vmax.f32 %v6297_v25, 0.0  ;;  %v10883_v25 = vld [vmem:[%s15550_s7 + $0x2a8] sm:$0xff] }
 0x56b   : > { %v6350_v0 = vpop.f32.mrf.mxu2 }
 0x56c   : > { %v6351_v7 = vadd.f32 %v6350_v0, %v6337_v32  ;;  %v10838_v0 = vld [vmem:[%s15550_s7 + $0x140] sm:$0xff]  ;;  %v6436_v32 = vld [vmem:[#allocation4 + $0x8] sm:$0x11] }
 0x56d   : > { %7888 = vmatpush.bf16.msrb.mxu1 %v10838_v0 }
 0x571   : > { %v6364_v38 = vpop.f32.mrf.mxu3 }
 0x572   : > { %v6365_v58 = vadd.f32 %v6364_v38, %v6351_v7 }
 0x573   : > { %v6352_v62 = vpop.f32.mrf.mxu2 }
 0x574   : > { %v6379_v47 = vadd.f32 %v6378_v54, %v6365_v58  ;;  %v6353_v63 = vadd.f32 %v6352_v62, %v6339_v35  ;;  %v6443_v62 = vld [vmem:[#allocation4 + $0x8] sm:$0x66] }
 0x576   : > { %v6393_v14 = vadd.f32 %v6392_v52, %v6379_v47 }
 0x579   : > { %v6366_v51 = vpop.f32.mrf.mxu3 }
 0x57a   : > { %v6367_v42 = vadd.f32 %v6366_v51, %v6353_v63 }
 0x57c   : > { %v6381_v21 = vadd.f32 %v6380_v24, %v6367_v42 }
 0x57e   : > { %v6395_v40 = vadd.f32 %v6394_v15, %v6381_v21  ;;  %v10866_v15 = vld [vmem:[%s15550_s7 + $0x220] sm:$0xff] }
 0x58b   : > { %v6406_v1 = vpop.f32.mrf.mxu2 }
 0x58c   : > { %v6407_v19 = vadd.f32 %v6406_v1, %v6393_v14 }
 0x591   : > { %v6420_v17 = vpop.f32.mrf.mxu3 }
 0x592   : > { %v6421_v12 = vadd.f32 %v6420_v17, %v6407_v19  ;;  %v10875_v19 = vld [vmem:[%s15550_s7 + $0x268] sm:$0xff] }
 0x593   : > { %v6408_v23 = vpop.f32.mrf.mxu2 }
 0x594   : > { %v6426_v38 = vmax.f32 %v6421_v12, 0.0  ;;  %v6409_v44 = vadd.f32 %v6408_v23, %v6395_v40  ;;  %v10874_v23 = vld [vmem:[%s15550_s7 + $0x260] sm:$0xff] }
 0x596   : > { %v6429_v48 = vpack.c.bf16 %v6426_v38, %v6425_v39 }
 0x598   : > { %v6431_v60 = vrot.slane %v6429_v48, 5 }
 0x599   : > { %v6422_v57 = vpop.f32.mrf.mxu3 }
 0x59a   : > { %v6432_v41 = vrot.slane %v6431_v60, 4  ;;  %6435 = vst [vmem:[#allocation4] sm:$0x88] %v6431_v60  ;;  %v6423_v7 = vadd.f32 %v6422_v57, %v6409_v44  ;;  %v10891_v60 = vld [vmem:[%s15550_s7 + $0x2e8] sm:$0xff] }
 0x59c   : > { %v6437_v45 = vsel %vm364_vm2, %v6432_v41, %v6436_v32  ;;  %v6444_v46 = vsel %vm6442_vm8, %v6432_v41, %v6443_v62  ;;  %v6428_v29 = vmax.f32 %v6423_v7, 0.0  ;;  %v10865_v41 = vld [vmem:[%s15550_s7 + $0x218] sm:$0xff] }
 0x59d   : > { %6438 = vst [vmem:[#allocation4 + $0x8] sm:$0x11] %v6437_v45  ;;  %v10873_v7 = vld [vmem:[%s15550_s7 + $0x258] sm:$0xff] }
 0x59e   : > { %6445 = vst [vmem:[#allocation4 + $0x8] sm:$0x66] %v6444_v46  ;;  %v6446_v13 = vpack.c.bf16 %v6428_v29, %v6427_v43 }
 0x5a0   : > { %v9798_v16 = vrot.slane %v6446_v13, 9 }
 0x5a1   : > { %v9801_v58 = vld [vmem:[#allocation4] sm:$0xf]  ;;  %v10796_v27 = vld [vmem:[#allocation4 + $0x4] sm:$0xf] }
 0x5a2   : > { %v6455_v61 = vsel %vm6453_vm9, %v9798_v16, %v6454_v30  ;;  %v6461_v47 = vld [vmem:[#allocation4] sm:$0xcc]  ;;  %v10882_v16 = vld [vmem:[%s15550_s7 + $0x2a0] sm:$0xff] }
 0x5a3   : > { %6456 = vst [vmem:[#allocation4 + $0x10] sm:$0x33] %v6455_v61  ;;  %v6459_v9 = vld [vmem:[#allocation4] sm:$0xee]  ;;  %v6509_v0 = vunpack.c.l.b16 %v6461_v47  ;;  %v6510_v17 = vunpack.c.h.b16 %v6461_v47  ;;  %v10890_v61 = vld [vmem:[%s15550_s7 + $0x2e0] sm:$0xff]  ;;  %v10881_v47 = vld [vmem:[%s15550_s7 + $0x298] sm:$0xff] }
 0x5a4   : > { %v6497_v39 = vunpack.c.l.b16 %v6459_v9  ;;  %v6498_v38 = vunpack.c.h.b16 %v6459_v9 }
 0x5a5   : > { %v10797_v54 = vld [vmem:[#allocation4 + $0x4] sm:$0x70]  ;;  %v9803_v37 = vld [vmem:[#allocation4 + $0x8] sm:$0x70] }
 0x5a6   : > { %v9802_v33 = vor.u32 %v10797_v54, %v9801_v58  ;;  %v9806_v51 = vor.u32 %v10796_v27, %v9803_v37  ;;  %v6460_v53 = vld [vmem:[#allocation4 + $0x8] sm:$0xff]  ;;  %v10864_v37 = vld [vmem:[%s15550_s7 + $0x210] sm:$0xff] }
 0x5a7   : > { %v15256_v22 = vunpack.c.l.b16 %v6460_v53  ;;  %v15258_v34 = vunpack.c.h.b16 %v6460_v53 }
 0x5a8   : > { %7819 = vmatmul.bf16.vlgmr.msra.gmra.mxu0 %v9802_v33  ;;  %7833 = vmatmul.bf16.vlgmr.msra.gmra.mxu1 %v9806_v51  ;;  %v6482_v28 = vshll.u32 %v9802_v33, 16  ;;  %v6489_v10 = vshll.u32 %v9806_v51, 16  ;;  %v6480_v35 = vshrl.u32 %v9802_v33, 16  ;;  %v6487_v1 = vshrl.u32 %v9806_v51, 16  ;;  %v10872_v33 = vld [vmem:[%s15550_s7 + $0x250] sm:$0xff] }
 0x5a9   : > { %7923 = vmatpush.bf16.msra.mxu0 %v10869_v20  ;;  %7937 = vmatpush.bf16.msra.mxu1 %v10877_v4  ;;  %v6513_v21 = vpack.c.b16 %v15256_v22, %v6509_v0  ;;  %v6514_v12 = vpack.c.b16 %v15258_v34, %v6510_v17  ;;  %v6501_v3 = vpack.c.b16 %v15256_v22, %v6497_v39  ;;  %v10862_v0 = vld [vmem:[%s15550_s7 + $0x200] sm:$0xff]  ;;  %v10901_v17 = vld [vmem:[%s15550_s7 + $0x338] sm:$0xff] }
 0x5aa   : > { %v6484_v52 = vrot.slane %v6482_v28, 1  ;;  %v6491_v49 = vrot.slane %v6489_v10, 1  ;;  %v6462_v63 = vld [vmem:[#allocation4 + $0x10] sm:$0x11]  ;;  %v6502_v40 = vpack.c.b16 %v15258_v34, %v6498_v38 }
 0x5ab   : > { %v6511_v2 = vunpack.c.l.b16 %v6462_v63  ;;  %v6512_v14 = vunpack.c.h.b16 %v6462_v63  ;;  %v6518_v44 = vshrl.u32 %v6513_v21, 16  ;;  %v6521_v32 = vshll.u32 %v6513_v21, 16  ;;  %v6464_v27 = vld [vmem:[#allocation4 + $0x10] sm:$0x33]  ;;  %v10863_v63 = vld [vmem:[%s15550_s7 + $0x208] sm:$0xff] }
 0x5ac   : > { %v6485_v11 = vor.u32 %v6484_v52, %v6480_v35  ;;  %v6492_v42 = vor.u32 %v6491_v49, %v6487_v1  ;;  %v6535_v62 = vshrl.u32 %v6514_v12, 16  ;;  %v6538_v57 = vshll.u32 %v6514_v12, 16  ;;  %v10889_v35 = vld [vmem:[%s15550_s7 + $0x2d8] sm:$0xff]  ;;  %v6463_v52 = vld [vmem:[#allocation4] sm:$0x88]  ;;  %v10879_v21 = vld [vmem:[%s15550_s7 + $0x288] sm:$0xff] }
 0x5ad   : > { %7924 = vmatpush.bf16.msra.mxu0 %v10868_v36  ;;  %7938 = vmatpush.bf16.msra.mxu1 %v10876_v55  ;;  %v6515_v24 = vpack.c.b16 %v6511_v2, %v6511_v2  ;;  %v6516_v31 = vpack.c.b16 %v6512_v14, %v6512_v14  ;;  %v6503_v13 = vrot.slane %v6501_v3, 1  ;;  %v6504_v30 = vrot.slane %v6502_v40, 1  ;;  %v10880_v14 = vld [vmem:[%s15550_s7 + $0x290] sm:$0xff]  ;;  %v10887_v12 = vld [vmem:[%s15550_s7 + $0x2c8] sm:$0xff] }
 0x5ae   : > { %7847 = vmatmul.bf16.vlgmr.msra.gmra.mxu2 %v6485_v11  ;;  %7861 = vmatmul.bf16.vlgmr.msra.gmra.mxu3 %v6492_v42  ;;  %v6520_v58 = vrot.slane %v6518_v44, 2  ;;  %v6523_v20 = vrot.slane %v6521_v32, 3  ;;  %v6537_v4 = vrot.slane %v6535_v62, 2  ;;  %v6540_v54 = vrot.slane %v6538_v57, 3  ;;  %v10900_v3 = vld [vmem:[%s15550_s7 + $0x330] sm:$0xff] }
 0x5af   : > { %7951 = vmatpush.bf16.msra.mxu2 %v10885_v18  ;;  %7965 = vmatpush.bf16.msra.mxu3 %v10893_v6  ;;  %v6526_v5 = vshrl.u32 %v6515_v24, 16  ;;  %v6529_v50 = vshll.u32 %v6515_v24, 16  ;;  %v6543_v56 = vshrl.u32 %v6516_v31, 16  ;;  %v6546_v48 = vshll.u32 %v6516_v31, 16  ;;  %v10871_v18 = vld [vmem:[%s15550_s7 + $0x248] sm:$0xff]  ;;  %v10870_v24 = vld [vmem:[%s15550_s7 + $0x240] sm:$0xff] }
 0x5b0   : > { %v6557_v10 = vunpack.c.l.b16 %v6464_v27  ;;  %v6558_v53 = vunpack.c.h.b16 %v6464_v27  ;;  %v6524_v36 = vor.u32 %v6523_v20, %v6520_v58  ;;  %v6541_v55 = vor.u32 %v6540_v54, %v6537_v4  ;;  %v10908_v40 = vld [vmem:[%s15550_s7 + $0x370] sm:$0xff] }
 0x5b1   : > { %7925 = vmatpush.bf16.msra.mxu0 %v10867_v26  ;;  %7939 = vmatpush.bf16.msra.mxu1 %v10875_v19  ;;  %v6528_v43 = vrot.slane %v6526_v5, 2  ;;  %v6531_v45 = vrot.slane %v6529_v50, 3  ;;  %v6545_v46 = vrot.slane %v6543_v56, 2  ;;  %v6548_v29 = vrot.slane %v6546_v48, 3  ;;  %v10888_v26 = vld [vmem:[%s15550_s7 + $0x2d0] sm:$0xff] }
 0x5b2   : > { %v6555_v6 = vunpack.c.l.b16 %v6463_v52  ;;  %v6561_v2 = vpack.c.b16 %v6557_v10, %v6557_v10  ;;  %v6556_v11 = vunpack.c.h.b16 %v6463_v52  ;;  %v6562_v42 = vpack.c.b16 %v6558_v53, %v6558_v53  ;;  %v10916_v27 = vld [vmem:[%s15550_s7 + $0x3b0] sm:$0xff]  ;;  %v10906_v10 = vld [vmem:[%s15550_s7 + $0x360] sm:$0xff]  ;;  %v10915_v53 = vld [vmem:[%s15550_s7 + $0x3a8] sm:$0xff] }
 0x5b3   : > { %7952 = vmatpush.bf16.msra.mxu2 %v10884_v59  ;;  %7966 = vmatpush.bf16.msra.mxu3 %v10892_v8  ;;  %v6532_v51 = vor.u32 %v6531_v45, %v6528_v43  ;;  %v6549_v28 = vor.u32 %v6548_v29, %v6545_v46  ;;  %v10917_v43 = vld [vmem:[%s15550_s7 + $0x3b8] sm:$0xff]  ;;  %v10922_v52 = vld [vmem:[%s15550_s7 + $0x3e0] sm:$0xff] }
 0x5b4   : > { %v6559_v19 = vpack.c.b16 %v15256_v22, %v6555_v6  ;;  %v6560_v9 = vpack.c.b16 %v15258_v34, %v6556_v11  ;;  %v10909_v22 = vld [vmem:[%s15550_s7 + $0x378] sm:$0xff]  ;;  %v6580_v31 = vshrl.u32 %v6561_v2, 16  ;;  %v6583_v34 = vshll.u32 %v6561_v2, 16 }
 0x5b5   : > { %7926 = vmatpush.bf16.msra.mxu0 %v10866_v15  ;;  %7940 = vmatpush.bf16.msra.mxu1 %v10874_v23  ;;  %v6533_v1 = vsel %vm2053_vm7, %v6524_v36, %v6532_v51  ;;  %v6550_v49 = vsel %vm2053_vm7, %v6541_v55, %v6549_v28  ;;  %v6597_v59 = vshrl.u32 %v6562_v42, 16  ;;  %v6600_v8 = vshll.u32 %v6562_v42, 16  ;;  %v10925_v45 = vld [vmem:[%s15550_s7 + $0x3f8] sm:$0xff]  ;;  %v10898_v28 = vld [vmem:[%s15550_s7 + $0x320] sm:$0xff]  ;;  %v10923_v36 = vld [vmem:[%s15550_s7 + $0x3e8] sm:$0xff] }
 0x5b6   : > { %v6564_v39 = vrot.slane %v6561_v2, 3  ;;  %v6567_v38 = vrot.slane %v6562_v42, 3  ;;  %v6572_v15 = vshrl.u32 %v6559_v19, 16  ;;  %v6575_v23 = vshll.u32 %v6559_v19, 16  ;;  %v10897_v55 = vld [vmem:[%s15550_s7 + $0x318] sm:$0xff] }
 0x5b7   : > { %7953 = vmatpush.bf16.msra.mxu2 %v10883_v25  ;;  %7967 = vmatpush.bf16.msra.mxu3 %v10891_v60  ;;  %v6589_v5 = vshrl.u32 %v6560_v9, 16  ;;  %v6592_v50 = vshll.u32 %v6560_v9, 16  ;;  %v6563_v56 = vrot.slane %v6559_v19, 3  ;;  %v6566_v48 = vrot.slane %v6560_v9, 3  ;;  %v10921_v6 = vld [vmem:[%s15550_s7 + $0x3d8] sm:$0xff] }
 0x5b8   : > { %7875 = vmatmul.bf16.vlgmr.msrb.gmra.mxu0 %v6503_v13  ;;  %7889 = vmatmul.bf16.vlgmr.msrb.gmra.mxu1 %v6504_v30  ;;  %v6582_v25 = vrot.slane %v6580_v31, 3  ;;  %v6585_v60 = vrot.slane %v6583_v34, 4  ;;  %v6599_v44 = vrot.slane %v6597_v59, 3  ;;  %v6602_v32 = vrot.slane %v6600_v8, 4  ;;  %v6465_v2 = vld [vmem:[#allocation4 + $0x8] sm:$0xee] }
 0x5b9   : > { %7927 = vmatpush.bf16.msra.mxu0 %v10865_v41  ;;  %7941 = vmatpush.bf16.msra.mxu1 %v10873_v7  ;;  %v6565_v62 = vsel %vm1561_vm6, %v6563_v56, %v6564_v39  ;;  %v6568_v57 = vsel %vm1561_vm6, %v6566_v48, %v6567_v38  ;;  %v10878_v41 = vld [vmem:[%s15550_s7 + $0x280] sm:$0xff]  ;;  %v6574_v46 = vrot.slane %v6572_v15, 3  ;;  %v6577_v29 = vrot.slane %v6575_v23, 4  ;;  %v10933_v59 = vld [vmem:[%s15550_s7 + $0x438] sm:$0xff]  ;;  %v10932_v56 = vld [vmem:[%s15550_s7 + $0x430] sm:$0xff] }
 0x5ba   : > { %v10886_v7 = vld [vmem:[%s15550_s7 + $0x2c0] sm:$0xff]  ;;  %v6591_v13 = vrot.slane %v6589_v5, 3  ;;  %v6594_v30 = vrot.slane %v6592_v50, 4  ;;  %v6586_v58 = vor.u32 %v6585_v60, %v6582_v25  ;;  %v6603_v20 = vor.u32 %v6602_v32, %v6599_v44  ;;  %v10941_v8 = vld [vmem:[%s15550_s7 + $0x478] sm:$0xff]  ;;  %v10940_v48 = vld [vmem:[%s15550_s7 + $0x470] sm:$0xff] }
 0x5bb   : > { %7954 = vmatpush.bf16.msra.mxu2 %v10882_v16  ;;  %7968 = vmatpush.bf16.msra.mxu3 %v10890_v61  ;;  %v10899_v16 = vld [vmem:[%s15550_s7 + $0x328] sm:$0xff]  ;;  %v6578_v4 = vor.u32 %v6577_v29, %v6574_v46  ;;  %v6609_v19 = vunpack.c.l.b16 %v6465_v2  ;;  %v6610_v9 = vunpack.c.h.b16 %v6465_v2  ;;  %v10894_v31 = vld [vmem:[%s15550_s7 + $0x300] sm:$0xff]  ;;  %v10929_v46 = vld [vmem:[%s15550_s7 + $0x418] sm:$0xff] }
 0x5bc   : > { %v10907_v61 = vld [vmem:[%s15550_s7 + $0x368] sm:$0xff]  ;;  %v6595_v54 = vor.u32 %v6594_v30, %v6591_v13  ;;  %v10902_v34 = vld [vmem:[%s15550_s7 + $0x340] sm:$0xff]  ;;  %v10937_v29 = vld [vmem:[%s15550_s7 + $0x458] sm:$0xff] }
 0x5bd   : > { %7928 = vmatpush.bf16.msra.mxu0 %v10864_v37  ;;  %7942 = vmatpush.bf16.msra.mxu1 %v10872_v33  ;;  %v10924_v37 = vld [vmem:[%s15550_s7 + $0x3f0] sm:$0xff]  ;;  %v6587_v33 = vsel %vm362_vm13, %v6578_v4, %v6586_v58  ;;  %v6468_v13 = vld [vmem:[#allocation4 + $0x18] sm:$0x11] }
 0x5be   : > { %7903 = vmatmul.bf16.vlgmr.msrb.gmra.mxu2 %v6533_v1  ;;  %7917 = vmatmul.bf16.vlgmr.msrb.gmra.mxu3 %v6550_v49  ;;  %v6604_v51 = vsel %vm362_vm13, %v6595_v54, %v6603_v20  ;;  %v10896_v1 = vld [vmem:[%s15550_s7 + $0x310] sm:$0xff]  ;;  %v6641_v58 = vunpack.c.l.b16 %v6468_v13  ;;  %v6642_v20 = vunpack.c.h.b16 %v6468_v13  ;;  %v10927_v4 = vld [vmem:[%s15550_s7 + $0x408] sm:$0xff] }
 0x5bf   : > { %7955 = vmatpush.bf16.msra.mxu2 %v10881_v47  ;;  %7969 = vmatpush.bf16.msra.mxu3 %v10889_v35  ;;  %v10905_v47 = vld [vmem:[%s15550_s7 + $0x358] sm:$0xff]  ;;  %v10914_v35 = vld [vmem:[%s15550_s7 + $0x3a0] sm:$0xff]  ;;  %v10904_v49 = vld [vmem:[%s15550_s7 + $0x350] sm:$0xff] }
 0x5c0   : > { %v10928_v30 = vld [vmem:[%s15550_s7 + $0x410] sm:$0xff]  ;;  %v10935_v54 = vld [vmem:[%s15550_s7 + $0x448] sm:$0xff] }
 0x5c1   : > { %7929 = vmatpush.bf16.msra.mxu0 %v10863_v63  ;;  %7943 = vmatpush.bf16.msra.mxu1 %v10871_v18  ;;  %v15410_v63 = vld [vmem:[#allocation4 + $0x10] sm:$0xff]  ;;  %v10913_v18 = vld [vmem:[%s15550_s7 + $0x398] sm:$0xff] }
 0x5c2   : > { %v6611_v11 = vunpack.c.l.b16 %v15410_v63  ;;  %v6612_v42 = vunpack.c.h.b16 %v15410_v63 }
 0x5c3   : > { %7956 = vmatpush.bf16.msra.mxu2 %v10880_v14  ;;  %7970 = vmatpush.bf16.msra.mxu3 %v10888_v26  ;;  %v10895_v14 = vld [vmem:[%s15550_s7 + $0x308] sm:$0xff] }
 0x5c4   : > { %v10903_v26 = vld [vmem:[%s15550_s7 + $0x348] sm:$0xff] }
 0x5c5   : > { %7930 = vmatpush.bf16.msra.mxu0 %v10862_v0  ;;  %7944 = vmatpush.bf16.msra.mxu1 %v10870_v24  ;;  %v10912_v0 = vld [vmem:[%s15550_s7 + $0x390] sm:$0xff] }
 0x5c6   : > { %v10920_v24 = vld [vmem:[%s15550_s7 + $0x3d0] sm:$0xff] }
 0x5c7   : > { %7957 = vmatpush.bf16.msra.mxu2 %v10879_v21  ;;  %7971 = vmatpush.bf16.msra.mxu3 %v10887_v12  ;;  %v10911_v21 = vld [vmem:[%s15550_s7 + $0x388] sm:$0xff] }
 0x5c8   : > { %7931 = vmatmul.bf16.vlgmr.msra.gmra.mxu0 %v6565_v62  ;;  %7945 = vmatmul.bf16.vlgmr.msra.gmra.mxu1 %v6568_v57  ;;  %v10919_v12 = vld [vmem:[%s15550_s7 + $0x3c8] sm:$0xff] }
 0x5c9   : > { %7979 = vmatpush.bf16.msrb.mxu0 %v10901_v17  ;;  %7993 = vmatpush.bf16.msrb.mxu1 %v10909_v22  ;;  %v6613_v17 = vpack.c.b16 %v6611_v11, %v6609_v19  ;;  %v6614_v22 = vpack.c.b16 %v6612_v42, %v6610_v9  ;;  %v10931_v62 = vld [vmem:[%s15550_s7 + $0x428] sm:$0xff]  ;;  %v11009_v9 = vld [vmem:[%s15551_s8] ss:$0 sm:$0xff] }
 0x5ca   : > { %v10939_v57 = vld [vmem:[%s15550_s7 + $0x468] sm:$0xff] }
 0x5cb   : > { %7958 = vmatpush.bf16.msra.mxu2 %v10878_v41  ;;  %7972 = vmatpush.bf16.msra.mxu3 %v10886_v7  ;;  %v6620_v39 = vshrl.u32 %v6613_v17, 16  ;;  %v6623_v38 = vshll.u32 %v6613_v17, 16  ;;  %v6628_v15 = vshrl.u32 %v6614_v22, 16  ;;  %v6631_v23 = vshll.u32 %v6614_v22, 16 }
 0x5cc   : > { %v6615_v5 = vrot.slane %v6613_v17, 1  ;;  %v6616_v50 = vrot.slane %v6614_v22, 1 }
 0x5cd   : > { %7980 = vmatpush.bf16.msrb.mxu0 %v10900_v3  ;;  %7994 = vmatpush.bf16.msrb.mxu1 %v10908_v40  ;;  %v10910_v3 = vld [vmem:[%s15550_s7 + $0x380] sm:$0xff]  ;;  %v6622_v25 = vrot.slane %v6620_v39, 1  ;;  %v6625_v60 = vrot.slane %v6623_v38, 2  ;;  %v6630_v44 = vrot.slane %v6628_v15, 1  ;;  %v6633_v32 = vrot.slane %v6631_v23, 2 }
 0x5ce   : > { %7959 = vmatmul.bf16.vlgmr.msra.gmra.mxu2 %v6587_v33  ;;  %7973 = vmatmul.bf16.vlgmr.msra.gmra.mxu3 %v6604_v51  ;;  %v10918_v40 = vld [vmem:[%s15550_s7 + $0x3c0] sm:$0xff]  ;;  %v6645_v51 = vpack.c.b16 %v6641_v58, %v6641_v58 }
 0x5cf   : > { %8007 = vmatpush.bf16.msrb.mxu2 %v10917_v43  ;;  %8021 = vmatpush.bf16.msrb.mxu3 %v10925_v45  ;;  %v6626_v41 = vor.u32 %v6625_v60, %v6622_v25  ;;  %v6634_v7 = vor.u32 %v6633_v32, %v6630_v44  ;;  %v10930_v43 = vld [vmem:[%s15550_s7 + $0x420] sm:$0xff] }
 0x5d0   : > { %v10938_v45 = vld [vmem:[%s15550_s7 + $0x460] sm:$0xff] }
 0x5d1   : > { %7981 = vmatpush.bf16.msrb.mxu0 %v10899_v16  ;;  %7995 = vmatpush.bf16.msrb.mxu1 %v10907_v61  ;;  %v10936_v16 = vld [vmem:[%s15550_s7 + $0x450] sm:$0xff]  ;;  %v6467_v61 = vld [vmem:[#allocation4 + $0x8] sm:$0xcc] }
 0x5d3   : > { %8008 = vmatpush.bf16.msrb.mxu2 %v10916_v27  ;;  %8022 = vmatpush.bf16.msrb.mxu3 %v10924_v37  ;;  %v6639_v27 = vunpack.c.l.b16 %v6467_v61  ;;  %v6640_v37 = vunpack.c.h.b16 %v6467_v61 }
 0x5d5   : > { %7982 = vmatpush.bf16.msrb.mxu0 %v10898_v28  ;;  %7996 = vmatpush.bf16.msrb.mxu1 %v10906_v10  ;;  %v6643_v33 = vpack.c.b16 %v6611_v11, %v6639_v27  ;;  %v6644_v28 = vpack.c.b16 %v6612_v42, %v6640_v37  ;;  %v6646_v10 = vpack.c.b16 %v6642_v20, %v6642_v20 }
 0x5d7   : > { %8009 = vmatpush.bf16.msrb.mxu2 %v10915_v53  ;;  %8023 = vmatpush.bf16.msrb.mxu3 %v10923_v36  ;;  %v10926_v53 = vld [vmem:[%s15550_s7 + $0x400] sm:$0xff] }
 0x5d8   : > { %v10934_v36 = vld [vmem:[%s15550_s7 + $0x440] sm:$0xff] }
 0x5d9   : > { %7983 = vmatpush.bf16.msrb.mxu0 %v10897_v55  ;;  %7997 = vmatpush.bf16.msrb.mxu1 %v10905_v47  ;;  %v6647_v55 = vrot.slane %v6643_v33, 2  ;;  %v6648_v47 = vrot.slane %v6645_v51, 2 }
 0x5db   : > { %8010 = vmatpush.bf16.msrb.mxu2 %v10914_v35  ;;  %8024 = vmatpush.bf16.msrb.mxu3 %v10922_v52  ;;  %v6650_v35 = vrot.slane %v6644_v28, 2  ;;  %v6651_v52 = vrot.slane %v6646_v10, 2 }
 0x5dd   : > { %7984 = vmatpush.bf16.msrb.mxu0 %v10896_v1  ;;  %7998 = vmatpush.bf16.msrb.mxu1 %v10904_v49  ;;  %v6649_v1 = vsel %vm1463_vm3, %v6647_v55, %v6648_v47  ;;  %v6652_v49 = vsel %vm1463_vm3, %v6650_v35, %v6651_v52 }
 0x5df   : > { %8011 = vmatpush.bf16.msrb.mxu2 %v10913_v18  ;;  %8025 = vmatpush.bf16.msrb.mxu3 %v10921_v6 }
 0x5e1   : > { %7985 = vmatpush.bf16.msrb.mxu0 %v10895_v14  ;;  %7999 = vmatpush.bf16.msrb.mxu1 %v10903_v26 }
 0x5e3   : > { %8012 = vmatpush.bf16.msrb.mxu2 %v10912_v0  ;;  %8026 = vmatpush.bf16.msrb.mxu3 %v10920_v24 }
 0x5e5   : > { %7986 = vmatpush.bf16.msrb.mxu0 %v10894_v31  ;;  %8000 = vmatpush.bf16.msrb.mxu1 %v10902_v34 }
 0x5e7   : > { %8013 = vmatpush.bf16.msrb.mxu2 %v10911_v21  ;;  %8027 = vmatpush.bf16.msrb.mxu3 %v10919_v12 }
 0x5e8   : > { %7987 = vmatmul.bf16.vlgmr.msrb.gmra.mxu0 %v6615_v5  ;;  %8001 = vmatmul.bf16.vlgmr.msrb.gmra.mxu1 %v6616_v50 }
 0x5e9   : > { %8035 = vmatpush.bf16.msra.mxu0 %v10933_v59  ;;  %8049 = vmatpush.bf16.msra.mxu1 %v10941_v8 }
 0x5eb   : > { %8014 = vmatpush.bf16.msrb.mxu2 %v10910_v3  ;;  %8028 = vmatpush.bf16.msrb.mxu3 %v10918_v40 }
 0x5ed   : > { %8036 = vmatpush.bf16.msra.mxu0 %v10932_v56  ;;  %8050 = vmatpush.bf16.msra.mxu1 %v10940_v48 }
 0x5ee   : > { %8015 = vmatmul.bf16.vlgmr.msrb.gmra.mxu2 %v6626_v41  ;;  %8029 = vmatmul.bf16.vlgmr.msrb.gmra.mxu3 %v6634_v7 }
 0x5f1   : > { %8037 = vmatpush.bf16.msra.mxu0 %v10931_v62  ;;  %8051 = vmatpush.bf16.msra.mxu1 %v10939_v57 }
 0x5f5   : > { %8038 = vmatpush.bf16.msra.mxu0 %v10930_v43  ;;  %8052 = vmatpush.bf16.msra.mxu1 %v10938_v45 }
 0x5f9   : > { %8039 = vmatpush.bf16.msra.mxu0 %v10929_v46  ;;  %8053 = vmatpush.bf16.msra.mxu1 %v10937_v29 }
 0x5fd   : > { %8040 = vmatpush.bf16.msra.mxu0 %v10928_v30  ;;  %8054 = vmatpush.bf16.msra.mxu1 %v10936_v16 }
 0x601   : > { %8041 = vmatpush.bf16.msra.mxu0 %v10927_v4  ;;  %8055 = vmatpush.bf16.msra.mxu1 %v10935_v54 }
 0x605   : > { %8042 = vmatpush.bf16.msra.mxu0 %v10926_v53  ;;  %8056 = vmatpush.bf16.msra.mxu1 %v10934_v36 }
 0x608   : > { %8043 = vmatmul.bf16.vlgmr.msra.gmra.mxu0 %v6649_v1  ;;  %8057 = vmatmul.bf16.vlgmr.msra.gmra.mxu1 %v6652_v49 }
 0x625   : > { %v7820_v63 = vpop.f32.mrf.mxu0  ;;  %v7834_v18 = vpop.f32.mrf.mxu1 }
 0x626   : > { %v7821_v24 = vadd.f32 %v11009_v9, %v7820_v63 }
 0x628   : > { %v7835_v22 = vadd.f32 %v7834_v18, %v7821_v24 }
 0x62d   : > { %v7822_v2 = vpop.f32.mrf.mxu0  ;;  %v7836_v11 = vpop.f32.mrf.mxu1 }
 0x62e   : > { %v7823_v8 = vadd.f32 %v11009_v9, %v7822_v2 }
 0x630   : > { %v7837_v39 = vadd.f32 %v7836_v11, %v7823_v8 }
 0x631   : > { %v7848_v6 = vpop.f32.mrf.mxu2  ;;  %v7862_v42 = vpop.f32.mrf.mxu3 }
 0x632   : > { %v7849_v59 = vadd.f32 %v7848_v6, %v7835_v22 }
 0x634   : > { %v7863_v12 = vadd.f32 %v7862_v42, %v7849_v59 }
 0x635   : > { %v7876_v26 = vpop.f32.mrf.mxu0  ;;  %v7890_v19 = vpop.f32.mrf.mxu1 }
 0x636   : > { %v7877_v15 = vadd.f32 %v7876_v26, %v7863_v12 }
 0x638   : > { %v7891_v56 = vadd.f32 %v7890_v19, %v7877_v15 }
 0x639   : > { %v7850_v14 = vpop.f32.mrf.mxu2  ;;  %v7864_v0 = vpop.f32.mrf.mxu3 }
 0x63a   : > { %v7851_v23 = vadd.f32 %v7850_v14, %v7837_v39 }
 0x63c   : > { %v7865_v48 = vadd.f32 %v7864_v0, %v7851_v23 }
 0x63d   : > { %v7878_v31 = vpop.f32.mrf.mxu0  ;;  %v7892_v34 = vpop.f32.mrf.mxu1 }
 0x63e   : > { %v7879_v25 = vadd.f32 %v7878_v31, %v7865_v48 }
 0x640   : > { %v7893_v57 = vadd.f32 %v7892_v34, %v7879_v25 }
 0x641   : > { %v7904_v17 = vpop.f32.mrf.mxu2  ;;  %v7918_v21 = vpop.f32.mrf.mxu3 }
 0x642   : > { %v7905_v40 = vadd.f32 %v7904_v17, %v7891_v56 }
 0x644   : > { %v7919_v44 = vadd.f32 %v7918_v21, %v7905_v40 }
 0x645   : > { %v7932_v5 = vpop.f32.mrf.mxu0  ;;  %v7946_v50 = vpop.f32.mrf.mxu1 }
 0x646   : > { %v7933_v41 = vadd.f32 %v7932_v5, %v7919_v44 }
 0x648   : > { %v7947_v45 = vadd.f32 %v7946_v50, %v7933_v41 }
 0x649   : > { %v7906_v38 = vpop.f32.mrf.mxu2  ;;  %v7920_v3 = vpop.f32.mrf.mxu3 }
 0x64a   : > { %v7907_v7 = vadd.f32 %v7906_v38, %v7893_v57 }
 0x64c   : > { %v7921_v46 = vadd.f32 %v7920_v3, %v7907_v7 }
 0x64d   : > { %v7934_v32 = vpop.f32.mrf.mxu0  ;;  %v7948_v62 = vpop.f32.mrf.mxu1 }
 0x64e   : > { %v7935_v61 = vadd.f32 %v7934_v32, %v7921_v46 }
 0x650   : > { %v7949_v4 = vadd.f32 %v7948_v62, %v7935_v61 }
 0x651   : > { %v7960_v60 = vpop.f32.mrf.mxu2  ;;  %v7974_v43 = vpop.f32.mrf.mxu3 }
 0x652   : > { %v7961_v16 = vadd.f32 %v7960_v60, %v7947_v45 }
 0x654   : > { %v7975_v58 = vadd.f32 %v7974_v43, %v7961_v16 }
 0x659   : > { %v7962_v29 = vpop.f32.mrf.mxu2  ;;  %v7976_v20 = vpop.f32.mrf.mxu3 }
 0x65a   : > { %v7963_v37 = vadd.f32 %v7962_v29, %v7949_v4 }
 0x65c   : > { %v7977_v10 = vadd.f32 %v7976_v20, %v7963_v37 }
 0x665   : > { %v7988_v13 = vpop.f32.mrf.mxu0  ;;  %v8002_v30 = vpop.f32.mrf.mxu1 }
 0x666   : > { %v7989_v54 = vadd.f32 %v7988_v13, %v7975_v58 }
 0x668   : > { %v8003_v28 = vadd.f32 %v8002_v30, %v7989_v54 }
 0x66d   : > { %v7990_v33 = vpop.f32.mrf.mxu0  ;;  %v8004_v51 = vpop.f32.mrf.mxu1 }
 0x66e   : > { %v7991_v55 = vadd.f32 %v7990_v33, %v7977_v10 }
 0x670   : > { %v8005_v49 = vadd.f32 %v8004_v51, %v7991_v55 }
 0x671   : > { %v8016_v27 = vpop.f32.mrf.mxu2  ;;  %v8030_v36 = vpop.f32.mrf.mxu3 }
 0x672   : > { %v8017_v53 = vadd.f32 %v8016_v27, %v8003_v28 }
 0x674   : > { %v8031_v47 = vadd.f32 %v8030_v36, %v8017_v53 }
 0x679   : > { %v8018_v35 = vpop.f32.mrf.mxu2  ;;  %v8032_v2 = vpop.f32.mrf.mxu3 }
 0x67a   : > { %v8019_v18 = vadd.f32 %v8018_v35, %v8005_v49 }
 0x67c   : > { %v8033_v11 = vadd.f32 %v8032_v2, %v8019_v18 }
 0x685   : > { %v8044_v52 = vpop.f32.mrf.mxu0  ;;  %v8058_v1 = vpop.f32.mrf.mxu1 }
 0x686   : > { %v8045_v63 = vadd.f32 %v8044_v52, %v8031_v47 }
 0x688   : > { %v8059_v6 = vadd.f32 %v8058_v1, %v8045_v63 }
 0x68a   : > { %v8063_v42 = vmax.f32 %v8059_v6, 0.0 }
 0x68c   : > { %v8066_v9 = vrot.slane %v8063_v42, 5 }
 0x68d   : > { %v8046_v14 = vpop.f32.mrf.mxu0  ;;  %v8060_v19 = vpop.f32.mrf.mxu1 }
 0x68e   : > { %v8047_v26 = vadd.f32 %v8046_v14, %v8033_v11  ;;  %v8068_v17 = vmax.f32 %v8063_v42, %v8066_v9 }
 0x690   : > { %v8061_v0 = vadd.f32 %v8060_v19, %v8047_v26 }
 0x692   : > { %v8064_v24 = vmax.f32 %v8061_v0, 0.0 }
 0x694   : > { %v8070_v22 = vrot.slane %v8064_v24, 2 }
 0x696   : > { %v8072_v31 = vmax.f32 %v8068_v17, %v8070_v22 }
 0x698   : > { %v8074_v34 = vrot.slane %v8072_v31, 1  ;;  %v8077_v8 = vrot.slane %v8072_v31, 2 }
 0x69a   : > { %v8076_v59 = vmax.f32 %v8072_v31, %v8074_v34 }
 0x69c   : > { %v8079_v21 = vmax.f32 %v8076_v59, %v8077_v8 }
 0x69e   : > { %8080 = vst [vmem:[%s324_s17] sm:$0x1] %v8079_v21 }
 0x69f   : > { %11038 = shalt.err (!%p11035_p3)
}
 0x6a0   : > { %10967 = dma.vmem_to_hbm [thread:$0]  (%p11164_p5), %s8093_s26, 16, %s8095_s27, %s8082_s28  }
 0x6a1 PF: > { %p10973_p4 = scmp.ge.s32.totalorder %s11073_s12, 2  ;;  %s8106_s14 = sand.u32 1, %s11061_s30  }
 0x6a2   : > { %s8107_s24 = scalar_lea.sflag [#allocation6], %s8106_s14 }
 0x6a3   : > { %p10970_p7 = pnand %p10973_p4, %p11168_p6 }
 0x6a5   : > { %p10971_p8 = pneg %p10970_p7 }
 0x6a7   : > { %11056 = dma.done.wait (%p10971_p8), %s8107_s24, 16  }
 0x6a8   : > { %11058 = vsyncadd (%p10971_p8), %s8107_s24, 4294967280  ;;  %p19_p9 = scmp.ge.s32.totalorder %s11151_s15, 4   ;;  %s15858_s30 = smov %s11065_s10 }
 0x6a9   : > { %s15859_s10 = smov %s11069_s11  ;;  %s15860_s11 = smov %s11162_s18 }
 0x6aa   : > { %s15861_s12 = smov %s11151_s15  ;;  %21 = sbr.rel (!%p19_p9) target bundleno = 3 (0x3), region = 91 }
 0x6af   :  { %8112 = vsyncpa [#allocation6], 1 }
 0x6b0   :  { %8114 = vsyncpa [#allocation6 + $0x1], 1 }

</bundles_post_ra>
